<compile_context>
chip_gen: v5e
topology: v5e:2x2
jax: 0.10.0
libtpu: 0.0.40
codegen_flags: <defaults>
</compile_context>

<pallas_src>
import functools

import jax
import jax.numpy as jnp
from jax.experimental import pallas as pl
from jax.experimental.pallas import tpu as pltpu

_VMEM_LIMIT = 32 * 1024 * 1024  # fits v5e/v6e (128 MiB phys) and v7x (64 MiB phys)


def _round_up(x, m):
    return -(-x // m) * m


def _choose_tm(m, row_bytes, target_steps=4, budget=6 * 1024 * 1024, cap=4096):
    """Pick the M tile: as large as the per-step VMEM budget allows (K and N are
    always full-dim blocks here), multiple of 16 (bf16 packs 16 rows/vreg), and
    capped so the 'parallel' grid keeps >= target_steps steps when M allows
    (v7x has 2 TensorCores; a 1-step grid leaves one idle and kills overlap)."""
    tm_max = max(16, min(cap, budget // max(row_bytes, 1)))
    tm_max = max(16, (tm_max // 16) * 16)
    steps = max(target_steps, -(-m // tm_max))
    tm = _round_up(max(1, -(-m // steps)), 16)
    return min(tm, tm_max)


def _pad_rows(x, mult):
    pad = (-x.shape[0]) % mult
    if pad == 0:
        return x
    return jnp.pad(x, ((0, pad), (0, 0)))


def _lane_group(n):
    """Group factor G so the GEMM output last dim becomes G*N = 128 (lane dense).
    N<128 outputs force masked vst.msk partial stores; grouping G logical rows
    into one 128-lane row via a block-diagonal weight keeps dense stores at
    negligible extra FLOPs (these layers are store/overhead bound, not MXU)."""
    return 128 // n if (n < 128 and 128 % n == 0) else 1


# ----------------------------------------------------------------------------
# Pallas kernel 1: single-shot GEMM (full K) with fused bias + activation.
# ----------------------------------------------------------------------------
def _mm_kernel(a_ref, b_ref, bias_ref, o_ref, *, act):
    acc = jnp.dot(a_ref[...], b_ref[...], preferred_element_type=jnp.float32)
    acc = acc + bias_ref[...]
    if act == "relu":
        acc = jnp.maximum(acc, 0.0)
    elif act == "gelu":
        acc = jax.nn.gelu(acc)
    o_ref[...] = acc.astype(o_ref.dtype)


def matmul_bias_act(a, b, bias, act="none", out_dtype=jnp.bfloat16):
    """act(a @ b + bias); a: (M, K), b: (K, N), bias: (N,). Single full-K Pallas
    GEMM tiled only along M; N<128 outputs are made lane-dense via grouping."""
    M, K = a.shape
    _, N = b.shape
    G = _lane_group(N)

    a = a.astype(jnp.bfloat16)
    b32 = b.astype(jnp.float32)
    bias32 = bias.astype(jnp.float32)
    if G > 1:
        a = _pad_rows(a, G).reshape(-1, G * K)
        b32 = jnp.kron(jnp.eye(G, dtype=jnp.float32), b32)   # (G*K, G*N) blockdiag
        bias32 = jnp.tile(bias32, G)
    Mg, Kg = a.shape
    Ng = G * N

    row_bytes = 4 * Kg + 8 * Ng          # dbl-buffered bf16 in/out + f32 acc row
    tm = _choose_tm(Mg, row_bytes)
    a = _pad_rows(a, tm)
    Mp = a.shape[0]

    out = pl.pallas_call(
        functools.partial(_mm_kernel, act=act),
        out_shape=jax.ShapeDtypeStruct((Mp, Ng), out_dtype),
        grid_spec=pltpu.PrefetchScalarGridSpec(
            num_scalar_prefetch=0,
            grid=(Mp // tm,),
            in_specs=[
                pl.BlockSpec((tm, Kg), lambda i: (i, 0)),
                pl.BlockSpec((Kg, Ng), lambda i: (0, 0)),
                pl.BlockSpec((1, Ng), lambda i: (0, 0)),
            ],
            out_specs=pl.BlockSpec((tm, Ng), lambda i: (i, 0)),
        ),
        compiler_params=pltpu.CompilerParams(
            dimension_semantics=("parallel",),
            vmem_limit_bytes=_VMEM_LIMIT),
    )(a, b32.astype(jnp.bfloat16), bias32.reshape(1, Ng))
    return out.reshape(-1, N)[:M]


# ----------------------------------------------------------------------------
# Pallas kernel 2: fused Event_2_Image_2_Fusion block
#   o = x + (gelu(x @ w1 + b1) @ w2 + b2), all in one VMEM-resident pass.
# ----------------------------------------------------------------------------
def _fusion_kernel(x_ref, w1_ref, b1_ref, w2_ref, b2_ref, o_ref):
    h = jnp.dot(x_ref[...], w1_ref[...], preferred_element_type=jnp.float32)
    # TODO(synk): PyTorch nn.GELU defaults to exact erf; tanh approximation kept
    # (fusion submodule source not provided; erf lowering in Mosaic not assumed).
    h = jax.nn.gelu(h + b1_ref[...])
    y = jnp.dot(h.astype(jnp.bfloat16), w2_ref[...],
                preferred_element_type=jnp.float32) + b2_ref[...]
    # Residual re-read from x_ref here (no f32 copy of x live across the matmuls).
    o_ref[...] = (x_ref[...].astype(jnp.float32) + y).astype(o_ref.dtype)


def fusion_block(p, x_nhwc):
    # Event_2_Image_2_Fusion(dim, size): residual channel-mixing MLP (1x1 convs).
    N, H, W, C = x_nhwc.shape
    M = N * H * W
    G = _lane_group(C)   # only the C=64 scale groups (G=2)

    x = x_nhwc.reshape(M, C).astype(jnp.bfloat16)
    w1 = p["w1"].astype(jnp.float32)
    w2 = p["w2"].astype(jnp.float32)
    b1 = p["b1"].astype(jnp.float32)
    b2 = p["b2"].astype(jnp.float32)
    if G > 1:
        x = _pad_rows(x, G).reshape(-1, G * C)
        eye = jnp.eye(G, dtype=jnp.float32)
        w1 = jnp.kron(eye, w1)
        w2 = jnp.kron(eye, w2)
        b1 = jnp.tile(b1, G)
        b2 = jnp.tile(b2, G)
    Mg, Cg = x.shape

    row_bytes = 16 * Cg                  # bf16 x/out (dbl) + f32 h + f32 y rows
    tm = _choose_tm(Mg, row_bytes)
    x = _pad_rows(x, tm)
    Mp = x.shape[0]

    out = pl.pallas_call(
        _fusion_kernel,
        out_shape=jax.ShapeDtypeStruct((Mp, Cg), jnp.bfloat16),
        grid_spec=pltpu.PrefetchScalarGridSpec(
            num_scalar_prefetch=0,
            grid=(Mp // tm,),
            in_specs=[
                pl.BlockSpec((tm, Cg), lambda i: (i, 0)),
                pl.BlockSpec((Cg, Cg), lambda i: (0, 0)),
                pl.BlockSpec((1, Cg), lambda i: (0, 0)),
                pl.BlockSpec((Cg, Cg), lambda i: (0, 0)),
                pl.BlockSpec((1, Cg), lambda i: (0, 0)),
            ],
            out_specs=pl.BlockSpec((tm, Cg), lambda i: (i, 0)),
        ),
        compiler_params=pltpu.CompilerParams(
            dimension_semantics=("parallel",),
            vmem_limit_bytes=_VMEM_LIMIT),
    )(x, w1.astype(jnp.bfloat16), b1.reshape(1, Cg),
      w2.astype(jnp.bfloat16), b2.reshape(1, Cg))
    out = out.reshape(-1, C)[:M]
    return out.reshape(N, H, W, C)


# ----------------------------------------------------------------------------
# Conv helpers (im2col glue in plain JAX under jit, bf16; GEMM in Pallas).
# TODO(synk): fuse im2col into the conv GEMM (overlapping input windows /
# phase-plane taps) to avoid materializing the 2.25x patch tensor in HBM.
# ----------------------------------------------------------------------------
def _im2col(x, kh, kw, stride, pad):
    # x: (N, H, W, C) -> (N*Ho*Wo, kh*kw*C)
    x = jnp.pad(x, ((0, 0), (pad, pad), (pad, pad), (0, 0)))
    N, Hp, Wp, C = x.shape
    Ho = (Hp - kh) // stride + 1
    Wo = (Wp - kw) // stride + 1
    cols = []
    for i in range(kh):
        for j in range(kw):
            cols.append(x[:, i:i + stride * Ho:stride,
                          j:j + stride * Wo:stride, :])
    patches = jnp.concatenate(cols, axis=-1)
    return patches.reshape(N * Ho * Wo, kh * kw * C), (N, Ho, Wo)


def conv3x3_s2(x, w, b, act="relu"):
    # x: NHWC, w: (3, 3, Cin, Cout), stride 2, pad 1.
    cols, (N, Ho, Wo) = _im2col(x.astype(jnp.bfloat16), 3, 3, 2, 1)
    cout = w.shape[-1]
    y = matmul_bias_act(cols, w.reshape(-1, cout), b, act,
                        out_dtype=jnp.bfloat16)
    return y.reshape(N, Ho, Wo, cout)


# ----------------------------------------------------------------------------
# Sub-encoders (structural equivalents of the unprovided submodules).
# ----------------------------------------------------------------------------
def image_encoder(params, imgs_nhwc):
    feats = []
    x = imgs_nhwc
    for i in range(4):
        x = conv3x3_s2(x, params[f"img{i}_w"], params[f"img{i}_b"], "relu")
        feats.append(x)
    return feats  # channels [32, 64, 128, 256] at H/2, H/4, H/8, H/16


def _event_pyramid(params, vox_nhwc):
    feats = []
    x = vox_nhwc
    for i in range(4):
        x = conv3x3_s2(x, params[f"ev{i}_w"], params[f"ev{i}_b"], "relu")
        feats.append(x)
    return feats  # channels [16, 32, 64, 128]


def event_encoder(params, events, n_left, n_right, forward, which):
    # events: (N, 2, H, W, T); `which` in {"left", "right"} -- only the needed
    # stream is built (the original forward discards the other half anyway).
    # TODO(synk): the original EventEncoder is a SLAYER spiking network whose
    # source is not provided; approximated here by temporal integration over
    # the left/right event windows followed by a shared conv pyramid.
    T = events.shape[-1]
    # The original time-reverses the backward stream before windowing; since
    # each window is immediately summed over T (order-invariant), read the
    # equivalent un-flipped slice directly (no materialized reversed copy).
    if forward:
        win = events[..., :n_left] if which == "left" else events[..., T - n_right:]
    else:
        win = events[..., T - n_left:] if which == "left" else events[..., :n_right]
    vox = win.sum(-1)                                  # (N, 2, H, W)
    vox = jnp.transpose(vox, (0, 2, 3, 1))             # NHWC
    return _event_pyramid(params, vox)


# ----------------------------------------------------------------------------
# Top-level encoderALL forward (jit: no eager dispatch, dead work never traced).
# ----------------------------------------------------------------------------
@functools.partial(jax.jit, static_argnames=("n_left", "n_right"))
def encoder_all_forward(params, events_forward, events_back, imgs,
                        n_left, n_right):
    # events_*: (N, 2, H, W, T) ; imgs: (N, C, H, W) -- PyTorch NCHW at I/O.
    ev_fwd_left = event_encoder(params, events_forward, n_left, n_right,
                                forward=True, which="left")
    ev_bwd_right = event_encoder(params, events_back, n_left, n_right,
                                 forward=False, which="right")

    ev_cat = [jnp.concatenate([ev_fwd_left[i], ev_bwd_right[i]], axis=-1)
              for i in range(4)]                            # [32, 64, 128, 256] ch

    imgs_nhwc = jnp.transpose(imgs, (0, 2, 3, 1))
    img_feats = image_encoder(params, imgs_nhwc)            # [32, 64, 128, 256] ch

    fusion_out = []
    for i in range(4):
        cat = jnp.concatenate([img_feats[i], ev_cat[i]], axis=-1)  # 64/128/256/512
        fp = {"w1": params[f"fus{i}_w1"], "b1": params[f"fus{i}_b1"],
              "w2": params[f"fus{i}_w2"], "b2": params[f"fus{i}_b2"]}
        f = fusion_block(fp, cat)                            # NHWC, bf16
        # transpose in bf16 (half the bytes); final f32 cast fuses with it.
        fusion_out.append(jnp.transpose(f, (0, 3, 1, 2)).astype(jnp.float32))
    return fusion_out


# ----------------------------------------------------------------------------
# Deterministic parameter init (shapes implied by the module's __init__).
# ----------------------------------------------------------------------------
def init_params(key, channel=1, hidden_number=16):
    embed = hidden_number * 2        # imageEncoder embed_dim = 32
    ehid = hidden_number // 2        # EventEncoder hidden = 8
    img_ch = [channel, embed, embed * 2, embed * 4, embed * 8]
    ev_ch = [2, ehid * 2, ehid * 4, ehid * 8, ehid * 16]
    fusion_dims = [img_ch[i + 1] + 2 * ev_ch[i + 1] for i in range(4)]  # 64..512

    keys = iter(jax.random.split(key, 16))
    p = {}
    for i in range(4):
        p[f"img{i}_w"] = 0.05 * jax.random.normal(
            next(keys), (3, 3, img_ch[i], img_ch[i + 1]), jnp.float32)
        p[f"img{i}_b"] = jnp.zeros((img_ch[i + 1],), jnp.float32)
        p[f"ev{i}_w"] = 0.05 * jax.random.normal(
            next(keys), (3, 3, ev_ch[i], ev_ch[i + 1]), jnp.float32)
        p[f"ev{i}_b"] = jnp.zeros((ev_ch[i + 1],), jnp.float32)
    for i, d in enumerate(fusion_dims):
        p[f"fus{i}_w1"] = 0.05 * jax.random.normal(next(keys), (d, d), jnp.float32)
        p[f"fus{i}_b1"] = jnp.zeros((d,), jnp.float32)
        p[f"fus{i}_w2"] = 0.05 * jax.random.normal(next(keys), (d, d), jnp.float32)
        p[f"fus{i}_b2"] = jnp.zeros((d,), jnp.float32)
    return p


if __name__ == "__main__":
    key = jax.random.PRNGKey(0)
    kp, k1, k2, k3 = jax.random.split(key, 4)

    image_size = 32        # small stand-in for the default 256
    bs, channel, T = 2, 1, 8
    n_left, n_right = 3, 3

    params = init_params(kp, channel=channel, hidden_number=16)
    events_forward = jax.random.uniform(k1, (bs, 2, image_size, image_size, T),
                                        jnp.float32)
    events_back = jax.random.uniform(k2, (bs, 2, image_size, image_size, T),
                                     jnp.float32)
    imgs = jax.random.uniform(k3, (bs, channel, image_size, image_size),
                              jnp.float32)

    outs = encoder_all_forward(params, events_forward, events_back, imgs,
                               n_left, n_right)
    outs = jax.block_until_ready(outs)

    expected = [(bs, 64, image_size // 2, image_size // 2),
                (bs, 128, image_size // 4, image_size // 4),
                (bs, 256, image_size // 8, image_size // 8),
                (bs, 512, image_size // 16, image_size // 16)]
    assert [o.shape for o in outs] == expected, [o.shape for o in outs]
    assert all(bool(jnp.all(jnp.isfinite(o))) for o in outs)
    print("KERNEL_OK")
</pallas_src>

<mosaic_0001>
module attributes {stable_mosaic.version = 11 : i64} {
  func.func @_mm_kernel(%arg0: i32, %arg1: memref<16x144xbf16, #tpu.memory_space<vmem>>, %arg2: memref<144x128xbf16, #tpu.memory_space<vmem>>, %arg3: memref<1x128xf32, #tpu.memory_space<vmem>>, %arg4: memref<16x128xbf16, #tpu.memory_space<vmem>>) attributes {dimension_semantics = [#tpu.dimension_semantics<parallel>], iteration_bounds = array<i64: 4>, scalar_prefetch = 0 : i64, scratch_operands = 0 : i64, tpu.core_type = #tpu.core_type<tc>, window_params = [{transform_indices = @transform_0, window_bounds = array<i64: 16, 144>}, {pipeline_mode = #tpu.pipeline_mode<synchronous>, transform_indices = @transform_1, window_bounds = array<i64: 144, 128>}, {pipeline_mode = #tpu.pipeline_mode<synchronous>, transform_indices = @transform_2, window_bounds = array<i64: 1, 128>}, {transform_indices = @transform_3, window_bounds = array<i64: 16, 128>}]} {
    %c0 = arith.constant 0 : index
    %c0_0 = arith.constant 0 : index
    %0 = vector.load %arg1[%c0, %c0_0] : memref<16x144xbf16, #tpu.memory_space<vmem>>, vector<16x144xbf16>
    %c0_1 = arith.constant 0 : index
    %c0_2 = arith.constant 0 : index
    %1 = vector.load %arg2[%c0_1, %c0_2] : memref<144x128xbf16, #tpu.memory_space<vmem>>, vector<144x128xbf16>
    %cst = arith.constant dense<0.000000e+00> : vector<16x128xf32>
    %2 = tpu.matmul %0, %1, %cst {dimension_numbers = #tpu.dot_dimension_numbers<[1], [0], [0], [1], [0, 0, 1, 1], [], []>} : vector<16x144xbf16>, vector<144x128xbf16>, vector<16x128xf32> -> vector<16x128xf32>
    %c0_3 = arith.constant 0 : index
    %c0_4 = arith.constant 0 : index
    %3 = vector.load %arg3[%c0_3, %c0_4] : memref<1x128xf32, #tpu.memory_space<vmem>>, vector<1x128xf32>
    %4 = vector.broadcast %3 : vector<1x128xf32> to vector<16x128xf32>
    %5 = arith.addf %2, %4 : vector<16x128xf32>
    %cst_5 = arith.constant 0.000000e+00 : f32
    %6 = vector.broadcast %cst_5 : f32 to vector<16x128xf32>
    %7 = arith.maximumf %5, %6 : vector<16x128xf32>
    %8 = arith.truncf %7 : vector<16x128xf32> to vector<16x128xbf16>
    %c0_6 = arith.constant 0 : index
    %c0_7 = arith.constant 0 : index
    %9 = vector.load %arg4[%c0_6, %c0_7] : memref<16x128xbf16, #tpu.memory_space<vmem>>, vector<16x128xbf16>
    tpu.vector_store %arg4[%c0_6, %c0_7], %8 {strides = array<i32>} : memref<16x128xbf16, #tpu.memory_space<vmem>>, vector<16x128xbf16>,
    return
  }
  func.func @transform_0(%arg0: i32) -> (i32, i32) {
    %c0_i32 = arith.constant 0 : i32
    %c0_i32_0 = arith.constant 0 : i32
    return %arg0, %c0_i32 : i32, i32
  }
  func.func @transform_1(%arg0: i32) -> (i32, i32) {
    %c0_i32 = arith.constant 0 : i32
    %c0_i32_0 = arith.constant 0 : i32
    %c0_i32_1 = arith.constant 0 : i32
    return %c0_i32, %c0_i32_0 : i32, i32
  }
  func.func @transform_2(%arg0: i32) -> (i32, i32) {
    %c0_i32 = arith.constant 0 : i32
    %c0_i32_0 = arith.constant 0 : i32
    %c0_i32_1 = arith.constant 0 : i32
    return %c0_i32, %c0_i32_0 : i32, i32
  }
  func.func @transform_3(%arg0: i32) -> (i32, i32) {
    %c0_i32 = arith.constant 0 : i32
    %c0_i32_0 = arith.constant 0 : i32
    return %arg0, %c0_i32 : i32, i32
  }
}

module attributes {stable_mosaic.version = 11 : i64} {
  func.func @_mm_kernel(%arg0: i32, %arg1: memref<32x36xbf16, #tpu.memory_space<vmem>>, %arg2: memref<36x128xbf16, #tpu.memory_space<vmem>>, %arg3: memref<1x128xf32, #tpu.memory_space<vmem>>, %arg4: memref<32x128xbf16, #tpu.memory_space<vmem>>) attributes {dimension_semantics = [#tpu.dimension_semantics<parallel>], iteration_bounds = array<i64: 4>, scalar_prefetch = 0 : i64, scratch_operands = 0 : i64, tpu.core_type = #tpu.core_type<tc>, window_params = [{transform_indices = @transform_0, window_bounds = array<i64: 32, 36>}, {pipeline_mode = #tpu.pipeline_mode<synchronous>, transform_indices = @transform_1, window_bounds = array<i64: 36, 128>}, {pipeline_mode = #tpu.pipeline_mode<synchronous>, transform_indices = @transform_2, window_bounds = array<i64: 1, 128>}, {transform_indices = @transform_3, window_bounds = array<i64: 32, 128>}]} {
    %c0 = arith.constant 0 : index
    %c0_0 = arith.constant 0 : index
    %0 = vector.load %arg1[%c0, %c0_0] : memref<32x36xbf16, #tpu.memory_space<vmem>>, vector<32x36xbf16>
    %c0_1 = arith.constant 0 : index
    %c0_2 = arith.constant 0 : index
    %1 = vector.load %arg2[%c0_1, %c0_2] : memref<36x128xbf16, #tpu.memory_space<vmem>>, vector<36x128xbf16>
    %cst = arith.constant dense<0.000000e+00> : vector<32x128xf32>
    %2 = tpu.matmul %0, %1, %cst {dimension_numbers = #tpu.dot_dimension_numbers<[1], [0], [0], [1], [0, 0, 1, 1], [], []>} : vector<32x36xbf16>, vector<36x128xbf16>, vector<32x128xf32> -> vector<32x128xf32>
    %c0_3 = arith.constant 0 : index
    %c0_4 = arith.constant 0 : index
    %3 = vector.load %arg3[%c0_3, %c0_4] : memref<1x128xf32, #tpu.memory_space<vmem>>, vector<1x128xf32>
    %4 = vector.broadcast %3 : vector<1x128xf32> to vector<32x128xf32>
    %5 = arith.addf %2, %4 : vector<32x128xf32>
    %cst_5 = arith.constant 0.000000e+00 : f32
    %6 = vector.broadcast %cst_5 : f32 to vector<32x128xf32>
    %7 = arith.maximumf %5, %6 : vector<32x128xf32>
    %8 = arith.truncf %7 : vector<32x128xf32> to vector<32x128xbf16>
    %c0_6 = arith.constant 0 : index
    %c0_7 = arith.constant 0 : index
    %9 = vector.load %arg4[%c0_6, %c0_7] : memref<32x128xbf16, #tpu.memory_space<vmem>>, vector<32x128xbf16>
    tpu.vector_store %arg4[%c0_6, %c0_7], %8 {strides = array<i32>} : memref<32x128xbf16, #tpu.memory_space<vmem>>, vector<32x128xbf16>,
    return
  }
  func.func @transform_0(%arg0: i32) -> (i32, i32) {
    %c0_i32 = arith.constant 0 : i32
    %c0_i32_0 = arith.constant 0 : i32
    return %arg0, %c0_i32 : i32, i32
  }
  func.func @transform_1(%arg0: i32) -> (i32, i32) {
    %c0_i32 = arith.constant 0 : i32
    %c0_i32_0 = arith.constant 0 : i32
    %c0_i32_1 = arith.constant 0 : i32
    return %c0_i32, %c0_i32_0 : i32, i32
  }
  func.func @transform_2(%arg0: i32) -> (i32, i32) {
    %c0_i32 = arith.constant 0 : i32
    %c0_i32_0 = arith.constant 0 : i32
    %c0_i32_1 = arith.constant 0 : i32
    return %c0_i32, %c0_i32_0 : i32, i32
  }
  func.func @transform_3(%arg0: i32) -> (i32, i32) {
    %c0_i32 = arith.constant 0 : i32
    %c0_i32_0 = arith.constant 0 : i32
    return %arg0, %c0_i32 : i32, i32
  }
}

module attributes {stable_mosaic.version = 11 : i64} {
  func.func @_fusion_kernel(%arg0: i32, %arg1: memref<64x128xbf16, #tpu.memory_space<vmem>>, %arg2: memref<128x128xbf16, #tpu.memory_space<vmem>>, %arg3: memref<1x128xf32, #tpu.memory_space<vmem>>, %arg4: memref<128x128xbf16, #tpu.memory_space<vmem>>, %arg5: memref<1x128xf32, #tpu.memory_space<vmem>>, %arg6: memref<64x128xbf16, #tpu.memory_space<vmem>>) attributes {dimension_semantics = [#tpu.dimension_semantics<parallel>], iteration_bounds = array<i64: 4>, scalar_prefetch = 0 : i64, scratch_operands = 0 : i64, tpu.core_type = #tpu.core_type<tc>, window_params = [{transform_indices = @transform_0, window_bounds = array<i64: 64, 128>}, {pipeline_mode = #tpu.pipeline_mode<synchronous>, transform_indices = @transform_1, window_bounds = array<i64: 128, 128>}, {pipeline_mode = #tpu.pipeline_mode<synchronous>, transform_indices = @transform_2, window_bounds = array<i64: 1, 128>}, {pipeline_mode = #tpu.pipeline_mode<synchronous>, transform_indices = @transform_3, window_bounds = array<i64: 128, 128>}, {pipeline_mode = #tpu.pipeline_mode<synchronous>, transform_indices = @transform_4, window_bounds = array<i64: 1, 128>}, {transform_indices = @transform_5, window_bounds = array<i64: 64, 128>}]} {
    %c0 = arith.constant 0 : index
    %c0_0 = arith.constant 0 : index
    %0 = vector.load %arg1[%c0, %c0_0] : memref<64x128xbf16, #tpu.memory_space<vmem>>, vector<64x128xbf16>
    %c0_1 = arith.constant 0 : index
    %c0_2 = arith.constant 0 : index
    %1 = vector.load %arg2[%c0_1, %c0_2] : memref<128x128xbf16, #tpu.memory_space<vmem>>, vector<128x128xbf16>
    %cst = arith.constant dense<0.000000e+00> : vector<64x128xf32>
    %2 = tpu.matmul %0, %1, %cst {dimension_numbers = #tpu.dot_dimension_numbers<[1], [0], [0], [1], [0, 0, 1, 1], [], []>} : vector<64x128xbf16>, vector<128x128xbf16>, vector<64x128xf32> -> vector<64x128xf32>
    %c0_3 = arith.constant 0 : index
    %c0_4 = arith.constant 0 : index
    %3 = vector.load %arg3[%c0_3, %c0_4] : memref<1x128xf32, #tpu.memory_space<vmem>>, vector<1x128xf32>
    %4 = vector.broadcast %3 : vector<1x128xf32> to vector<64x128xf32>
    %5 = arith.addf %2, %4 : vector<64x128xf32>
    %6 = arith.mulf %5, %5 : vector<64x128xf32>
    %7 = arith.mulf %5, %6 : vector<64x128xf32>
    %cst_5 = arith.constant 4.471500e-02 : f32
    %8 = vector.broadcast %cst_5 : f32 to vector<64x128xf32>
    %9 = arith.mulf %8, %7 : vector<64x128xf32>
    %10 = arith.addf %5, %9 : vector<64x128xf32>
    %cst_6 = arith.constant 0.797884583 : f32
    %11 = vector.broadcast %cst_6 : f32 to vector<64x128xf32>
    %12 = arith.mulf %11, %10 : vector<64x128xf32>
    %13 = math.tanh %12 : vector<64x128xf32>
    %cst_7 = arith.constant 1.000000e+00 : f32
    %14 = vector.broadcast %cst_7 : f32 to vector<64x128xf32>
    %15 = arith.addf %14, %13 : vector<64x128xf32>
    %cst_8 = arith.constant 5.000000e-01 : f32
    %16 = vector.broadcast %cst_8 : f32 to vector<64x128xf32>
    %17 = arith.mulf %16, %15 : vector<64x128xf32>
    %18 = arith.mulf %5, %17 : vector<64x128xf32>
    %19 = arith.truncf %18 : vector<64x128xf32> to vector<64x128xbf16>
    %c0_9 = arith.constant 0 : index
    %c0_10 = arith.constant 0 : index
    %20 = vector.load %arg4[%c0_9, %c0_10] : memref<128x128xbf16, #tpu.memory_space<vmem>>, vector<128x128xbf16>
    %cst_11 = arith.constant dense<0.000000e+00> : vector<64x128xf32>
    %21 = tpu.matmul %19, %20, %cst_11 {dimension_numbers = #tpu.dot_dimension_numbers<[1], [0], [0], [1], [0, 0, 1, 1], [], []>} : vector<64x128xbf16>, vector<128x128xbf16>, vector<64x128xf32> -> vector<64x128xf32>
    %c0_12 = arith.constant 0 : index
    %c0_13 = arith.constant 0 : index
    %22 = vector.load %arg5[%c0_12, %c0_13] : memref<1x128xf32, #tpu.memory_space<vmem>>, vector<1x128xf32>
    %23 = vector.broadcast %22 : vector<1x128xf32> to vector<64x128xf32>
    %24 = arith.addf %21, %23 : vector<64x128xf32>
    %c0_14 = arith.constant 0 : index
    %c0_15 = arith.constant 0 : index
    %25 = vector.load %arg1[%c0_14, %c0_15] : memref<64x128xbf16, #tpu.memory_space<vmem>>, vector<64x128xbf16>
    %26 = arith.extf %25 : vector<64x128xbf16> to vector<64x128xf32>
    %27 = arith.addf %26, %24 : vector<64x128xf32>
    %28 = arith.truncf %27 : vector<64x128xf32> to vector<64x128xbf16>
    %c0_16 = arith.constant 0 : index
    %c0_17 = arith.constant 0 : index
    %29 = vector.load %arg6[%c0_16, %c0_17] : memref<64x128xbf16, #tpu.memory_space<vmem>>, vector<64x128xbf16>
    tpu.vector_store %arg6[%c0_16, %c0_17], %28 {strides = array<i32>} : memref<64x128xbf16, #tpu.memory_space<vmem>>, vector<64x128xbf16>,
    return
  }
  func.func @transform_0(%arg0: i32) -> (i32, i32) {
    %c0_i32 = arith.constant 0 : i32
    %c0_i32_0 = arith.constant 0 : i32
    return %arg0, %c0_i32 : i32, i32
  }
  func.func @transform_1(%arg0: i32) -> (i32, i32) {
    %c0_i32 = arith.constant 0 : i32
    %c0_i32_0 = arith.constant 0 : i32
    %c0_i32_1 = arith.constant 0 : i32
    return %c0_i32, %c0_i32_0 : i32, i32
  }
  func.func @transform_2(%arg0: i32) -> (i32, i32) {
    %c0_i32 = arith.constant 0 : i32
    %c0_i32_0 = arith.constant 0 : i32
    %c0_i32_1 = arith.constant 0 : i32
    return %c0_i32, %c0_i32_0 : i32, i32
  }
  func.func @transform_3(%arg0: i32) -> (i32, i32) {
    %c0_i32 = arith.constant 0 : i32
    %c0_i32_0 = arith.constant 0 : i32
    %c0_i32_1 = arith.constant 0 : i32
    return %c0_i32, %c0_i32_0 : i32, i32
  }
  func.func @transform_4(%arg0: i32) -> (i32, i32) {
    %c0_i32 = arith.constant 0 : i32
    %c0_i32_0 = arith.constant 0 : i32
    %c0_i32_1 = arith.constant 0 : i32
    return %c0_i32, %c0_i32_0 : i32, i32
  }
  func.func @transform_5(%arg0: i32) -> (i32, i32) {
    %c0_i32 = arith.constant 0 : i32
    %c0_i32_0 = arith.constant 0 : i32
    return %arg0, %c0_i32 : i32, i32
  }
}

module attributes {stable_mosaic.version = 11 : i64} {
  func.func @_mm_kernel(%arg0: i32, %arg1: memref<16x576xbf16, #tpu.memory_space<vmem>>, %arg2: memref<576x128xbf16, #tpu.memory_space<vmem>>, %arg3: memref<1x128xf32, #tpu.memory_space<vmem>>, %arg4: memref<16x128xbf16, #tpu.memory_space<vmem>>) attributes {dimension_semantics = [#tpu.dimension_semantics<parallel>], iteration_bounds = array<i64: 2>, scalar_prefetch = 0 : i64, scratch_operands = 0 : i64, tpu.core_type = #tpu.core_type<tc>, window_params = [{transform_indices = @transform_0, window_bounds = array<i64: 16, 576>}, {pipeline_mode = #tpu.pipeline_mode<synchronous>, transform_indices = @transform_1, window_bounds = array<i64: 576, 128>}, {pipeline_mode = #tpu.pipeline_mode<synchronous>, transform_indices = @transform_2, window_bounds = array<i64: 1, 128>}, {transform_indices = @transform_3, window_bounds = array<i64: 16, 128>}]} {
    %c0 = arith.constant 0 : index
    %c0_0 = arith.constant 0 : index
    %0 = vector.load %arg1[%c0, %c0_0] : memref<16x576xbf16, #tpu.memory_space<vmem>>, vector<16x576xbf16>
    %c0_1 = arith.constant 0 : index
    %c0_2 = arith.constant 0 : index
    %1 = vector.load %arg2[%c0_1, %c0_2] : memref<576x128xbf16, #tpu.memory_space<vmem>>, vector<576x128xbf16>
    %cst = arith.constant dense<0.000000e+00> : vector<16x128xf32>
    %2 = tpu.matmul %0, %1, %cst {dimension_numbers = #tpu.dot_dimension_numbers<[1], [0], [0], [1], [0, 0, 1, 1], [], []>} : vector<16x576xbf16>, vector<576x128xbf16>, vector<16x128xf32> -> vector<16x128xf32>
    %c0_3 = arith.constant 0 : index
    %c0_4 = arith.constant 0 : index
    %3 = vector.load %arg3[%c0_3, %c0_4] : memref<1x128xf32, #tpu.memory_space<vmem>>, vector<1x128xf32>
    %4 = vector.broadcast %3 : vector<1x128xf32> to vector<16x128xf32>
    %5 = arith.addf %2, %4 : vector<16x128xf32>
    %cst_5 = arith.constant 0.000000e+00 : f32
    %6 = vector.broadcast %cst_5 : f32 to vector<16x128xf32>
    %7 = arith.maximumf %5, %6 : vector<16x128xf32>
    %8 = arith.truncf %7 : vector<16x128xf32> to vector<16x128xbf16>
    %c0_6 = arith.constant 0 : index
    %c0_7 = arith.constant 0 : index
    %9 = vector.load %arg4[%c0_6, %c0_7] : memref<16x128xbf16, #tpu.memory_space<vmem>>, vector<16x128xbf16>
    tpu.vector_store %arg4[%c0_6, %c0_7], %8 {strides = array<i32>} : memref<16x128xbf16, #tpu.memory_space<vmem>>, vector<16x128xbf16>,
    return
  }
  func.func @transform_0(%arg0: i32) -> (i32, i32) {
    %c0_i32 = arith.constant 0 : i32
    %c0_i32_0 = arith.constant 0 : i32
    return %arg0, %c0_i32 : i32, i32
  }
  func.func @transform_1(%arg0: i32) -> (i32, i32) {
    %c0_i32 = arith.constant 0 : i32
    %c0_i32_0 = arith.constant 0 : i32
    %c0_i32_1 = arith.constant 0 : i32
    return %c0_i32, %c0_i32_0 : i32, i32
  }
  func.func @transform_2(%arg0: i32) -> (i32, i32) {
    %c0_i32 = arith.constant 0 : i32
    %c0_i32_0 = arith.constant 0 : i32
    %c0_i32_1 = arith.constant 0 : i32
    return %c0_i32, %c0_i32_0 : i32, i32
  }
  func.func @transform_3(%arg0: i32) -> (i32, i32) {
    %c0_i32 = arith.constant 0 : i32
    %c0_i32_0 = arith.constant 0 : i32
    return %arg0, %c0_i32 : i32, i32
  }
}

module attributes {stable_mosaic.version = 11 : i64} {
  func.func @_mm_kernel(%arg0: i32, %arg1: memref<16x576xbf16, #tpu.memory_space<vmem>>, %arg2: memref<576x128xbf16, #tpu.memory_space<vmem>>, %arg3: memref<1x128xf32, #tpu.memory_space<vmem>>, %arg4: memref<16x128xbf16, #tpu.memory_space<vmem>>) attributes {dimension_semantics = [#tpu.dimension_semantics<parallel>], iteration_bounds = array<i64: 4>, scalar_prefetch = 0 : i64, scratch_operands = 0 : i64, tpu.core_type = #tpu.core_type<tc>, window_params = [{transform_indices = @transform_0, window_bounds = array<i64: 16, 576>}, {pipeline_mode = #tpu.pipeline_mode<synchronous>, transform_indices = @transform_1, window_bounds = array<i64: 576, 128>}, {pipeline_mode = #tpu.pipeline_mode<synchronous>, transform_indices = @transform_2, window_bounds = array<i64: 1, 128>}, {transform_indices = @transform_3, window_bounds = array<i64: 16, 128>}]} {
    %c0 = arith.constant 0 : index
    %c0_0 = arith.constant 0 : index
    %0 = vector.load %arg1[%c0, %c0_0] : memref<16x576xbf16, #tpu.memory_space<vmem>>, vector<16x576xbf16>
    %c0_1 = arith.constant 0 : index
    %c0_2 = arith.constant 0 : index
    %1 = vector.load %arg2[%c0_1, %c0_2] : memref<576x128xbf16, #tpu.memory_space<vmem>>, vector<576x128xbf16>
    %cst = arith.constant dense<0.000000e+00> : vector<16x128xf32>
    %2 = tpu.matmul %0, %1, %cst {dimension_numbers = #tpu.dot_dimension_numbers<[1], [0], [0], [1], [0, 0, 1, 1], [], []>} : vector<16x576xbf16>, vector<576x128xbf16>, vector<16x128xf32> -> vector<16x128xf32>
    %c0_3 = arith.constant 0 : index
    %c0_4 = arith.constant 0 : index
    %3 = vector.load %arg3[%c0_3, %c0_4] : memref<1x128xf32, #tpu.memory_space<vmem>>, vector<1x128xf32>
    %4 = vector.broadcast %3 : vector<1x128xf32> to vector<16x128xf32>
    %5 = arith.addf %2, %4 : vector<16x128xf32>
    %cst_5 = arith.constant 0.000000e+00 : f32
    %6 = vector.broadcast %cst_5 : f32 to vector<16x128xf32>
    %7 = arith.maximumf %5, %6 : vector<16x128xf32>
    %8 = arith.truncf %7 : vector<16x128xf32> to vector<16x128xbf16>
    %c0_6 = arith.constant 0 : index
    %c0_7 = arith.constant 0 : index
    %9 = vector.load %arg4[%c0_6, %c0_7] : memref<16x128xbf16, #tpu.memory_space<vmem>>, vector<16x128xbf16>
    tpu.vector_store %arg4[%c0_6, %c0_7], %8 {strides = array<i32>} : memref<16x128xbf16, #tpu.memory_space<vmem>>, vector<16x128xbf16>,
    return
  }
  func.func @transform_0(%arg0: i32) -> (i32, i32) {
    %c0_i32 = arith.constant 0 : i32
    %c0_i32_0 = arith.constant 0 : i32
    return %arg0, %c0_i32 : i32, i32
  }
  func.func @transform_1(%arg0: i32) -> (i32, i32) {
    %c0_i32 = arith.constant 0 : i32
    %c0_i32_0 = arith.constant 0 : i32
    %c0_i32_1 = arith.constant 0 : i32
    return %c0_i32, %c0_i32_0 : i32, i32
  }
  func.func @transform_2(%arg0: i32) -> (i32, i32) {
    %c0_i32 = arith.constant 0 : i32
    %c0_i32_0 = arith.constant 0 : i32
    %c0_i32_1 = arith.constant 0 : i32
    return %c0_i32, %c0_i32_0 : i32, i32
  }
  func.func @transform_3(%arg0: i32) -> (i32, i32) {
    %c0_i32 = arith.constant 0 : i32
    %c0_i32_0 = arith.constant 0 : i32
    return %arg0, %c0_i32 : i32, i32
  }
}

module attributes {stable_mosaic.version = 11 : i64} {
  func.func @_fusion_kernel(%arg0: i32, %arg1: memref<32x128xbf16, #tpu.memory_space<vmem>>, %arg2: memref<128x128xbf16, #tpu.memory_space<vmem>>, %arg3: memref<1x128xf32, #tpu.memory_space<vmem>>, %arg4: memref<128x128xbf16, #tpu.memory_space<vmem>>, %arg5: memref<1x128xf32, #tpu.memory_space<vmem>>, %arg6: memref<32x128xbf16, #tpu.memory_space<vmem>>) attributes {dimension_semantics = [#tpu.dimension_semantics<parallel>], iteration_bounds = array<i64: 4>, scalar_prefetch = 0 : i64, scratch_operands = 0 : i64, tpu.core_type = #tpu.core_type<tc>, window_params = [{transform_indices = @transform_0, window_bounds = array<i64: 32, 128>}, {pipeline_mode = #tpu.pipeline_mode<synchronous>, transform_indices = @transform_1, window_bounds = array<i64: 128, 128>}, {pipeline_mode = #tpu.pipeline_mode<synchronous>, transform_indices = @transform_2, window_bounds = array<i64: 1, 128>}, {pipeline_mode = #tpu.pipeline_mode<synchronous>, transform_indices = @transform_3, window_bounds = array<i64: 128, 128>}, {pipeline_mode = #tpu.pipeline_mode<synchronous>, transform_indices = @transform_4, window_bounds = array<i64: 1, 128>}, {transform_indices = @transform_5, window_bounds = array<i64: 32, 128>}]} {
    %c0 = arith.constant 0 : index
    %c0_0 = arith.constant 0 : index
    %0 = vector.load %arg1[%c0, %c0_0] : memref<32x128xbf16, #tpu.memory_space<vmem>>, vector<32x128xbf16>
    %c0_1 = arith.constant 0 : index
    %c0_2 = arith.constant 0 : index
    %1 = vector.load %arg2[%c0_1, %c0_2] : memref<128x128xbf16, #tpu.memory_space<vmem>>, vector<128x128xbf16>
    %cst = arith.constant dense<0.000000e+00> : vector<32x128xf32>
    %2 = tpu.matmul %0, %1, %cst {dimension_numbers = #tpu.dot_dimension_numbers<[1], [0], [0], [1], [0, 0, 1, 1], [], []>} : vector<32x128xbf16>, vector<128x128xbf16>, vector<32x128xf32> -> vector<32x128xf32>
    %c0_3 = arith.constant 0 : index
    %c0_4 = arith.constant 0 : index
    %3 = vector.load %arg3[%c0_3, %c0_4] : memref<1x128xf32, #tpu.memory_space<vmem>>, vector<1x128xf32>
    %4 = vector.broadcast %3 : vector<1x128xf32> to vector<32x128xf32>
    %5 = arith.addf %2, %4 : vector<32x128xf32>
    %6 = arith.mulf %5, %5 : vector<32x128xf32>
    %7 = arith.mulf %5, %6 : vector<32x128xf32>
    %cst_5 = arith.constant 4.471500e-02 : f32
    %8 = vector.broadcast %cst_5 : f32 to vector<32x128xf32>
    %9 = arith.mulf %8, %7 : vector<32x128xf32>
    %10 = arith.addf %5, %9 : vector<32x128xf32>
    %cst_6 = arith.constant 0.797884583 : f32
    %11 = vector.broadcast %cst_6 : f32 to vector<32x128xf32>
    %12 = arith.mulf %11, %10 : vector<32x128xf32>
    %13 = math.tanh %12 : vector<32x128xf32>
    %cst_7 = arith.constant 1.000000e+00 : f32
    %14 = vector.broadcast %cst_7 : f32 to vector<32x128xf32>
    %15 = arith.addf %14, %13 : vector<32x128xf32>
    %cst_8 = arith.constant 5.000000e-01 : f32
    %16 = vector.broadcast %cst_8 : f32 to vector<32x128xf32>
    %17 = arith.mulf %16, %15 : vector<32x128xf32>
    %18 = arith.mulf %5, %17 : vector<32x128xf32>
    %19 = arith.truncf %18 : vector<32x128xf32> to vector<32x128xbf16>
    %c0_9 = arith.constant 0 : index
    %c0_10 = arith.constant 0 : index
    %20 = vector.load %arg4[%c0_9, %c0_10] : memref<128x128xbf16, #tpu.memory_space<vmem>>, vector<128x128xbf16>
    %cst_11 = arith.constant dense<0.000000e+00> : vector<32x128xf32>
    %21 = tpu.matmul %19, %20, %cst_11 {dimension_numbers = #tpu.dot_dimension_numbers<[1], [0], [0], [1], [0, 0, 1, 1], [], []>} : vector<32x128xbf16>, vector<128x128xbf16>, vector<32x128xf32> -> vector<32x128xf32>
    %c0_12 = arith.constant 0 : index
    %c0_13 = arith.constant 0 : index
    %22 = vector.load %arg5[%c0_12, %c0_13] : memref<1x128xf32, #tpu.memory_space<vmem>>, vector<1x128xf32>
    %23 = vector.broadcast %22 : vector<1x128xf32> to vector<32x128xf32>
    %24 = arith.addf %21, %23 : vector<32x128xf32>
    %c0_14 = arith.constant 0 : index
    %c0_15 = arith.constant 0 : index
    %25 = vector.load %arg1[%c0_14, %c0_15] : memref<32x128xbf16, #tpu.memory_space<vmem>>, vector<32x128xbf16>
    %26 = arith.extf %25 : vector<32x128xbf16> to vector<32x128xf32>
    %27 = arith.addf %26, %24 : vector<32x128xf32>
    %28 = arith.truncf %27 : vector<32x128xf32> to vector<32x128xbf16>
    %c0_16 = arith.constant 0 : index
    %c0_17 = arith.constant 0 : index
    %29 = vector.load %arg6[%c0_16, %c0_17] : memref<32x128xbf16, #tpu.memory_space<vmem>>, vector<32x128xbf16>
    tpu.vector_store %arg6[%c0_16, %c0_17], %28 {strides = array<i32>} : memref<32x128xbf16, #tpu.memory_space<vmem>>, vector<32x128xbf16>,
    return
  }
  func.func @transform_0(%arg0: i32) -> (i32, i32) {
    %c0_i32 = arith.constant 0 : i32
    %c0_i32_0 = arith.constant 0 : i32
    return %arg0, %c0_i32 : i32, i32
  }
  func.func @transform_1(%arg0: i32) -> (i32, i32) {
    %c0_i32 = arith.constant 0 : i32
    %c0_i32_0 = arith.constant 0 : i32
    %c0_i32_1 = arith.constant 0 : i32
    return %c0_i32, %c0_i32_0 : i32, i32
  }
  func.func @transform_2(%arg0: i32) -> (i32, i32) {
    %c0_i32 = arith.constant 0 : i32
    %c0_i32_0 = arith.constant 0 : i32
    %c0_i32_1 = arith.constant 0 : i32
    return %c0_i32, %c0_i32_0 : i32, i32
  }
  func.func @transform_3(%arg0: i32) -> (i32, i32) {
    %c0_i32 = arith.constant 0 : i32
    %c0_i32_0 = arith.constant 0 : i32
    %c0_i32_1 = arith.constant 0 : i32
    return %c0_i32, %c0_i32_0 : i32, i32
  }
  func.func @transform_4(%arg0: i32) -> (i32, i32) {
    %c0_i32 = arith.constant 0 : i32
    %c0_i32_0 = arith.constant 0 : i32
    %c0_i32_1 = arith.constant 0 : i32
    return %c0_i32, %c0_i32_0 : i32, i32
  }
  func.func @transform_5(%arg0: i32) -> (i32, i32) {
    %c0_i32 = arith.constant 0 : i32
    %c0_i32_0 = arith.constant 0 : i32
    return %arg0, %c0_i32 : i32, i32
  }
}

module attributes {stable_mosaic.version = 11 : i64} {
  func.func @_mm_kernel(%arg0: i32, %arg1: memref<16x576xbf16, #tpu.memory_space<vmem>>, %arg2: memref<576x128xbf16, #tpu.memory_space<vmem>>, %arg3: memref<1x128xf32, #tpu.memory_space<vmem>>, %arg4: memref<16x128xbf16, #tpu.memory_space<vmem>>) attributes {dimension_semantics = [#tpu.dimension_semantics<parallel>], iteration_bounds = array<i64: 1>, scalar_prefetch = 0 : i64, scratch_operands = 0 : i64, tpu.core_type = #tpu.core_type<tc>, window_params = [{transform_indices = @transform_0, window_bounds = array<i64: 16, 576>}, {pipeline_mode = #tpu.pipeline_mode<synchronous>, transform_indices = @transform_1, window_bounds = array<i64: 576, 128>}, {pipeline_mode = #tpu.pipeline_mode<synchronous>, transform_indices = @transform_2, window_bounds = array<i64: 1, 128>}, {transform_indices = @transform_3, window_bounds = array<i64: 16, 128>}]} {
    %c0 = arith.constant 0 : index
    %c0_0 = arith.constant 0 : index
    %0 = vector.load %arg1[%c0, %c0_0] : memref<16x576xbf16, #tpu.memory_space<vmem>>, vector<16x576xbf16>
    %c0_1 = arith.constant 0 : index
    %c0_2 = arith.constant 0 : index
    %1 = vector.load %arg2[%c0_1, %c0_2] : memref<576x128xbf16, #tpu.memory_space<vmem>>, vector<576x128xbf16>
    %cst = arith.constant dense<0.000000e+00> : vector<16x128xf32>
    %2 = tpu.matmul %0, %1, %cst {dimension_numbers = #tpu.dot_dimension_numbers<[1], [0], [0], [1], [0, 0, 1, 1], [], []>} : vector<16x576xbf16>, vector<576x128xbf16>, vector<16x128xf32> -> vector<16x128xf32>
    %c0_3 = arith.constant 0 : index
    %c0_4 = arith.constant 0 : index
    %3 = vector.load %arg3[%c0_3, %c0_4] : memref<1x128xf32, #tpu.memory_space<vmem>>, vector<1x128xf32>
    %4 = vector.broadcast %3 : vector<1x128xf32> to vector<16x128xf32>
    %5 = arith.addf %2, %4 : vector<16x128xf32>
    %cst_5 = arith.constant 0.000000e+00 : f32
    %6 = vector.broadcast %cst_5 : f32 to vector<16x128xf32>
    %7 = arith.maximumf %5, %6 : vector<16x128xf32>
    %8 = arith.truncf %7 : vector<16x128xf32> to vector<16x128xbf16>
    %c0_6 = arith.constant 0 : index
    %c0_7 = arith.constant 0 : index
    %9 = vector.load %arg4[%c0_6, %c0_7] : memref<16x128xbf16, #tpu.memory_space<vmem>>, vector<16x128xbf16>
    tpu.vector_store %arg4[%c0_6, %c0_7], %8 {strides = array<i32>} : memref<16x128xbf16, #tpu.memory_space<vmem>>, vector<16x128xbf16>,
    return
  }
  func.func @transform_0(%arg0: i32) -> (i32, i32) {
    %c0_i32 = arith.constant 0 : i32
    %c0_i32_0 = arith.constant 0 : i32
    return %arg0, %c0_i32 : i32, i32
  }
  func.func @transform_1(%arg0: i32) -> (i32, i32) {
    %c0_i32 = arith.constant 0 : i32
    %c0_i32_0 = arith.constant 0 : i32
    %c0_i32_1 = arith.constant 0 : i32
    return %c0_i32, %c0_i32_0 : i32, i32
  }
  func.func @transform_2(%arg0: i32) -> (i32, i32) {
    %c0_i32 = arith.constant 0 : i32
    %c0_i32_0 = arith.constant 0 : i32
    %c0_i32_1 = arith.constant 0 : i32
    return %c0_i32, %c0_i32_0 : i32, i32
  }
  func.func @transform_3(%arg0: i32) -> (i32, i32) {
    %c0_i32 = arith.constant 0 : i32
    %c0_i32_0 = arith.constant 0 : i32
    return %arg0, %c0_i32 : i32, i32
  }
}

module attributes {stable_mosaic.version = 11 : i64} {
  func.func @_fusion_kernel(%arg0: i32, %arg1: memref<16x256xbf16, #tpu.memory_space<vmem>>, %arg2: memref<256x256xbf16, #tpu.memory_space<vmem>>, %arg3: memref<1x256xf32, #tpu.memory_space<vmem>>, %arg4: memref<256x256xbf16, #tpu.memory_space<vmem>>, %arg5: memref<1x256xf32, #tpu.memory_space<vmem>>, %arg6: memref<16x256xbf16, #tpu.memory_space<vmem>>) attributes {dimension_semantics = [#tpu.dimension_semantics<parallel>], iteration_bounds = array<i64: 2>, scalar_prefetch = 0 : i64, scratch_operands = 0 : i64, tpu.core_type = #tpu.core_type<tc>, window_params = [{transform_indices = @transform_0, window_bounds = array<i64: 16, 256>}, {pipeline_mode = #tpu.pipeline_mode<synchronous>, transform_indices = @transform_1, window_bounds = array<i64: 256, 256>}, {pipeline_mode = #tpu.pipeline_mode<synchronous>, transform_indices = @transform_2, window_bounds = array<i64: 1, 256>}, {pipeline_mode = #tpu.pipeline_mode<synchronous>, transform_indices = @transform_3, window_bounds = array<i64: 256, 256>}, {pipeline_mode = #tpu.pipeline_mode<synchronous>, transform_indices = @transform_4, window_bounds = array<i64: 1, 256>}, {transform_indices = @transform_5, window_bounds = array<i64: 16, 256>}]} {
    %c0 = arith.constant 0 : index
    %c0_0 = arith.constant 0 : index
    %0 = vector.load %arg1[%c0, %c0_0] : memref<16x256xbf16, #tpu.memory_space<vmem>>, vector<16x256xbf16>
    %c0_1 = arith.constant 0 : index
    %c0_2 = arith.constant 0 : index
    %1 = vector.load %arg2[%c0_1, %c0_2] : memref<256x256xbf16, #tpu.memory_space<vmem>>, vector<256x256xbf16>
    %cst = arith.constant dense<0.000000e+00> : vector<16x256xf32>
    %2 = tpu.matmul %0, %1, %cst {dimension_numbers = #tpu.dot_dimension_numbers<[1], [0], [0], [1], [0, 0, 1, 1], [], []>} : vector<16x256xbf16>, vector<256x256xbf16>, vector<16x256xf32> -> vector<16x256xf32>
    %c0_3 = arith.constant 0 : index
    %c0_4 = arith.constant 0 : index
    %3 = vector.load %arg3[%c0_3, %c0_4] : memref<1x256xf32, #tpu.memory_space<vmem>>, vector<1x256xf32>
    %4 = vector.broadcast %3 : vector<1x256xf32> to vector<16x256xf32>
    %5 = arith.addf %2, %4 : vector<16x256xf32>
    %6 = arith.mulf %5, %5 : vector<16x256xf32>
    %7 = arith.mulf %5, %6 : vector<16x256xf32>
    %cst_5 = arith.constant 4.471500e-02 : f32
    %8 = vector.broadcast %cst_5 : f32 to vector<16x256xf32>
    %9 = arith.mulf %8, %7 : vector<16x256xf32>
    %10 = arith.addf %5, %9 : vector<16x256xf32>
    %cst_6 = arith.constant 0.797884583 : f32
    %11 = vector.broadcast %cst_6 : f32 to vector<16x256xf32>
    %12 = arith.mulf %11, %10 : vector<16x256xf32>
    %13 = math.tanh %12 : vector<16x256xf32>
    %cst_7 = arith.constant 1.000000e+00 : f32
    %14 = vector.broadcast %cst_7 : f32 to vector<16x256xf32>
    %15 = arith.addf %14, %13 : vector<16x256xf32>
    %cst_8 = arith.constant 5.000000e-01 : f32
    %16 = vector.broadcast %cst_8 : f32 to vector<16x256xf32>
    %17 = arith.mulf %16, %15 : vector<16x256xf32>
    %18 = arith.mulf %5, %17 : vector<16x256xf32>
    %19 = arith.truncf %18 : vector<16x256xf32> to vector<16x256xbf16>
    %c0_9 = arith.constant 0 : index
    %c0_10 = arith.constant 0 : index
    %20 = vector.load %arg4[%c0_9, %c0_10] : memref<256x256xbf16, #tpu.memory_space<vmem>>, vector<256x256xbf16>
    %cst_11 = arith.constant dense<0.000000e+00> : vector<16x256xf32>
    %21 = tpu.matmul %19, %20, %cst_11 {dimension_numbers = #tpu.dot_dimension_numbers<[1], [0], [0], [1], [0, 0, 1, 1], [], []>} : vector<16x256xbf16>, vector<256x256xbf16>, vector<16x256xf32> -> vector<16x256xf32>
    %c0_12 = arith.constant 0 : index
    %c0_13 = arith.constant 0 : index
    %22 = vector.load %arg5[%c0_12, %c0_13] : memref<1x256xf32, #tpu.memory_space<vmem>>, vector<1x256xf32>
    %23 = vector.broadcast %22 : vector<1x256xf32> to vector<16x256xf32>
    %24 = arith.addf %21, %23 : vector<16x256xf32>
    %c0_14 = arith.constant 0 : index
    %c0_15 = arith.constant 0 : index
    %25 = vector.load %arg1[%c0_14, %c0_15] : memref<16x256xbf16, #tpu.memory_space<vmem>>, vector<16x256xbf16>
    %26 = arith.extf %25 : vector<16x256xbf16> to vector<16x256xf32>
    %27 = arith.addf %26, %24 : vector<16x256xf32>
    %28 = arith.truncf %27 : vector<16x256xf32> to vector<16x256xbf16>
    %c0_16 = arith.constant 0 : index
    %c0_17 = arith.constant 0 : index
    %29 = vector.load %arg6[%c0_16, %c0_17] : memref<16x256xbf16, #tpu.memory_space<vmem>>, vector<16x256xbf16>
    tpu.vector_store %arg6[%c0_16, %c0_17], %28 {strides = array<i32>} : memref<16x256xbf16, #tpu.memory_space<vmem>>, vector<16x256xbf16>,
    return
  }
  func.func @transform_0(%arg0: i32) -> (i32, i32) {
    %c0_i32 = arith.constant 0 : i32
    %c0_i32_0 = arith.constant 0 : i32
    return %arg0, %c0_i32 : i32, i32
  }
  func.func @transform_1(%arg0: i32) -> (i32, i32) {
    %c0_i32 = arith.constant 0 : i32
    %c0_i32_0 = arith.constant 0 : i32
    %c0_i32_1 = arith.constant 0 : i32
    return %c0_i32, %c0_i32_0 : i32, i32
  }
  func.func @transform_2(%arg0: i32) -> (i32, i32) {
    %c0_i32 = arith.constant 0 : i32
    %c0_i32_0 = arith.constant 0 : i32
    %c0_i32_1 = arith.constant 0 : i32
    return %c0_i32, %c0_i32_0 : i32, i32
  }
  func.func @transform_3(%arg0: i32) -> (i32, i32) {
    %c0_i32 = arith.constant 0 : i32
    %c0_i32_0 = arith.constant 0 : i32
    %c0_i32_1 = arith.constant 0 : i32
    return %c0_i32, %c0_i32_0 : i32, i32
  }
  func.func @transform_4(%arg0: i32) -> (i32, i32) {
    %c0_i32 = arith.constant 0 : i32
    %c0_i32_0 = arith.constant 0 : i32
    %c0_i32_1 = arith.constant 0 : i32
    return %c0_i32, %c0_i32_0 : i32, i32
  }
  func.func @transform_5(%arg0: i32) -> (i32, i32) {
    %c0_i32 = arith.constant 0 : i32
    %c0_i32_0 = arith.constant 0 : i32
    return %arg0, %c0_i32 : i32, i32
  }
}

module attributes {stable_mosaic.version = 11 : i64} {
  func.func @_mm_kernel(%arg0: i32, %arg1: memref<16x1152xbf16, #tpu.memory_space<vmem>>, %arg2: memref<1152x256xbf16, #tpu.memory_space<vmem>>, %arg3: memref<1x256xf32, #tpu.memory_space<vmem>>, %arg4: memref<16x256xbf16, #tpu.memory_space<vmem>>) attributes {dimension_semantics = [#tpu.dimension_semantics<parallel>], iteration_bounds = array<i64: 1>, scalar_prefetch = 0 : i64, scratch_operands = 0 : i64, tpu.core_type = #tpu.core_type<tc>, window_params = [{transform_indices = @transform_0, window_bounds = array<i64: 16, 1152>}, {pipeline_mode = #tpu.pipeline_mode<synchronous>, transform_indices = @transform_1, window_bounds = array<i64: 1152, 256>}, {pipeline_mode = #tpu.pipeline_mode<synchronous>, transform_indices = @transform_2, window_bounds = array<i64: 1, 256>}, {transform_indices = @transform_3, window_bounds = array<i64: 16, 256>}]} {
    %c0 = arith.constant 0 : index
    %c0_0 = arith.constant 0 : index
    %0 = vector.load %arg1[%c0, %c0_0] : memref<16x1152xbf16, #tpu.memory_space<vmem>>, vector<16x1152xbf16>
    %c0_1 = arith.constant 0 : index
    %c0_2 = arith.constant 0 : index
    %1 = vector.load %arg2[%c0_1, %c0_2] : memref<1152x256xbf16, #tpu.memory_space<vmem>>, vector<1152x256xbf16>
    %cst = arith.constant dense<0.000000e+00> : vector<16x256xf32>
    %2 = tpu.matmul %0, %1, %cst {dimension_numbers = #tpu.dot_dimension_numbers<[1], [0], [0], [1], [0, 0, 1, 1], [], []>} : vector<16x1152xbf16>, vector<1152x256xbf16>, vector<16x256xf32> -> vector<16x256xf32>
    %c0_3 = arith.constant 0 : index
    %c0_4 = arith.constant 0 : index
    %3 = vector.load %arg3[%c0_3, %c0_4] : memref<1x256xf32, #tpu.memory_space<vmem>>, vector<1x256xf32>
    %4 = vector.broadcast %3 : vector<1x256xf32> to vector<16x256xf32>
    %5 = arith.addf %2, %4 : vector<16x256xf32>
    %cst_5 = arith.constant 0.000000e+00 : f32
    %6 = vector.broadcast %cst_5 : f32 to vector<16x256xf32>
    %7 = arith.maximumf %5, %6 : vector<16x256xf32>
    %8 = arith.truncf %7 : vector<16x256xf32> to vector<16x256xbf16>
    %c0_6 = arith.constant 0 : index
    %c0_7 = arith.constant 0 : index
    %9 = vector.load %arg4[%c0_6, %c0_7] : memref<16x256xbf16, #tpu.memory_space<vmem>>, vector<16x256xbf16>
    tpu.vector_store %arg4[%c0_6, %c0_7], %8 {strides = array<i32>} : memref<16x256xbf16, #tpu.memory_space<vmem>>, vector<16x256xbf16>,
    return
  }
  func.func @transform_0(%arg0: i32) -> (i32, i32) {
    %c0_i32 = arith.constant 0 : i32
    %c0_i32_0 = arith.constant 0 : i32
    return %arg0, %c0_i32 : i32, i32
  }
  func.func @transform_1(%arg0: i32) -> (i32, i32) {
    %c0_i32 = arith.constant 0 : i32
    %c0_i32_0 = arith.constant 0 : i32
    %c0_i32_1 = arith.constant 0 : i32
    return %c0_i32, %c0_i32_0 : i32, i32
  }
  func.func @transform_2(%arg0: i32) -> (i32, i32) {
    %c0_i32 = arith.constant 0 : i32
    %c0_i32_0 = arith.constant 0 : i32
    %c0_i32_1 = arith.constant 0 : i32
    return %c0_i32, %c0_i32_0 : i32, i32
  }
  func.func @transform_3(%arg0: i32) -> (i32, i32) {
    %c0_i32 = arith.constant 0 : i32
    %c0_i32_0 = arith.constant 0 : i32
    return %arg0, %c0_i32 : i32, i32
  }
}

module attributes {stable_mosaic.version = 11 : i64} {
  func.func @_fusion_kernel(%arg0: i32, %arg1: memref<16x512xbf16, #tpu.memory_space<vmem>>, %arg2: memref<512x512xbf16, #tpu.memory_space<vmem>>, %arg3: memref<1x512xf32, #tpu.memory_space<vmem>>, %arg4: memref<512x512xbf16, #tpu.memory_space<vmem>>, %arg5: memref<1x512xf32, #tpu.memory_space<vmem>>, %arg6: memref<16x512xbf16, #tpu.memory_space<vmem>>) attributes {dimension_semantics = [#tpu.dimension_semantics<parallel>], iteration_bounds = array<i64: 1>, scalar_prefetch = 0 : i64, scratch_operands = 0 : i64, tpu.core_type = #tpu.core_type<tc>, window_params = [{transform_indices = @transform_0, window_bounds = array<i64: 16, 512>}, {pipeline_mode = #tpu.pipeline_mode<synchronous>, transform_indices = @transform_1, window_bounds = array<i64: 512, 512>}, {pipeline_mode = #tpu.pipeline_mode<synchronous>, transform_indices = @transform_2, window_bounds = array<i64: 1, 512>}, {pipeline_mode = #tpu.pipeline_mode<synchronous>, transform_indices = @transform_3, window_bounds = array<i64: 512, 512>}, {pipeline_mode = #tpu.pipeline_mode<synchronous>, transform_indices = @transform_4, window_bounds = array<i64: 1, 512>}, {transform_indices = @transform_5, window_bounds = array<i64: 16, 512>}]} {
    %c0 = arith.constant 0 : index
    %c0_0 = arith.constant 0 : index
    %0 = vector.load %arg1[%c0, %c0_0] : memref<16x512xbf16, #tpu.memory_space<vmem>>, vector<16x512xbf16>
    %c0_1 = arith.constant 0 : index
    %c0_2 = arith.constant 0 : index
    %1 = vector.load %arg2[%c0_1, %c0_2] : memref<512x512xbf16, #tpu.memory_space<vmem>>, vector<512x512xbf16>
    %cst = arith.constant dense<0.000000e+00> : vector<16x512xf32>
    %2 = tpu.matmul %0, %1, %cst {dimension_numbers = #tpu.dot_dimension_numbers<[1], [0], [0], [1], [0, 0, 1, 1], [], []>} : vector<16x512xbf16>, vector<512x512xbf16>, vector<16x512xf32> -> vector<16x512xf32>
    %c0_3 = arith.constant 0 : index
    %c0_4 = arith.constant 0 : index
    %3 = vector.load %arg3[%c0_3, %c0_4] : memref<1x512xf32, #tpu.memory_space<vmem>>, vector<1x512xf32>
    %4 = vector.broadcast %3 : vector<1x512xf32> to vector<16x512xf32>
    %5 = arith.addf %2, %4 : vector<16x512xf32>
    %6 = arith.mulf %5, %5 : vector<16x512xf32>
    %7 = arith.mulf %5, %6 : vector<16x512xf32>
    %cst_5 = arith.constant 4.471500e-02 : f32
    %8 = vector.broadcast %cst_5 : f32 to vector<16x512xf32>
    %9 = arith.mulf %8, %7 : vector<16x512xf32>
    %10 = arith.addf %5, %9 : vector<16x512xf32>
    %cst_6 = arith.constant 0.797884583 : f32
    %11 = vector.broadcast %cst_6 : f32 to vector<16x512xf32>
    %12 = arith.mulf %11, %10 : vector<16x512xf32>
    %13 = math.tanh %12 : vector<16x512xf32>
    %cst_7 = arith.constant 1.000000e+00 : f32
    %14 = vector.broadcast %cst_7 : f32 to vector<16x512xf32>
    %15 = arith.addf %14, %13 : vector<16x512xf32>
    %cst_8 = arith.constant 5.000000e-01 : f32
    %16 = vector.broadcast %cst_8 : f32 to vector<16x512xf32>
    %17 = arith.mulf %16, %15 : vector<16x512xf32>
    %18 = arith.mulf %5, %17 : vector<16x512xf32>
    %19 = arith.truncf %18 : vector<16x512xf32> to vector<16x512xbf16>
    %c0_9 = arith.constant 0 : index
    %c0_10 = arith.constant 0 : index
    %20 = vector.load %arg4[%c0_9, %c0_10] : memref<512x512xbf16, #tpu.memory_space<vmem>>, vector<512x512xbf16>
    %cst_11 = arith.constant dense<0.000000e+00> : vector<16x512xf32>
    %21 = tpu.matmul %19, %20, %cst_11 {dimension_numbers = #tpu.dot_dimension_numbers<[1], [0], [0], [1], [0, 0, 1, 1], [], []>} : vector<16x512xbf16>, vector<512x512xbf16>, vector<16x512xf32> -> vector<16x512xf32>
    %c0_12 = arith.constant 0 : index
    %c0_13 = arith.constant 0 : index
    %22 = vector.load %arg5[%c0_12, %c0_13] : memref<1x512xf32, #tpu.memory_space<vmem>>, vector<1x512xf32>
    %23 = vector.broadcast %22 : vector<1x512xf32> to vector<16x512xf32>
    %24 = arith.addf %21, %23 : vector<16x512xf32>
    %c0_14 = arith.constant 0 : index
    %c0_15 = arith.constant 0 : index
    %25 = vector.load %arg1[%c0_14, %c0_15] : memref<16x512xbf16, #tpu.memory_space<vmem>>, vector<16x512xbf16>
    %26 = arith.extf %25 : vector<16x512xbf16> to vector<16x512xf32>
    %27 = arith.addf %26, %24 : vector<16x512xf32>
    %28 = arith.truncf %27 : vector<16x512xf32> to vector<16x512xbf16>
    %c0_16 = arith.constant 0 : index
    %c0_17 = arith.constant 0 : index
    %29 = vector.load %arg6[%c0_16, %c0_17] : memref<16x512xbf16, #tpu.memory_space<vmem>>, vector<16x512xbf16>
    tpu.vector_store %arg6[%c0_16, %c0_17], %28 {strides = array<i32>} : memref<16x512xbf16, #tpu.memory_space<vmem>>, vector<16x512xbf16>,
    return
  }
  func.func @transform_0(%arg0: i32) -> (i32, i32) {
    %c0_i32 = arith.constant 0 : i32
    %c0_i32_0 = arith.constant 0 : i32
    return %arg0, %c0_i32 : i32, i32
  }
  func.func @transform_1(%arg0: i32) -> (i32, i32) {
    %c0_i32 = arith.constant 0 : i32
    %c0_i32_0 = arith.constant 0 : i32
    %c0_i32_1 = arith.constant 0 : i32
    return %c0_i32, %c0_i32_0 : i32, i32
  }
  func.func @transform_2(%arg0: i32) -> (i32, i32) {
    %c0_i32 = arith.constant 0 : i32
    %c0_i32_0 = arith.constant 0 : i32
    %c0_i32_1 = arith.constant 0 : i32
    return %c0_i32, %c0_i32_0 : i32, i32
  }
  func.func @transform_3(%arg0: i32) -> (i32, i32) {
    %c0_i32 = arith.constant 0 : i32
    %c0_i32_0 = arith.constant 0 : i32
    %c0_i32_1 = arith.constant 0 : i32
    return %c0_i32, %c0_i32_0 : i32, i32
  }
  func.func @transform_4(%arg0: i32) -> (i32, i32) {
    %c0_i32 = arith.constant 0 : i32
    %c0_i32_0 = arith.constant 0 : i32
    %c0_i32_1 = arith.constant 0 : i32
    return %c0_i32, %c0_i32_0 : i32, i32
  }
  func.func @transform_5(%arg0: i32) -> (i32, i32) {
    %c0_i32 = arith.constant 0 : i32
    %c0_i32_0 = arith.constant 0 : i32
    return %arg0, %c0_i32 : i32, i32
  }
}

</mosaic_0001>

<bundles_post_ra>
// kernel: mul.18
= control target key start
LH: loop header
LB: loop body
LE: loop exit
PB: predicated region body
PF: predicated region fallthrough
CT: control target
= control target key end

     0   :  { %vm39_vm0 = vcmask 130048   ;;  %s170_s0 = inlined_call_operand.vmem [shape: f32[3,3,2,16], index: 0, kind: input, shape index: {}]   ;;  %s171_s1 = inlined_call_operand.vmem [shape: f32[18,16], index: 1, kind: output, shape index: {}]  }
   0x1   :  { %v81_v0 = vld [vmem:[%s170_s0 + $0x10] sm:$0x3]  ;;  %v82_v1 = vld [vmem:[%s170_s0 + $0xe] sm:$0x3]  ;;  %v83_v2 = vld [vmem:[%s170_s0 + $0xc] sm:$0x3] }
   0x2   :  { %7 = vst [vmem:[#allocation0 + $0x10] sm:$0x3] %v81_v0  ;;  %v84_v3 = vld [vmem:[%s170_s0 + $0xa] sm:$0x3]  ;;  %v85_v4 = vld [vmem:[%s170_s0 + $0x8] sm:$0x3] }
   0x3   :  { %11 = vst [vmem:[#allocation0 + $0x40] sm:$0x3] %v82_v1  ;;  %v86_v5 = vld [vmem:[%s170_s0 + $0x6] sm:$0x3]  ;;  %v87_v6 = vld [vmem:[%s170_s0 + $0x4] sm:$0x3] }
   0x4   :  { %15 = vst [vmem:[#allocation0 + $0x28] sm:$0x3] %v83_v2  ;;  %v88_v7 = vld [vmem:[%s170_s0 + $0x2] sm:$0x3]  ;;  %v36_v8 = vld [vmem:[%s170_s0] sm:$0x3] }
   0x5   :  { %19 = vst [vmem:[#allocation0 + $0x30] sm:$0x3] %v84_v3 }
   0x6   :  { %23 = vst [vmem:[#allocation0 + $0x20] sm:$0x3] %v85_v4 }
   0x7   :  { %27 = vst [vmem:[#allocation0 + $0x18] sm:$0x3] %v86_v5 }
   0x8   :  { %31 = vst [vmem:[#allocation0] sm:$0x3] %v87_v6 }
   0x9   :  { %35 = vst [vmem:[#allocation0 + $0x8] sm:$0x3] %v88_v7  ;;  %v77_v16 = vld [vmem:[#allocation0 + $0x10] sm:$0x3]  }
   0xa   :  { %37 = vst [vmem:[#allocation0 + $0x38] sm:$0x3] %v36_v8  ;;  %v72_v9 = vld [vmem:[#allocation0 + $0x40] sm:$0x3]  }
   0xb   :  { %v67_v10 = vld [vmem:[#allocation0 + $0x28] sm:$0x3]   ;;  %95 = vst.msk [vmem:[%s171_s1 + $0xe] sm:$0x3] %vm39_vm0, %v72_v9  }
   0xc   :  { %v62_v11 = vld [vmem:[#allocation0 + $0x30] sm:$0x3]   ;;  %94 = vst.msk [vmem:[%s171_s1 + $0xc] sm:$0x3] %vm39_vm0, %v67_v10  }
   0xd   :  { %v57_v12 = vld [vmem:[#allocation0 + $0x20] sm:$0x3]   ;;  %93 = vst.msk [vmem:[%s171_s1 + $0xa] sm:$0x3] %vm39_vm0, %v62_v11  }
   0xe   :  { %v52_v13 = vld [vmem:[#allocation0 + $0x18] sm:$0x3]   ;;  %92 = vst.msk [vmem:[%s171_s1 + $0x8] sm:$0x3] %vm39_vm0, %v57_v12  }
   0xf   :  { %v47_v14 = vld [vmem:[#allocation0] sm:$0x3]   ;;  %91 = vst.msk [vmem:[%s171_s1 + $0x6] sm:$0x3] %vm39_vm0, %v52_v13  }
  0x10   :  { %v42_v15 = vld [vmem:[#allocation0 + $0x8] sm:$0x3]   ;;  %90 = vst.msk [vmem:[%s171_s1 + $0x4] sm:$0x3] %vm39_vm0, %v47_v14  }
  0x11   :  { %v38_v17 = vld [vmem:[#allocation0 + $0x38] sm:$0x3]   ;;  %89 = vst.msk [vmem:[%s171_s1 + $0x2] sm:$0x3] %vm39_vm0, %v42_v15  }
  0x12   :  { %40 = vst.msk [vmem:[%s171_s1] sm:$0x3] %vm39_vm0, %v38_v17  }
  0x13   :  { %96 = vst.msk [vmem:[%s171_s1 + $0x10] sm:$0x3] %vm39_vm0, %v77_v16  }

// kernel: tile.53
= control target key start
LH: loop header
LB: loop body
LE: loop exit
PB: predicated region body
PF: predicated region fallthrough
CT: control target
= control target key end

     0   :  { %s22_s0 = inlined_call_operand.vmem [shape: f32[16], index: 0, kind: input, shape index: {}]   ;;  %s23_s1 = inlined_call_operand.vmem [shape: f32[8,16], index: 1, kind: output, shape index: {}]  }
   0x1   :  { %v4_v0 = vld [vmem:[%s22_s0] ss:$0 sm:$0xff] }
   0x2   :  { %5 = vst [vmem:[%s23_s1] sm:$0xff] %v4_v0 }

// kernel: tile.54
= control target key start
LH: loop header
LB: loop body
LE: loop exit
PB: predicated region body
PF: predicated region fallthrough
CT: control target
= control target key end

     0   :  { %s67_s10 = smov 112   ;;  %s68_s11 = smov 80   ;;  %vm3_vm0 = vcmask 130048   ;;  %vm9_vm1 = vcmask 1048448   ;;  %vm15_vm2 = vcmask 917248   ;;  %vm21_vm3 = vcmask 786048   ;;  %s111_s0 = inlined_call_operand.vmem [shape: f32[8,16], index: 0, kind: input, shape index: {}]   ;;  %s112_s1 = inlined_call_operand.vmem [shape: f32[1,128], index: 1, kind: output, shape index: {}]  }
   0x1   :  { %v53_v0 = vld [vmem:[%s111_s0 + $0x7] sm:$0x1]   ;;  %v55_v1 = vld [vmem:[%s111_s0 + $0x5] sm:$0x1]   ;;  %v57_v2 = vld [vmem:[%s111_s0 + $0x3] sm:$0x1]  }
   0x2   :  { %7 = vrot.lane.b32.xlu0 %v53_v0, %s67_s10  ;;  %19 = vrot.lane.b32.xlu1 %v55_v1, %s68_s11  ;;  %s69_s14 = smov 48   ;;  %v54_v3 = vld [vmem:[%s111_s0 + $0x6] sm:$0x1]   ;;  %v56_v4 = vld [vmem:[%s111_s0 + $0x4] sm:$0x1]   ;;  %s70_s21 = smov 96  }
   0x3   :  { %31 = vrot.lane.b32.xlu2 %v57_v2, %s69_s14  ;;  %v58_v5 = vld [vmem:[%s111_s0 + $0x2] sm:$0x1]   ;;  %s71_s22 = smov 64   ;;  %s72_s23 = smov 32   ;;  %v59_v6 = vld [vmem:[%s111_s0 + $0x1] sm:$0x1]  }
   0x4   :  { %s73_s26 = smov 16   ;;  %v2_v7 = vld [vmem:[%s111_s0] sm:$0x1]   ;;  %vm27_vm4 = vcmask 654848   ;;  %vm33_vm5 = vcmask 523648   ;;  %vm39_vm6 = vcmask 392448  }
   0x5   :  { %4 = vst.msk [vmem:[#allocation0] sm:$0x1] %vm3_vm0, %v2_v7   ;;  %vm45_vm7 = vcmask 261248  }
   0xa   :  { %13 = vrot.lane.b32.xlu0 %v54_v3, %s70_s21  ;;  %25 = vrot.lane.b32.xlu1 %v56_v4, %s71_s22 }
   0xb   :  { %37 = vrot.lane.b32.xlu2 %v58_v5, %s72_s23 }
  0x12   :  { %43 = vrot.lane.b32.xlu0 %v59_v6, %s73_s26 }
  0x5d   :  { %v32_v8 = vpop.permute.xlu2 %31  }
  0x65   :  { %v38_v9 = vpop.permute.xlu2 %37  }
  0x74   :  { %v8_v10 = vpop.permute.xlu0 %7   ;;  %v20_v11 = vpop.permute.xlu1 %19  }
  0x75   :  { %10 = vst.msk [vmem:[#allocation0] sm:$0x1] %vm9_vm1, %v8_v10  }
  0x7c   :  { %v14_v12 = vpop.permute.xlu0 %13   ;;  %v26_v13 = vpop.permute.xlu1 %25  }
  0x7d   :  { %16 = vst.msk [vmem:[#allocation0] sm:$0x1] %vm15_vm2, %v14_v12  }
  0x7e   :  { %22 = vst.msk [vmem:[#allocation0] sm:$0x1] %vm21_vm3, %v20_v11  }
  0x7f   :  { %28 = vst.msk [vmem:[#allocation0] sm:$0x1] %vm27_vm4, %v26_v13  }
  0x80   :  { %34 = vst.msk [vmem:[#allocation0] sm:$0x1] %vm33_vm5, %v32_v8  }
  0x81   :  { %40 = vst.msk [vmem:[#allocation0] sm:$0x1] %vm39_vm6, %v38_v9  }
  0x84   :  { %v44_v14 = vpop.permute.xlu0 %43  }
  0x85   :  { %46 = vst.msk [vmem:[#allocation0] sm:$0x1] %vm45_vm7, %v44_v14  }
  0x8c   :  { %v49_v15 = vld [vmem:[#allocation0] sm:$0x1] }
  0x8d   :  { %52 = vst [vmem:[%s112_s1] sm:$0x1] %v49_v15 }

// kernel: encoder_all_forward.20
= control target key start
LH: loop header
LB: loop body
LE: loop exit
PB: predicated region body
PF: predicated region fallthrough
CT: control target
= control target key end

     0   :  { %s470_s12 = smov 0   ;;  %s521_s0 = inlined_call_operand.vmem [shape: bf16[64,144], index: 0, kind: input, shape index: {}]   ;;  %s522_s1 = inlined_call_operand.vmem [shape: bf16[144,128], index: 1, kind: input, shape index: {}]   ;;  %s523_s2 = inlined_call_operand.vmem [shape: f32[1,128], index: 2, kind: input, shape index: {}]   ;;  %s524_s3 = inlined_call_operand.vmem [shape: bf16[64,128], index: 3, kind: output, shape index: {}]  }
   0x1 LB: > { %s359_s13 = sadd.s32 4294967295, %s448_s12   ;;  %p363_p0 = scmp.ge.s32.totalorder %s448_s12, 1  ;;  %s448_s12 = sphi %s470_s12, %s13_s12  }
   0x2   : > { %p139_p1 = scmp.lt.s32.totalorder %s448_s12, 5 }
   0x4   : > { %p140_p2 = pnand %p363_p0, %p139_p1 }
   0x5   : > { %s364_s16 = sshll.u32 (!%p140_p2), %s359_s13, 1 }
   0x6   : > { %143 = sbr.rel (%p140_p2) target bundleno = 186 (0xba), region = 32  ;;  %p165_p3 = scmp.lt.s32.totalorder (!%p140_p2), %s364_s16, 7 }
   0xb   : > { %v426_v0 = vld [vmem:[%s522_s1 + $0x38] sm:$0xff]  ;;  %v425_v1 = vld [vmem:[%s522_s1 + $0x30] sm:$0xff]  ;;  %v427_v2 = vld [vmem:[%s522_s1 + $0x40] sm:$0xff]  ;;  %s526_s16 = smov (!%p165_p3, %s364_s16), 7  ;;  %vm265_vm0 = vcmask 130048  }
   0xc   : > { %269 = vmatpush.bf16.msra.mxu0 %v426_v0  ;;  %290 = vmatpush.bf16.msra.mxu1 %v427_v2  ;;  %s416_s21 = sshll.u32 %s526_s16, 3  ;;  %v424_v3 = vld [vmem:[%s522_s1 + $0x28] sm:$0xff]  ;;  %v423_v7 = vld [vmem:[%s522_s1 + $0x20] sm:$0xff]  ;;  %v422_v8 = vld [vmem:[%s522_s1 + $0x18] sm:$0xff]  ;;  %s368_s13 = sshll.u32 %s526_s16, 2 }
   0xd   : > { %s169_s26 = scalar_lea.vmem %s521_s0, %s416_s21  ;;  %v421_v9 = vld [vmem:[%s522_s1 + $0x10] sm:$0xff]  ;;  %v420_v10 = vld [vmem:[%s522_s1 + $0x8] sm:$0xff]  ;;  %v419_v11 = vld [vmem:[%s522_s1] sm:$0xff]  ;;  %s175_s17 = scalar_lea.vmem %s524_s3, %s368_s13 }
   0xe   : > { %v417_v4 = vld [vmem:[%s169_s26 + $0x4] sm:$0xf]  ;;  %v373_v5 = vld [vmem:[%s169_s26 + $0x8] sm:$0xf0]  ;;  %v371_v12 = vld [vmem:[%s169_s26] sm:$0xf] }
   0xf   : > { %v376_v6 = vor.u32 %v417_v4, %v373_v5  ;;  %v418_v13 = vld [vmem:[%s169_s26 + $0x4] sm:$0xf0]  ;;  %v441_v17 = vld [vmem:[%s523_s2] ss:$0 sm:$0xff] }
  0x10   : > { %270 = vmatpush.bf16.msra.mxu0 %v425_v1  ;;  %v372_v14 = vor.u32 %v418_v13, %v371_v12 }
  0x11   : > { %413 = vmatmul.msk.bf16.vlgmr.msra.gmra.mxu1 %vm265_vm0, %v376_v6 }
  0x14   : > { %271 = vmatpush.bf16.msra.mxu0 %v424_v3 }
  0x18   : > { %272 = vmatpush.bf16.msra.mxu0 %v423_v7 }
  0x1c   : > { %273 = vmatpush.bf16.msra.mxu0 %v422_v8 }
  0x20   : > { %274 = vmatpush.bf16.msra.mxu0 %v421_v9 }
  0x24   : > { %275 = vmatpush.bf16.msra.mxu0 %v420_v10 }
  0x28   : > { %276 = vmatpush.bf16.msra.mxu0 %v419_v11 }
  0x2b   : > { %277 = vmatmul.bf16.vlgmr.msra.gmra.mxu0 %v372_v14 }
  0x8e   : > { %v292_v15 = vpop.f32.mrf.mxu1 }
  0x96   : > { %v294_v22 = vpop.f32.mrf.mxu1 }
  0xa8   : > { %v278_v16 = vpop.f32.mrf.mxu0 }
  0xa9   : > { %v279_v18 = vadd.f32 %v441_v17, %v278_v16 }
  0xab   : > { %v293_v20 = vadd.f32 %v292_v15, %v279_v18 }
  0xad   : > { %v297_v24 = vmax.f32 %v293_v20, 0.0 }
  0xb0   : > { %v280_v19 = vpop.f32.mrf.mxu0 }
  0xb1   : > { %v281_v21 = vadd.f32 %v441_v17, %v280_v19 }
  0xb3   : > { %v295_v23 = vadd.f32 %v294_v22, %v281_v21 }
  0xb5   : > { %v298_v25 = vmax.f32 %v295_v23, 0.0 }
  0xb7   : > { %v431_v26 = vpack.c.bf16 %v298_v25, %v297_v24 }
  0xb9   : > { %432 = vst [vmem:[%s175_s17] sm:$0xff] %v431_v26  }
  0xba PF: > { %s13_s12 = sadd.s32 1, %s448_s12  }
  0xbb   : > { %p10_p4 = scmp.ge.s32.totalorder %s13_s12, 6  }
  0xbd   :  { %12 = sbr.rel (!%p10_p4) target bundleno = 1 (0x1), region = 62 }

// kernel: mul.4
= control target key start
LH: loop header
LB: loop body
LE: loop exit
PB: predicated region body
PF: predicated region fallthrough
CT: control target
= control target key end

     0   :  { %vm15_vm0 = vcmask 261120   ;;  %s59_s0 = inlined_call_operand.vmem [shape: f32[3,3,32], index: 0, kind: input, shape index: {}]   ;;  %s60_s1 = inlined_call_operand.vmem [shape: f32[9,32], index: 1, kind: output, shape index: {}]  }
   0x1   :  { %v27_v0 = vld [vmem:[%s59_s0 + $0x8] sm:$0xf]  ;;  %v28_v1 = vld [vmem:[%s59_s0 + $0x4] sm:$0xf]  ;;  %v12_v2 = vld [vmem:[%s59_s0] sm:$0xf] }
   0x2   :  { %7 = vst [vmem:[#allocation0] sm:$0xf] %v27_v0 }
   0x3   :  { %11 = vst [vmem:[#allocation0 + $0x10] sm:$0xf] %v28_v1 }
   0x4   :  { %13 = vst [vmem:[#allocation0 + $0x8] sm:$0xf] %v12_v2 }
   0x9   :  { %v23_v3 = vld [vmem:[#allocation0] sm:$0x7]  }
   0xa   :  { %v18_v4 = vld [vmem:[#allocation0 + $0x10] sm:$0x7]   ;;  %30 = vst.msk [vmem:[%s60_s1 + $0x6] sm:$0x7] %vm15_vm0, %v23_v3  }
   0xb   :  { %v14_v5 = vld [vmem:[#allocation0 + $0x8] sm:$0x7]   ;;  %29 = vst.msk [vmem:[%s60_s1 + $0x3] sm:$0x7] %vm15_vm0, %v18_v4  }
   0xc   :  { %16 = vst.msk [vmem:[%s60_s1] sm:$0x7] %vm15_vm0, %v14_v5  }

// kernel: tile.83
= control target key start
LH: loop header
LB: loop body
LE: loop exit
PB: predicated region body
PF: predicated region fallthrough
CT: control target
= control target key end

     0   :  { %s22_s0 = inlined_call_operand.vmem [shape: f32[32], index: 0, kind: input, shape index: {}]   ;;  %s23_s1 = inlined_call_operand.vmem [shape: f32[4,32], index: 1, kind: output, shape index: {}]  }
   0x1   :  { %v4_v0 = vld [vmem:[%s22_s0] ss:$0 sm:$0xff] }
   0x2   :  { %5 = vst [vmem:[%s23_s1] sm:$0xf] %v4_v0 }

// kernel: tile.84
= control target key start
LH: loop header
LB: loop body
LE: loop exit
PB: predicated region body
PF: predicated region fallthrough
CT: control target
= control target key end

     0   :  { %s37_s8 = smov 32   ;;  %s38_s9 = smov 64   ;;  %vm7_vm0 = vcmask 261120   ;;  %vm13_vm1 = vcmask 1048320   ;;  %vm19_vm2 = vcmask 785920   ;;  %vm25_vm3 = vcmask 523520   ;;  %s55_s0 = inlined_call_operand.vmem [shape: f32[4,32], index: 0, kind: input, shape index: {}]   ;;  %s56_s1 = inlined_call_operand.vmem [shape: f32[1,128], index: 1, kind: output, shape index: {}]  }
   0x1   :  { %v4_v0 = vld [vmem:[%s55_s0] sm:$0xf]  ;;  %s36_s0 = smov 96  }
   0x2   :  { %5 = vst [vmem:[#allocation1] sm:$0xf] %v4_v0 }
   0x9   :  { %v10_v1 = vld [vmem:[#allocation1 + $0x3] sm:$0x1]   ;;  %v22_v2 = vld [vmem:[#allocation1 + $0x1] sm:$0x1]   ;;  %v16_v3 = vld [vmem:[#allocation1 + $0x2] sm:$0x1]  }
   0xa   :  { %11 = vrot.lane.b32.xlu0 %v10_v1, %s36_s0  ;;  %23 = vrot.lane.b32.xlu1 %v22_v2, %s37_s8  ;;  %v6_v4 = vld [vmem:[#allocation1] sm:$0x1]  }
   0xb   :  { %8 = vst.msk [vmem:[#allocation0] sm:$0x1] %vm7_vm0, %v6_v4  }
  0x12   :  { %17 = vrot.lane.b32.xlu0 %v16_v3, %s38_s9 }
  0x7c   :  { %v12_v5 = vpop.permute.xlu0 %11   ;;  %v24_v6 = vpop.permute.xlu1 %23  }
  0x7d   :  { %14 = vst.msk [vmem:[#allocation0] sm:$0x1] %vm13_vm1, %v12_v5  }
  0x84   :  { %v18_v7 = vpop.permute.xlu0 %17  }
  0x85   :  { %20 = vst.msk [vmem:[#allocation0] sm:$0x1] %vm19_vm2, %v18_v7  }
  0x86   :  { %26 = vst.msk [vmem:[#allocation0] sm:$0x1] %vm25_vm3, %v24_v6  }
  0x8d   :  { %v29_v8 = vld [vmem:[#allocation0] sm:$0x1] }
  0x8e   :  { %32 = vst [vmem:[%s56_s1] sm:$0x1] %v29_v8 }

// kernel: encoder_all_forward.24
= control target key start
LH: loop header
LB: loop body
LE: loop exit
PB: predicated region body
PF: predicated region fallthrough
CT: control target
= control target key end

     0   :  { %s395_s12 = smov 0   ;;  %s427_s0 = inlined_call_operand.vmem [shape: bf16[128,36], index: 0, kind: input, shape index: {}]   ;;  %s428_s1 = inlined_call_operand.vmem [shape: bf16[36,128], index: 1, kind: input, shape index: {}]   ;;  %s429_s2 = inlined_call_operand.vmem [shape: f32[1,128], index: 2, kind: input, shape index: {}]   ;;  %s430_s3 = inlined_call_operand.vmem [shape: bf16[128,128], index: 3, kind: output, shape index: {}]  }
   0x1 LB: > { %s311_s13 = sadd.s32 4294967295, %s373_s12   ;;  %p315_p0 = scmp.ge.s32.totalorder %s373_s12, 1  ;;  %s373_s12 = sphi %s395_s12, %s13_s12  }
   0x2   : > { %p138_p1 = scmp.lt.s32.totalorder %s373_s12, 5 }
   0x4   : > { %p139_p2 = pnand %p315_p0, %p138_p1 }
   0x5   : > { %s316_s16 = sshll.u32 (!%p139_p2), %s311_s13, 2 }
   0x6   : > { %142 = sbr.rel (%p139_p2) target bundleno = 170 (0xaa), region = 32  ;;  %p163_p3 = scmp.lt.s32.totalorder (!%p139_p2), %s316_s16, 15 }
   0xb   : > { %v183_v0 = vld [vmem:[%s428_s1 + $0x10] sm:$0x3]  ;;  %vm220_vm0 = vcmask 1041408   ;;  %s432_s16 = smov (!%p163_p3, %s316_s16), 15  ;;  %v343_v4 = vld [vmem:[%s428_s1 + $0x8] sm:$0xff]  ;;  %v342_v5 = vld [vmem:[%s428_s1] sm:$0xff] }
   0xc   : > { %v207_v1 = vunpack.c.l.b16 %v183_v0  ;;  %s317_s19 = sshll.u32 %s432_s16, 2  ;;  %vm213_vm1 = vcmask 293888   ;;  %v366_v10 = vld [vmem:[%s429_s2] ss:$0 sm:$0xff] }
   0xd   : > { %s166_s24 = scalar_lea.vmem %s427_s0, %s317_s19  ;;  %s172_s29 = scalar_lea.vmem %s430_s3, %s317_s19 }
   0xe   : > { %v210_v2 = vpack.c.b16 %v207_v1, %v207_v1  ;;  %v340_v6 = vld [vmem:[%s166_s24] sm:$0xff]  ;;  %v341_v7 = vld [vmem:[%s166_s24 + $0x8] sm:$0xff] }
  0x10   : > { %v222_v3 = vsel %vm220_vm0, %v210_v2, 0 }
  0x11   : > { %229 = vmatpush.bf16.msra.mxu0 %v222_v3  ;;  %355 = vmatpush.bf16.msra.mxu1 %v222_v3 }
  0x15   : > { %230 = vmatpush.bf16.msra.mxu0 %v343_v4  ;;  %356 = vmatpush.bf16.msra.mxu1 %v343_v4 }
  0x19   : > { %231 = vmatpush.bf16.msra.mxu0 %v342_v5  ;;  %357 = vmatpush.bf16.msra.mxu1 %v342_v5 }
  0x1c   : > { %336 = vmatmul.msk.bf16.vlgmr.msra.gmra.mxu0 %vm213_vm1, %v340_v6  ;;  %337 = vmatmul.msk.bf16.vlgmr.msra.gmra.mxu1 %vm213_vm1, %v341_v7 }
  0x99   : > { %v233_v8 = vpop.f32.mrf.mxu0  ;;  %v238_v9 = vpop.f32.mrf.mxu1 }
  0x9a   : > { %v234_v11 = vadd.f32 %v366_v10, %v233_v8  ;;  %v239_v12 = vadd.f32 %v366_v10, %v238_v9 }
  0x9c   : > { %v243_v17 = vmax.f32 %v234_v11, 0.0  ;;  %v245_v18 = vmax.f32 %v239_v12, 0.0 }
  0xa1   : > { %v235_v13 = vpop.f32.mrf.mxu0  ;;  %v240_v14 = vpop.f32.mrf.mxu1 }
  0xa2   : > { %v236_v15 = vadd.f32 %v366_v10, %v235_v13  ;;  %v241_v16 = vadd.f32 %v366_v10, %v240_v14 }
  0xa4   : > { %v244_v19 = vmax.f32 %v236_v15, 0.0  ;;  %v246_v20 = vmax.f32 %v241_v16, 0.0 }
  0xa6   : > { %v347_v21 = vpack.c.bf16 %v244_v19, %v243_v17  ;;  %v352_v22 = vpack.c.bf16 %v246_v20, %v245_v18 }
  0xa8   : > { %348 = vst [vmem:[%s172_s29] sm:$0xff] %v347_v21  }
  0xa9   : > { %354 = vst [vmem:[%s172_s29 + $0x8] sm:$0xff] %v352_v22  }
  0xaa PF: > { %s13_s12 = sadd.s32 1, %s373_s12  }
  0xab   : > { %p10_p4 = scmp.ge.s32.totalorder %s13_s12, 6  }
  0xad   :  { %12 = sbr.rel (!%p10_p4) target bundleno = 1 (0x1), region = 62 }

// kernel: tile.93
= control target key start
LH: loop header
LB: loop body
LE: loop exit
PB: predicated region body
PF: predicated region fallthrough
CT: control target
= control target key end

     0   :  { %s22_s0 = inlined_call_operand.vmem [shape: f32[64], index: 0, kind: input, shape index: {}]   ;;  %s23_s1 = inlined_call_operand.vmem [shape: f32[2,64], index: 1, kind: output, shape index: {}]  }
   0x1   :  { %v4_v0 = vld [vmem:[%s22_s0] ss:$0 sm:$0xff] }
   0x2   :  { %5 = vst [vmem:[%s23_s1] sm:$0x3] %v4_v0 }

// kernel: tile.98
= control target key start
LH: loop header
LB: loop body
LE: loop exit
PB: predicated region body
PF: predicated region fallthrough
CT: control target
= control target key end

     0   :  { %vm7_vm0 = vcmask 523264   ;;  %vm13_vm1 = vcmask 1048064   ;;  %s39_s0 = inlined_call_operand.vmem [shape: f32[2,64], index: 0, kind: input, shape index: {}]   ;;  %s40_s1 = inlined_call_operand.vmem [shape: f32[1,128], index: 1, kind: output, shape index: {}]  }
   0x1   :  { %v4_v0 = vld [vmem:[%s39_s0] sm:$0x3]  ;;  %s22_s0 = smov 64  }
   0x2   :  { %5 = vst [vmem:[#allocation1] sm:$0x3] %v4_v0 }
   0x9   :  { %v10_v1 = vld [vmem:[#allocation1 + $0x1] sm:$0x1]   ;;  %v6_v2 = vld [vmem:[#allocation1] sm:$0x1]  }
   0xa   :  { %11 = vrot.lane.b32.xlu0 %v10_v1, %s22_s0  ;;  %8 = vst.msk [vmem:[#allocation0] sm:$0x1] %vm7_vm0, %v6_v2  }
  0x7c   :  { %v12_v3 = vpop.permute.xlu0 %11  }
  0x7d   :  { %14 = vst.msk [vmem:[#allocation0] sm:$0x1] %vm13_vm1, %v12_v3  }
  0x84   :  { %v17_v4 = vld [vmem:[#allocation0] sm:$0x1] }
  0x85   :  { %20 = vst [vmem:[%s40_s1] sm:$0x1] %v17_v4 }

// kernel: encoder_all_forward.28
= control target key start
LH: loop header
LB: loop body
LE: loop exit
PB: predicated region body
PF: predicated region fallthrough
CT: control target
= control target key end

     0   :  { %s832_s18 = smov 0   ;;  %s957_s0 = inlined_call_operand.vmem [shape: bf16[256,128], index: 0, kind: input, shape index: {}]   ;;  %s958_s1 = inlined_call_operand.vmem [shape: bf16[128,128], index: 1, kind: input, shape index: {}]   ;;  %s959_s2 = inlined_call_operand.vmem [shape: f32[1,128], index: 2, kind: input, shape index: {}]   ;;  %s960_s3 = inlined_call_operand.vmem [shape: bf16[128,128], index: 3, kind: input, shape index: {}]   ;;  %s961_s4 = inlined_call_operand.vmem [shape: f32[1,128], index: 4, kind: input, shape index: {}]   ;;  %s962_s5 = inlined_call_operand.vmem [shape: bf16[256,128], index: 5, kind: output, shape index: {}]  }
   0x1 LB: > { %s618_s19 = sadd.s32 4294967295, %s800_s18   ;;  %p622_p0 = scmp.ge.s32.totalorder %s800_s18, 1  ;;  %s800_s18 = sphi %s832_s18, %s15_s18  }
   0x2   : > { %p188_p1 = scmp.lt.s32.totalorder %s800_s18, 5 }
   0x4   : > { %p189_p2 = pnand %p622_p0, %p188_p1 }
   0x5   : > { %s623_s28 = sshll.u32 (!%p189_p2), %s618_s19, 3 }
   0x6   : > { %192 = sbr.rel (%p189_p2) target bundleno = 373 (0x175), region = 40  ;;  %p217_p3 = scmp.lt.s32.totalorder (!%p189_p2), %s623_s28, 31 }
   0xb   : > { %v720_v0 = vld [vmem:[%s958_s1 + $0x38] sm:$0xff]  ;;  %v719_v1 = vld [vmem:[%s958_s1 + $0x30] sm:$0xff]  ;;  %v718_v2 = vld [vmem:[%s958_s1 + $0x28] sm:$0xff]  ;;  %s964_s28 = smov (!%p217_p3, %s623_s28), 31 }
   0xc   : > { %328 = vmatpush.bf16.msra.mxu0 %v720_v0  ;;  %752 = vmatpush.bf16.msra.mxu2 %v720_v0  ;;  %v717_v3 = vld [vmem:[%s958_s1 + $0x20] sm:$0xff]  ;;  %v716_v4 = vld [vmem:[%s958_s1 + $0x18] sm:$0xff]  ;;  %v715_v5 = vld [vmem:[%s958_s1 + $0x10] sm:$0xff]  ;;  %s624_s10 = sshll.u32 %s964_s28, 2 }
   0xd   : > { %v714_v6 = vld [vmem:[%s958_s1 + $0x8] sm:$0xff]  ;;  %v713_v7 = vld [vmem:[%s958_s1] sm:$0xff]  ;;  %s872_s15 = scalar_lea.vmem %s957_s0, %s624_s10  ;;  %v728_v12 = vld [vmem:[%s960_s3 + $0x38] sm:$0xff]  ;;  %s945_s17 = scalar_lea.vmem %s962_s5, %s624_s10 }
   0xe   : > { %v709_v8 = vld [vmem:[%s872_s15] sm:$0xff]  ;;  %v711_v9 = vld [vmem:[%s872_s15 + $0x10] sm:$0xff]  ;;  %v710_v10 = vld [vmem:[%s872_s15 + $0x8] sm:$0xff]  ;;  %501 = vmatpush.bf16.msra.mxu1 %v728_v12  ;;  %760 = vmatpush.bf16.msra.mxu3 %v728_v12 }
   0xf   : > { %v712_v11 = vld [vmem:[%s872_s15 + $0x18] sm:$0xff]  ;;  %v727_v13 = vld [vmem:[%s960_s3 + $0x30] sm:$0xff]  ;;  %v726_v14 = vld [vmem:[%s960_s3 + $0x28] sm:$0xff] }
  0x10   : > { %329 = vmatpush.bf16.msra.mxu0 %v719_v1  ;;  %753 = vmatpush.bf16.msra.mxu2 %v719_v1  ;;  %v725_v15 = vld [vmem:[%s960_s3 + $0x20] sm:$0xff]  ;;  %v724_v16 = vld [vmem:[%s960_s3 + $0x18] sm:$0xff]  ;;  %v723_v17 = vld [vmem:[%s960_s3 + $0x10] sm:$0xff] }
  0x11   : > { %v722_v18 = vld [vmem:[%s960_s3 + $0x8] sm:$0xff]  ;;  %v902_v19 = vld [vmem:[%s959_s2] ss:$0 sm:$0xff] }
  0x12   : > { %502 = vmatpush.bf16.msra.mxu1 %v727_v13  ;;  %761 = vmatpush.bf16.msra.mxu3 %v727_v13  ;;  %v721_v20 = vld [vmem:[%s960_s3] sm:$0xff] }
  0x14   : > { %330 = vmatpush.bf16.msra.mxu0 %v718_v2  ;;  %754 = vmatpush.bf16.msra.mxu2 %v718_v2 }
  0x16   : > { %503 = vmatpush.bf16.msra.mxu1 %v726_v14  ;;  %762 = vmatpush.bf16.msra.mxu3 %v726_v14 }
  0x18   : > { %331 = vmatpush.bf16.msra.mxu0 %v717_v3  ;;  %755 = vmatpush.bf16.msra.mxu2 %v717_v3 }
  0x1a   : > { %504 = vmatpush.bf16.msra.mxu1 %v725_v15  ;;  %763 = vmatpush.bf16.msra.mxu3 %v725_v15 }
  0x1c   : > { %332 = vmatpush.bf16.msra.mxu0 %v716_v4  ;;  %756 = vmatpush.bf16.msra.mxu2 %v716_v4 }
  0x1e   : > { %505 = vmatpush.bf16.msra.mxu1 %v724_v16  ;;  %764 = vmatpush.bf16.msra.mxu3 %v724_v16 }
  0x20   : > { %333 = vmatpush.bf16.msra.mxu0 %v715_v5  ;;  %757 = vmatpush.bf16.msra.mxu2 %v715_v5 }
  0x22   : > { %506 = vmatpush.bf16.msra.mxu1 %v723_v17  ;;  %765 = vmatpush.bf16.msra.mxu3 %v723_v17 }
  0x24   : > { %334 = vmatpush.bf16.msra.mxu0 %v714_v6  ;;  %758 = vmatpush.bf16.msra.mxu2 %v714_v6 }
  0x26   : > { %507 = vmatpush.bf16.msra.mxu1 %v722_v18  ;;  %766 = vmatpush.bf16.msra.mxu3 %v722_v18 }
  0x28   : > { %335 = vmatpush.bf16.msra.mxu0 %v713_v7  ;;  %759 = vmatpush.bf16.msra.mxu2 %v713_v7 }
  0x2a   : > { %508 = vmatpush.bf16.msra.mxu1 %v721_v20  ;;  %767 = vmatpush.bf16.msra.mxu3 %v721_v20 }
  0x2b   : > { %336 = vmatmul.bf16.vlgmr.msra.gmra.mxu0 %v709_v8  ;;  %346 = vmatmul.bf16.vlgmr.msra.gmra.mxu2 %v711_v9 }
  0x3b   : > { %341 = vmatmul.bf16.gmra.mxu0 %v710_v10  ;;  %351 = vmatmul.bf16.gmra.mxu2 %v712_v11 }
  0xa8   : > { %v337_v21 = vpop.f32.mrf.mxu0 }
  0xa9   : > { %v338_v22 = vadd.f32 %v902_v19, %v337_v21 }
  0xab   : > { %v357_v23 = vmul.f32 %v338_v22, %v338_v22 }
  0xad   : > { %v365_v24 = vmul.f32 %v357_v23, %v338_v22 }
  0xae   : > { %v347_v25 = vpop.f32.mrf.mxu2 }
  0xaf   : > { %v373_v26 = vmul.f32 0.044715, %v365_v24  ;;  %v909_v27 = vadd.f32 %v902_v19, %v347_v25 }
  0xb0   : > { %v339_v28 = vpop.f32.mrf.mxu0 }
  0xb1   : > { %v381_v29 = vadd.f32 %v373_v26, %v338_v22  ;;  %v361_v30 = vmul.f32 %v909_v27, %v909_v27  ;;  %v340_v31 = vadd.f32 %v902_v19, %v339_v28 }
  0xb3   : > { %v369_v32 = vmul.f32 %v361_v30, %v909_v27  ;;  %v358_v33 = vmul.f32 %v340_v31, %v340_v31  ;;  %v389_v34 = vmul.f32 0.7978846, %v381_v29 }
  0xb5   : > { %v377_v35 = vmul.f32 0.044715, %v369_v32  ;;  %v366_v36 = vmul.f32 %v358_v33, %v340_v31  ;;  %778 = vtanh.f32 %v389_v34 }
  0xb6   : > { %v349_v37 = vpop.f32.mrf.mxu2 }
  0xb7   : > { %v385_v38 = vadd.f32 %v377_v35, %v909_v27  ;;  %v374_v39 = vmul.f32 0.044715, %v366_v36  ;;  %v350_v40 = vadd.f32 %v902_v19, %v349_v37 }
  0xb8   : > { %v342_v41 = vpop.f32.mrf.mxu0 }
  0xb9   : > { %v382_v42 = vadd.f32 %v374_v39, %v340_v31  ;;  %v362_v43 = vmul.f32 %v350_v40, %v350_v40  ;;  %v918_v44 = vadd.f32 %v902_v19, %v342_v41  ;;  %v393_v45 = vmul.f32 0.7978846, %v385_v38 }
  0xbb   : > { %v370_v46 = vmul.f32 %v362_v43, %v350_v40  ;;  %v359_v47 = vmul.f32 %v918_v44, %v918_v44  ;;  %v390_v48 = vmul.f32 0.7978846, %v382_v42  ;;  %780 = vtanh.f32 %v393_v45  ;;  %v779_v49 = vpop.eup %778 }
  0xbc   : > { %v405_v57 = vadd.f32 1.0, %v779_v49 }
  0xbd   : > { %v378_v50 = vmul.f32 0.044715, %v370_v46  ;;  %v367_v51 = vmul.f32 %v359_v47, %v918_v44  ;;  %782 = vtanh.f32 %v390_v48 }
  0xbe   : > { %v352_v52 = vpop.f32.mrf.mxu2  ;;  %v413_v4 = vmul.f32 0.5, %v405_v57 }
  0xbf   : > { %v386_v53 = vadd.f32 %v378_v50, %v350_v40  ;;  %v375_v54 = vmul.f32 0.044715, %v367_v51  ;;  %v924_v55 = vadd.f32 %v902_v19, %v352_v52  ;;  %v777_v51 = vld [vmem:[%s961_s4] ss:$0 sm:$0xff] }
  0xc0   : > { %v344_v56 = vpop.f32.mrf.mxu0  ;;  %v421_v13 = vmul.f32 %v413_v4, %v338_v22 }
  0xc1   : > { %v383_v58 = vadd.f32 %v375_v54, %v918_v44  ;;  %v363_v59 = vmul.f32 %v924_v55, %v924_v55  ;;  %v345_v60 = vadd.f32 %v902_v19, %v344_v56  ;;  %v394_v61 = vmul.f32 0.7978846, %v386_v53  ;;  %v781_v62 = vpop.eup %780 }
  0xc2   : > { %v409_v9 = vadd.f32 1.0, %v781_v62 }
  0xc3   : > { %v783_v63 = vpop.eup %782  ;;  %v371_v0 = vmul.f32 %v363_v59, %v924_v55  ;;  %v360_v1 = vmul.f32 %v345_v60, %v345_v60  ;;  %784 = vtanh.f32 %v394_v61  ;;  %v391_v2 = vmul.f32 0.7978846, %v383_v58  ;;  %v232_v61 = vld [vmem:[%s872_s15 + $0x10] sm:$0xff]  }
  0xc4   : > { %v406_v3 = vadd.f32 1.0, %v783_v63  ;;  %v417_v23 = vmul.f32 0.5, %v409_v9 }
  0xc5   : > { %v379_v5 = vmul.f32 0.044715, %v371_v0  ;;  %v368_v6 = vmul.f32 %v360_v1, %v345_v60  ;;  %786 = vtanh.f32 %v391_v2  ;;  %v534_v0 = vunpack.c.l.bf16 %v232_v61  ;;  %v230_v1 = vld [vmem:[%s872_s15 + $0x8] sm:$0xff]  }
  0xc6   : > { %v354_v7 = vpop.f32.mrf.mxu2  ;;  %v414_v8 = vmul.f32 0.5, %v406_v3  ;;  %v535_v2 = vunpack.c.h.bf16 %v232_v61  ;;  %v533_v9 = vunpack.c.h.bf16 %v230_v1 }
  0xc7   : > { %v387_v10 = vadd.f32 %v379_v5, %v924_v55  ;;  %v376_v11 = vmul.f32 0.044715, %v368_v6  ;;  %v355_v12 = vadd.f32 %v902_v19, %v354_v7  ;;  %v425_v19 = vmul.f32 %v417_v23, %v909_v27 }
  0xc8   : > { %v422_v14 = vmul.f32 %v414_v8, %v340_v31  ;;  %v532_v5 = vunpack.c.l.bf16 %v230_v1 }
  0xc9   : > { %v785_v15 = vpop.eup %784  ;;  %v384_v16 = vadd.f32 %v376_v11, %v345_v60  ;;  %v364_v17 = vmul.f32 %v355_v12, %v355_v12  ;;  %v395_v18 = vmul.f32 0.7978846, %v387_v10 }
  0xca   : > { %v429_v20 = vpack.c.bf16 %v422_v14, %v421_v13  ;;  %v410_v21 = vadd.f32 1.0, %v785_v15 }
  0xcb   : > { %v372_v24 = vmul.f32 %v364_v17, %v355_v12  ;;  %v392_v25 = vmul.f32 0.7978846, %v384_v16  ;;  %788 = vtanh.f32 %v395_v18  ;;  %v787_v28 = vpop.eup %786  ;;  %v234_v17 = vld [vmem:[%s872_s15 + $0x18] sm:$0xff]  }
  0xcc   : > { %509 = vmatmul.bf16.vlgmr.msra.gmra.mxu1 %v429_v20  ;;  %v418_v26 = vmul.f32 0.5, %v410_v21  ;;  %v407_v32 = vadd.f32 1.0, %v787_v28  ;;  %v536_v20 = vunpack.c.l.bf16 %v234_v17  ;;  %v537_v21 = vunpack.c.h.bf16 %v234_v17 }
  0xcd   : > { %v380_v29 = vmul.f32 0.044715, %v372_v24  ;;  %790 = vtanh.f32 %v392_v25 }
  0xce   : > { %v426_v30 = vmul.f32 %v418_v26, %v350_v40  ;;  %v415_v37 = vmul.f32 0.5, %v407_v32 }
  0xcf   : > { %v388_v22 = vadd.f32 %v380_v29, %v355_v12 }
  0xd0   : > { %v431_v31 = vpack.c.bf16 %v426_v30, %v425_v19  ;;  %v423_v41 = vmul.f32 %v415_v37, %v918_v44  ;;  %v228_v44 = vld [vmem:[%s872_s15] sm:$0xff]  }
  0xd1   : > { %v396_v33 = vmul.f32 0.7978846, %v388_v22  ;;  %v789_v34 = vpop.eup %788  ;;  %v530_v53 = vunpack.c.l.bf16 %v228_v44  ;;  %v531_v54 = vunpack.c.h.bf16 %v228_v44 }
  0xd2   : > { %519 = vmatmul.bf16.vlgmr.msra.gmra.mxu3 %v431_v31  ;;  %v411_v39 = vadd.f32 1.0, %v789_v34 }
  0xd3   : > { %v791_v35 = vpop.eup %790  ;;  %792 = vtanh.f32 %v396_v33 }
  0xd4   : > { %v408_v36 = vadd.f32 1.0, %v791_v35  ;;  %v419_v40 = vmul.f32 0.5, %v411_v39 }
  0xd6   : > { %v416_v38 = vmul.f32 0.5, %v408_v36  ;;  %v427_v47 = vmul.f32 %v419_v40, %v924_v55 }
  0xd8   : > { %v424_v42 = vmul.f32 %v416_v38, %v345_v60 }
  0xd9   : > { %v793_v43 = vpop.eup %792 }
  0xda   : > { %v430_v45 = vpack.c.bf16 %v424_v42, %v423_v41  ;;  %v412_v27 = vadd.f32 1.0, %v793_v43 }
  0xdc   : > { %514 = vmatmul.bf16.gmra.mxu1 %v430_v45  ;;  %v420_v46 = vmul.f32 0.5, %v412_v27 }
  0xde   : > { %v428_v48 = vmul.f32 %v420_v46, %v355_v12 }
  0xe0   : > { %v432_v49 = vpack.c.bf16 %v428_v48, %v427_v47 }
  0xe2   : > { %524 = vmatmul.bf16.gmra.mxu3 %v432_v49 }
 0x149   : > { %v510_v50 = vpop.f32.mrf.mxu1 }
 0x14a   : > { %v511_v52 = vadd.f32 %v777_v51, %v510_v50 }
 0x14c   : > { %v538_v58 = vadd.f32 %v530_v53, %v511_v52 }
 0x151   : > { %v512_v56 = vpop.f32.mrf.mxu1 }
 0x152   : > { %v513_v57 = vadd.f32 %v777_v51, %v512_v56 }
 0x154   : > { %v539_v59 = vadd.f32 %v531_v54, %v513_v57 }
 0x155   : > { %v520_v55 = vpop.f32.mrf.mxu3 }
 0x156   : > { %v732_v60 = vpack.c.bf16 %v539_v59, %v538_v58  ;;  %v521_v63 = vadd.f32 %v777_v51, %v520_v55 }
 0x158   : > { %733 = vst [vmem:[%s945_s17] sm:$0xff] %v732_v60   ;;  %v542_v6 = vadd.f32 %v534_v0, %v521_v63 }
 0x159   : > { %v515_v62 = vpop.f32.mrf.mxu1 }
 0x15a   : > { %v516_v7 = vadd.f32 %v777_v51, %v515_v62 }
 0x15c   : > { %v540_v13 = vadd.f32 %v532_v5, %v516_v7 }
 0x15d   : > { %v522_v3 = vpop.f32.mrf.mxu3 }
 0x15e   : > { %v523_v4 = vadd.f32 %v777_v51, %v522_v3 }
 0x160   : > { %v543_v8 = vadd.f32 %v535_v2, %v523_v4 }
 0x161   : > { %v517_v10 = vpop.f32.mrf.mxu1 }
 0x162   : > { %v742_v11 = vpack.c.bf16 %v543_v8, %v542_v6  ;;  %v518_v12 = vadd.f32 %v777_v51, %v517_v10 }
 0x164   : > { %750 = vst [vmem:[%s945_s17 + $0x10] sm:$0xff] %v742_v11   ;;  %v541_v14 = vadd.f32 %v533_v9, %v518_v12 }
 0x165   : > { %v525_v15 = vpop.f32.mrf.mxu3 }
 0x166   : > { %v737_v16 = vpack.c.bf16 %v541_v14, %v540_v13  ;;  %v526_v18 = vadd.f32 %v777_v51, %v525_v15 }
 0x168   : > { %749 = vst [vmem:[%s945_s17 + $0x8] sm:$0xff] %v737_v16   ;;  %v544_v25 = vadd.f32 %v536_v20, %v526_v18 }
 0x16d   : > { %v527_v23 = vpop.f32.mrf.mxu3 }
 0x16e   : > { %v528_v24 = vadd.f32 %v777_v51, %v527_v23 }
 0x170   : > { %v545_v26 = vadd.f32 %v537_v21, %v528_v24 }
 0x172   : > { %v747_v28 = vpack.c.bf16 %v545_v26, %v544_v25 }
 0x174   : > { %751 = vst [vmem:[%s945_s17 + $0x18] sm:$0xff] %v747_v28  }
 0x175 PF: > { %s15_s18 = sadd.s32 1, %s800_s18  }
 0x176   : > { %p12_p4 = scmp.ge.s32.totalorder %s15_s18, 6  }
 0x178   :  { %14 = sbr.rel (!%p12_p4) target bundleno = 1 (0x1), region = 70 }

// kernel: encoder_all_forward.21
= control target key start
LH: loop header
LB: loop body
LE: loop exit
PB: predicated region body
PF: predicated region fallthrough
CT: control target
= control target key end

     0   :  { %s897_s12 = smov 0   ;;  %s1041_s0 = inlined_call_operand.vmem [shape: bf16[32,576], index: 0, kind: input, shape index: {}]   ;;  %s1042_s1 = inlined_call_operand.vmem [shape: bf16[576,128], index: 1, kind: input, shape index: {}]   ;;  %s1043_s2 = inlined_call_operand.vmem [shape: f32[1,128], index: 2, kind: input, shape index: {}]   ;;  %s1044_s3 = inlined_call_operand.vmem [shape: bf16[32,128], index: 3, kind: output, shape index: {}]  }
   0x1 LB: > { %s637_s13 = sadd.s32 4294967295, %s875_s12   ;;  %p641_p0 = scmp.ge.s32.totalorder %s875_s12, 1  ;;  %s875_s12 = sphi %s897_s12, %s13_s12  }
   0x2   : > { %p139_p1 = scmp.lt.s32.totalorder %s875_s12, 3 }
   0x4   : > { %p140_p2 = pnand %p641_p0, %p139_p1 }
   0x5   : > { %s642_s11 = sshll.u32 (!%p140_p2), %s637_s13, 1 }
   0x6   : > { %143 = sbr.rel (%p140_p2) target bundleno = 200 (0xc8), region = 32  ;;  %p165_p3 = scmp.lt.s32.totalorder (!%p140_p2), %s642_s11, 3 }
   0xb   : > { %v825_v0 = vld [vmem:[%s1042_s1 + $0x38] sm:$0xff]  ;;  %v824_v4 = vld [vmem:[%s1042_s1 + $0x30] sm:$0xff]  ;;  %v823_v8 = vld [vmem:[%s1042_s1 + $0x28] sm:$0xff]  ;;  %s1046_s11 = smov (!%p165_p3, %s642_s11), 3  ;;  %vm501_vm0 = vcmask 523264  }
   0xc   : > { %v841_v1 = vld [vmem:[%s1042_s1 + $0xb8] sm:$0xff]  ;;  %505 = vmatpush.bf16.msra.mxu0 %v825_v0  ;;  %v840_v5 = vld [vmem:[%s1042_s1 + $0xb0] sm:$0xff]  ;;  %v839_v9 = vld [vmem:[%s1042_s1 + $0xa8] sm:$0xff]  ;;  %s859_s6 = smul.u32 20, %s1046_s11  ;;  %s645_s18 = sshll.u32 %s1046_s11, 2 }
   0xd   : > { %v849_v2 = vld [vmem:[%s1042_s1 + $0xf8] sm:$0xff]  ;;  %533 = vmatpush.bf16.msra.mxu2 %v841_v1  ;;  %v848_v6 = vld [vmem:[%s1042_s1 + $0xf0] sm:$0xff]  ;;  %v847_v10 = vld [vmem:[%s1042_s1 + $0xe8] sm:$0xff]  ;;  %s175_s21 = scalar_lea.vmem %s1044_s3, %s645_s18 }
   0xe   : > { %v833_v3 = vld [vmem:[%s1042_s1 + $0x78] sm:$0xff]  ;;  %547 = vmatpush.bf16.msra.mxu3 %v849_v2  ;;  %v832_v7 = vld [vmem:[%s1042_s1 + $0x70] sm:$0xff]  ;;  %v831_v11 = vld [vmem:[%s1042_s1 + $0x68] sm:$0xff]  ;;  %s989_s20 = scalar_lea.vmem %s1041_s0, %s859_s6 }
   0xf   : > { %519 = vmatpush.bf16.msra.mxu1 %v833_v3  ;;  %v822_v12 = vld [vmem:[%s1042_s1 + $0x20] sm:$0xff]  ;;  %v821_v16 = vld [vmem:[%s1042_s1 + $0x18] sm:$0xff]  ;;  %v820_v20 = vld [vmem:[%s1042_s1 + $0x10] sm:$0xff] }
  0x10   : > { %506 = vmatpush.bf16.msra.mxu0 %v824_v4  ;;  %v838_v13 = vld [vmem:[%s1042_s1 + $0xa0] sm:$0xff]  ;;  %v837_v17 = vld [vmem:[%s1042_s1 + $0x98] sm:$0xff]  ;;  %v836_v21 = vld [vmem:[%s1042_s1 + $0x90] sm:$0xff] }
  0x11   : > { %534 = vmatpush.bf16.msra.mxu2 %v840_v5  ;;  %v846_v14 = vld [vmem:[%s1042_s1 + $0xe0] sm:$0xff]  ;;  %v845_v18 = vld [vmem:[%s1042_s1 + $0xd8] sm:$0xff]  ;;  %v844_v22 = vld [vmem:[%s1042_s1 + $0xd0] sm:$0xff] }
  0x12   : > { %548 = vmatpush.bf16.msra.mxu3 %v848_v6  ;;  %v830_v15 = vld [vmem:[%s1042_s1 + $0x60] sm:$0xff]  ;;  %v829_v19 = vld [vmem:[%s1042_s1 + $0x58] sm:$0xff]  ;;  %v828_v23 = vld [vmem:[%s1042_s1 + $0x50] sm:$0xff] }
  0x13   : > { %520 = vmatpush.bf16.msra.mxu1 %v832_v7  ;;  %v819_v24 = vld [vmem:[%s1042_s1 + $0x8] sm:$0xff]  ;;  %v818_v28 = vld [vmem:[%s1042_s1] sm:$0xff]  ;;  %v815_v33 = vld [vmem:[%s989_s20 + $0x10] sm:$0xf0] }
  0x14   : > { %507 = vmatpush.bf16.msra.mxu0 %v823_v8  ;;  %v835_v25 = vld [vmem:[%s1042_s1 + $0x88] sm:$0xff]  ;;  %v834_v29 = vld [vmem:[%s1042_s1 + $0x80] sm:$0xff]  ;;  %v816_v35 = vld [vmem:[%s989_s20 + $0x18] sm:$0xf0] }
  0x15   : > { %535 = vmatpush.bf16.msra.mxu2 %v839_v9  ;;  %v843_v26 = vld [vmem:[%s1042_s1 + $0xc8] sm:$0xff]  ;;  %v842_v30 = vld [vmem:[%s1042_s1 + $0xc0] sm:$0xff]  ;;  %v650_v39 = vld [vmem:[%s989_s20 + $0x14] sm:$0xf0] }
  0x16   : > { %549 = vmatpush.bf16.msra.mxu3 %v847_v10  ;;  %v827_v27 = vld [vmem:[%s1042_s1 + $0x48] sm:$0xff]  ;;  %v826_v31 = vld [vmem:[%s1042_s1 + $0x40] sm:$0xff]  ;;  %v853_v40 = vld [vmem:[%s1042_s1 + $0x118] sm:$0xff] }
  0x17   : > { %521 = vmatpush.bf16.msra.mxu1 %v831_v11  ;;  %v648_v32 = vld [vmem:[%s989_s20] sm:$0xf]  ;;  %v656_v34 = vld [vmem:[%s989_s20 + $0x8] sm:$0xf]  ;;  %v814_v36 = vld [vmem:[%s989_s20 + $0xc] sm:$0xf] }
  0x18   : > { %508 = vmatpush.bf16.msra.mxu0 %v822_v12  ;;  %v658_v37 = vld [vmem:[%s989_s20 + $0x1c] sm:$0xf0]  ;;  %v813_v38 = vld [vmem:[%s989_s20 + $0x4] sm:$0xf]  ;;  %v649_v41 = vor.u32 %v815_v33, %v648_v32  ;;  %v657_v42 = vor.u32 %v816_v35, %v656_v34  ;;  %v852_v45 = vld [vmem:[%s1042_s1 + $0x110] sm:$0xff] }
  0x19   : > { %536 = vmatpush.bf16.msra.mxu2 %v838_v13  ;;  %v661_v43 = vor.u32 %v814_v36, %v658_v37  ;;  %v653_v44 = vor.u32 %v813_v38, %v650_v39  ;;  %v851_v46 = vld [vmem:[%s1042_s1 + $0x108] sm:$0xff]  ;;  %v850_v47 = vld [vmem:[%s1042_s1 + $0x100] sm:$0xff]  ;;  %v664_v48 = vld [vmem:[%s989_s20 + $0x10] sm:$0xf] }
  0x1a   : > { %550 = vmatpush.bf16.msra.mxu3 %v846_v14  ;;  %v817_v49 = vld [vmem:[%s989_s20 + $0x20] sm:$0xf0]  ;;  %v868_v54 = vld [vmem:[%s1043_s2] ss:$0 sm:$0xff] }
  0x1b   : > { %522 = vmatpush.bf16.msra.mxu1 %v830_v15  ;;  %v665_v50 = vor.u32 %v817_v49, %v664_v48 }
  0x1c   : > { %509 = vmatpush.bf16.msra.mxu0 %v821_v16 }
  0x1d   : > { %537 = vmatpush.bf16.msra.mxu2 %v837_v17 }
  0x1e   : > { %551 = vmatpush.bf16.msra.mxu3 %v845_v18 }
  0x1f   : > { %523 = vmatpush.bf16.msra.mxu1 %v829_v19 }
  0x20   : > { %510 = vmatpush.bf16.msra.mxu0 %v820_v20 }
  0x21   : > { %538 = vmatpush.bf16.msra.mxu2 %v836_v21 }
  0x22   : > { %552 = vmatpush.bf16.msra.mxu3 %v844_v22 }
  0x23   : > { %524 = vmatpush.bf16.msra.mxu1 %v828_v23 }
  0x24   : > { %511 = vmatpush.bf16.msra.mxu0 %v819_v24 }
  0x25   : > { %539 = vmatpush.bf16.msra.mxu2 %v835_v25 }
  0x26   : > { %553 = vmatpush.bf16.msra.mxu3 %v843_v26 }
  0x27   : > { %525 = vmatpush.bf16.msra.mxu1 %v827_v27 }
  0x28   : > { %512 = vmatpush.bf16.msra.mxu0 %v818_v28 }
  0x29   : > { %540 = vmatpush.bf16.msra.mxu2 %v834_v29 }
  0x2a   : > { %554 = vmatpush.bf16.msra.mxu3 %v842_v30 }
  0x2b   : > { %526 = vmatpush.bf16.msra.mxu1 %v826_v31  ;;  %513 = vmatmul.bf16.vlgmr.msra.gmra.mxu0 %v649_v41 }
  0x2c   : > { %565 = vmatpush.bf16.msrb.mxu0 %v853_v40  ;;  %541 = vmatmul.bf16.vlgmr.msra.gmra.mxu2 %v657_v42 }
  0x2d   : > { %555 = vmatmul.bf16.vlgmr.msra.gmra.mxu3 %v661_v43 }
  0x2e   : > { %527 = vmatmul.bf16.vlgmr.msra.gmra.mxu1 %v653_v44 }
  0x30   : > { %566 = vmatpush.bf16.msrb.mxu0 %v852_v45 }
  0x34   : > { %567 = vmatpush.bf16.msrb.mxu0 %v851_v46 }
  0x38   : > { %568 = vmatpush.bf16.msrb.mxu0 %v850_v47 }
  0x3b   : > { %810 = vmatmul.msk.bf16.vlgmr.msrb.gmra.mxu0 %vm501_vm0, %v665_v50 }
  0xa8   : > { %v514_v51 = vpop.f32.mrf.mxu0 }
  0xa9   : > { %v515_v56 = vadd.f32 %v868_v54, %v514_v51 }
  0xab   : > { %v528_v52 = vpop.f32.mrf.mxu1 }
  0xac   : > { %v529_v60 = vadd.f32 %v528_v52, %v515_v56 }
  0xaf   : > { %v542_v53 = vpop.f32.mrf.mxu2 }
  0xb0   : > { %v516_v55 = vpop.f32.mrf.mxu0  ;;  %v556_v57 = vpop.f32.mrf.mxu3  ;;  %v543_v63 = vadd.f32 %v542_v53, %v529_v60 }
  0xb1   : > { %v517_v58 = vadd.f32 %v868_v54, %v516_v55 }
  0xb2   : > { %v557_v2 = vadd.f32 %v556_v57, %v543_v63 }
  0xb3   : > { %v530_v59 = vpop.f32.mrf.mxu1 }
  0xb4   : > { %v531_v0 = vadd.f32 %v530_v59, %v517_v58 }
  0xb7   : > { %v544_v61 = vpop.f32.mrf.mxu2 }
  0xb8   : > { %v570_v62 = vpop.f32.mrf.mxu0  ;;  %v545_v1 = vadd.f32 %v544_v61, %v531_v0  ;;  %v558_v3 = vpop.f32.mrf.mxu3 }
  0xb9   : > { %v571_v5 = vadd.f32 %v570_v62, %v557_v2 }
  0xba   : > { %v559_v4 = vadd.f32 %v558_v3, %v545_v1 }
  0xbb   : > { %v575_v8 = vmax.f32 %v571_v5, 0.0 }
  0xc0   : > { %v572_v6 = vpop.f32.mrf.mxu0 }
  0xc1   : > { %v573_v7 = vadd.f32 %v572_v6, %v559_v4 }
  0xc3   : > { %v576_v9 = vmax.f32 %v573_v7, 0.0 }
  0xc5   : > { %v857_v10 = vpack.c.bf16 %v576_v9, %v575_v8 }
  0xc7   : > { %858 = vst [vmem:[%s175_s21] sm:$0xff] %v857_v10  }
  0xc8 PF: > { %s13_s12 = sadd.s32 1, %s875_s12  }
  0xc9   : > { %p10_p4 = scmp.ge.s32.totalorder %s13_s12, 4  }
  0xcb   :  { %12 = sbr.rel (!%p10_p4) target bundleno = 1 (0x1), region = 62 }

// kernel: encoder_all_forward.25
= control target key start
LH: loop header
LB: loop body
LE: loop exit
PB: predicated region body
PF: predicated region fallthrough
CT: control target
= control target key end

     0   :  { %s897_s12 = smov 0   ;;  %s1041_s0 = inlined_call_operand.vmem [shape: bf16[64,576], index: 0, kind: input, shape index: {}]   ;;  %s1042_s1 = inlined_call_operand.vmem [shape: bf16[576,128], index: 1, kind: input, shape index: {}]   ;;  %s1043_s2 = inlined_call_operand.vmem [shape: f32[1,128], index: 2, kind: input, shape index: {}]   ;;  %s1044_s3 = inlined_call_operand.vmem [shape: bf16[64,128], index: 3, kind: output, shape index: {}]  }
   0x1 LB: > { %s637_s13 = sadd.s32 4294967295, %s875_s12   ;;  %p641_p0 = scmp.ge.s32.totalorder %s875_s12, 1  ;;  %s875_s12 = sphi %s897_s12, %s13_s12  }
   0x2   : > { %p139_p1 = scmp.lt.s32.totalorder %s875_s12, 5 }
   0x4   : > { %p140_p2 = pnand %p641_p0, %p139_p1 }
   0x5   : > { %s642_s11 = sshll.u32 (!%p140_p2), %s637_s13, 1 }
   0x6   : > { %143 = sbr.rel (%p140_p2) target bundleno = 200 (0xc8), region = 32  ;;  %p165_p3 = scmp.lt.s32.totalorder (!%p140_p2), %s642_s11, 7 }
   0xb   : > { %v825_v0 = vld [vmem:[%s1042_s1 + $0x38] sm:$0xff]  ;;  %v824_v4 = vld [vmem:[%s1042_s1 + $0x30] sm:$0xff]  ;;  %v823_v8 = vld [vmem:[%s1042_s1 + $0x28] sm:$0xff]  ;;  %s1046_s11 = smov (!%p165_p3, %s642_s11), 7  ;;  %vm501_vm0 = vcmask 523264  }
   0xc   : > { %v841_v1 = vld [vmem:[%s1042_s1 + $0xb8] sm:$0xff]  ;;  %505 = vmatpush.bf16.msra.mxu0 %v825_v0  ;;  %v840_v5 = vld [vmem:[%s1042_s1 + $0xb0] sm:$0xff]  ;;  %v839_v9 = vld [vmem:[%s1042_s1 + $0xa8] sm:$0xff]  ;;  %s859_s6 = smul.u32 20, %s1046_s11  ;;  %s645_s18 = sshll.u32 %s1046_s11, 2 }
   0xd   : > { %v849_v2 = vld [vmem:[%s1042_s1 + $0xf8] sm:$0xff]  ;;  %533 = vmatpush.bf16.msra.mxu2 %v841_v1  ;;  %v848_v6 = vld [vmem:[%s1042_s1 + $0xf0] sm:$0xff]  ;;  %v847_v10 = vld [vmem:[%s1042_s1 + $0xe8] sm:$0xff]  ;;  %s175_s21 = scalar_lea.vmem %s1044_s3, %s645_s18 }
   0xe   : > { %v833_v3 = vld [vmem:[%s1042_s1 + $0x78] sm:$0xff]  ;;  %547 = vmatpush.bf16.msra.mxu3 %v849_v2  ;;  %v832_v7 = vld [vmem:[%s1042_s1 + $0x70] sm:$0xff]  ;;  %v831_v11 = vld [vmem:[%s1042_s1 + $0x68] sm:$0xff]  ;;  %s989_s20 = scalar_lea.vmem %s1041_s0, %s859_s6 }
   0xf   : > { %519 = vmatpush.bf16.msra.mxu1 %v833_v3  ;;  %v822_v12 = vld [vmem:[%s1042_s1 + $0x20] sm:$0xff]  ;;  %v821_v16 = vld [vmem:[%s1042_s1 + $0x18] sm:$0xff]  ;;  %v820_v20 = vld [vmem:[%s1042_s1 + $0x10] sm:$0xff] }
  0x10   : > { %506 = vmatpush.bf16.msra.mxu0 %v824_v4  ;;  %v838_v13 = vld [vmem:[%s1042_s1 + $0xa0] sm:$0xff]  ;;  %v837_v17 = vld [vmem:[%s1042_s1 + $0x98] sm:$0xff]  ;;  %v836_v21 = vld [vmem:[%s1042_s1 + $0x90] sm:$0xff] }
  0x11   : > { %534 = vmatpush.bf16.msra.mxu2 %v840_v5  ;;  %v846_v14 = vld [vmem:[%s1042_s1 + $0xe0] sm:$0xff]  ;;  %v845_v18 = vld [vmem:[%s1042_s1 + $0xd8] sm:$0xff]  ;;  %v844_v22 = vld [vmem:[%s1042_s1 + $0xd0] sm:$0xff] }
  0x12   : > { %548 = vmatpush.bf16.msra.mxu3 %v848_v6  ;;  %v830_v15 = vld [vmem:[%s1042_s1 + $0x60] sm:$0xff]  ;;  %v829_v19 = vld [vmem:[%s1042_s1 + $0x58] sm:$0xff]  ;;  %v828_v23 = vld [vmem:[%s1042_s1 + $0x50] sm:$0xff] }
  0x13   : > { %520 = vmatpush.bf16.msra.mxu1 %v832_v7  ;;  %v819_v24 = vld [vmem:[%s1042_s1 + $0x8] sm:$0xff]  ;;  %v818_v28 = vld [vmem:[%s1042_s1] sm:$0xff]  ;;  %v815_v33 = vld [vmem:[%s989_s20 + $0x10] sm:$0xf0] }
  0x14   : > { %507 = vmatpush.bf16.msra.mxu0 %v823_v8  ;;  %v835_v25 = vld [vmem:[%s1042_s1 + $0x88] sm:$0xff]  ;;  %v834_v29 = vld [vmem:[%s1042_s1 + $0x80] sm:$0xff]  ;;  %v816_v35 = vld [vmem:[%s989_s20 + $0x18] sm:$0xf0] }
  0x15   : > { %535 = vmatpush.bf16.msra.mxu2 %v839_v9  ;;  %v843_v26 = vld [vmem:[%s1042_s1 + $0xc8] sm:$0xff]  ;;  %v842_v30 = vld [vmem:[%s1042_s1 + $0xc0] sm:$0xff]  ;;  %v650_v39 = vld [vmem:[%s989_s20 + $0x14] sm:$0xf0] }
  0x16   : > { %549 = vmatpush.bf16.msra.mxu3 %v847_v10  ;;  %v827_v27 = vld [vmem:[%s1042_s1 + $0x48] sm:$0xff]  ;;  %v826_v31 = vld [vmem:[%s1042_s1 + $0x40] sm:$0xff]  ;;  %v853_v40 = vld [vmem:[%s1042_s1 + $0x118] sm:$0xff] }
  0x17   : > { %521 = vmatpush.bf16.msra.mxu1 %v831_v11  ;;  %v648_v32 = vld [vmem:[%s989_s20] sm:$0xf]  ;;  %v656_v34 = vld [vmem:[%s989_s20 + $0x8] sm:$0xf]  ;;  %v814_v36 = vld [vmem:[%s989_s20 + $0xc] sm:$0xf] }
  0x18   : > { %508 = vmatpush.bf16.msra.mxu0 %v822_v12  ;;  %v658_v37 = vld [vmem:[%s989_s20 + $0x1c] sm:$0xf0]  ;;  %v813_v38 = vld [vmem:[%s989_s20 + $0x4] sm:$0xf]  ;;  %v649_v41 = vor.u32 %v815_v33, %v648_v32  ;;  %v657_v42 = vor.u32 %v816_v35, %v656_v34  ;;  %v852_v45 = vld [vmem:[%s1042_s1 + $0x110] sm:$0xff] }
  0x19   : > { %536 = vmatpush.bf16.msra.mxu2 %v838_v13  ;;  %v661_v43 = vor.u32 %v814_v36, %v658_v37  ;;  %v653_v44 = vor.u32 %v813_v38, %v650_v39  ;;  %v851_v46 = vld [vmem:[%s1042_s1 + $0x108] sm:$0xff]  ;;  %v850_v47 = vld [vmem:[%s1042_s1 + $0x100] sm:$0xff]  ;;  %v664_v48 = vld [vmem:[%s989_s20 + $0x10] sm:$0xf] }
  0x1a   : > { %550 = vmatpush.bf16.msra.mxu3 %v846_v14  ;;  %v817_v49 = vld [vmem:[%s989_s20 + $0x20] sm:$0xf0]  ;;  %v868_v54 = vld [vmem:[%s1043_s2] ss:$0 sm:$0xff] }
  0x1b   : > { %522 = vmatpush.bf16.msra.mxu1 %v830_v15  ;;  %v665_v50 = vor.u32 %v817_v49, %v664_v48 }
  0x1c   : > { %509 = vmatpush.bf16.msra.mxu0 %v821_v16 }
  0x1d   : > { %537 = vmatpush.bf16.msra.mxu2 %v837_v17 }
  0x1e   : > { %551 = vmatpush.bf16.msra.mxu3 %v845_v18 }
  0x1f   : > { %523 = vmatpush.bf16.msra.mxu1 %v829_v19 }
  0x20   : > { %510 = vmatpush.bf16.msra.mxu0 %v820_v20 }
  0x21   : > { %538 = vmatpush.bf16.msra.mxu2 %v836_v21 }
  0x22   : > { %552 = vmatpush.bf16.msra.mxu3 %v844_v22 }
  0x23   : > { %524 = vmatpush.bf16.msra.mxu1 %v828_v23 }
  0x24   : > { %511 = vmatpush.bf16.msra.mxu0 %v819_v24 }
  0x25   : > { %539 = vmatpush.bf16.msra.mxu2 %v835_v25 }
  0x26   : > { %553 = vmatpush.bf16.msra.mxu3 %v843_v26 }
  0x27   : > { %525 = vmatpush.bf16.msra.mxu1 %v827_v27 }
  0x28   : > { %512 = vmatpush.bf16.msra.mxu0 %v818_v28 }
  0x29   : > { %540 = vmatpush.bf16.msra.mxu2 %v834_v29 }
  0x2a   : > { %554 = vmatpush.bf16.msra.mxu3 %v842_v30 }
  0x2b   : > { %526 = vmatpush.bf16.msra.mxu1 %v826_v31  ;;  %513 = vmatmul.bf16.vlgmr.msra.gmra.mxu0 %v649_v41 }
  0x2c   : > { %565 = vmatpush.bf16.msrb.mxu0 %v853_v40  ;;  %541 = vmatmul.bf16.vlgmr.msra.gmra.mxu2 %v657_v42 }
  0x2d   : > { %555 = vmatmul.bf16.vlgmr.msra.gmra.mxu3 %v661_v43 }
  0x2e   : > { %527 = vmatmul.bf16.vlgmr.msra.gmra.mxu1 %v653_v44 }
  0x30   : > { %566 = vmatpush.bf16.msrb.mxu0 %v852_v45 }
  0x34   : > { %567 = vmatpush.bf16.msrb.mxu0 %v851_v46 }
  0x38   : > { %568 = vmatpush.bf16.msrb.mxu0 %v850_v47 }
  0x3b   : > { %810 = vmatmul.msk.bf16.vlgmr.msrb.gmra.mxu0 %vm501_vm0, %v665_v50 }
  0xa8   : > { %v514_v51 = vpop.f32.mrf.mxu0 }
  0xa9   : > { %v515_v56 = vadd.f32 %v868_v54, %v514_v51 }
  0xab   : > { %v528_v52 = vpop.f32.mrf.mxu1 }
  0xac   : > { %v529_v60 = vadd.f32 %v528_v52, %v515_v56 }
  0xaf   : > { %v542_v53 = vpop.f32.mrf.mxu2 }
  0xb0   : > { %v516_v55 = vpop.f32.mrf.mxu0  ;;  %v556_v57 = vpop.f32.mrf.mxu3  ;;  %v543_v63 = vadd.f32 %v542_v53, %v529_v60 }
  0xb1   : > { %v517_v58 = vadd.f32 %v868_v54, %v516_v55 }
  0xb2   : > { %v557_v2 = vadd.f32 %v556_v57, %v543_v63 }
  0xb3   : > { %v530_v59 = vpop.f32.mrf.mxu1 }
  0xb4   : > { %v531_v0 = vadd.f32 %v530_v59, %v517_v58 }
  0xb7   : > { %v544_v61 = vpop.f32.mrf.mxu2 }
  0xb8   : > { %v570_v62 = vpop.f32.mrf.mxu0  ;;  %v545_v1 = vadd.f32 %v544_v61, %v531_v0  ;;  %v558_v3 = vpop.f32.mrf.mxu3 }
  0xb9   : > { %v571_v5 = vadd.f32 %v570_v62, %v557_v2 }
  0xba   : > { %v559_v4 = vadd.f32 %v558_v3, %v545_v1 }
  0xbb   : > { %v575_v8 = vmax.f32 %v571_v5, 0.0 }
  0xc0   : > { %v572_v6 = vpop.f32.mrf.mxu0 }
  0xc1   : > { %v573_v7 = vadd.f32 %v572_v6, %v559_v4 }
  0xc3   : > { %v576_v9 = vmax.f32 %v573_v7, 0.0 }
  0xc5   : > { %v857_v10 = vpack.c.bf16 %v576_v9, %v575_v8 }
  0xc7   : > { %858 = vst [vmem:[%s175_s21] sm:$0xff] %v857_v10  }
  0xc8 PF: > { %s13_s12 = sadd.s32 1, %s875_s12  }
  0xc9   : > { %p10_p4 = scmp.ge.s32.totalorder %s13_s12, 6  }
  0xcb   :  { %12 = sbr.rel (!%p10_p4) target bundleno = 1 (0x1), region = 62 }

// kernel: encoder_all_forward.29
= control target key start
LH: loop header
LB: loop body
LE: loop exit
PB: predicated region body
PF: predicated region fallthrough
CT: control target
= control target key end

     0   :  { %s712_s18 = smov 0   ;;  %s796_s0 = inlined_call_operand.vmem [shape: bf16[128,128], index: 0, kind: input, shape index: {}]   ;;  %s797_s1 = inlined_call_operand.vmem [shape: bf16[128,128], index: 1, kind: input, shape index: {}]   ;;  %s798_s2 = inlined_call_operand.vmem [shape: f32[1,128], index: 2, kind: input, shape index: {}]   ;;  %s799_s3 = inlined_call_operand.vmem [shape: bf16[128,128], index: 3, kind: input, shape index: {}]   ;;  %s800_s4 = inlined_call_operand.vmem [shape: f32[1,128], index: 4, kind: input, shape index: {}]   ;;  %s801_s5 = inlined_call_operand.vmem [shape: bf16[128,128], index: 5, kind: output, shape index: {}]  }
   0x1 LB: > { %s528_s19 = sadd.s32 4294967295, %s680_s18   ;;  %p532_p0 = scmp.ge.s32.totalorder %s680_s18, 1  ;;  %s680_s18 = sphi %s712_s18, %s15_s18  }
   0x2   : > { %p188_p1 = scmp.lt.s32.totalorder %s680_s18, 5 }
   0x4   : > { %p189_p2 = pnand %p532_p0, %p188_p1 }
   0x5   : > { %s533_s28 = sshll.u32 (!%p189_p2), %s528_s19, 2 }
   0x6   : > { %192 = sbr.rel (%p189_p2) target bundleno = 357 (0x165), region = 40  ;;  %p217_p3 = scmp.lt.s32.totalorder (!%p189_p2), %s533_s28, 15 }
   0xb   : > { %v620_v0 = vld [vmem:[%s797_s1 + $0x38] sm:$0xff]  ;;  %v619_v1 = vld [vmem:[%s797_s1 + $0x30] sm:$0xff]  ;;  %v618_v2 = vld [vmem:[%s797_s1 + $0x28] sm:$0xff]  ;;  %s803_s28 = smov (!%p217_p3, %s533_s28), 15 }
   0xc   : > { %312 = vmatpush.bf16.msra.mxu0 %v620_v0  ;;  %640 = vmatpush.bf16.msra.mxu2 %v620_v0  ;;  %v617_v3 = vld [vmem:[%s797_s1 + $0x20] sm:$0xff]  ;;  %v616_v4 = vld [vmem:[%s797_s1 + $0x18] sm:$0xff]  ;;  %v615_v5 = vld [vmem:[%s797_s1 + $0x10] sm:$0xff]  ;;  %s534_s10 = sshll.u32 %s803_s28, 2 }
   0xd   : > { %v614_v6 = vld [vmem:[%s797_s1 + $0x8] sm:$0xff]  ;;  %v613_v7 = vld [vmem:[%s797_s1] sm:$0xff]  ;;  %s752_s15 = scalar_lea.vmem %s796_s0, %s534_s10  ;;  %v628_v10 = vld [vmem:[%s799_s3 + $0x38] sm:$0xff]  ;;  %s226_s17 = scalar_lea.vmem %s801_s5, %s534_s10 }
   0xe   : > { %v611_v8 = vld [vmem:[%s752_s15] sm:$0xff]  ;;  %v612_v9 = vld [vmem:[%s752_s15 + $0x8] sm:$0xff]  ;;  %437 = vmatpush.bf16.msra.mxu1 %v628_v10  ;;  %648 = vmatpush.bf16.msra.mxu3 %v628_v10  ;;  %v627_v11 = vld [vmem:[%s799_s3 + $0x30] sm:$0xff] }
   0xf   : > { %v626_v12 = vld [vmem:[%s799_s3 + $0x28] sm:$0xff]  ;;  %v625_v13 = vld [vmem:[%s799_s3 + $0x20] sm:$0xff]  ;;  %v624_v14 = vld [vmem:[%s799_s3 + $0x18] sm:$0xff] }
  0x10   : > { %313 = vmatpush.bf16.msra.mxu0 %v619_v1  ;;  %641 = vmatpush.bf16.msra.mxu2 %v619_v1  ;;  %v623_v15 = vld [vmem:[%s799_s3 + $0x10] sm:$0xff]  ;;  %v622_v16 = vld [vmem:[%s799_s3 + $0x8] sm:$0xff]  ;;  %v664_v17 = vld [vmem:[%s798_s2] ss:$0 sm:$0xff] }
  0x11   : > { %v621_v18 = vld [vmem:[%s799_s3] sm:$0xff] }
  0x12   : > { %438 = vmatpush.bf16.msra.mxu1 %v627_v11  ;;  %649 = vmatpush.bf16.msra.mxu3 %v627_v11 }
  0x14   : > { %314 = vmatpush.bf16.msra.mxu0 %v618_v2  ;;  %642 = vmatpush.bf16.msra.mxu2 %v618_v2  ;;  %v665_v2 = vld [vmem:[%s800_s4] ss:$0 sm:$0xff] }
  0x16   : > { %439 = vmatpush.bf16.msra.mxu1 %v626_v12  ;;  %650 = vmatpush.bf16.msra.mxu3 %v626_v12 }
  0x18   : > { %315 = vmatpush.bf16.msra.mxu0 %v617_v3  ;;  %643 = vmatpush.bf16.msra.mxu2 %v617_v3  ;;  %v228_v3 = vld [vmem:[%s752_s15] sm:$0xff]  }
  0x1a   : > { %440 = vmatpush.bf16.msra.mxu1 %v625_v13  ;;  %651 = vmatpush.bf16.msra.mxu3 %v625_v13  ;;  %v230_v13 = vld [vmem:[%s752_s15 + $0x8] sm:$0xff]  }
  0x1c   : > { %316 = vmatpush.bf16.msra.mxu0 %v616_v4  ;;  %644 = vmatpush.bf16.msra.mxu2 %v616_v4 }
  0x1e   : > { %441 = vmatpush.bf16.msra.mxu1 %v624_v14  ;;  %652 = vmatpush.bf16.msra.mxu3 %v624_v14 }
  0x20   : > { %317 = vmatpush.bf16.msra.mxu0 %v615_v5  ;;  %645 = vmatpush.bf16.msra.mxu2 %v615_v5  ;;  %v456_v5 = vunpack.c.l.bf16 %v228_v3 }
  0x22   : > { %442 = vmatpush.bf16.msra.mxu1 %v623_v15  ;;  %653 = vmatpush.bf16.msra.mxu3 %v623_v15  ;;  %v458_v15 = vunpack.c.l.bf16 %v230_v13 }
  0x24   : > { %318 = vmatpush.bf16.msra.mxu0 %v614_v6  ;;  %646 = vmatpush.bf16.msra.mxu2 %v614_v6  ;;  %v457_v6 = vunpack.c.h.bf16 %v228_v3 }
  0x26   : > { %443 = vmatpush.bf16.msra.mxu1 %v622_v16  ;;  %654 = vmatpush.bf16.msra.mxu3 %v622_v16  ;;  %v459_v16 = vunpack.c.h.bf16 %v230_v13 }
  0x28   : > { %319 = vmatpush.bf16.msra.mxu0 %v613_v7  ;;  %647 = vmatpush.bf16.msra.mxu2 %v613_v7 }
  0x2a   : > { %444 = vmatpush.bf16.msra.mxu1 %v621_v18  ;;  %655 = vmatpush.bf16.msra.mxu3 %v621_v18 }
  0x2b   : > { %320 = vmatmul.bf16.vlgmr.msra.gmra.mxu0 %v611_v8  ;;  %325 = vmatmul.bf16.vlgmr.msra.gmra.mxu2 %v612_v9 }
  0xa8   : > { %v321_v19 = vpop.f32.mrf.mxu0 }
  0xa9   : > { %v322_v20 = vadd.f32 %v664_v17, %v321_v19 }
  0xab   : > { %v331_v21 = vmul.f32 %v322_v20, %v322_v20 }
  0xad   : > { %v335_v22 = vmul.f32 %v331_v21, %v322_v20 }
  0xae   : > { %v326_v23 = vpop.f32.mrf.mxu2 }
  0xaf   : > { %v339_v24 = vmul.f32 0.044715, %v335_v22  ;;  %v327_v25 = vadd.f32 %v664_v17, %v326_v23 }
  0xb0   : > { %v323_v26 = vpop.f32.mrf.mxu0 }
  0xb1   : > { %v343_v27 = vadd.f32 %v339_v24, %v322_v20  ;;  %v333_v28 = vmul.f32 %v327_v25, %v327_v25  ;;  %v324_v29 = vadd.f32 %v664_v17, %v323_v26 }
  0xb3   : > { %v337_v30 = vmul.f32 %v333_v28, %v327_v25  ;;  %v332_v31 = vmul.f32 %v324_v29, %v324_v29  ;;  %v347_v32 = vmul.f32 0.7978846, %v343_v27 }
  0xb5   : > { %v341_v33 = vmul.f32 0.044715, %v337_v30  ;;  %v336_v34 = vmul.f32 %v332_v31, %v324_v29  ;;  %666 = vtanh.f32 %v347_v32 }
  0xb6   : > { %v328_v35 = vpop.f32.mrf.mxu2 }
  0xb7   : > { %v345_v36 = vadd.f32 %v341_v33, %v327_v25  ;;  %v340_v37 = vmul.f32 0.044715, %v336_v34  ;;  %v329_v38 = vadd.f32 %v664_v17, %v328_v35 }
  0xb9   : > { %v344_v39 = vadd.f32 %v340_v37, %v324_v29  ;;  %v334_v40 = vmul.f32 %v329_v38, %v329_v38  ;;  %v349_v41 = vmul.f32 0.7978846, %v345_v36 }
  0xbb   : > { %v338_v42 = vmul.f32 %v334_v40, %v329_v38  ;;  %v348_v43 = vmul.f32 0.7978846, %v344_v39  ;;  %668 = vtanh.f32 %v349_v41  ;;  %v667_v44 = vpop.eup %666 }
  0xbc   : > { %v355_v47 = vadd.f32 1.0, %v667_v44 }
  0xbd   : > { %v342_v45 = vmul.f32 0.044715, %v338_v42  ;;  %670 = vtanh.f32 %v348_v43 }
  0xbe   : > { %v359_v52 = vmul.f32 0.5, %v355_v47 }
  0xbf   : > { %v346_v46 = vadd.f32 %v342_v45, %v329_v38 }
  0xc0   : > { %v363_v55 = vmul.f32 %v359_v52, %v322_v20 }
  0xc1   : > { %v350_v48 = vmul.f32 0.7978846, %v346_v46  ;;  %v669_v49 = vpop.eup %668 }
  0xc2   : > { %v357_v54 = vadd.f32 1.0, %v669_v49 }
  0xc3   : > { %v671_v50 = vpop.eup %670  ;;  %672 = vtanh.f32 %v350_v48 }
  0xc4   : > { %v356_v51 = vadd.f32 1.0, %v671_v50  ;;  %v361_v60 = vmul.f32 0.5, %v357_v54 }
  0xc6   : > { %v360_v53 = vmul.f32 0.5, %v356_v51  ;;  %v365_v62 = vmul.f32 %v361_v60, %v327_v25 }
  0xc8   : > { %v364_v56 = vmul.f32 %v360_v53, %v324_v29 }
  0xc9   : > { %v673_v57 = vpop.eup %672 }
  0xca   : > { %v367_v58 = vpack.c.bf16 %v364_v56, %v363_v55  ;;  %v358_v59 = vadd.f32 1.0, %v673_v57 }
  0xcc   : > { %445 = vmatmul.bf16.vlgmr.msra.gmra.mxu1 %v367_v58  ;;  %v362_v61 = vmul.f32 0.5, %v358_v59 }
  0xce   : > { %v366_v63 = vmul.f32 %v362_v61, %v329_v38 }
  0xd0   : > { %v368_v0 = vpack.c.bf16 %v366_v63, %v365_v62 }
  0xd2   : > { %450 = vmatmul.bf16.vlgmr.msra.gmra.mxu3 %v368_v0 }
 0x149   : > { %v446_v1 = vpop.f32.mrf.mxu1 }
 0x14a   : > { %v447_v4 = vadd.f32 %v665_v2, %v446_v1 }
 0x14c   : > { %v460_v9 = vadd.f32 %v456_v5, %v447_v4 }
 0x151   : > { %v448_v7 = vpop.f32.mrf.mxu1 }
 0x152   : > { %v449_v8 = vadd.f32 %v665_v2, %v448_v7 }
 0x154   : > { %v461_v10 = vadd.f32 %v457_v6, %v449_v8 }
 0x155   : > { %v451_v11 = vpop.f32.mrf.mxu3 }
 0x156   : > { %v632_v12 = vpack.c.bf16 %v461_v10, %v460_v9  ;;  %v452_v14 = vadd.f32 %v665_v2, %v451_v11 }
 0x158   : > { %633 = vst [vmem:[%s226_s17] sm:$0xff] %v632_v12   ;;  %v462_v19 = vadd.f32 %v458_v15, %v452_v14 }
 0x15d   : > { %v453_v17 = vpop.f32.mrf.mxu3 }
 0x15e   : > { %v454_v18 = vadd.f32 %v665_v2, %v453_v17 }
 0x160   : > { %v463_v20 = vadd.f32 %v459_v16, %v454_v18 }
 0x162   : > { %v637_v21 = vpack.c.bf16 %v463_v20, %v462_v19 }
 0x164   : > { %639 = vst [vmem:[%s226_s17 + $0x8] sm:$0xff] %v637_v21  }
 0x165 PF: > { %s15_s18 = sadd.s32 1, %s680_s18  }
 0x166   : > { %p12_p4 = scmp.ge.s32.totalorder %s15_s18, 6  }
 0x168   :  { %14 = sbr.rel (!%p12_p4) target bundleno = 1 (0x1), region = 70 }

// kernel: encoder_all_forward.22
= control target key start
LH: loop header
LB: loop body
LE: loop exit
PB: predicated region body
PF: predicated region fallthrough
CT: control target
= control target key end

     0   :  { %vm338_vm0 = vcmask 523264   ;;  %s798_s1 = inlined_call_operand.vmem [shape: bf16[576,128], index: 1, kind: input, shape index: {}]   ;;  %s799_s2 = inlined_call_operand.vmem [shape: f32[1,128], index: 2, kind: input, shape index: {}]   ;;  %s800_s0 = inlined_call_operand.vmem [shape: bf16[16,576], index: 0, kind: input, shape index: {}]   ;;  %s801_s3 = inlined_call_operand.vmem [shape: bf16[16,128], index: 3, kind: output, shape index: {}]  }
   0x1   :  { %v599_v0 = vld [vmem:[%s798_s1 + $0x38] sm:$0xff]  ;;  %v598_v4 = vld [vmem:[%s798_s1 + $0x30] sm:$0xff]  ;;  %v597_v8 = vld [vmem:[%s798_s1 + $0x28] sm:$0xff] }
   0x2   :  { %v615_v1 = vld [vmem:[%s798_s1 + $0xb8] sm:$0xff]  ;;  %342 = vmatpush.bf16.msra.mxu0 %v599_v0  ;;  %v614_v5 = vld [vmem:[%s798_s1 + $0xb0] sm:$0xff]  ;;  %v613_v9 = vld [vmem:[%s798_s1 + $0xa8] sm:$0xff] }
   0x3   :  { %v623_v2 = vld [vmem:[%s798_s1 + $0xf8] sm:$0xff]  ;;  %370 = vmatpush.bf16.msra.mxu2 %v615_v1  ;;  %v622_v6 = vld [vmem:[%s798_s1 + $0xf0] sm:$0xff]  ;;  %v621_v10 = vld [vmem:[%s798_s1 + $0xe8] sm:$0xff] }
   0x4   :  { %v607_v3 = vld [vmem:[%s798_s1 + $0x78] sm:$0xff]  ;;  %384 = vmatpush.bf16.msra.mxu3 %v623_v2  ;;  %v606_v7 = vld [vmem:[%s798_s1 + $0x70] sm:$0xff]  ;;  %v605_v11 = vld [vmem:[%s798_s1 + $0x68] sm:$0xff] }
   0x5   :  { %356 = vmatpush.bf16.msra.mxu1 %v607_v3  ;;  %v596_v12 = vld [vmem:[%s798_s1 + $0x20] sm:$0xff]  ;;  %v595_v16 = vld [vmem:[%s798_s1 + $0x18] sm:$0xff]  ;;  %v594_v20 = vld [vmem:[%s798_s1 + $0x10] sm:$0xff] }
   0x6   :  { %343 = vmatpush.bf16.msra.mxu0 %v598_v4  ;;  %v612_v13 = vld [vmem:[%s798_s1 + $0xa0] sm:$0xff]  ;;  %v611_v17 = vld [vmem:[%s798_s1 + $0x98] sm:$0xff]  ;;  %v610_v21 = vld [vmem:[%s798_s1 + $0x90] sm:$0xff] }
   0x7   :  { %371 = vmatpush.bf16.msra.mxu2 %v614_v5  ;;  %v620_v14 = vld [vmem:[%s798_s1 + $0xe0] sm:$0xff]  ;;  %v619_v18 = vld [vmem:[%s798_s1 + $0xd8] sm:$0xff]  ;;  %v618_v22 = vld [vmem:[%s798_s1 + $0xd0] sm:$0xff] }
   0x8   :  { %385 = vmatpush.bf16.msra.mxu3 %v622_v6  ;;  %v604_v15 = vld [vmem:[%s798_s1 + $0x60] sm:$0xff]  ;;  %v603_v19 = vld [vmem:[%s798_s1 + $0x58] sm:$0xff]  ;;  %v602_v23 = vld [vmem:[%s798_s1 + $0x50] sm:$0xff] }
   0x9   :  { %357 = vmatpush.bf16.msra.mxu1 %v606_v7  ;;  %v593_v24 = vld [vmem:[%s798_s1 + $0x8] sm:$0xff]  ;;  %v592_v28 = vld [vmem:[%s798_s1] sm:$0xff]  ;;  %v589_v33 = vld [vmem:[%s800_s0 + $0x10] sm:$0xf0] }
   0xa   :  { %344 = vmatpush.bf16.msra.mxu0 %v597_v8  ;;  %v609_v25 = vld [vmem:[%s798_s1 + $0x88] sm:$0xff]  ;;  %v608_v29 = vld [vmem:[%s798_s1 + $0x80] sm:$0xff]  ;;  %v590_v35 = vld [vmem:[%s800_s0 + $0x18] sm:$0xf0] }
   0xb   :  { %372 = vmatpush.bf16.msra.mxu2 %v613_v9  ;;  %v617_v26 = vld [vmem:[%s798_s1 + $0xc8] sm:$0xff]  ;;  %v616_v30 = vld [vmem:[%s798_s1 + $0xc0] sm:$0xff]  ;;  %v426_v39 = vld [vmem:[%s800_s0 + $0x14] sm:$0xf0] }
   0xc   :  { %386 = vmatpush.bf16.msra.mxu3 %v621_v10  ;;  %v601_v27 = vld [vmem:[%s798_s1 + $0x48] sm:$0xff]  ;;  %v600_v31 = vld [vmem:[%s798_s1 + $0x40] sm:$0xff]  ;;  %v627_v40 = vld [vmem:[%s798_s1 + $0x118] sm:$0xff] }
   0xd   :  { %358 = vmatpush.bf16.msra.mxu1 %v605_v11  ;;  %v424_v32 = vld [vmem:[%s800_s0] sm:$0xf]  ;;  %v432_v34 = vld [vmem:[%s800_s0 + $0x8] sm:$0xf]  ;;  %v588_v36 = vld [vmem:[%s800_s0 + $0xc] sm:$0xf] }
   0xe   :  { %345 = vmatpush.bf16.msra.mxu0 %v596_v12  ;;  %v434_v37 = vld [vmem:[%s800_s0 + $0x1c] sm:$0xf0]  ;;  %v587_v38 = vld [vmem:[%s800_s0 + $0x4] sm:$0xf]  ;;  %v425_v41 = vor.u32 %v589_v33, %v424_v32  ;;  %v433_v42 = vor.u32 %v590_v35, %v432_v34  ;;  %v626_v45 = vld [vmem:[%s798_s1 + $0x110] sm:$0xff] }
   0xf   :  { %373 = vmatpush.bf16.msra.mxu2 %v612_v13  ;;  %v437_v43 = vor.u32 %v588_v36, %v434_v37  ;;  %v429_v44 = vor.u32 %v587_v38, %v426_v39  ;;  %v625_v46 = vld [vmem:[%s798_s1 + $0x108] sm:$0xff]  ;;  %v624_v47 = vld [vmem:[%s798_s1 + $0x100] sm:$0xff]  ;;  %v440_v48 = vld [vmem:[%s800_s0 + $0x10] sm:$0xf] }
  0x10   :  { %387 = vmatpush.bf16.msra.mxu3 %v620_v14  ;;  %v591_v49 = vld [vmem:[%s800_s0 + $0x20] sm:$0xf0]  ;;  %v633_v54 = vld [vmem:[%s799_s2] ss:$0 sm:$0xff] }
  0x11   :  { %359 = vmatpush.bf16.msra.mxu1 %v604_v15  ;;  %v441_v50 = vor.u32 %v591_v49, %v440_v48 }
  0x12   :  { %346 = vmatpush.bf16.msra.mxu0 %v595_v16 }
  0x13   :  { %374 = vmatpush.bf16.msra.mxu2 %v611_v17 }
  0x14   :  { %388 = vmatpush.bf16.msra.mxu3 %v619_v18 }
  0x15   :  { %360 = vmatpush.bf16.msra.mxu1 %v603_v19 }
  0x16   :  { %347 = vmatpush.bf16.msra.mxu0 %v594_v20 }
  0x17   :  { %375 = vmatpush.bf16.msra.mxu2 %v610_v21 }
  0x18   :  { %389 = vmatpush.bf16.msra.mxu3 %v618_v22 }
  0x19   :  { %361 = vmatpush.bf16.msra.mxu1 %v602_v23 }
  0x1a   :  { %348 = vmatpush.bf16.msra.mxu0 %v593_v24 }
  0x1b   :  { %376 = vmatpush.bf16.msra.mxu2 %v609_v25 }
  0x1c   :  { %390 = vmatpush.bf16.msra.mxu3 %v617_v26 }
  0x1d   :  { %362 = vmatpush.bf16.msra.mxu1 %v601_v27 }
  0x1e   :  { %349 = vmatpush.bf16.msra.mxu0 %v592_v28 }
  0x1f   :  { %377 = vmatpush.bf16.msra.mxu2 %v608_v29 }
  0x20   :  { %391 = vmatpush.bf16.msra.mxu3 %v616_v30 }
  0x21   :  { %363 = vmatpush.bf16.msra.mxu1 %v600_v31  ;;  %350 = vmatmul.bf16.vlgmr.msra.gmra.mxu0 %v425_v41 }
  0x22   :  { %402 = vmatpush.bf16.msrb.mxu0 %v627_v40  ;;  %378 = vmatmul.bf16.vlgmr.msra.gmra.mxu2 %v433_v42 }
  0x23   :  { %392 = vmatmul.bf16.vlgmr.msra.gmra.mxu3 %v437_v43 }
  0x24   :  { %364 = vmatmul.bf16.vlgmr.msra.gmra.mxu1 %v429_v44 }
  0x26   :  { %403 = vmatpush.bf16.msrb.mxu0 %v626_v45 }
  0x2a   :  { %404 = vmatpush.bf16.msrb.mxu0 %v625_v46 }
  0x2e   :  { %405 = vmatpush.bf16.msrb.mxu0 %v624_v47 }
  0x31   :  { %586 = vmatmul.msk.bf16.vlgmr.msrb.gmra.mxu0 %vm338_vm0, %v441_v50 }
  0x9e   :  { %v351_v51 = vpop.f32.mrf.mxu0 }
  0x9f   :  { %v352_v56 = vadd.f32 %v633_v54, %v351_v51 }
  0xa1   :  { %v365_v52 = vpop.f32.mrf.mxu1 }
  0xa2   :  { %v366_v60 = vadd.f32 %v365_v52, %v352_v56 }
  0xa5   :  { %v379_v53 = vpop.f32.mrf.mxu2 }
  0xa6   :  { %v353_v55 = vpop.f32.mrf.mxu0  ;;  %v393_v57 = vpop.f32.mrf.mxu3  ;;  %v380_v63 = vadd.f32 %v379_v53, %v366_v60 }
  0xa7   :  { %v354_v58 = vadd.f32 %v633_v54, %v353_v55 }
  0xa8   :  { %v394_v2 = vadd.f32 %v393_v57, %v380_v63 }
  0xa9   :  { %v367_v59 = vpop.f32.mrf.mxu1 }
  0xaa   :  { %v368_v0 = vadd.f32 %v367_v59, %v354_v58 }
  0xad   :  { %v381_v61 = vpop.f32.mrf.mxu2 }
  0xae   :  { %v407_v62 = vpop.f32.mrf.mxu0  ;;  %v382_v1 = vadd.f32 %v381_v61, %v368_v0  ;;  %v395_v3 = vpop.f32.mrf.mxu3 }
  0xaf   :  { %v408_v5 = vadd.f32 %v407_v62, %v394_v2 }
  0xb0   :  { %v396_v4 = vadd.f32 %v395_v3, %v382_v1 }
  0xb1   :  { %v412_v8 = vmax.f32 %v408_v5, 0.0 }
  0xb6   :  { %v409_v6 = vpop.f32.mrf.mxu0 }
  0xb7   :  { %v410_v7 = vadd.f32 %v409_v6, %v396_v4 }
  0xb9   :  { %v413_v9 = vmax.f32 %v410_v7, 0.0 }
  0xbb   :  { %v631_v10 = vpack.c.bf16 %v413_v9, %v412_v8 }
  0xbd   :  { %632 = vst [vmem:[%s801_s3] sm:$0xff] %v631_v10  }

// kernel: encoder_all_forward.30
= control target key start
LH: loop header
LB: loop body
LE: loop exit
PB: predicated region body
PF: predicated region fallthrough
CT: control target
= control target key end

     0   :  { %s1260_s18 = smov 0   ;;  %s1695_s0 = inlined_call_operand.vmem [shape: bf16[32,256], index: 0, kind: input, shape index: {}]   ;;  %s1696_s1 = inlined_call_operand.vmem [shape: bf16[256,256], index: 1, kind: input, shape index: {}]   ;;  %s1697_s2 = inlined_call_operand.vmem [shape: f32[1,256], index: 2, kind: input, shape index: {}]   ;;  %s1698_s3 = inlined_call_operand.vmem [shape: bf16[256,256], index: 3, kind: input, shape index: {}]   ;;  %s1699_s4 = inlined_call_operand.vmem [shape: f32[1,256], index: 4, kind: input, shape index: {}]   ;;  %s1700_s5 = inlined_call_operand.vmem [shape: bf16[32,256], index: 5, kind: output, shape index: {}]  }
   0x1 LB: > { %s861_s19 = sadd.s32 4294967295, %s1228_s18   ;;  %p865_p0 = scmp.ge.s32.totalorder %s1228_s18, 1  ;;  %s1228_s18 = sphi %s1260_s18, %s15_s18  }
   0x2   : > { %p189_p1 = scmp.lt.s32.totalorder %s1228_s18, 3 }
   0x4   : > { %p190_p2 = pnand %p865_p0, %p189_p1 }
   0x5   : > { %s866_s11 = sshll.u32 (!%p190_p2), %s861_s19, 1 }
   0x6   : > { %193 = sbr.rel (%p190_p2) target bundleno = 362 (0x16a), region = 40  ;;  %p220_p3 = scmp.lt.s32.totalorder (!%p190_p2), %s866_s11, 3 }
   0xb   : > { %v938_v0 = vld [vmem:[%s1696_s1 + $0x70] sm:$0xf]  ;;  %v1157_v1 = vld [vmem:[%s1696_s1 + $0x74] sm:$0xf0]  ;;  %v1156_v5 = vld [vmem:[%s1696_s1 + $0x74] sm:$0xf] }
   0xc   : > { %v1002_v2 = vld [vmem:[%s1696_s1 + $0xf0] sm:$0xf]  ;;  %v939_v3 = vor.u32 %v1157_v1, %v938_v0  ;;  %v1173_v4 = vld [vmem:[%s1696_s1 + $0xf4] sm:$0xf0]  ;;  %v940_v6 = vld [vmem:[%s1696_s1 + $0x78] sm:$0xf0] }
   0xd   : > { %v1003_v7 = vor.u32 %v1173_v4, %v1002_v2  ;;  %v943_v8 = vor.u32 %v1156_v5, %v940_v6  ;;  %v1172_v9 = vld [vmem:[%s1696_s1 + $0xf4] sm:$0xf]  ;;  %v1004_v10 = vld [vmem:[%s1696_s1 + $0xf8] sm:$0xf0]  ;;  %v930_v11 = vld [vmem:[%s1696_s1 + $0x60] sm:$0xf] }
   0xe   : > { %443 = vmatpush.bf16.msra.mxu0 %v939_v3  ;;  %v1007_v12 = vor.u32 %v1172_v9, %v1004_v10  ;;  %v1155_v13 = vld [vmem:[%s1696_s1 + $0x64] sm:$0xf0]  ;;  %v994_v14 = vld [vmem:[%s1696_s1 + $0xe0] sm:$0xf]  ;;  %v1154_v18 = vld [vmem:[%s1696_s1 + $0x64] sm:$0xf] }
   0xf   : > { %v1171_v15 = vld [vmem:[%s1696_s1 + $0xe4] sm:$0xf0]  ;;  %457 = vmatpush.bf16.msra.mxu1 %v1003_v7  ;;  %471 = vmatpush.bf16.msra.mxu2 %v943_v8  ;;  %v931_v16 = vor.u32 %v1155_v13, %v930_v11  ;;  %v932_v19 = vld [vmem:[%s1696_s1 + $0x68] sm:$0xf0]  ;;  %v1170_v20 = vld [vmem:[%s1696_s1 + $0xe4] sm:$0xf] }
  0x10   : > { %v995_v17 = vor.u32 %v1171_v15, %v994_v14  ;;  %485 = vmatpush.bf16.msra.mxu3 %v1007_v12  ;;  %v935_v21 = vor.u32 %v1154_v18, %v932_v19  ;;  %v996_v22 = vld [vmem:[%s1696_s1 + $0xe8] sm:$0xf0]  ;;  %v922_v23 = vld [vmem:[%s1696_s1 + $0x50] sm:$0xf]  ;;  %v1153_v24 = vld [vmem:[%s1696_s1 + $0x54] sm:$0xf0] }
  0x11   : > { %v999_v25 = vor.u32 %v1170_v20, %v996_v22  ;;  %v986_v26 = vld [vmem:[%s1696_s1 + $0xd0] sm:$0xf]  ;;  %v1169_v27 = vld [vmem:[%s1696_s1 + $0xd4] sm:$0xf0]  ;;  %v1152_v28 = vld [vmem:[%s1696_s1 + $0x54] sm:$0xf]  ;;  %v923_v29 = vor.u32 %v1153_v24, %v922_v23 }
  0x12   : > { %444 = vmatpush.bf16.msra.mxu0 %v931_v16  ;;  %v924_v30 = vld [vmem:[%s1696_s1 + $0x58] sm:$0xf0]  ;;  %v1168_v31 = vld [vmem:[%s1696_s1 + $0xd4] sm:$0xf]  ;;  %v987_v33 = vor.u32 %v1169_v27, %v986_v26  ;;  %v914_v35 = vld [vmem:[%s1696_s1 + $0x40] sm:$0xf] }
  0x13   : > { %v988_v32 = vld [vmem:[%s1696_s1 + $0xd8] sm:$0xf0]  ;;  %458 = vmatpush.bf16.msra.mxu1 %v995_v17  ;;  %472 = vmatpush.bf16.msra.mxu2 %v935_v21  ;;  %v927_v34 = vor.u32 %v1152_v28, %v924_v30  ;;  %v1151_v36 = vld [vmem:[%s1696_s1 + $0x44] sm:$0xf0]  ;;  %v978_v37 = vld [vmem:[%s1696_s1 + $0xc0] sm:$0xf] }
  0x14   : > { %486 = vmatpush.bf16.msra.mxu3 %v999_v25  ;;  %v991_v38 = vor.u32 %v1168_v31, %v988_v32  ;;  %v1167_v39 = vld [vmem:[%s1696_s1 + $0xc4] sm:$0xf0]  ;;  %v1150_v40 = vld [vmem:[%s1696_s1 + $0x44] sm:$0xf]  ;;  %v916_v41 = vld [vmem:[%s1696_s1 + $0x48] sm:$0xf0]  ;;  %v915_v44 = vor.u32 %v1151_v36, %v914_v35 }
  0x15   : > { %v1166_v42 = vld [vmem:[%s1696_s1 + $0xc4] sm:$0xf]  ;;  %v980_v43 = vld [vmem:[%s1696_s1 + $0xc8] sm:$0xf0]  ;;  %v979_v45 = vor.u32 %v1167_v39, %v978_v37  ;;  %v919_v46 = vor.u32 %v1150_v40, %v916_v41  ;;  %v906_v47 = vld [vmem:[%s1696_s1 + $0x30] sm:$0xf] }
  0x16   : > { %445 = vmatpush.bf16.msra.mxu0 %v923_v29  ;;  %v1149_v48 = vld [vmem:[%s1696_s1 + $0x34] sm:$0xf0]  ;;  %v970_v49 = vld [vmem:[%s1696_s1 + $0xb0] sm:$0xf]  ;;  %v983_v50 = vor.u32 %v1166_v42, %v980_v43  ;;  %v1148_v52 = vld [vmem:[%s1696_s1 + $0x34] sm:$0xf] }
  0x17   : > { %459 = vmatpush.bf16.msra.mxu1 %v987_v33  ;;  %473 = vmatpush.bf16.msra.mxu2 %v927_v34  ;;  %v1165_v51 = vld [vmem:[%s1696_s1 + $0xb4] sm:$0xf0]  ;;  %v908_v53 = vld [vmem:[%s1696_s1 + $0x38] sm:$0xf0]  ;;  %v1164_v54 = vld [vmem:[%s1696_s1 + $0xb4] sm:$0xf]  ;;  %v907_v56 = vor.u32 %v1149_v48, %v906_v47 }
  0x18   : > { %487 = vmatpush.bf16.msra.mxu3 %v991_v38  ;;  %v972_v55 = vld [vmem:[%s1696_s1 + $0xb8] sm:$0xf0]  ;;  %v971_v57 = vor.u32 %v1165_v51, %v970_v49  ;;  %v911_v58 = vor.u32 %v1148_v52, %v908_v53  ;;  %v898_v59 = vld [vmem:[%s1696_s1 + $0x20] sm:$0xf]  ;;  %v1147_v60 = vld [vmem:[%s1696_s1 + $0x24] sm:$0xf0] }
  0x19   : > { %v962_v61 = vld [vmem:[%s1696_s1 + $0xa0] sm:$0xf]  ;;  %v975_v62 = vor.u32 %v1164_v54, %v972_v55  ;;  %v1163_v63 = vld [vmem:[%s1696_s1 + $0xa4] sm:$0xf0]  ;;  %v1146_v0 = vld [vmem:[%s1696_s1 + $0x24] sm:$0xf]  ;;  %v899_v4 = vor.u32 %v1147_v60, %v898_v59 }
  0x1a   : > { %446 = vmatpush.bf16.msra.mxu0 %v915_v44  ;;  %v900_v1 = vld [vmem:[%s1696_s1 + $0x28] sm:$0xf0]  ;;  %v1162_v2 = vld [vmem:[%s1696_s1 + $0xa4] sm:$0xf]  ;;  %v890_v5 = vld [vmem:[%s1696_s1 + $0x10] sm:$0xf]  ;;  %v963_v6 = vor.u32 %v1163_v63, %v962_v61 }
  0x1b   : > { %460 = vmatpush.bf16.msra.mxu1 %v979_v45  ;;  %474 = vmatpush.bf16.msra.mxu2 %v919_v46  ;;  %v964_v3 = vld [vmem:[%s1696_s1 + $0xa8] sm:$0xf0]  ;;  %v903_v7 = vor.u32 %v1146_v0, %v900_v1  ;;  %v1145_v8 = vld [vmem:[%s1696_s1 + $0x14] sm:$0xf0]  ;;  %v954_v9 = vld [vmem:[%s1696_s1 + $0x90] sm:$0xf] }
  0x1c   : > { %488 = vmatpush.bf16.msra.mxu3 %v983_v50  ;;  %v1161_v10 = vld [vmem:[%s1696_s1 + $0x94] sm:$0xf0]  ;;  %v967_v11 = vor.u32 %v1162_v2, %v964_v3  ;;  %v1144_v12 = vld [vmem:[%s1696_s1 + $0x14] sm:$0xf]  ;;  %v892_v13 = vld [vmem:[%s1696_s1 + $0x18] sm:$0xf0]  ;;  %v891_v16 = vor.u32 %v1145_v8, %v890_v5 }
  0x1d   : > { %v1160_v14 = vld [vmem:[%s1696_s1 + $0x94] sm:$0xf]  ;;  %v956_v15 = vld [vmem:[%s1696_s1 + $0x98] sm:$0xf0]  ;;  %v882_v17 = vld [vmem:[%s1696_s1] sm:$0xf]  ;;  %v955_v18 = vor.u32 %v1161_v10, %v954_v9  ;;  %v895_v19 = vor.u32 %v1144_v12, %v892_v13 }
  0x1e   : > { %447 = vmatpush.bf16.msra.mxu0 %v907_v56  ;;  %v1143_v20 = vld [vmem:[%s1696_s1 + $0x4] sm:$0xf0]  ;;  %v946_v21 = vld [vmem:[%s1696_s1 + $0x80] sm:$0xf]  ;;  %s1702_s11 = smov (!%p220_p3, %s866_s11), 3  ;;  %v959_v22 = vor.u32 %v1160_v14, %v956_v15 }
  0x1f   : > { %461 = vmatpush.bf16.msra.mxu1 %v971_v57  ;;  %475 = vmatpush.bf16.msra.mxu2 %v911_v58  ;;  %v1159_v23 = vld [vmem:[%s1696_s1 + $0x84] sm:$0xf0]  ;;  %v1142_v24 = vld [vmem:[%s1696_s1 + $0x4] sm:$0xf]  ;;  %v884_v25 = vld [vmem:[%s1696_s1 + $0x8] sm:$0xf0]  ;;  %v883_v28 = vor.u32 %v1143_v20, %v882_v17 }
  0x20   : > { %489 = vmatpush.bf16.msra.mxu3 %v975_v62  ;;  %v1158_v26 = vld [vmem:[%s1696_s1 + $0x84] sm:$0xf]  ;;  %v948_v27 = vld [vmem:[%s1696_s1 + $0x88] sm:$0xf0]  ;;  %s1138_s8 = sshll.u32 %s1702_s11, 3  ;;  %v947_v29 = vor.u32 %v1159_v23, %v946_v21  ;;  %v887_v30 = vor.u32 %v1142_v24, %v884_v25 }
  0x21   : > { %s1470_s12 = scalar_lea.vmem %s1695_s0, %s1138_s8  ;;  %v951_v34 = vor.u32 %v1158_v26, %v948_v27  ;;  %v1066_v38 = vld [vmem:[%s1698_s3 + $0x70] sm:$0xf]  ;;  %v1189_v39 = vld [vmem:[%s1698_s3 + $0x74] sm:$0xf0]  ;;  %v1188_v40 = vld [vmem:[%s1698_s3 + $0x74] sm:$0xf]  ;;  %s231_s22 = scalar_lea.vmem %s1700_s5, %s1138_s8 }
  0x22   : > { %448 = vmatpush.bf16.msra.mxu0 %v899_v4  ;;  %v874_v31 = vld [vmem:[%s1470_s12] sm:$0xf]  ;;  %v1141_v32 = vld [vmem:[%s1470_s12 + $0x4] sm:$0xf0]  ;;  %v1140_v33 = vld [vmem:[%s1470_s12 + $0x4] sm:$0xf]  ;;  %v1067_v41 = vor.u32 %v1189_v39, %v1066_v38 }
  0x23   : > { %462 = vmatpush.bf16.msra.mxu1 %v963_v6  ;;  %476 = vmatpush.bf16.msra.mxu2 %v903_v7  ;;  %v876_v35 = vld [vmem:[%s1470_s12 + $0x8] sm:$0xf0]  ;;  %v875_v36 = vor.u32 %v1141_v32, %v874_v31  ;;  %v1068_v42 = vld [vmem:[%s1698_s3 + $0x78] sm:$0xf0]  ;;  %v1058_v44 = vld [vmem:[%s1698_s3 + $0x60] sm:$0xf] }
  0x24   : > { %490 = vmatpush.bf16.msra.mxu3 %v967_v11  ;;  %v879_v37 = vor.u32 %v1140_v33, %v876_v35  ;;  %v1071_v43 = vor.u32 %v1188_v40, %v1068_v42  ;;  %v1187_v45 = vld [vmem:[%s1698_s3 + $0x64] sm:$0xf0]  ;;  %v1186_v46 = vld [vmem:[%s1698_s3 + $0x64] sm:$0xf]  ;;  %v1060_v48 = vld [vmem:[%s1698_s3 + $0x68] sm:$0xf0] }
  0x25   : > { %v1059_v47 = vor.u32 %v1187_v45, %v1058_v44  ;;  %v1063_v49 = vor.u32 %v1186_v46, %v1060_v48  ;;  %v1130_v50 = vld [vmem:[%s1698_s3 + $0xf0] sm:$0xf]  ;;  %v1205_v51 = vld [vmem:[%s1698_s3 + $0xf4] sm:$0xf0]  ;;  %v1204_v52 = vld [vmem:[%s1698_s3 + $0xf4] sm:$0xf] }
  0x26   : > { %449 = vmatpush.bf16.msra.mxu0 %v891_v16  ;;  %v1131_v53 = vor.u32 %v1205_v51, %v1130_v50  ;;  %v1132_v54 = vld [vmem:[%s1698_s3 + $0xf8] sm:$0xf0]  ;;  %v1050_v56 = vld [vmem:[%s1698_s3 + $0x50] sm:$0xf]  ;;  %v1185_v57 = vld [vmem:[%s1698_s3 + $0x54] sm:$0xf0] }
  0x27   : > { %463 = vmatpush.bf16.msra.mxu1 %v955_v18  ;;  %477 = vmatpush.bf16.msra.mxu2 %v895_v19  ;;  %v1135_v55 = vor.u32 %v1204_v52, %v1132_v54  ;;  %v1184_v58 = vld [vmem:[%s1698_s3 + $0x54] sm:$0xf]  ;;  %v1051_v59 = vor.u32 %v1185_v57, %v1050_v56  ;;  %v1052_v60 = vld [vmem:[%s1698_s3 + $0x58] sm:$0xf0]  ;;  %v1122_v62 = vld [vmem:[%s1698_s3 + $0xe0] sm:$0xf] }
  0x28   : > { %491 = vmatpush.bf16.msra.mxu3 %v959_v22  ;;  %v1055_v61 = vor.u32 %v1184_v58, %v1052_v60  ;;  %v1203_v63 = vld [vmem:[%s1698_s3 + $0xe4] sm:$0xf0]  ;;  %v1202_v0 = vld [vmem:[%s1698_s3 + $0xe4] sm:$0xf]  ;;  %v1124_v2 = vld [vmem:[%s1698_s3 + $0xe8] sm:$0xf0] }
  0x29   : > { %v1123_v1 = vor.u32 %v1203_v63, %v1122_v62  ;;  %v1127_v3 = vor.u32 %v1202_v0, %v1124_v2  ;;  %v1042_v4 = vld [vmem:[%s1698_s3 + $0x40] sm:$0xf]  ;;  %v1183_v5 = vld [vmem:[%s1698_s3 + $0x44] sm:$0xf0]  ;;  %v1182_v6 = vld [vmem:[%s1698_s3 + $0x44] sm:$0xf] }
  0x2a   : > { %450 = vmatpush.bf16.msra.mxu0 %v883_v28  ;;  %v1043_v7 = vor.u32 %v1183_v5, %v1042_v4  ;;  %v1044_v8 = vld [vmem:[%s1698_s3 + $0x48] sm:$0xf0]  ;;  %v1114_v10 = vld [vmem:[%s1698_s3 + $0xd0] sm:$0xf]  ;;  %v1201_v11 = vld [vmem:[%s1698_s3 + $0xd4] sm:$0xf0] }
  0x2b   : > { %464 = vmatpush.bf16.msra.mxu1 %v947_v29  ;;  %478 = vmatpush.bf16.msra.mxu2 %v887_v30  ;;  %v1047_v9 = vor.u32 %v1182_v6, %v1044_v8  ;;  %v1200_v12 = vld [vmem:[%s1698_s3 + $0xd4] sm:$0xf]  ;;  %v1115_v13 = vor.u32 %v1201_v11, %v1114_v10  ;;  %v1116_v14 = vld [vmem:[%s1698_s3 + $0xd8] sm:$0xf0]  ;;  %v1034_v16 = vld [vmem:[%s1698_s3 + $0x30] sm:$0xf] }
  0x2c   : > { %492 = vmatpush.bf16.msra.mxu3 %v951_v34  ;;  %v1119_v15 = vor.u32 %v1200_v12, %v1116_v14  ;;  %v1181_v17 = vld [vmem:[%s1698_s3 + $0x34] sm:$0xf0]  ;;  %v1180_v18 = vld [vmem:[%s1698_s3 + $0x34] sm:$0xf]  ;;  %v1036_v20 = vld [vmem:[%s1698_s3 + $0x38] sm:$0xf0] }
  0x2d   : > { %451 = vmatmul.bf16.vlgmr.msra.gmra.mxu0 %v875_v36  ;;  %v1035_v19 = vor.u32 %v1181_v17, %v1034_v16  ;;  %v1039_v21 = vor.u32 %v1180_v18, %v1036_v20  ;;  %v1106_v22 = vld [vmem:[%s1698_s3 + $0xc0] sm:$0xf]  ;;  %v1199_v23 = vld [vmem:[%s1698_s3 + $0xc4] sm:$0xf0]  ;;  %v1198_v24 = vld [vmem:[%s1698_s3 + $0xc4] sm:$0xf] }
  0x2e   : > { %465 = vmatmul.bf16.vlgmr.msra.gmra.mxu1 %v879_v37  ;;  %479 = vmatmul.bf16.vlgmr.msra.gmra.mxu2 %v875_v36  ;;  %v1584_v25 = vld [vmem:[%s1697_s2] sm:$0x3]  ;;  %v1107_v26 = vor.u32 %v1199_v23, %v1106_v22  ;;  %v1108_v27 = vld [vmem:[%s1698_s3 + $0xc8] sm:$0xf0]  ;;  %v1179_v30 = vld [vmem:[%s1698_s3 + $0x24] sm:$0xf0] }
  0x2f   : > { %493 = vmatmul.bf16.vlgmr.msra.gmra.mxu3 %v879_v37  ;;  %735 = vmatpush.bf16.msrb.mxu0 %v1067_v41  ;;  %v1111_v28 = vor.u32 %v1198_v24, %v1108_v27  ;;  %v1026_v29 = vld [vmem:[%s1698_s3 + $0x20] sm:$0xf]  ;;  %v1178_v31 = vld [vmem:[%s1698_s3 + $0x24] sm:$0xf]  ;;  %v1028_v33 = vld [vmem:[%s1698_s3 + $0x28] sm:$0xf0] }
  0x30   : > { %763 = vmatpush.bf16.msrb.mxu2 %v1071_v43  ;;  %749 = vmatpush.bf16.msrb.mxu1 %v1131_v53  ;;  %v1027_v32 = vor.u32 %v1179_v30, %v1026_v29  ;;  %v1031_v34 = vor.u32 %v1178_v31, %v1028_v33  ;;  %v1098_v35 = vld [vmem:[%s1698_s3 + $0xb0] sm:$0xf]  ;;  %v1197_v36 = vld [vmem:[%s1698_s3 + $0xb4] sm:$0xf0]  ;;  %v1196_v37 = vld [vmem:[%s1698_s3 + $0xb4] sm:$0xf] }
  0x31   : > { %777 = vmatpush.bf16.msrb.mxu3 %v1135_v55  ;;  %v269_v38 = vperm.slane %v1584_v25, 0  ;;  %v1099_v39 = vor.u32 %v1197_v36, %v1098_v35  ;;  %v1100_v40 = vld [vmem:[%s1698_s3 + $0xb8] sm:$0xf0]  ;;  %v1018_v42 = vld [vmem:[%s1698_s3 + $0x10] sm:$0xf]  ;;  %v270_v5 = vperm.slane %v1584_v25, 1 }
  0x32   : > { %v1103_v41 = vor.u32 %v1196_v37, %v1100_v40  ;;  %v1177_v43 = vld [vmem:[%s1698_s3 + $0x14] sm:$0xf0]  ;;  %v1176_v44 = vld [vmem:[%s1698_s3 + $0x14] sm:$0xf]  ;;  %v1020_v46 = vld [vmem:[%s1698_s3 + $0x18] sm:$0xf0] }
  0x33   : > { %736 = vmatpush.bf16.msrb.mxu0 %v1059_v47  ;;  %v1019_v45 = vor.u32 %v1177_v43, %v1018_v42  ;;  %v1090_v47 = vld [vmem:[%s1698_s3 + $0xa0] sm:$0xf]  ;;  %v1195_v48 = vld [vmem:[%s1698_s3 + $0xa4] sm:$0xf0]  ;;  %v1023_v50 = vor.u32 %v1176_v44, %v1020_v46  ;;  %v1194_v52 = vld [vmem:[%s1698_s3 + $0xa4] sm:$0xf] }
  0x34   : > { %764 = vmatpush.bf16.msrb.mxu2 %v1063_v49  ;;  %750 = vmatpush.bf16.msrb.mxu1 %v1123_v1  ;;  %v1091_v51 = vor.u32 %v1195_v48, %v1090_v47  ;;  %v1092_v53 = vld [vmem:[%s1698_s3 + $0xa8] sm:$0xf0]  ;;  %v1010_v54 = vld [vmem:[%s1698_s3] sm:$0xf]  ;;  %v1175_v58 = vld [vmem:[%s1698_s3 + $0x4] sm:$0xf0] }
  0x35   : > { %778 = vmatpush.bf16.msrb.mxu3 %v1127_v3  ;;  %v1095_v57 = vor.u32 %v1194_v52, %v1092_v53  ;;  %v1012_v60 = vld [vmem:[%s1698_s3 + $0x8] sm:$0xf0]  ;;  %v1082_v63 = vld [vmem:[%s1698_s3 + $0x90] sm:$0xf]  ;;  %v1193_v0 = vld [vmem:[%s1698_s3 + $0x94] sm:$0xf0] }
  0x36   : > { %v1192_v1 = vld [vmem:[%s1698_s3 + $0x94] sm:$0xf]  ;;  %v1083_v3 = vor.u32 %v1193_v0, %v1082_v63  ;;  %v1084_v4 = vld [vmem:[%s1698_s3 + $0x98] sm:$0xf0]  ;;  %v1074_v8 = vld [vmem:[%s1698_s3 + $0x80] sm:$0xf] }
  0x37   : > { %737 = vmatpush.bf16.msrb.mxu0 %v1051_v59  ;;  %v1174_v59 = vld [vmem:[%s1698_s3 + $0x4] sm:$0xf]  ;;  %v1087_v6 = vor.u32 %v1192_v1, %v1084_v4  ;;  %v1076_v14 = vld [vmem:[%s1698_s3 + $0x88] sm:$0xf0]  ;;  %v569_v63 = vld [vmem:[%s1699_s4] sm:$0x3] }
  0x38   : > { %765 = vmatpush.bf16.msrb.mxu2 %v1055_v61  ;;  %751 = vmatpush.bf16.msrb.mxu1 %v1115_v13  ;;  %v1011_v61 = vor.u32 %v1175_v58, %v1010_v54  ;;  %v1015_v62 = vor.u32 %v1174_v59, %v1012_v60  ;;  %v1190_v10 = vld [vmem:[%s1698_s3 + $0x84] sm:$0xf]  ;;  %v571_v1 = vperm.slane %v569_v63, 0  ;;  %v572_v4 = vperm.slane %v569_v63, 1 }
  0x39   : > { %779 = vmatpush.bf16.msrb.mxu3 %v1119_v15  ;;  %v1079_v18 = vor.u32 %v1190_v10, %v1076_v14 }
  0x3b   : > { %738 = vmatpush.bf16.msrb.mxu0 %v1043_v7 }
  0x3c   : > { %766 = vmatpush.bf16.msrb.mxu2 %v1047_v9  ;;  %752 = vmatpush.bf16.msrb.mxu1 %v1107_v26  ;;  %v1191_v9 = vld [vmem:[%s1698_s3 + $0x84] sm:$0xf0] }
  0x3d   : > { %780 = vmatpush.bf16.msrb.mxu3 %v1111_v28  ;;  %v1075_v13 = vor.u32 %v1191_v9, %v1074_v8 }
  0x3f   : > { %739 = vmatpush.bf16.msrb.mxu0 %v1035_v19 }
  0x40   : > { %767 = vmatpush.bf16.msrb.mxu2 %v1039_v21  ;;  %753 = vmatpush.bf16.msrb.mxu1 %v1099_v39 }
  0x41   : > { %781 = vmatpush.bf16.msrb.mxu3 %v1103_v41 }
  0x43   : > { %740 = vmatpush.bf16.msrb.mxu0 %v1027_v32 }
  0x44   : > { %768 = vmatpush.bf16.msrb.mxu2 %v1031_v34  ;;  %754 = vmatpush.bf16.msrb.mxu1 %v1091_v51 }
  0x45   : > { %782 = vmatpush.bf16.msrb.mxu3 %v1095_v57 }
  0x47   : > { %741 = vmatpush.bf16.msrb.mxu0 %v1019_v45 }
  0x48   : > { %769 = vmatpush.bf16.msrb.mxu2 %v1023_v50  ;;  %755 = vmatpush.bf16.msrb.mxu1 %v1083_v3 }
  0x49   : > { %783 = vmatpush.bf16.msrb.mxu3 %v1087_v6 }
  0x4b   : > { %742 = vmatpush.bf16.msrb.mxu0 %v1011_v61 }
  0x4c   : > { %770 = vmatpush.bf16.msrb.mxu2 %v1015_v62  ;;  %756 = vmatpush.bf16.msrb.mxu1 %v1075_v13 }
  0x4d   : > { %784 = vmatpush.bf16.msrb.mxu3 %v1079_v18 }
  0xaa   : > { %v452_v49 = vpop.f32.mrf.mxu0 }
  0xab   : > { %v453_v55 = vadd.f32 %v452_v49, %v269_v38  ;;  %v466_v56 = vpop.f32.mrf.mxu1 }
  0xad   : > { %v1659_v2 = vadd.f32 %v466_v56, %v453_v55 }
  0xaf   : > { %v499_v7 = vmul.f32 %v1659_v2, %v1659_v2 }
  0xb1   : > { %v503_v11 = vmul.f32 %v499_v7, %v1659_v2  ;;  %v480_v12 = vpop.f32.mrf.mxu2 }
  0xb2   : > { %v481_v15 = vadd.f32 %v480_v12, %v270_v5  ;;  %v494_v16 = vpop.f32.mrf.mxu3  ;;  %v454_v17 = vpop.f32.mrf.mxu0 }
  0xb3   : > { %v507_v19 = vmul.f32 0.044715, %v503_v11  ;;  %v455_v20 = vadd.f32 %v454_v17, %v269_v38  ;;  %v468_v22 = vpop.f32.mrf.mxu1 }
  0xb4   : > { %v495_v21 = vadd.f32 %v494_v16, %v481_v15  ;;  %v234_v16 = vld [vmem:[%s1470_s12 + $0x8] sm:$0xff] }
  0xb5   : > { %v511_v23 = vadd.f32 %v507_v19, %v1659_v2  ;;  %v469_v24 = vadd.f32 %v468_v22, %v455_v20  ;;  %v793_v22 = vunpack.c.l.bf16 %v234_v16 }
  0xb6   : > { %v500_v25 = vmul.f32 %v495_v21, %v495_v21 }
  0xb7   : > { %v515_v26 = vmul.f32 0.7978846, %v511_v23  ;;  %v501_v27 = vmul.f32 %v469_v24, %v469_v24 }
  0xb8   : > { %v504_v28 = vmul.f32 %v500_v25, %v495_v21 }
  0xb9   : > { %v505_v29 = vmul.f32 %v501_v27, %v469_v24  ;;  %v482_v30 = vpop.f32.mrf.mxu2  ;;  %1214 = vtanh.f32 %v515_v26 }
  0xba   : > { %v508_v31 = vmul.f32 0.044715, %v504_v28  ;;  %v483_v32 = vadd.f32 %v482_v30, %v270_v5  ;;  %v496_v34 = vpop.f32.mrf.mxu3  ;;  %v233_v5 = vld [vmem:[%s1470_s12] sm:$0xff] }
  0xbb   : > { %v509_v33 = vmul.f32 0.044715, %v505_v29  ;;  %v791_v8 = vunpack.c.l.bf16 %v233_v5  ;;  %v792_v10 = vunpack.c.h.bf16 %v233_v5 }
  0xbc   : > { %v512_v35 = vadd.f32 %v508_v31, %v495_v21  ;;  %v497_v36 = vadd.f32 %v496_v34, %v483_v32 }
  0xbd   : > { %v513_v37 = vadd.f32 %v509_v33, %v469_v24 }
  0xbe   : > { %v516_v38 = vmul.f32 0.7978846, %v512_v35  ;;  %v502_v39 = vmul.f32 %v497_v36, %v497_v36 }
  0xbf   : > { %v517_v40 = vmul.f32 0.7978846, %v513_v37  ;;  %v1215_v42 = vpop.eup %1214 }
  0xc0   : > { %v506_v41 = vmul.f32 %v502_v39, %v497_v36  ;;  %v523_v45 = vadd.f32 1.0, %v1215_v42 }
  0xc1   : > { %1216 = vtanh.f32 %v517_v40 }
  0xc2   : > { %1218 = vtanh.f32 %v516_v38  ;;  %v510_v43 = vmul.f32 0.044715, %v506_v41  ;;  %v527_v50 = vmul.f32 0.5, %v523_v45 }
  0xc4   : > { %v514_v44 = vadd.f32 %v510_v43, %v497_v36  ;;  %v531_v53 = vmul.f32 %v527_v50, %v1659_v2 }
  0xc6   : > { %v518_v46 = vmul.f32 0.7978846, %v514_v44 }
  0xc7   : > { %v1217_v47 = vpop.eup %1216 }
  0xc8   : > { %v1219_v48 = vpop.eup %1218  ;;  %1220 = vtanh.f32 %v518_v46  ;;  %v525_v49 = vadd.f32 1.0, %v1217_v47 }
  0xc9   : > { %v524_v52 = vadd.f32 1.0, %v1219_v48 }
  0xca   : > { %v529_v51 = vmul.f32 0.5, %v525_v49 }
  0xcb   : > { %v528_v58 = vmul.f32 0.5, %v524_v52 }
  0xcc   : > { %v533_v54 = vmul.f32 %v529_v51, %v469_v24  ;;  %v794_v24 = vunpack.c.h.bf16 %v234_v16 }
  0xcd   : > { %v532_v60 = vmul.f32 %v528_v58, %v495_v21 }
  0xce   : > { %v1221_v55 = vpop.eup %1220  ;;  %v535_v56 = vpack.c.bf16 %v533_v54, %v531_v53 }
  0xcf   : > { %v526_v57 = vadd.f32 1.0, %v1221_v55 }
  0xd0   : > { %743 = vmatmul.bf16.vlgmr.msrb.gmra.mxu0 %v535_v56  ;;  %771 = vmatmul.bf16.vlgmr.msrb.gmra.mxu2 %v535_v56 }
  0xd1   : > { %v530_v59 = vmul.f32 0.5, %v526_v57 }
  0xd3   : > { %v534_v61 = vmul.f32 %v530_v59, %v497_v36 }
  0xd5   : > { %v536_v62 = vpack.c.bf16 %v534_v61, %v532_v60 }
  0xd7   : > { %757 = vmatmul.bf16.vlgmr.msrb.gmra.mxu1 %v536_v62  ;;  %785 = vmatmul.bf16.vlgmr.msrb.gmra.mxu3 %v536_v62 }
 0x14d   : > { %v744_v0 = vpop.f32.mrf.mxu0 }
 0x14e   : > { %v745_v6 = vadd.f32 %v744_v0, %v571_v1 }
 0x153   : > { %v772_v3 = vpop.f32.mrf.mxu2 }
 0x154   : > { %v758_v2 = vpop.f32.mrf.mxu1  ;;  %v773_v9 = vadd.f32 %v772_v3, %v572_v4 }
 0x155   : > { %v759_v7 = vadd.f32 %v758_v2, %v745_v6  ;;  %v746_v13 = vpop.f32.mrf.mxu0 }
 0x156   : > { %v747_v19 = vadd.f32 %v746_v13, %v571_v1 }
 0x157   : > { %v795_v14 = vadd.f32 %v791_v8, %v759_v7 }
 0x15a   : > { %v786_v11 = vpop.f32.mrf.mxu3 }
 0x15b   : > { %v787_v12 = vadd.f32 %v786_v11, %v773_v9  ;;  %v774_v18 = vpop.f32.mrf.mxu2 }
 0x15c   : > { %v760_v17 = vpop.f32.mrf.mxu1  ;;  %v775_v23 = vadd.f32 %v774_v18, %v572_v4 }
 0x15d   : > { %v796_v15 = vadd.f32 %v792_v10, %v787_v12  ;;  %v761_v21 = vadd.f32 %v760_v17, %v747_v19 }
 0x15f   : > { %v799_v20 = vpack.c.bf16 %v796_v15, %v795_v14  ;;  %v797_v27 = vadd.f32 %v793_v22, %v761_v21 }
 0x161   : > { %801 = vst [vmem:[%s231_s22] sm:$0xff] %v799_v20 }
 0x162   : > { %v788_v25 = vpop.f32.mrf.mxu3 }
 0x163   : > { %v789_v26 = vadd.f32 %v788_v25, %v775_v23 }
 0x165   : > { %v798_v28 = vadd.f32 %v794_v24, %v789_v26 }
 0x167   : > { %v800_v29 = vpack.c.bf16 %v798_v28, %v797_v27 }
 0x169   : > { %802 = vst [vmem:[%s231_s22 + $0x8] sm:$0xff] %v800_v29 }
 0x16a PF: > { %s15_s18 = sadd.s32 1, %s1228_s18  }
 0x16b   : > { %p12_p4 = scmp.ge.s32.totalorder %s15_s18, 4  }
 0x16d   :  { %14 = sbr.rel (!%p12_p4) target bundleno = 1 (0x1), region = 70 }

// kernel: encoder_all_forward.27
= control target key start
LH: loop header
LB: loop body
LE: loop exit
PB: predicated region body
PF: predicated region fallthrough
CT: control target
= control target key end

     0   :  { %s2952_s1 = inlined_call_operand.vmem [shape: bf16[1152,256], index: 1, kind: input, shape index: {}]   ;;  %s2953_s0 = inlined_call_operand.vmem [shape: bf16[16,1152], index: 0, kind: input, shape index: {}]   ;;  %s2954_s2 = inlined_call_operand.vmem [shape: f32[1,256], index: 2, kind: input, shape index: {}]   ;;  %s2955_s3 = inlined_call_operand.vmem [shape: bf16[16,256], index: 3, kind: output, shape index: {}]  }
   0x1   :  { %v1298_v0 = vld [vmem:[%s2952_s1 + $0x70] sm:$0xf]  ;;  %v1840_v1 = vld [vmem:[%s2952_s1 + $0x74] sm:$0xf0]  ;;  %v1290_v11 = vld [vmem:[%s2952_s1 + $0x60] sm:$0xf] }
   0x2   :  { %v1362_v2 = vld [vmem:[%s2952_s1 + $0xf0] sm:$0xf]  ;;  %v1299_v3 = vor.u32 %v1840_v1, %v1298_v0  ;;  %v1856_v4 = vld [vmem:[%s2952_s1 + $0xf4] sm:$0xf0]  ;;  %v1838_v13 = vld [vmem:[%s2952_s1 + $0x64] sm:$0xf0] }
   0x3   :  { %v1426_v5 = vld [vmem:[%s2952_s1 + $0x170] sm:$0xf]  ;;  %v1872_v6 = vld [vmem:[%s2952_s1 + $0x174] sm:$0xf0]  ;;  %v1363_v7 = vor.u32 %v1856_v4, %v1362_v2  ;;  %v1354_v14 = vld [vmem:[%s2952_s1 + $0xe0] sm:$0xf]  ;;  %v1291_v16 = vor.u32 %v1838_v13, %v1290_v11 }
   0x4   :  { %v1427_v8 = vor.u32 %v1872_v6, %v1426_v5  ;;  %v1490_v9 = vld [vmem:[%s2952_s1 + $0x1f0] sm:$0xf]  ;;  %v1888_v10 = vld [vmem:[%s2952_s1 + $0x1f4] sm:$0xf0]  ;;  %940 = vmatpush.bf16.msra.mxu0 %v1299_v3  ;;  %v1854_v15 = vld [vmem:[%s2952_s1 + $0xe4] sm:$0xf0] }
   0x5   :  { %v1491_v12 = vor.u32 %v1888_v10, %v1490_v9  ;;  %954 = vmatpush.bf16.msra.mxu1 %v1363_v7  ;;  %v1355_v17 = vor.u32 %v1854_v15, %v1354_v14  ;;  %v1418_v18 = vld [vmem:[%s2952_s1 + $0x160] sm:$0xf]  ;;  %v1870_v19 = vld [vmem:[%s2952_s1 + $0x164] sm:$0xf0]  ;;  %v1282_v23 = vld [vmem:[%s2952_s1 + $0x50] sm:$0xf] }
   0x6   :  { %968 = vmatpush.bf16.msra.mxu2 %v1427_v8  ;;  %v1482_v20 = vld [vmem:[%s2952_s1 + $0x1e0] sm:$0xf]  ;;  %v1419_v21 = vor.u32 %v1870_v19, %v1418_v18  ;;  %v1886_v22 = vld [vmem:[%s2952_s1 + $0x1e4] sm:$0xf0]  ;;  %v1836_v24 = vld [vmem:[%s2952_s1 + $0x54] sm:$0xf0] }
   0x7   :  { %982 = vmatpush.bf16.msra.mxu3 %v1491_v12  ;;  %v1483_v25 = vor.u32 %v1886_v22, %v1482_v20  ;;  %v1346_v26 = vld [vmem:[%s2952_s1 + $0xd0] sm:$0xf]  ;;  %v1852_v27 = vld [vmem:[%s2952_s1 + $0xd4] sm:$0xf0]  ;;  %v1283_v29 = vor.u32 %v1836_v24, %v1282_v23  ;;  %v1274_v35 = vld [vmem:[%s2952_s1 + $0x40] sm:$0xf] }
   0x8   :  { %v1410_v28 = vld [vmem:[%s2952_s1 + $0x150] sm:$0xf]  ;;  %941 = vmatpush.bf16.msra.mxu0 %v1291_v16  ;;  %v1868_v30 = vld [vmem:[%s2952_s1 + $0x154] sm:$0xf0]  ;;  %v1347_v33 = vor.u32 %v1852_v27, %v1346_v26  ;;  %v1834_v36 = vld [vmem:[%s2952_s1 + $0x44] sm:$0xf0] }
   0x9   :  { %v1474_v31 = vld [vmem:[%s2952_s1 + $0x1d0] sm:$0xf]  ;;  %v1884_v32 = vld [vmem:[%s2952_s1 + $0x1d4] sm:$0xf0]  ;;  %955 = vmatpush.bf16.msra.mxu1 %v1355_v17  ;;  %v1411_v34 = vor.u32 %v1868_v30, %v1410_v28  ;;  %v1338_v37 = vld [vmem:[%s2952_s1 + $0xc0] sm:$0xf]  ;;  %v1275_v44 = vor.u32 %v1834_v36, %v1274_v35 }
   0xa   :  { %969 = vmatpush.bf16.msra.mxu2 %v1419_v21  ;;  %v1475_v38 = vor.u32 %v1884_v32, %v1474_v31  ;;  %v1850_v39 = vld [vmem:[%s2952_s1 + $0xc4] sm:$0xf0]  ;;  %v1402_v40 = vld [vmem:[%s2952_s1 + $0x140] sm:$0xf]  ;;  %v1266_v47 = vld [vmem:[%s2952_s1 + $0x30] sm:$0xf] }
   0xb   :  { %983 = vmatpush.bf16.msra.mxu3 %v1483_v25  ;;  %v1866_v41 = vld [vmem:[%s2952_s1 + $0x144] sm:$0xf0]  ;;  %v1466_v42 = vld [vmem:[%s2952_s1 + $0x1c0] sm:$0xf]  ;;  %v1339_v45 = vor.u32 %v1850_v39, %v1338_v37  ;;  %v1832_v48 = vld [vmem:[%s2952_s1 + $0x34] sm:$0xf0] }
   0xc   :  { %v1882_v43 = vld [vmem:[%s2952_s1 + $0x1c4] sm:$0xf0]  ;;  %942 = vmatpush.bf16.msra.mxu0 %v1283_v29  ;;  %v1403_v46 = vor.u32 %v1866_v41, %v1402_v40  ;;  %v1330_v49 = vld [vmem:[%s2952_s1 + $0xb0] sm:$0xf]  ;;  %v1848_v51 = vld [vmem:[%s2952_s1 + $0xb4] sm:$0xf0]  ;;  %v1267_v56 = vor.u32 %v1832_v48, %v1266_v47 }
   0xd   :  { %956 = vmatpush.bf16.msra.mxu1 %v1347_v33  ;;  %v1467_v50 = vor.u32 %v1882_v43, %v1466_v42  ;;  %v1394_v52 = vld [vmem:[%s2952_s1 + $0x130] sm:$0xf]  ;;  %v1864_v53 = vld [vmem:[%s2952_s1 + $0x134] sm:$0xf0]  ;;  %v1331_v57 = vor.u32 %v1848_v51, %v1330_v49  ;;  %v1258_v59 = vld [vmem:[%s2952_s1 + $0x20] sm:$0xf] }
   0xe   :  { %970 = vmatpush.bf16.msra.mxu2 %v1411_v34  ;;  %v1458_v54 = vld [vmem:[%s2952_s1 + $0x1b0] sm:$0xf]  ;;  %v1880_v55 = vld [vmem:[%s2952_s1 + $0x1b4] sm:$0xf0]  ;;  %v1395_v58 = vor.u32 %v1864_v53, %v1394_v52  ;;  %v1830_v60 = vld [vmem:[%s2952_s1 + $0x24] sm:$0xf0] }
   0xf   :  { %984 = vmatpush.bf16.msra.mxu3 %v1475_v38  ;;  %v1322_v61 = vld [vmem:[%s2952_s1 + $0xa0] sm:$0xf]  ;;  %v1459_v62 = vor.u32 %v1880_v55, %v1458_v54  ;;  %v1846_v63 = vld [vmem:[%s2952_s1 + $0xa4] sm:$0xf0]  ;;  %v1259_v4 = vor.u32 %v1830_v60, %v1258_v59  ;;  %v1250_v7 = vld [vmem:[%s2952_s1 + $0x10] sm:$0xf] }
  0x10   :  { %943 = vmatpush.bf16.msra.mxu0 %v1275_v44  ;;  %v1386_v0 = vld [vmem:[%s2952_s1 + $0x120] sm:$0xf]  ;;  %v1862_v1 = vld [vmem:[%s2952_s1 + $0x124] sm:$0xf0]  ;;  %v1323_v5 = vor.u32 %v1846_v63, %v1322_v61  ;;  %v1828_v8 = vld [vmem:[%s2952_s1 + $0x14] sm:$0xf0] }
  0x11   :  { %957 = vmatpush.bf16.msra.mxu1 %v1339_v45  ;;  %v1450_v2 = vld [vmem:[%s2952_s1 + $0x1a0] sm:$0xf]  ;;  %v1878_v3 = vld [vmem:[%s2952_s1 + $0x1a4] sm:$0xf0]  ;;  %v1387_v6 = vor.u32 %v1862_v1, %v1386_v0  ;;  %v1314_v9 = vld [vmem:[%s2952_s1 + $0x90] sm:$0xf]  ;;  %v1251_v16 = vor.u32 %v1828_v8, %v1250_v7 }
  0x12   :  { %971 = vmatpush.bf16.msra.mxu2 %v1403_v46  ;;  %v1451_v10 = vor.u32 %v1878_v3, %v1450_v2  ;;  %v1844_v11 = vld [vmem:[%s2952_s1 + $0x94] sm:$0xf0]  ;;  %v1378_v12 = vld [vmem:[%s2952_s1 + $0x110] sm:$0xf]  ;;  %v1242_v17 = vld [vmem:[%s2952_s1] sm:$0xf] }
  0x13   :  { %985 = vmatpush.bf16.msra.mxu3 %v1467_v50  ;;  %v1860_v13 = vld [vmem:[%s2952_s1 + $0x114] sm:$0xf0]  ;;  %v1442_v14 = vld [vmem:[%s2952_s1 + $0x190] sm:$0xf]  ;;  %v1826_v18 = vld [vmem:[%s2952_s1 + $0x4] sm:$0xf0]  ;;  %v1315_v19 = vor.u32 %v1844_v11, %v1314_v9 }
  0x14   :  { %944 = vmatpush.bf16.msra.mxu0 %v1267_v56  ;;  %v1876_v15 = vld [vmem:[%s2952_s1 + $0x194] sm:$0xf0]  ;;  %v1379_v20 = vor.u32 %v1860_v13, %v1378_v12  ;;  %v1306_v21 = vld [vmem:[%s2952_s1 + $0x80] sm:$0xf]  ;;  %v1842_v22 = vld [vmem:[%s2952_s1 + $0x84] sm:$0xf0]  ;;  %v1243_v31 = vor.u32 %v1826_v18, %v1242_v17 }
  0x15   :  { %958 = vmatpush.bf16.msra.mxu1 %v1331_v57  ;;  %v1370_v23 = vld [vmem:[%s2952_s1 + $0x100] sm:$0xf]  ;;  %v1443_v24 = vor.u32 %v1876_v15, %v1442_v14  ;;  %v1858_v25 = vld [vmem:[%s2952_s1 + $0x104] sm:$0xf0]  ;;  %v1554_v26 = vld [vmem:[%s2952_s1 + $0x270] sm:$0xf]  ;;  %v1307_v35 = vor.u32 %v1842_v22, %v1306_v21 }
  0x16   :  { %972 = vmatpush.bf16.msra.mxu2 %v1395_v58  ;;  %v1904_v27 = vld [vmem:[%s2952_s1 + $0x274] sm:$0xf0]  ;;  %v1618_v28 = vld [vmem:[%s2952_s1 + $0x2f0] sm:$0xf]  ;;  %v1434_v33 = vld [vmem:[%s2952_s1 + $0x180] sm:$0xf]  ;;  %v1371_v36 = vor.u32 %v1858_v25, %v1370_v23 }
  0x17   :  { %986 = vmatpush.bf16.msra.mxu3 %v1459_v62  ;;  %v1920_v29 = vld [vmem:[%s2952_s1 + $0x2f4] sm:$0xf0]  ;;  %v1682_v30 = vld [vmem:[%s2952_s1 + $0x370] sm:$0xf]  ;;  %v1874_v34 = vld [vmem:[%s2952_s1 + $0x184] sm:$0xf0]  ;;  %v1555_v39 = vor.u32 %v1904_v27, %v1554_v26 }
  0x18   :  { %945 = vmatpush.bf16.msra.mxu0 %v1259_v4  ;;  %v1936_v32 = vld [vmem:[%s2952_s1 + $0x374] sm:$0xf0]  ;;  %v1746_v37 = vld [vmem:[%s2952_s1 + $0x3f0] sm:$0xf]  ;;  %v1619_v40 = vor.u32 %v1920_v29, %v1618_v28  ;;  %v1546_v41 = vld [vmem:[%s2952_s1 + $0x260] sm:$0xf]  ;;  %v1435_v44 = vor.u32 %v1874_v34, %v1434_v33 }
  0x19   :  { %959 = vmatpush.bf16.msra.mxu1 %v1323_v5  ;;  %v1952_v38 = vld [vmem:[%s2952_s1 + $0x3f4] sm:$0xf0]  ;;  %v1902_v42 = vld [vmem:[%s2952_s1 + $0x264] sm:$0xf0]  ;;  %v1683_v43 = vor.u32 %v1936_v32, %v1682_v30  ;;  %v1610_v45 = vld [vmem:[%s2952_s1 + $0x2e0] sm:$0xf] }
  0x1a   :  { %973 = vmatpush.bf16.msra.mxu2 %v1387_v6  ;;  %v1918_v46 = vld [vmem:[%s2952_s1 + $0x2e4] sm:$0xf0]  ;;  %v1674_v47 = vld [vmem:[%s2952_s1 + $0x360] sm:$0xf]  ;;  %v1747_v48 = vor.u32 %v1952_v38, %v1746_v37  ;;  %v1538_v52 = vld [vmem:[%s2952_s1 + $0x250] sm:$0xf]  ;;  %v1547_v56 = vor.u32 %v1902_v42, %v1546_v41 }
  0x1b   :  { %987 = vmatpush.bf16.msra.mxu3 %v1451_v10  ;;  %v1934_v49 = vld [vmem:[%s2952_s1 + $0x364] sm:$0xf0]  ;;  %v1738_v50 = vld [vmem:[%s2952_s1 + $0x3e0] sm:$0xf]  ;;  %v1820_v54 = vld [vmem:[%s2953_s0 + $0x20] sm:$0xf0]  ;;  %v1611_v57 = vor.u32 %v1918_v46, %v1610_v45 }
  0x1c   :  { %946 = vmatpush.bf16.msra.mxu0 %v1251_v16  ;;  %v1950_v51 = vld [vmem:[%s2952_s1 + $0x3e4] sm:$0xf0]  ;;  %v1206_v53 = vld [vmem:[%s2953_s0] sm:$0xf]  ;;  %v1900_v58 = vld [vmem:[%s2952_s1 + $0x254] sm:$0xf0]  ;;  %v1675_v62 = vor.u32 %v1934_v49, %v1674_v47 }
  0x1d   :  { %960 = vmatpush.bf16.msra.mxu1 %v1315_v19  ;;  %v1214_v55 = vld [vmem:[%s2953_s0 + $0x8] sm:$0xf]  ;;  %v1602_v59 = vld [vmem:[%s2952_s1 + $0x2d0] sm:$0xf]  ;;  %v2247_v60 = vor.u32 %v1820_v54, %v1206_v53  ;;  %v1821_v61 = vld [vmem:[%s2953_s0 + $0x28] sm:$0xf0]  ;;  %v1739_v3 = vor.u32 %v1950_v51, %v1738_v50  ;;  %v1539_v11 = vor.u32 %v1900_v58, %v1538_v52 }
  0x1e   :  { %974 = vmatpush.bf16.msra.mxu2 %v1379_v20  ;;  %v1916_v63 = vld [vmem:[%s2952_s1 + $0x2d4] sm:$0xf0]  ;;  %v1666_v0 = vld [vmem:[%s2952_s1 + $0x350] sm:$0xf]  ;;  %v2261_v2 = vor.u32 %v1821_v61, %v1214_v55  ;;  %v1816_v5 = vld [vmem:[%s2953_s0 + $0x4] sm:$0xf] }
  0x1f   :  { %988 = vmatpush.bf16.msra.mxu3 %v1443_v24  ;;  %v1932_v1 = vld [vmem:[%s2952_s1 + $0x354] sm:$0xf0]  ;;  %v1730_v4 = vld [vmem:[%s2952_s1 + $0x3d0] sm:$0xf]  ;;  %v1208_v6 = vld [vmem:[%s2953_s0 + $0x24] sm:$0xf0]  ;;  %v1603_v12 = vor.u32 %v1916_v63, %v1602_v59 }
  0x20   :  { %947 = vmatpush.bf16.msra.mxu0 %v1243_v31  ;;  %v1948_v7 = vld [vmem:[%s2952_s1 + $0x3d4] sm:$0xf0]  ;;  %v2277_v8 = vor.u32 %v1816_v5, %v1208_v6  ;;  %v1817_v9 = vld [vmem:[%s2953_s0 + $0xc] sm:$0xf]  ;;  %v1216_v10 = vld [vmem:[%s2953_s0 + $0x2c] sm:$0xf0]  ;;  %v1667_v15 = vor.u32 %v1932_v1, %v1666_v0 }
  0x21   :  { %961 = vmatpush.bf16.msra.mxu1 %v1307_v35  ;;  %v1530_v13 = vld [vmem:[%s2952_s1 + $0x240] sm:$0xf]  ;;  %v2288_v14 = vor.u32 %v1817_v9, %v1216_v10  ;;  %v1898_v16 = vld [vmem:[%s2952_s1 + $0x244] sm:$0xf0]  ;;  %v1731_v19 = vor.u32 %v1948_v7, %v1730_v4  ;;  %v1522_v26 = vld [vmem:[%s2952_s1 + $0x230] sm:$0xf] }
  0x22   :  { %975 = vmatpush.bf16.msra.mxu2 %v1371_v36  ;;  %v1594_v17 = vld [vmem:[%s2952_s1 + $0x2c0] sm:$0xf]  ;;  %v1914_v18 = vld [vmem:[%s2952_s1 + $0x2c4] sm:$0xf0]  ;;  %v1531_v24 = vor.u32 %v1898_v16, %v1530_v13  ;;  %v1896_v28 = vld [vmem:[%s2952_s1 + $0x234] sm:$0xf0] }
  0x23   :  { %989 = vmatpush.bf16.msra.mxu3 %v1435_v44  ;;  %948 = vmatmul.bf16.vlgmr.msra.gmra.mxu0 %v2247_v60  ;;  %v1658_v20 = vld [vmem:[%s2952_s1 + $0x340] sm:$0xf]  ;;  %v1930_v21 = vld [vmem:[%s2952_s1 + $0x344] sm:$0xf0]  ;;  %v1595_v25 = vor.u32 %v1914_v18, %v1594_v17  ;;  %v1586_v29 = vld [vmem:[%s2952_s1 + $0x2b0] sm:$0xf]  ;;  %v1523_v36 = vor.u32 %v1896_v28, %v1522_v26 }
  0x24   :  { %996 = vmatpush.bf16.msrb.mxu0 %v1555_v39  ;;  %962 = vmatmul.bf16.vlgmr.msra.gmra.mxu1 %v2277_v8  ;;  %v1722_v22 = vld [vmem:[%s2952_s1 + $0x3c0] sm:$0xf]  ;;  %v1946_v23 = vld [vmem:[%s2952_s1 + $0x3c4] sm:$0xf0]  ;;  %v1659_v27 = vor.u32 %v1930_v21, %v1658_v20  ;;  %v1912_v30 = vld [vmem:[%s2952_s1 + $0x2b4] sm:$0xf0] }
  0x25   :  { %1010 = vmatpush.bf16.msrb.mxu1 %v1619_v40  ;;  %976 = vmatmul.bf16.vlgmr.msra.gmra.mxu2 %v2261_v2  ;;  %v1723_v31 = vor.u32 %v1946_v23, %v1722_v22  ;;  %v1650_v32 = vld [vmem:[%s2952_s1 + $0x330] sm:$0xf]  ;;  %v1928_v33 = vld [vmem:[%s2952_s1 + $0x334] sm:$0xf0]  ;;  %v1587_v37 = vor.u32 %v1912_v30, %v1586_v29  ;;  %v1514_v38 = vld [vmem:[%s2952_s1 + $0x220] sm:$0xf] }
  0x26   :  { %1024 = vmatpush.bf16.msrb.mxu2 %v1683_v43  ;;  %990 = vmatmul.bf16.vlgmr.msra.gmra.mxu3 %v2288_v14  ;;  %v1714_v34 = vld [vmem:[%s2952_s1 + $0x3b0] sm:$0xf]  ;;  %v1944_v35 = vld [vmem:[%s2952_s1 + $0x3b4] sm:$0xf0]  ;;  %v1651_v39 = vor.u32 %v1928_v33, %v1650_v32  ;;  %v1894_v40 = vld [vmem:[%s2952_s1 + $0x224] sm:$0xf0] }
  0x27   :  { %1038 = vmatpush.bf16.msrb.mxu3 %v1747_v48  ;;  %v1578_v41 = vld [vmem:[%s2952_s1 + $0x2a0] sm:$0xf]  ;;  %v1910_v42 = vld [vmem:[%s2952_s1 + $0x2a4] sm:$0xf0]  ;;  %v1715_v43 = vor.u32 %v1944_v35, %v1714_v34  ;;  %v1515_v48 = vor.u32 %v1894_v40, %v1514_v38  ;;  %v1506_v50 = vld [vmem:[%s2952_s1 + $0x210] sm:$0xf] }
  0x28   :  { %997 = vmatpush.bf16.msrb.mxu0 %v1547_v56  ;;  %v1642_v44 = vld [vmem:[%s2952_s1 + $0x320] sm:$0xf]  ;;  %v1926_v45 = vld [vmem:[%s2952_s1 + $0x324] sm:$0xf0]  ;;  %v1579_v49 = vor.u32 %v1910_v42, %v1578_v41  ;;  %v1892_v51 = vld [vmem:[%s2952_s1 + $0x214] sm:$0xf0] }
  0x29   :  { %1011 = vmatpush.bf16.msrb.mxu1 %v1611_v57  ;;  %v1706_v46 = vld [vmem:[%s2952_s1 + $0x3a0] sm:$0xf]  ;;  %v1942_v47 = vld [vmem:[%s2952_s1 + $0x3a4] sm:$0xf0]  ;;  %v1643_v52 = vor.u32 %v1926_v45, %v1642_v44  ;;  %v1570_v53 = vld [vmem:[%s2952_s1 + $0x290] sm:$0xf]  ;;  %v1507_v1 = vor.u32 %v1892_v51, %v1506_v50 }
  0x2a   :  { %1025 = vmatpush.bf16.msrb.mxu2 %v1675_v62  ;;  %v1908_v54 = vld [vmem:[%s2952_s1 + $0x294] sm:$0xf0]  ;;  %v1634_v55 = vld [vmem:[%s2952_s1 + $0x310] sm:$0xf]  ;;  %v1707_v56 = vor.u32 %v1942_v47, %v1706_v46  ;;  %v1498_v61 = vld [vmem:[%s2952_s1 + $0x200] sm:$0xf] }
  0x2b   :  { %1039 = vmatpush.bf16.msrb.mxu3 %v1739_v3  ;;  %v1924_v57 = vld [vmem:[%s2952_s1 + $0x314] sm:$0xf0]  ;;  %v1698_v58 = vld [vmem:[%s2952_s1 + $0x390] sm:$0xf]  ;;  %v1890_v62 = vld [vmem:[%s2952_s1 + $0x204] sm:$0xf0]  ;;  %v1571_v3 = vor.u32 %v1908_v54, %v1570_v53 }
  0x2c   :  { %998 = vmatpush.bf16.msrb.mxu0 %v1539_v11  ;;  %v1940_v59 = vld [vmem:[%s2952_s1 + $0x394] sm:$0xf0]  ;;  %v1562_v63 = vld [vmem:[%s2952_s1 + $0x280] sm:$0xf]  ;;  %v1906_v0 = vld [vmem:[%s2952_s1 + $0x284] sm:$0xf0]  ;;  %v1635_v7 = vor.u32 %v1924_v57, %v1634_v55  ;;  %v1499_v20 = vor.u32 %v1890_v62, %v1498_v61 }
  0x2d   :  { %1012 = vmatpush.bf16.msrb.mxu1 %v1603_v12  ;;  %v1626_v4 = vld [vmem:[%s2952_s1 + $0x300] sm:$0xf]  ;;  %v1922_v5 = vld [vmem:[%s2952_s1 + $0x304] sm:$0xf0]  ;;  %v1810_v6 = vld [vmem:[%s2952_s1 + $0x470] sm:$0xf]  ;;  %v1699_v12 = vor.u32 %v1940_v59, %v1698_v58  ;;  %v1563_v21 = vor.u32 %v1906_v0, %v1562_v63 }
  0x2e   :  { %1026 = vmatpush.bf16.msrb.mxu2 %v1667_v15  ;;  %v1968_v9 = vld [vmem:[%s2952_s1 + $0x474] sm:$0xf0]  ;;  %v1839_v10 = vld [vmem:[%s2952_s1 + $0x74] sm:$0xf]  ;;  %v1300_v11 = vld [vmem:[%s2952_s1 + $0x78] sm:$0xf0] }
  0x2f   :  { %1040 = vmatpush.bf16.msrb.mxu3 %v1731_v19  ;;  %v1855_v13 = vld [vmem:[%s2952_s1 + $0xf4] sm:$0xf]  ;;  %v1364_v15 = vld [vmem:[%s2952_s1 + $0xf8] sm:$0xf0]  ;;  %v1690_v16 = vld [vmem:[%s2952_s1 + $0x380] sm:$0xf]  ;;  %v1811_v26 = vor.u32 %v1968_v9, %v1810_v6  ;;  %v1303_v30 = vor.u32 %v1839_v10, %v1300_v11 }
  0x30   :  { %999 = vmatpush.bf16.msrb.mxu0 %v1531_v24  ;;  %v1938_v17 = vld [vmem:[%s2952_s1 + $0x384] sm:$0xf0]  ;;  %v1222_v18 = vld [vmem:[%s2953_s0 + $0x10] sm:$0xf]  ;;  %v1822_v19 = vld [vmem:[%s2953_s0 + $0x30] sm:$0xf0] }
  0x31   :  { %1013 = vmatpush.bf16.msrb.mxu1 %v1595_v25  ;;  %v1230_v22 = vld [vmem:[%s2953_s0 + $0x18] sm:$0xf]  ;;  %v1823_v23 = vld [vmem:[%s2953_s0 + $0x38] sm:$0xf0]  ;;  %v1871_v24 = vld [vmem:[%s2952_s1 + $0x174] sm:$0xf]  ;;  %v1627_v25 = vor.u32 %v1922_v5, %v1626_v4  ;;  %v1691_v35 = vor.u32 %v1938_v17, %v1690_v16 }
  0x32   :  { %1027 = vmatpush.bf16.msrb.mxu2 %v1659_v27  ;;  %v1428_v27 = vld [vmem:[%s2952_s1 + $0x178] sm:$0xf0]  ;;  %v1818_v28 = vld [vmem:[%s2953_s0 + $0x14] sm:$0xf]  ;;  %v1224_v29 = vld [vmem:[%s2953_s0 + $0x34] sm:$0xf0]  ;;  %v2471_v40 = vor.u32 %v1823_v23, %v1230_v22 }
  0x33   :  { %1041 = vmatpush.bf16.msrb.mxu3 %v1723_v31  ;;  %v1367_v31 = vor.u32 %v1855_v13, %v1364_v15  ;;  %v1819_v32 = vld [vmem:[%s2953_s0 + $0x1c] sm:$0xf]  ;;  %v1802_v33 = vld [vmem:[%s2952_s1 + $0x460] sm:$0xf]  ;;  %v1966_v34 = vld [vmem:[%s2952_s1 + $0x464] sm:$0xf0]  ;;  %v1431_v41 = vor.u32 %v1871_v24, %v1428_v27  ;;  %v2479_v44 = vor.u32 %v1818_v28, %v1224_v29 }
  0x34   :  { %1000 = vmatpush.bf16.msrb.mxu0 %v1523_v36  ;;  %v2460_v36 = vor.u32 %v1822_v19, %v1222_v18  ;;  %v1837_v38 = vld [vmem:[%s2952_s1 + $0x64] sm:$0xf]  ;;  %v1803_v45 = vor.u32 %v1966_v34, %v1802_v33  ;;  %v1420_v47 = vld [vmem:[%s2952_s1 + $0x168] sm:$0xf0]  ;;  %v1794_v50 = vld [vmem:[%s2952_s1 + $0x450] sm:$0xf] }
  0x35   :  { %1014 = vmatpush.bf16.msrb.mxu1 %v1587_v37  ;;  %v1232_v37 = vld [vmem:[%s2953_s0 + $0x3c] sm:$0xf0]  ;;  %v1853_v42 = vld [vmem:[%s2952_s1 + $0xe4] sm:$0xf]  ;;  %v1964_v51 = vld [vmem:[%s2952_s1 + $0x454] sm:$0xf0] }
  0x36   :  { %1028 = vmatpush.bf16.msrb.mxu2 %v1651_v39  ;;  %v1292_v39 = vld [vmem:[%s2952_s1 + $0x68] sm:$0xf0]  ;;  %v1869_v46 = vld [vmem:[%s2952_s1 + $0x164] sm:$0xf]  ;;  %v1835_v53 = vld [vmem:[%s2952_s1 + $0x54] sm:$0xf]  ;;  %v1795_v58 = vor.u32 %v1964_v51, %v1794_v50 }
  0x37   :  { %1042 = vmatpush.bf16.msrb.mxu3 %v1715_v43  ;;  %v1356_v43 = vld [vmem:[%s2952_s1 + $0xe8] sm:$0xf0]  ;;  %v1284_v54 = vld [vmem:[%s2952_s1 + $0x58] sm:$0xf0]  ;;  %v1423_v55 = vor.u32 %v1869_v46, %v1420_v47  ;;  %v1867_v59 = vld [vmem:[%s2952_s1 + $0x154] sm:$0xf] }
  0x38   :  { %1001 = vmatpush.bf16.msrb.mxu0 %v1515_v48  ;;  %v2487_v48 = vor.u32 %v1819_v32, %v1232_v37  ;;  %v1348_v57 = vld [vmem:[%s2952_s1 + $0xd8] sm:$0xf0]  ;;  %v1287_v62 = vor.u32 %v1835_v53, %v1284_v54  ;;  %v1786_v63 = vld [vmem:[%s2952_s1 + $0x440] sm:$0xf]  ;;  %v1962_v0 = vld [vmem:[%s2952_s1 + $0x444] sm:$0xf0] }
  0x39   :  { %1015 = vmatpush.bf16.msrb.mxu1 %v1579_v49  ;;  %v1295_v49 = vor.u32 %v1837_v38, %v1292_v39  ;;  %v1412_v61 = vld [vmem:[%s2952_s1 + $0x158] sm:$0xf0]  ;;  %v1276_v4 = vld [vmem:[%s2952_s1 + $0x48] sm:$0xf0]  ;;  %v1849_v6 = vld [vmem:[%s2952_s1 + $0xc4] sm:$0xf]  ;;  %v1787_v9 = vor.u32 %v1962_v0, %v1786_v63 }
  0x3a   :  { %1029 = vmatpush.bf16.msrb.mxu2 %v1643_v52  ;;  %v1359_v52 = vor.u32 %v1853_v42, %v1356_v43  ;;  %v1415_v5 = vor.u32 %v1867_v59, %v1412_v61  ;;  %v1865_v10 = vld [vmem:[%s2952_s1 + $0x144] sm:$0xf]  ;;  %v1404_v11 = vld [vmem:[%s2952_s1 + $0x148] sm:$0xf0]  ;;  %v1778_v13 = vld [vmem:[%s2952_s1 + $0x430] sm:$0xf] }
  0x3b   :  { %1043 = vmatpush.bf16.msrb.mxu3 %v1707_v56  ;;  %v1851_v56 = vld [vmem:[%s2952_s1 + $0xd4] sm:$0xf]  ;;  %v1960_v15 = vld [vmem:[%s2952_s1 + $0x434] sm:$0xf0]  ;;  %v1268_v18 = vld [vmem:[%s2952_s1 + $0x38] sm:$0xf0]  ;;  %v1407_v19 = vor.u32 %v1865_v10, %v1404_v11 }
  0x3c   :  { %1002 = vmatpush.bf16.msrb.mxu0 %v1507_v1  ;;  %v1351_v1 = vor.u32 %v1851_v56, %v1348_v57  ;;  %v1831_v17 = vld [vmem:[%s2952_s1 + $0x34] sm:$0xf]  ;;  %v1779_v22 = vor.u32 %v1960_v15, %v1778_v13  ;;  %v1396_v24 = vld [vmem:[%s2952_s1 + $0x138] sm:$0xf0]  ;;  %v1958_v27 = vld [vmem:[%s2952_s1 + $0x424] sm:$0xf0] }
  0x3d   :  { %1016 = vmatpush.bf16.msrb.mxu1 %v1571_v3  ;;  %v1833_v3 = vld [vmem:[%s2952_s1 + $0x44] sm:$0xf]  ;;  %v1863_v23 = vld [vmem:[%s2952_s1 + $0x134] sm:$0xf]  ;;  %v1324_v33 = vld [vmem:[%s2952_s1 + $0xa8] sm:$0xf0] }
  0x3e   :  { %1030 = vmatpush.bf16.msrb.mxu2 %v1635_v7  ;;  %v1340_v7 = vld [vmem:[%s2952_s1 + $0xc8] sm:$0xf0]  ;;  %v1829_v29 = vld [vmem:[%s2952_s1 + $0x24] sm:$0xf]  ;;  %v1762_v39 = vld [vmem:[%s2952_s1 + $0x410] sm:$0xf] }
  0x3f   :  { %1044 = vmatpush.bf16.msrb.mxu3 %v1699_v12  ;;  %v1279_v12 = vor.u32 %v1833_v3, %v1276_v4  ;;  %v1343_v16 = vor.u32 %v1849_v6, %v1340_v7  ;;  %v1845_v32 = vld [vmem:[%s2952_s1 + $0xa4] sm:$0xf]  ;;  %v1388_v37 = vld [vmem:[%s2952_s1 + $0x128] sm:$0xf0]  ;;  %v1827_v43 = vld [vmem:[%s2952_s1 + $0x14] sm:$0xf] }
  0x40   :  { %1003 = vmatpush.bf16.msrb.mxu0 %v1499_v20  ;;  %v1847_v20 = vld [vmem:[%s2952_s1 + $0xb4] sm:$0xf]  ;;  %v1327_v42 = vor.u32 %v1845_v32, %v1324_v33  ;;  %v1380_v51 = vld [vmem:[%s2952_s1 + $0x118] sm:$0xf0]  ;;  %v1754_v53 = vld [vmem:[%s2952_s1 + $0x400] sm:$0xf] }
  0x41   :  { %1017 = vmatpush.bf16.msrb.mxu1 %v1563_v21  ;;  %v1332_v21 = vld [vmem:[%s2952_s1 + $0xb8] sm:$0xf0]  ;;  %v1843_v46 = vld [vmem:[%s2952_s1 + $0x94] sm:$0xf]  ;;  %v1954_v54 = vld [vmem:[%s2952_s1 + $0x404] sm:$0xf0] }
  0x42   :  { %1031 = vmatpush.bf16.msrb.mxu2 %v1627_v25  ;;  %v1271_v25 = vor.u32 %v1831_v17, %v1268_v18  ;;  %v1335_v28 = vor.u32 %v1847_v20, %v1332_v21  ;;  %v1859_v50 = vld [vmem:[%s2952_s1 + $0x114] sm:$0xf]  ;;  %v1244_v57 = vld [vmem:[%s2952_s1 + $0x8] sm:$0xf0]  ;;  %v1492_v63 = vld [vmem:[%s2952_s1 + $0x1f8] sm:$0xf0]  ;;  %v1755_v6 = vor.u32 %v1954_v54, %v1754_v53 }
  0x43   :  { %1045 = vmatpush.bf16.msrb.mxu3 %v1691_v35  ;;  %1004 = vmatmul.bf16.vlgmr.msrb.gmra.mxu0 %v2460_v36  ;;  %v1861_v35 = vld [vmem:[%s2952_s1 + $0x124] sm:$0xf]  ;;  %v1308_v59 = vld [vmem:[%s2952_s1 + $0x88] sm:$0xf0]  ;;  %v1903_v0 = vld [vmem:[%s2952_s1 + $0x274] sm:$0xf] }
  0x44   :  { %1052 = vmatpush.bf16.msra.mxu0 %v1811_v26  ;;  %1018 = vmatmul.bf16.vlgmr.msrb.gmra.mxu1 %v2479_v44  ;;  %v1770_v26 = vld [vmem:[%s2952_s1 + $0x420] sm:$0xf]  ;;  %v1391_v47 = vor.u32 %v1861_v35, %v1388_v37  ;;  %v1556_v3 = vld [vmem:[%s2952_s1 + $0x278] sm:$0xf0]  ;;  %v1919_v4 = vld [vmem:[%s2952_s1 + $0x2f4] sm:$0xf] }
  0x45   :  { %1066 = vmatpush.bf16.msra.mxu1 %v1303_v30  ;;  %1032 = vmatmul.bf16.vlgmr.msrb.gmra.mxu2 %v2471_v40  ;;  %v1260_v30 = vld [vmem:[%s2952_s1 + $0x28] sm:$0xf0]  ;;  %v1771_v34 = vor.u32 %v1958_v27, %v1770_v26  ;;  %v1857_v7 = vld [vmem:[%s2952_s1 + $0x104] sm:$0xf]  ;;  %v1238_v10 = vld [vmem:[%s2953_s0 + $0x20] sm:$0xf]  ;;  %v1559_v18 = vor.u32 %v1903_v0, %v1556_v3 }
  0x46   :  { %1080 = vmatpush.bf16.msra.mxu2 %v1367_v31  ;;  %1046 = vmatmul.bf16.vlgmr.msrb.gmra.mxu3 %v2487_v48  ;;  %v1399_v31 = vor.u32 %v1863_v23, %v1396_v24  ;;  %v1263_v38 = vor.u32 %v1829_v29, %v1260_v30  ;;  %v1824_v13 = vld [vmem:[%s2953_s0 + $0x40] sm:$0xf0]  ;;  %v1935_v15 = vld [vmem:[%s2952_s1 + $0x374] sm:$0xf]  ;;  %v1484_v20 = vld [vmem:[%s2952_s1 + $0x1e8] sm:$0xf0] }
  0x47   :  { %1094 = vmatpush.bf16.msra.mxu3 %v1431_v41  ;;  %v1956_v41 = vld [vmem:[%s2952_s1 + $0x414] sm:$0xf0]  ;;  %v1901_v23 = vld [vmem:[%s2952_s1 + $0x264] sm:$0xf]  ;;  %v1548_v24 = vld [vmem:[%s2952_s1 + $0x268] sm:$0xf0] }
  0x48   :  { %1053 = vmatpush.bf16.msra.mxu0 %v1803_v45  ;;  %v1252_v45 = vld [vmem:[%s2952_s1 + $0x18] sm:$0xf0]  ;;  %v1917_v27 = vld [vmem:[%s2952_s1 + $0x2e4] sm:$0xf]  ;;  %v1551_v32 = vor.u32 %v1901_v23, %v1548_v24  ;;  %v1883_v33 = vld [vmem:[%s2952_s1 + $0x1d4] sm:$0xf] }
  0x49   :  { %1067 = vmatpush.bf16.msra.mxu1 %v1295_v49  ;;  %v1316_v49 = vld [vmem:[%s2952_s1 + $0x98] sm:$0xf0]  ;;  %v1255_v56 = vor.u32 %v1827_v43, %v1252_v45  ;;  %v1933_v30 = vld [vmem:[%s2952_s1 + $0x364] sm:$0xf]  ;;  %v1899_v37 = vld [vmem:[%s2952_s1 + $0x254] sm:$0xf] }
  0x4a   :  { %1081 = vmatpush.bf16.msra.mxu2 %v1359_v52  ;;  %v1763_v52 = vor.u32 %v1956_v41, %v1762_v39  ;;  %v1319_v61 = vor.u32 %v1843_v46, %v1316_v49  ;;  %v1915_v41 = vld [vmem:[%s2952_s1 + $0x2d4] sm:$0xf]  ;;  %v1668_v46 = vld [vmem:[%s2952_s1 + $0x358] sm:$0xf0]  ;;  %v1881_v49 = vld [vmem:[%s2952_s1 + $0x1c4] sm:$0xf] }
  0x4b   :  { %1095 = vmatpush.bf16.msra.mxu3 %v1423_v55  ;;  %v1825_v55 = vld [vmem:[%s2952_s1 + $0x4] sm:$0xf]  ;;  %v1931_v45 = vld [vmem:[%s2952_s1 + $0x354] sm:$0xf]  ;;  %v1588_v3 = vld [vmem:[%s2952_s1 + $0x2b8] sm:$0xf0] }
  0x4c   :  { %1054 = vmatpush.bf16.msra.mxu0 %v1795_v58  ;;  %v1841_v58 = vld [vmem:[%s2952_s1 + $0x84] sm:$0xf]  ;;  %v1247_v11 = vor.u32 %v1825_v55, %v1244_v57  ;;  %v1671_v53 = vor.u32 %v1931_v45, %v1668_v46  ;;  %v1444_v23 = vld [vmem:[%s2952_s1 + $0x198] sm:$0xf0] }
  0x4d   :  { %1068 = vmatpush.bf16.msra.mxu1 %v1287_v62  ;;  %v1887_v62 = vld [vmem:[%s2952_s1 + $0x1f4] sm:$0xf]  ;;  %v1311_v17 = vor.u32 %v1841_v58, %v1308_v59  ;;  %v1913_v54 = vld [vmem:[%s2952_s1 + $0x2c4] sm:$0xf]  ;;  %v1460_v59 = vld [vmem:[%s2952_s1 + $0x1b8] sm:$0xf0] }
  0x4e   :  { %1082 = vmatpush.bf16.msra.mxu2 %v1351_v1  ;;  %v1383_v1 = vor.u32 %v1859_v50, %v1380_v51  ;;  %v1468_v50 = vld [vmem:[%s2952_s1 + $0x1c8] sm:$0xf0]  ;;  %v1879_v58 = vld [vmem:[%s2952_s1 + $0x1b4] sm:$0xf]  ;;  %v1748_v45 = vld [vmem:[%s2952_s1 + $0x3f8] sm:$0xf0] }
  0x4f   :  { %1096 = vmatpush.bf16.msra.mxu3 %v1415_v5  ;;  %v1620_v5 = vld [vmem:[%s2952_s1 + $0x2f8] sm:$0xf0]  ;;  %v1471_v55 = vor.u32 %v1881_v49, %v1468_v50  ;;  %v1967_v49 = vld [vmem:[%s2952_s1 + $0x474] sm:$0xf] }
  0x50   :  { %1055 = vmatpush.bf16.msra.mxu0 %v1787_v9  ;;  %v1372_v9 = vld [vmem:[%s2952_s1 + $0x108] sm:$0xf0]  ;;  %v1623_v21 = vor.u32 %v1919_v4, %v1620_v5  ;;  %v1463_v4 = vor.u32 %v1879_v58, %v1460_v59  ;;  %v1927_v5 = vld [vmem:[%s2952_s1 + $0x334] sm:$0xf]  ;;  %v1812_v50 = vld [vmem:[%s2952_s1 + $0x478] sm:$0xf0] }
  0x51   :  { %1069 = vmatpush.bf16.msra.mxu1 %v1279_v12  ;;  %v1495_v12 = vor.u32 %v1887_v62, %v1492_v63  ;;  %v1895_v62 = vld [vmem:[%s2952_s1 + $0x234] sm:$0xf]  ;;  %v1524_v63 = vld [vmem:[%s2952_s1 + $0x238] sm:$0xf0]  ;;  %v1965_v58 = vld [vmem:[%s2952_s1 + $0x464] sm:$0xf] }
  0x52   :  { %1083 = vmatpush.bf16.msra.mxu2 %v1343_v16  ;;  %v1684_v16 = vld [vmem:[%s2952_s1 + $0x378] sm:$0xf0]  ;;  %v1804_v59 = vld [vmem:[%s2952_s1 + $0x468] sm:$0xf0] }
  0x53   :  { %1097 = vmatpush.bf16.msra.mxu3 %v1407_v19  ;;  %v1885_v19 = vld [vmem:[%s2952_s1 + $0x1e4] sm:$0xf]  ;;  %v1687_v26 = vor.u32 %v1935_v15, %v1684_v16 }
  0x54   :  { %1056 = vmatpush.bf16.msra.mxu0 %v1779_v22  ;;  %v1375_v22 = vor.u32 %v1857_v7, %v1372_v9  ;;  %v1487_v29 = vor.u32 %v1885_v19, %v1484_v20  ;;  %v1527_v7 = vor.u32 %v1895_v62, %v1524_v63  ;;  %v1877_v9 = vld [vmem:[%s2952_s1 + $0x1a4] sm:$0xf]  ;;  %v1644_v20 = vld [vmem:[%s2952_s1 + $0x328] sm:$0xf0]  ;;  %v1807_v62 = vor.u32 %v1965_v58, %v1804_v59  ;;  %v1947_v63 = vld [vmem:[%s2952_s1 + $0x3d4] sm:$0xf] }
  0x55   :  { %1070 = vmatpush.bf16.msra.mxu1 %v1271_v25  ;;  %v2679_v25 = vor.u32 %v1824_v13, %v1238_v10  ;;  %v1452_v10 = vld [vmem:[%s2952_s1 + $0x1a8] sm:$0xf0]  ;;  %v1909_v16 = vld [vmem:[%s2952_s1 + $0x2a4] sm:$0xf] }
  0x56   :  { %1084 = vmatpush.bf16.msra.mxu2 %v1335_v28  ;;  %v1612_v28 = vld [vmem:[%s2952_s1 + $0x2e8] sm:$0xf0]  ;;  %v1925_v19 = vld [vmem:[%s2952_s1 + $0x324] sm:$0xf] }
  0x57   :  { %1098 = vmatpush.bf16.msra.mxu3 %v1399_v31  ;;  %v1676_v31 = vld [vmem:[%s2952_s1 + $0x368] sm:$0xf0]  ;;  %v1615_v35 = vor.u32 %v1917_v27, %v1612_v28  ;;  %v1508_v27 = vld [vmem:[%s2952_s1 + $0x218] sm:$0xf0]  ;;  %v1647_v28 = vor.u32 %v1925_v19, %v1644_v20 }
  0x58   :  { %1057 = vmatpush.bf16.msra.mxu0 %v1771_v34  ;;  %v1476_v34 = vld [vmem:[%s2952_s1 + $0x1d8] sm:$0xf0]  ;;  %v1679_v39 = vor.u32 %v1933_v30, %v1676_v31  ;;  %v1516_v13 = vld [vmem:[%s2952_s1 + $0x228] sm:$0xf0] }
  0x59   :  { %1071 = vmatpush.bf16.msra.mxu1 %v1263_v38  ;;  %v1540_v38 = vld [vmem:[%s2952_s1 + $0x258] sm:$0xf0]  ;;  %v1479_v43 = vor.u32 %v1883_v33, %v1476_v34  ;;  %v1873_v34 = vld [vmem:[%s2952_s1 + $0x184] sm:$0xf]  ;;  %v1772_v19 = vld [vmem:[%s2952_s1 + $0x428] sm:$0xf0] }
  0x5a   :  { %1085 = vmatpush.bf16.msra.mxu2 %v1327_v42  ;;  %v1604_v42 = vld [vmem:[%s2952_s1 + $0x2d8] sm:$0xf0] }
  0x5b   :  { %1099 = vmatpush.bf16.msra.mxu3 %v1391_v47  ;;  %v1543_v47 = vor.u32 %v1899_v37, %v1540_v38  ;;  %v1607_v51 = vor.u32 %v1915_v41, %v1604_v42  ;;  %v1572_v30 = vld [vmem:[%s2952_s1 + $0x298] sm:$0xf0]  ;;  %v1436_v37 = vld [vmem:[%s2952_s1 + $0x188] sm:$0xf0]  ;;  %v1889_v38 = vld [vmem:[%s2952_s1 + $0x204] sm:$0xf] }
  0x5c   :  { %1058 = vmatpush.bf16.msra.mxu0 %v1763_v52  ;;  %v1897_v52 = vld [vmem:[%s2952_s1 + $0x244] sm:$0xf]  ;;  %v1636_v33 = vld [vmem:[%s2952_s1 + $0x318] sm:$0xf0] }
  0x5d   :  { %1072 = vmatpush.bf16.msra.mxu1 %v1255_v56  ;;  %v1929_v56 = vld [vmem:[%s2952_s1 + $0x344] sm:$0xf] }
  0x5e   :  { %1086 = vmatpush.bf16.msra.mxu2 %v1319_v61  ;;  %v1905_v42 = vld [vmem:[%s2952_s1 + $0x284] sm:$0xf] }
  0x5f   :  { %1100 = vmatpush.bf16.msra.mxu3 %v1383_v1  ;;  %v1911_v1 = vld [vmem:[%s2952_s1 + $0x2b4] sm:$0xf] }
  0x60   :  { %1059 = vmatpush.bf16.msra.mxu0 %v1755_v6  ;;  %v1652_v6 = vld [vmem:[%s2952_s1 + $0x338] sm:$0xf0] }
  0x61   :  { %1073 = vmatpush.bf16.msra.mxu1 %v1247_v11  ;;  %v1591_v11 = vor.u32 %v1911_v1, %v1588_v3  ;;  %v1655_v15 = vor.u32 %v1927_v5, %v1652_v6  ;;  %v1963_v1 = vld [vmem:[%s2952_s1 + $0x454] sm:$0xf]  ;;  %v1796_v3 = vld [vmem:[%s2952_s1 + $0x458] sm:$0xf0]  ;;  %v1724_v6 = vld [vmem:[%s2952_s1 + $0x3c8] sm:$0xf0] }
  0x62   :  { %1087 = vmatpush.bf16.msra.mxu2 %v1311_v17  ;;  %v1580_v17 = vld [vmem:[%s2952_s1 + $0x2a8] sm:$0xf0]  ;;  %v1799_v5 = vor.u32 %v1963_v1, %v1796_v3 }
  0x63   :  { %1101 = vmatpush.bf16.msra.mxu3 %v1375_v22  ;;  %1060 = vmatmul.bf16.vlgmr.msra.gmra.mxu0 %v2679_v25  ;;  %v1875_v22 = vld [vmem:[%s2952_s1 + $0x194] sm:$0xf]  ;;  %v1583_v24 = vor.u32 %v1909_v16, %v1580_v17  ;;  %v1941_v16 = vld [vmem:[%s2952_s1 + $0x3a4] sm:$0xf]  ;;  %v1708_v17 = vld [vmem:[%s2952_s1 + $0x3a8] sm:$0xf0] }
  0x64   :  { %1108 = vmatpush.bf16.msrb.mxu0 %v1495_v12  ;;  %1074 = vmatmul.bf16.vlgmr.msra.gmra.mxu1 %v2247_v60  ;;  %v1660_v60 = vld [vmem:[%s2952_s1 + $0x348] sm:$0xf0]  ;;  %v1893_v12 = vld [vmem:[%s2952_s1 + $0x224] sm:$0xf]  ;;  %v1447_v31 = vor.u32 %v1875_v22, %v1444_v23  ;;  %v1711_v20 = vor.u32 %v1941_v16, %v1708_v17  ;;  %v1939_v22 = vld [vmem:[%s2952_s1 + $0x394] sm:$0xf] }
  0x65   :  { %1122 = vmatpush.bf16.msrb.mxu1 %v1559_v18  ;;  %1088 = vmatmul.bf16.vlgmr.msra.gmra.mxu2 %v2277_v8  ;;  %v1532_v8 = vld [vmem:[%s2952_s1 + $0x248] sm:$0xf0]  ;;  %v1663_v0 = vor.u32 %v1929_v56, %v1660_v60  ;;  %v1455_v18 = vor.u32 %v1877_v9, %v1452_v10  ;;  %v1949_v56 = vld [vmem:[%s2952_s1 + $0x3e4] sm:$0xf]  ;;  %v1943_v9 = vld [vmem:[%s2952_s1 + $0x3b4] sm:$0xf] }
  0x66   :  { %1136 = vmatpush.bf16.msrb.mxu2 %v1623_v21  ;;  %1102 = vmatmul.bf16.vlgmr.msra.gmra.mxu3 %v2261_v2  ;;  %v1596_v2 = vld [vmem:[%s2952_s1 + $0x2c8] sm:$0xf0]  ;;  %v1535_v57 = vor.u32 %v1897_v52, %v1532_v8  ;;  %v1519_v21 = vor.u32 %v1893_v12, %v1516_v13  ;;  %v1921_v52 = vld [vmem:[%s2952_s1 + $0x304] sm:$0xf]  ;;  %v1716_v10 = vld [vmem:[%s2952_s1 + $0x3b8] sm:$0xf0] }
  0x67   :  { %1150 = vmatpush.bf16.msrb.mxu3 %v1687_v26  ;;  %v1599_v61 = vor.u32 %v1913_v54, %v1596_v2  ;;  %v1891_v26 = vld [vmem:[%s2952_s1 + $0x214] sm:$0xf]  ;;  %v1628_v8 = vld [vmem:[%s2952_s1 + $0x308] sm:$0xf0]  ;;  %v1780_v12 = vld [vmem:[%s2952_s1 + $0x438] sm:$0xf0]  ;;  %v1719_v13 = vor.u32 %v1943_v9, %v1716_v10 }
  0x68   :  { %1109 = vmatpush.bf16.msrb.mxu0 %v1487_v29  ;;  %v1907_v29 = vld [vmem:[%s2952_s1 + $0x294] sm:$0xf]  ;;  %v1740_v60 = vld [vmem:[%s2952_s1 + $0x3e8] sm:$0xf0]  ;;  %v1700_v23 = vld [vmem:[%s2952_s1 + $0x398] sm:$0xf0] }
  0x69   :  { %1123 = vmatpush.bf16.msrb.mxu1 %v1551_v32  ;;  %v1923_v32 = vld [vmem:[%s2952_s1 + $0x314] sm:$0xf]  ;;  %v1575_v41 = vor.u32 %v1907_v29, %v1572_v30  ;;  %v1937_v29 = vld [vmem:[%s2952_s1 + $0x384] sm:$0xf]  ;;  %v1692_v30 = vld [vmem:[%s2952_s1 + $0x388] sm:$0xf0] }
  0x6a   :  { %1137 = vmatpush.bf16.msrb.mxu2 %v1615_v35  ;;  %v1511_v35 = vor.u32 %v1891_v26, %v1508_v27  ;;  %v1639_v46 = vor.u32 %v1923_v32, %v1636_v33  ;;  %v1764_v26 = vld [vmem:[%s2952_s1 + $0x418] sm:$0xf0]  ;;  %v1703_v27 = vor.u32 %v1939_v22, %v1700_v23  ;;  %v1756_v32 = vld [vmem:[%s2952_s1 + $0x408] sm:$0xf0]  ;;  %v1695_v33 = vor.u32 %v1937_v29, %v1692_v30 }
  0x6b   :  { %1151 = vmatpush.bf16.msrb.mxu3 %v1679_v39  ;;  %v1500_v39 = vld [vmem:[%s2952_s1 + $0x208] sm:$0xf0] }
  0x6c   :  { %1110 = vmatpush.bf16.msrb.mxu0 %v1479_v43  ;;  %v1951_v43 = vld [vmem:[%s2952_s1 + $0x3f4] sm:$0xf] }
  0x6d   :  { %1124 = vmatpush.bf16.msrb.mxu1 %v1543_v47  ;;  %v1564_v47 = vld [vmem:[%s2952_s1 + $0x288] sm:$0xf0]  ;;  %v1751_v54 = vor.u32 %v1951_v43, %v1748_v45 }
  0x6e   :  { %1138 = vmatpush.bf16.msrb.mxu2 %v1607_v51  ;;  %v1439_v51 = vor.u32 %v1873_v34, %v1436_v37  ;;  %v1567_v2 = vor.u32 %v1905_v42, %v1564_v47 }
  0x6f   :  { %1152 = vmatpush.bf16.msrb.mxu3 %v1671_v53  ;;  %v1503_v53 = vor.u32 %v1889_v38, %v1500_v39 }
  0x70   :  { %1111 = vmatpush.bf16.msrb.mxu0 %v1471_v55  ;;  %v1815_v55 = vor.u32 %v1967_v49, %v1812_v50 }
  0x71   :  { %1125 = vmatpush.bf16.msrb.mxu1 %v1535_v57  ;;  %v1631_v57 = vor.u32 %v1921_v52, %v1628_v8 }
  0x72   :  { %1139 = vmatpush.bf16.msrb.mxu2 %v1599_v61  ;;  %v1743_v61 = vor.u32 %v1949_v56, %v1740_v60 }
  0x73   :  { %1153 = vmatpush.bf16.msrb.mxu3 %v1663_v0  ;;  %v1732_v0 = vld [vmem:[%s2952_s1 + $0x3d8] sm:$0xf0] }
  0x74   :  { %1112 = vmatpush.bf16.msrb.mxu0 %v1463_v4  ;;  %v1735_v4 = vor.u32 %v1947_v63, %v1732_v0 }
  0x75   :  { %1126 = vmatpush.bf16.msrb.mxu1 %v1527_v7 }
  0x76   :  { %1140 = vmatpush.bf16.msrb.mxu2 %v1591_v11  ;;  %v1959_v11 = vld [vmem:[%s2952_s1 + $0x434] sm:$0xf] }
  0x77   :  { %1154 = vmatpush.bf16.msrb.mxu3 %v1655_v15  ;;  %v1783_v15 = vor.u32 %v1959_v11, %v1780_v12 }
  0x78   :  { %1113 = vmatpush.bf16.msrb.mxu0 %v1455_v18  ;;  %v1957_v18 = vld [vmem:[%s2952_s1 + $0x424] sm:$0xf] }
  0x79   :  { %1127 = vmatpush.bf16.msrb.mxu1 %v1519_v21  ;;  %v1775_v21 = vor.u32 %v1957_v18, %v1772_v19 }
  0x7a   :  { %1141 = vmatpush.bf16.msrb.mxu2 %v1583_v24  ;;  %v1955_v24 = vld [vmem:[%s2952_s1 + $0x414] sm:$0xf] }
  0x7b   :  { %1155 = vmatpush.bf16.msrb.mxu3 %v1647_v28  ;;  %v1767_v28 = vor.u32 %v1955_v24, %v1764_v26 }
  0x7c   :  { %1114 = vmatpush.bf16.msrb.mxu0 %v1447_v31  ;;  %v1953_v31 = vld [vmem:[%s2952_s1 + $0x404] sm:$0xf] }
  0x7d   :  { %1128 = vmatpush.bf16.msrb.mxu1 %v1511_v35  ;;  %v1759_v34 = vor.u32 %v1953_v31, %v1756_v32 }
  0x7e   :  { %1142 = vmatpush.bf16.msrb.mxu2 %v1575_v41 }
  0x7f   :  { %1156 = vmatpush.bf16.msrb.mxu3 %v1639_v46 }
  0x80   :  { %1115 = vmatpush.bf16.msrb.mxu0 %v1439_v51 }
  0x81   :  { %1129 = vmatpush.bf16.msrb.mxu1 %v1503_v53 }
  0x82   :  { %1143 = vmatpush.bf16.msrb.mxu2 %v1567_v2 }
  0x83   :  { %1157 = vmatpush.bf16.msrb.mxu3 %v1631_v57  ;;  %1116 = vmatmul.bf16.vlgmr.msrb.gmra.mxu0 %v2288_v14  ;;  %v1945_v14 = vld [vmem:[%s2952_s1 + $0x3c4] sm:$0xf] }
  0x84   :  { %1164 = vmatpush.bf16.msra.mxu0 %v1751_v54  ;;  %1130 = vmatmul.bf16.vlgmr.msrb.gmra.mxu1 %v2460_v36  ;;  %v1961_v36 = vld [vmem:[%s2952_s1 + $0x444] sm:$0xf] }
  0x85   :  { %1178 = vmatpush.bf16.msra.mxu1 %v1815_v55  ;;  %1144 = vmatmul.bf16.vlgmr.msrb.gmra.mxu2 %v2479_v44  ;;  %v1788_v44 = vld [vmem:[%s2952_s1 + $0x448] sm:$0xf0] }
  0x86   :  { %1158 = vmatmul.bf16.vlgmr.msrb.gmra.mxu3 %v2471_v40  ;;  %v1727_v40 = vor.u32 %v1945_v14, %v1724_v6  ;;  %v1791_v7 = vor.u32 %v1961_v36, %v1788_v44 }
  0x88   :  { %1165 = vmatpush.bf16.msra.mxu0 %v1743_v61 }
  0x89   :  { %1179 = vmatpush.bf16.msra.mxu1 %v1807_v62 }
  0x8c   :  { %1166 = vmatpush.bf16.msra.mxu0 %v1735_v4 }
  0x8d   :  { %1180 = vmatpush.bf16.msra.mxu1 %v1799_v5 }
  0x90   :  { %1167 = vmatpush.bf16.msra.mxu0 %v1727_v40 }
  0x91   :  { %1181 = vmatpush.bf16.msra.mxu1 %v1791_v7 }
  0x94   :  { %1168 = vmatpush.bf16.msra.mxu0 %v1719_v13 }
  0x95   :  { %1182 = vmatpush.bf16.msra.mxu1 %v1783_v15 }
  0x98   :  { %1169 = vmatpush.bf16.msra.mxu0 %v1711_v20 }
  0x99   :  { %1183 = vmatpush.bf16.msra.mxu1 %v1775_v21 }
  0x9c   :  { %1170 = vmatpush.bf16.msra.mxu0 %v1703_v27 }
  0x9d   :  { %1184 = vmatpush.bf16.msra.mxu1 %v1767_v28 }
  0xa0   :  { %1171 = vmatpush.bf16.msra.mxu0 %v1695_v33  ;;  %v949_v37 = vpop.f32.mrf.mxu0 }
  0xa1   :  { %1185 = vmatpush.bf16.msra.mxu1 %v1759_v34  ;;  %v963_v35 = vpop.f32.mrf.mxu1 }
  0xa3   :  { %1172 = vmatmul.bf16.vlgmr.msra.gmra.mxu0 %v2487_v48  ;;  %v168_v48 = vld [vmem:[%s2954_s2] sm:$0x3] }
  0xa4   :  { %1186 = vmatmul.bf16.vlgmr.msra.gmra.mxu1 %v2679_v25  ;;  %v170_v2 = vperm.slane %v168_v48, 0  ;;  %v171_v60 = vperm.slane %v168_v48, 1 }
  0xa6   :  { %v950_v56 = vadd.f32 %v949_v37, %v170_v2 }
  0xa8   :  { %v977_v38 = vpop.f32.mrf.mxu2  ;;  %v951_v41 = vpop.f32.mrf.mxu0  ;;  %v964_v61 = vadd.f32 %v963_v35, %v950_v56 }
  0xa9   :  { %v965_v39 = vpop.f32.mrf.mxu1  ;;  %v991_v42 = vpop.f32.mrf.mxu3  ;;  %v952_v4 = vadd.f32 %v951_v41, %v170_v2 }
  0xaa   :  { %v978_v63 = vadd.f32 %v977_v38, %v964_v61 }
  0xab   :  { %v966_v44 = vadd.f32 %v965_v39, %v952_v4 }
  0xac   :  { %v992_v5 = vadd.f32 %v991_v42, %v978_v63 }
  0xb0   :  { %v979_v43 = vpop.f32.mrf.mxu2 }
  0xb1   :  { %v993_v46 = vpop.f32.mrf.mxu3  ;;  %v980_v11 = vadd.f32 %v979_v43, %v966_v44 }
  0xb3   :  { %v994_v19 = vadd.f32 %v993_v46, %v980_v11 }
  0xc0   :  { %v1005_v47 = vpop.f32.mrf.mxu0 }
  0xc1   :  { %v1019_v45 = vpop.f32.mrf.mxu1  ;;  %v1006_v40 = vadd.f32 %v1005_v47, %v992_v5 }
  0xc3   :  { %v1020_v12 = vadd.f32 %v1019_v45, %v1006_v40 }
  0xc8   :  { %v1033_v49 = vpop.f32.mrf.mxu2  ;;  %v1007_v51 = vpop.f32.mrf.mxu0 }
  0xc9   :  { %v1021_v50 = vpop.f32.mrf.mxu1  ;;  %v1047_v52 = vpop.f32.mrf.mxu3  ;;  %v1034_v20 = vadd.f32 %v1033_v49, %v1020_v12  ;;  %v1008_v23 = vadd.f32 %v1007_v51, %v994_v19 }
  0xcb   :  { %v1048_v26 = vadd.f32 %v1047_v52, %v1034_v20  ;;  %v1022_v30 = vadd.f32 %v1021_v50, %v1008_v23 }
  0xd0   :  { %v1035_v8 = vpop.f32.mrf.mxu2 }
  0xd1   :  { %v1049_v54 = vpop.f32.mrf.mxu3  ;;  %v1036_v35 = vadd.f32 %v1035_v8, %v1022_v30 }
  0xd3   :  { %v1050_v43 = vadd.f32 %v1049_v54, %v1036_v35 }
  0xe0   :  { %v1061_v25 = vpop.f32.mrf.mxu0 }
  0xe1   :  { %v1075_v53 = vpop.f32.mrf.mxu1  ;;  %v1062_v31 = vadd.f32 %v1061_v25, %v1048_v26 }
  0xe2   :  { %v1076_v62 = vadd.f32 %v1075_v53, %v171_v60 }
  0xe3   :  { %v1192_v41 = vmax.f32 %v1062_v31, 0.0 }
  0xe8   :  { %v1089_v55 = vpop.f32.mrf.mxu2  ;;  %v1063_v58 = vpop.f32.mrf.mxu0 }
  0xe9   :  { %v1077_v57 = vpop.f32.mrf.mxu1  ;;  %v1103_v59 = vpop.f32.mrf.mxu3  ;;  %v1090_v0 = vadd.f32 %v1089_v55, %v1076_v62  ;;  %v1064_v49 = vadd.f32 %v1063_v58, %v1050_v43 }
  0xea   :  { %v1078_v7 = vadd.f32 %v1077_v57, %v171_v60 }
  0xeb   :  { %v1104_v14 = vadd.f32 %v1103_v59, %v1090_v0  ;;  %v1194_v53 = vmax.f32 %v1064_v49, 0.0 }
  0xf0   :  { %v1091_v1 = vpop.f32.mrf.mxu2 }
  0xf1   :  { %v1105_v36 = vpop.f32.mrf.mxu3  ;;  %v1092_v13 = vadd.f32 %v1091_v1, %v1078_v7 }
  0xf3   :  { %v1106_v21 = vadd.f32 %v1105_v36, %v1092_v13 }
 0x100   :  { %v1117_v3 = vpop.f32.mrf.mxu0 }
 0x101   :  { %v1131_v6 = vpop.f32.mrf.mxu1  ;;  %v1118_v9 = vadd.f32 %v1117_v3, %v1104_v14 }
 0x103   :  { %v1132_v15 = vadd.f32 %v1131_v6, %v1118_v9 }
 0x108   :  { %v1145_v10 = vpop.f32.mrf.mxu2  ;;  %v1119_v16 = vpop.f32.mrf.mxu0 }
 0x109   :  { %v1133_v17 = vpop.f32.mrf.mxu1  ;;  %v1159_v18 = vpop.f32.mrf.mxu3  ;;  %v1146_v22 = vadd.f32 %v1145_v10, %v1132_v15  ;;  %v1120_v24 = vadd.f32 %v1119_v16, %v1106_v21 }
 0x10b   :  { %v1160_v27 = vadd.f32 %v1159_v18, %v1146_v22  ;;  %v1134_v32 = vadd.f32 %v1133_v17, %v1120_v24 }
 0x110   :  { %v1147_v28 = vpop.f32.mrf.mxu2 }
 0x111   :  { %v1148_v37 = vadd.f32 %v1147_v28, %v1134_v32  ;;  %v1161_v39 = vpop.f32.mrf.mxu3 }
 0x113   :  { %v1162_v45 = vadd.f32 %v1161_v39, %v1148_v37 }
 0x120   :  { %v1173_v29 = vpop.f32.mrf.mxu0 }
 0x121   :  { %v1174_v33 = vadd.f32 %v1173_v29, %v1160_v27  ;;  %v1187_v34 = vpop.f32.mrf.mxu1 }
 0x123   :  { %v1188_v38 = vadd.f32 %v1187_v34, %v1174_v33 }
 0x125   :  { %v1193_v42 = vmax.f32 %v1188_v38, 0.0 }
 0x127   :  { %v1196_v46 = vpack.c.bf16 %v1193_v42, %v1192_v41 }
 0x128   :  { %v1175_v47 = vpop.f32.mrf.mxu0 }
 0x129   :  { %1198 = vst [vmem:[%s2955_s3] sm:$0xff] %v1196_v46  ;;  %v1176_v50 = vadd.f32 %v1175_v47, %v1162_v45  ;;  %v1189_v51 = vpop.f32.mrf.mxu1 }
 0x12b   :  { %v1190_v52 = vadd.f32 %v1189_v51, %v1176_v50 }
 0x12d   :  { %v1195_v48 = vmax.f32 %v1190_v52, 0.0 }
 0x12f   :  { %v1197_v8 = vpack.c.bf16 %v1195_v48, %v1194_v53 }
 0x131   :  { %1199 = vst [vmem:[%s2955_s3 + $0x8] sm:$0xff] %v1197_v8 }

// kernel: encoder_all_forward.31
= control target key start
LH: loop header
LB: loop body
LE: loop exit
PB: predicated region body
PF: predicated region fallthrough
CT: control target
= control target key end

     0   :  { %s5204_s1 = inlined_call_operand.vmem [shape: bf16[512,512], index: 1, kind: input, shape index: {}]   ;;  %s5205_s0 = inlined_call_operand.vmem [shape: bf16[16,512], index: 0, kind: input, shape index: {}]   ;;  %s5206_s3 = inlined_call_operand.vmem [shape: bf16[512,512], index: 3, kind: input, shape index: {}]   ;;  %s5207_s2 = inlined_call_operand.vmem [shape: f32[1,512], index: 2, kind: input, shape index: {}]   ;;  %s5208_s4 = inlined_call_operand.vmem [shape: f32[1,512], index: 4, kind: input, shape index: {}]   ;;  %s5209_s5 = inlined_call_operand.vmem [shape: bf16[16,512], index: 5, kind: output, shape index: {}]  }
   0x1   :  { %v2282_v0 = vld [vmem:[%s5204_s1 + $0xe0] sm:$0xf]  ;;  %v3226_v1 = vld [vmem:[%s5204_s1 + $0xec] sm:$0xf0] }
   0x2   :  { %v2410_v2 = vld [vmem:[%s5204_s1 + $0x1e0] sm:$0xf]  ;;  %v2283_v3 = vor.u32 %v3226_v1, %v2282_v0  ;;  %v3258_v4 = vld [vmem:[%s5204_s1 + $0x1ec] sm:$0xf0] }
   0x3   :  { %v2538_v5 = vld [vmem:[%s5204_s1 + $0x2e0] sm:$0xf]  ;;  %v3290_v6 = vld [vmem:[%s5204_s1 + $0x2ec] sm:$0xf0]  ;;  %v2411_v7 = vor.u32 %v3258_v4, %v2410_v2 }
   0x4   :  { %v2539_v8 = vor.u32 %v3290_v6, %v2538_v5  ;;  %v2666_v9 = vld [vmem:[%s5204_s1 + $0x3e0] sm:$0xf]  ;;  %v3322_v10 = vld [vmem:[%s5204_s1 + $0x3ec] sm:$0xf0]  ;;  %822 = vmatpush.bf16.msra.mxu0 %v2283_v3 }
   0x5   :  { %v2266_v11 = vld [vmem:[%s5204_s1 + $0xc0] sm:$0xf]  ;;  %v2667_v12 = vor.u32 %v3322_v10, %v2666_v9  ;;  %v3222_v13 = vld [vmem:[%s5204_s1 + $0xcc] sm:$0xf0]  ;;  %836 = vmatpush.bf16.msra.mxu1 %v2411_v7 }
   0x6   :  { %v2394_v14 = vld [vmem:[%s5204_s1 + $0x1c0] sm:$0xf]  ;;  %v3254_v15 = vld [vmem:[%s5204_s1 + $0x1cc] sm:$0xf0]  ;;  %850 = vmatpush.bf16.msra.mxu2 %v2539_v8  ;;  %v2267_v16 = vor.u32 %v3222_v13, %v2266_v11 }
   0x7   :  { %v2395_v17 = vor.u32 %v3254_v15, %v2394_v14  ;;  %v2522_v18 = vld [vmem:[%s5204_s1 + $0x2c0] sm:$0xf]  ;;  %v3286_v19 = vld [vmem:[%s5204_s1 + $0x2cc] sm:$0xf0]  ;;  %864 = vmatpush.bf16.msra.mxu3 %v2667_v12 }
   0x8   :  { %v2650_v20 = vld [vmem:[%s5204_s1 + $0x3c0] sm:$0xf]  ;;  %v2523_v21 = vor.u32 %v3286_v19, %v2522_v18  ;;  %v3318_v22 = vld [vmem:[%s5204_s1 + $0x3cc] sm:$0xf0]  ;;  %823 = vmatpush.bf16.msra.mxu0 %v2267_v16 }
   0x9   :  { %v2250_v23 = vld [vmem:[%s5204_s1 + $0xa0] sm:$0xf]  ;;  %v3218_v24 = vld [vmem:[%s5204_s1 + $0xac] sm:$0xf0]  ;;  %v2651_v25 = vor.u32 %v3318_v22, %v2650_v20  ;;  %837 = vmatpush.bf16.msra.mxu1 %v2395_v17 }
   0xa   :  { %v2378_v26 = vld [vmem:[%s5204_s1 + $0x1a0] sm:$0xf]  ;;  %v3250_v27 = vld [vmem:[%s5204_s1 + $0x1ac] sm:$0xf0]  ;;  %v2251_v29 = vor.u32 %v3218_v24, %v2250_v23  ;;  %851 = vmatpush.bf16.msra.mxu2 %v2523_v21 }
   0xb   :  { %v2506_v28 = vld [vmem:[%s5204_s1 + $0x2a0] sm:$0xf]  ;;  %v3282_v30 = vld [vmem:[%s5204_s1 + $0x2ac] sm:$0xf0]  ;;  %v2379_v33 = vor.u32 %v3250_v27, %v2378_v26  ;;  %865 = vmatpush.bf16.msra.mxu3 %v2651_v25  ;;  %v3224_v27 = vld [vmem:[%s5204_s1 + $0xe4] sm:$0xf] }
   0xc   :  { %v2634_v31 = vld [vmem:[%s5204_s1 + $0x3a0] sm:$0xf]  ;;  %v3314_v32 = vld [vmem:[%s5204_s1 + $0x3ac] sm:$0xf0]  ;;  %v2507_v34 = vor.u32 %v3282_v30, %v2506_v28  ;;  %824 = vmatpush.bf16.msra.mxu0 %v2251_v29  ;;  %v2284_v29 = vld [vmem:[%s5204_s1 + $0xf0] sm:$0xf0] }
   0xd   :  { %v2234_v35 = vld [vmem:[%s5204_s1 + $0x80] sm:$0xf]  ;;  %v3214_v36 = vld [vmem:[%s5204_s1 + $0x8c] sm:$0xf0]  ;;  %v2635_v38 = vor.u32 %v3314_v32, %v2634_v31  ;;  %838 = vmatpush.bf16.msra.mxu1 %v2379_v33  ;;  %v3256_v30 = vld [vmem:[%s5204_s1 + $0x1e4] sm:$0xf] }
   0xe   :  { %v2362_v37 = vld [vmem:[%s5204_s1 + $0x180] sm:$0xf]  ;;  %v3246_v39 = vld [vmem:[%s5204_s1 + $0x18c] sm:$0xf0]  ;;  %v2235_v44 = vor.u32 %v3214_v36, %v2234_v35  ;;  %852 = vmatpush.bf16.msra.mxu2 %v2507_v34  ;;  %v2412_v31 = vld [vmem:[%s5204_s1 + $0x1f0] sm:$0xf0] }
   0xf   :  { %v2490_v40 = vld [vmem:[%s5204_s1 + $0x280] sm:$0xf]  ;;  %v3278_v41 = vld [vmem:[%s5204_s1 + $0x28c] sm:$0xf0]  ;;  %v2363_v45 = vor.u32 %v3246_v39, %v2362_v37  ;;  %866 = vmatpush.bf16.msra.mxu3 %v2635_v38  ;;  %v3288_v32 = vld [vmem:[%s5204_s1 + $0x2e4] sm:$0xf] }
  0x10   :  { %v2618_v42 = vld [vmem:[%s5204_s1 + $0x380] sm:$0xf]  ;;  %v3310_v43 = vld [vmem:[%s5204_s1 + $0x38c] sm:$0xf0]  ;;  %v2491_v46 = vor.u32 %v3278_v41, %v2490_v40  ;;  %825 = vmatpush.bf16.msra.mxu0 %v2235_v44  ;;  %v2540_v33 = vld [vmem:[%s5204_s1 + $0x2f0] sm:$0xf0] }
  0x11   :  { %v2218_v47 = vld [vmem:[%s5204_s1 + $0x60] sm:$0xf]  ;;  %v3210_v48 = vld [vmem:[%s5204_s1 + $0x6c] sm:$0xf0]  ;;  %v2619_v50 = vor.u32 %v3310_v43, %v2618_v42  ;;  %839 = vmatpush.bf16.msra.mxu1 %v2363_v45  ;;  %v3320_v34 = vld [vmem:[%s5204_s1 + $0x3e4] sm:$0xf]  ;;  %v2287_v45 = vor.u32 %v3224_v27, %v2284_v29 }
  0x12   :  { %v2346_v49 = vld [vmem:[%s5204_s1 + $0x160] sm:$0xf]  ;;  %v3242_v51 = vld [vmem:[%s5204_s1 + $0x16c] sm:$0xf0]  ;;  %v2219_v56 = vor.u32 %v3210_v48, %v2218_v47  ;;  %853 = vmatpush.bf16.msra.mxu2 %v2491_v46  ;;  %v2668_v36 = vld [vmem:[%s5204_s1 + $0x3f0] sm:$0xf0] }
  0x13   :  { %v2474_v52 = vld [vmem:[%s5204_s1 + $0x260] sm:$0xf]  ;;  %v3274_v53 = vld [vmem:[%s5204_s1 + $0x26c] sm:$0xf0]  ;;  %v2347_v57 = vor.u32 %v3242_v51, %v2346_v49  ;;  %867 = vmatpush.bf16.msra.mxu3 %v2619_v50  ;;  %v2162_v37 = vld [vmem:[%s5205_s0 + $0x8] sm:$0xf]  ;;  %v2415_v49 = vor.u32 %v3256_v30, %v2412_v31  ;;  %v2543_v50 = vor.u32 %v3288_v32, %v2540_v33 }
  0x14   :  { %v2602_v54 = vld [vmem:[%s5204_s1 + $0x360] sm:$0xf]  ;;  %v3306_v55 = vld [vmem:[%s5204_s1 + $0x36c] sm:$0xf0]  ;;  %v2475_v58 = vor.u32 %v3274_v53, %v2474_v52  ;;  %826 = vmatpush.bf16.msra.mxu0 %v2219_v56  ;;  %v3195_v38 = vld [vmem:[%s5205_s0 + $0x14] sm:$0xf0] }
  0x15   :  { %v2202_v59 = vld [vmem:[%s5204_s1 + $0x40] sm:$0xf]  ;;  %v3206_v60 = vld [vmem:[%s5204_s1 + $0x4c] sm:$0xf0]  ;;  %v2603_v62 = vor.u32 %v3306_v55, %v2602_v54  ;;  %840 = vmatpush.bf16.msra.mxu1 %v2347_v57  ;;  %v3193_v43 = vld [vmem:[%s5205_s0 + $0xc] sm:$0xf]  ;;  %v2671_v54 = vor.u32 %v3320_v34, %v2668_v36  ;;  %v3747_v55 = vor.u32 %v3195_v38, %v2162_v37 }
  0x16   :  { %v2330_v61 = vld [vmem:[%s5204_s1 + $0x140] sm:$0xf]  ;;  %v3238_v63 = vld [vmem:[%s5204_s1 + $0x14c] sm:$0xf0]  ;;  %v2203_v4 = vor.u32 %v3206_v60, %v2202_v59  ;;  %854 = vmatpush.bf16.msra.mxu2 %v2475_v58  ;;  %v2164_v46 = vld [vmem:[%s5205_s0 + $0x18] sm:$0xf0] }
  0x17   :  { %v2458_v0 = vld [vmem:[%s5204_s1 + $0x240] sm:$0xf]  ;;  %v3270_v1 = vld [vmem:[%s5204_s1 + $0x24c] sm:$0xf0]  ;;  %v2331_v6 = vor.u32 %v3238_v63, %v2330_v61  ;;  %868 = vmatpush.bf16.msra.mxu3 %v2603_v62  ;;  %v3220_v47 = vld [vmem:[%s5204_s1 + $0xc4] sm:$0xf]  ;;  %v3760_v60 = vor.u32 %v3193_v43, %v2164_v46 }
  0x18   :  { %v2586_v2 = vld [vmem:[%s5204_s1 + $0x340] sm:$0xf]  ;;  %v3302_v3 = vld [vmem:[%s5204_s1 + $0x34c] sm:$0xf0]  ;;  %v2459_v7 = vor.u32 %v3270_v1, %v2458_v0  ;;  %827 = vmatpush.bf16.msra.mxu0 %v2203_v4  ;;  %v2268_v48 = vld [vmem:[%s5204_s1 + $0xd0] sm:$0xf0] }
  0x19   :  { %v2186_v5 = vld [vmem:[%s5204_s1 + $0x20] sm:$0xf]  ;;  %v3202_v8 = vld [vmem:[%s5204_s1 + $0x2c] sm:$0xf0]  ;;  %v2587_v11 = vor.u32 %v3302_v3, %v2586_v2  ;;  %841 = vmatpush.bf16.msra.mxu1 %v2331_v6  ;;  %v3252_v51 = vld [vmem:[%s5204_s1 + $0x1c4] sm:$0xf]  ;;  %v2271_v63 = vor.u32 %v3220_v47, %v2268_v48 }
  0x1a   :  { %v2314_v9 = vld [vmem:[%s5204_s1 + $0x120] sm:$0xf]  ;;  %v3234_v10 = vld [vmem:[%s5204_s1 + $0x12c] sm:$0xf0]  ;;  %v2187_v18 = vor.u32 %v3202_v8, %v2186_v5  ;;  %855 = vmatpush.bf16.msra.mxu2 %v2459_v7  ;;  %v3192_v52 = vld [vmem:[%s5205_s0 + $0x4] sm:$0xf] }
  0x1b   :  { %v2442_v12 = vld [vmem:[%s5204_s1 + $0x220] sm:$0xf]  ;;  %v3266_v13 = vld [vmem:[%s5204_s1 + $0x22c] sm:$0xf0]  ;;  %v2315_v23 = vor.u32 %v3234_v10, %v2314_v9  ;;  %869 = vmatpush.bf16.msra.mxu3 %v2587_v11  ;;  %v2156_v53 = vld [vmem:[%s5205_s0 + $0x10] sm:$0xf0] }
  0x1c   :  { %v2570_v14 = vld [vmem:[%s5204_s1 + $0x320] sm:$0xf]  ;;  %v3298_v15 = vld [vmem:[%s5204_s1 + $0x32c] sm:$0xf0]  ;;  %v2443_v24 = vor.u32 %v3266_v13, %v2442_v12  ;;  %828 = vmatpush.bf16.msra.mxu0 %v2187_v18  ;;  %v2396_v56 = vld [vmem:[%s5204_s1 + $0x1d0] sm:$0xf0]  ;;  %v3768_v0 = vor.u32 %v3192_v52, %v2156_v53 }
  0x1d   :  { %v2170_v16 = vld [vmem:[%s5204_s1] sm:$0xf]  ;;  %v3198_v17 = vld [vmem:[%s5204_s1 + $0xc] sm:$0xf0]  ;;  %v2571_v28 = vor.u32 %v3298_v15, %v2570_v14  ;;  %842 = vmatpush.bf16.msra.mxu1 %v2315_v23  ;;  %v3284_v57 = vld [vmem:[%s5204_s1 + $0x2c4] sm:$0xf]  ;;  %v2399_v1 = vor.u32 %v3252_v51, %v2396_v56 }
  0x1e   :  { %v2298_v19 = vld [vmem:[%s5204_s1 + $0x100] sm:$0xf]  ;;  %v3230_v20 = vld [vmem:[%s5204_s1 + $0x10c] sm:$0xf0]  ;;  %v2171_v35 = vor.u32 %v3198_v17, %v2170_v16  ;;  %856 = vmatpush.bf16.msra.mxu2 %v2443_v24  ;;  %v2524_v58 = vld [vmem:[%s5204_s1 + $0x2d0] sm:$0xf0] }
  0x1f   :  { %v2426_v21 = vld [vmem:[%s5204_s1 + $0x200] sm:$0xf]  ;;  %v3262_v22 = vld [vmem:[%s5204_s1 + $0x20c] sm:$0xf0]  ;;  %v2299_v39 = vor.u32 %v3230_v20, %v2298_v19  ;;  %870 = vmatpush.bf16.msra.mxu3 %v2571_v28  ;;  %v3316_v61 = vld [vmem:[%s5204_s1 + $0x3c4] sm:$0xf]  ;;  %v2527_v2 = vor.u32 %v3284_v57, %v2524_v58 }
  0x20   :  { %v2554_v25 = vld [vmem:[%s5204_s1 + $0x300] sm:$0xf]  ;;  %v3294_v26 = vld [vmem:[%s5204_s1 + $0x30c] sm:$0xf0]  ;;  %v2427_v40 = vor.u32 %v3262_v22, %v2426_v21  ;;  %829 = vmatpush.bf16.msra.mxu0 %v2171_v35  ;;  %v2652_v62 = vld [vmem:[%s5204_s1 + $0x3d0] sm:$0xf0] }
  0x21   :  { %v2154_v41 = vld [vmem:[%s5205_s0] sm:$0xf]  ;;  %v3194_v42 = vld [vmem:[%s5205_s0 + $0xc] sm:$0xf0]  ;;  %v2555_v44 = vor.u32 %v3294_v26, %v2554_v25  ;;  %843 = vmatpush.bf16.msra.mxu1 %v2299_v39  ;;  %v3216_v3 = vld [vmem:[%s5204_s1 + $0xa4] sm:$0xf]  ;;  %v2655_v6 = vor.u32 %v3316_v61, %v2652_v62 }
  0x22   :  { %857 = vmatpush.bf16.msra.mxu2 %v2427_v40  ;;  %v3758_v59 = vor.u32 %v3194_v42, %v2154_v41  ;;  %v2252_v4 = vld [vmem:[%s5204_s1 + $0xb0] sm:$0xf0]  ;;  %v3248_v5 = vld [vmem:[%s5204_s1 + $0x1a4] sm:$0xf] }
  0x23   :  { %871 = vmatpush.bf16.msra.mxu3 %v2555_v44  ;;  %v2380_v7 = vld [vmem:[%s5204_s1 + $0x1b0] sm:$0xf0]  ;;  %v3280_v8 = vld [vmem:[%s5204_s1 + $0x2a4] sm:$0xf]  ;;  %v2255_v12 = vor.u32 %v3216_v3, %v2252_v4 }
  0x24   :  { %878 = vmatpush.bf16.msrb.mxu0 %v2287_v45  ;;  %v2508_v9 = vld [vmem:[%s5204_s1 + $0x2b0] sm:$0xf0]  ;;  %v3312_v10 = vld [vmem:[%s5204_s1 + $0x3a4] sm:$0xf]  ;;  %844 = vmatmul.bf16.vlgmr.msra.gmra.mxu1 %v3768_v0  ;;  %v2383_v13 = vor.u32 %v3248_v5, %v2380_v7 }
  0x25   :  { %892 = vmatpush.bf16.msrb.mxu1 %v2415_v49  ;;  %858 = vmatmul.bf16.vlgmr.msra.gmra.mxu2 %v3747_v55  ;;  %v2636_v11 = vld [vmem:[%s5204_s1 + $0x3b0] sm:$0xf0]  ;;  %v2511_v14 = vor.u32 %v3280_v8, %v2508_v9  ;;  %v3212_v15 = vld [vmem:[%s5204_s1 + $0x84] sm:$0xf] }
  0x26   :  { %906 = vmatpush.bf16.msrb.mxu2 %v2543_v50  ;;  %830 = vmatmul.bf16.vlgmr.msra.gmra.mxu0 %v3758_v59  ;;  %v2236_v16 = vld [vmem:[%s5204_s1 + $0x90] sm:$0xf0]  ;;  %v3244_v17 = vld [vmem:[%s5204_s1 + $0x184] sm:$0xf]  ;;  %v2639_v18 = vor.u32 %v3312_v10, %v2636_v11 }
  0x27   :  { %920 = vmatpush.bf16.msrb.mxu3 %v2671_v54  ;;  %v2364_v19 = vld [vmem:[%s5204_s1 + $0x190] sm:$0xf0]  ;;  %v3276_v20 = vld [vmem:[%s5204_s1 + $0x284] sm:$0xf]  ;;  %v2239_v24 = vor.u32 %v3212_v15, %v2236_v16  ;;  %v3259_v16 = vld [vmem:[%s5204_s1 + $0x1f4] sm:$0xf0] }
  0x28   :  { %872 = vmatmul.bf16.vlgmr.msra.gmra.mxu3 %v3760_v60  ;;  %879 = vmatpush.bf16.msrb.mxu0 %v2271_v63  ;;  %v2492_v21 = vld [vmem:[%s5204_s1 + $0x290] sm:$0xf0]  ;;  %v3308_v22 = vld [vmem:[%s5204_s1 + $0x384] sm:$0xf]  ;;  %v2367_v25 = vor.u32 %v3244_v17, %v2364_v19  ;;  %v2546_v17 = vld [vmem:[%s5204_s1 + $0x2e8] sm:$0xf] }
  0x29   :  { %893 = vmatpush.bf16.msrb.mxu1 %v2399_v1  ;;  %v2620_v23 = vld [vmem:[%s5204_s1 + $0x390] sm:$0xf0]  ;;  %v2495_v26 = vor.u32 %v3276_v20, %v2492_v21  ;;  %v3208_v27 = vld [vmem:[%s5204_s1 + $0x64] sm:$0xf]  ;;  %v2674_v21 = vld [vmem:[%s5204_s1 + $0x3e8] sm:$0xf] }
  0x2a   :  { %907 = vmatpush.bf16.msrb.mxu2 %v2527_v2  ;;  %v2220_v28 = vld [vmem:[%s5204_s1 + $0x70] sm:$0xf0]  ;;  %v3240_v29 = vld [vmem:[%s5204_s1 + $0x164] sm:$0xf]  ;;  %v2623_v30 = vor.u32 %v3308_v22, %v2620_v23  ;;  %v3323_v22 = vld [vmem:[%s5204_s1 + $0x3f4] sm:$0xf0] }
  0x2b   :  { %921 = vmatpush.bf16.msrb.mxu3 %v2655_v6  ;;  %v2348_v31 = vld [vmem:[%s5204_s1 + $0x170] sm:$0xf0]  ;;  %v3272_v32 = vld [vmem:[%s5204_s1 + $0x264] sm:$0xf]  ;;  %v2223_v36 = vor.u32 %v3208_v27, %v2220_v28  ;;  %v2274_v27 = vld [vmem:[%s5204_s1 + $0xc8] sm:$0xf] }
  0x2c   :  { %880 = vmatpush.bf16.msrb.mxu0 %v2255_v12  ;;  %v2476_v33 = vld [vmem:[%s5204_s1 + $0x270] sm:$0xf0]  ;;  %v3304_v34 = vld [vmem:[%s5204_s1 + $0x364] sm:$0xf]  ;;  %v2351_v37 = vor.u32 %v3240_v29, %v2348_v31  ;;  %v2290_v12 = vld [vmem:[%s5204_s1 + $0xe8] sm:$0xf] }
  0x2d   :  { %894 = vmatpush.bf16.msrb.mxu1 %v2383_v13  ;;  %v2604_v35 = vld [vmem:[%s5204_s1 + $0x370] sm:$0xf0]  ;;  %v2479_v38 = vor.u32 %v3272_v32, %v2476_v33  ;;  %v3204_v39 = vld [vmem:[%s5204_s1 + $0x44] sm:$0xf]  ;;  %v3227_v13 = vld [vmem:[%s5204_s1 + $0xf4] sm:$0xf0] }
  0x2e   :  { %908 = vmatpush.bf16.msrb.mxu2 %v2511_v14  ;;  %v2204_v40 = vld [vmem:[%s5204_s1 + $0x50] sm:$0xf0]  ;;  %v3236_v41 = vld [vmem:[%s5204_s1 + $0x144] sm:$0xf]  ;;  %v2607_v42 = vor.u32 %v3304_v34, %v2604_v35  ;;  %v2418_v14 = vld [vmem:[%s5204_s1 + $0x1e8] sm:$0xf] }
  0x2f   :  { %922 = vmatpush.bf16.msrb.mxu3 %v2639_v18  ;;  %v2332_v43 = vld [vmem:[%s5204_s1 + $0x150] sm:$0xf0]  ;;  %v3268_v44 = vld [vmem:[%s5204_s1 + $0x244] sm:$0xf]  ;;  %v2207_v48 = vor.u32 %v3204_v39, %v2204_v40  ;;  %v3291_v18 = vld [vmem:[%s5204_s1 + $0x2f4] sm:$0xf0] }
  0x30   :  { %881 = vmatpush.bf16.msrb.mxu0 %v2239_v24  ;;  %v2460_v45 = vld [vmem:[%s5204_s1 + $0x250] sm:$0xf0]  ;;  %v3300_v46 = vld [vmem:[%s5204_s1 + $0x344] sm:$0xf]  ;;  %v2335_v49 = vor.u32 %v3236_v41, %v2332_v43  ;;  %v2291_v24 = vor.u32 %v3227_v13, %v2290_v12  ;;  %v3223_v28 = vld [vmem:[%s5204_s1 + $0xd4] sm:$0xf0] }
  0x31   :  { %895 = vmatpush.bf16.msrb.mxu1 %v2367_v25  ;;  %v2588_v47 = vld [vmem:[%s5204_s1 + $0x350] sm:$0xf0]  ;;  %v2463_v50 = vor.u32 %v3268_v44, %v2460_v45  ;;  %v3200_v51 = vld [vmem:[%s5204_s1 + $0x24] sm:$0xf]  ;;  %v2419_v25 = vor.u32 %v3259_v16, %v2418_v14  ;;  %v2402_v29 = vld [vmem:[%s5204_s1 + $0x1c8] sm:$0xf] }
  0x32   :  { %909 = vmatpush.bf16.msrb.mxu2 %v2495_v26  ;;  %v2188_v52 = vld [vmem:[%s5204_s1 + $0x30] sm:$0xf0]  ;;  %v3232_v53 = vld [vmem:[%s5204_s1 + $0x124] sm:$0xf]  ;;  %v2591_v54 = vor.u32 %v3300_v46, %v2588_v47  ;;  %v2547_v26 = vor.u32 %v3291_v18, %v2546_v17  ;;  %v3255_v31 = vld [vmem:[%s5204_s1 + $0x1d4] sm:$0xf0] }
  0x33   :  { %923 = vmatpush.bf16.msrb.mxu3 %v2623_v30  ;;  %v2316_v56 = vld [vmem:[%s5204_s1 + $0x130] sm:$0xf0]  ;;  %v3264_v57 = vld [vmem:[%s5204_s1 + $0x224] sm:$0xf]  ;;  %v2191_v63 = vor.u32 %v3200_v51, %v2188_v52  ;;  %v2675_v30 = vor.u32 %v3323_v22, %v2674_v21  ;;  %v2530_v32 = vld [vmem:[%s5204_s1 + $0x2c8] sm:$0xf] }
  0x34   :  { %882 = vmatpush.bf16.msrb.mxu0 %v2223_v36  ;;  %v2444_v58 = vld [vmem:[%s5204_s1 + $0x230] sm:$0xf0]  ;;  %v3296_v61 = vld [vmem:[%s5204_s1 + $0x324] sm:$0xf]  ;;  %v2319_v3 = vor.u32 %v3232_v53, %v2316_v56  ;;  %v3287_v33 = vld [vmem:[%s5204_s1 + $0x2d4] sm:$0xf0]  ;;  %v2275_v36 = vor.u32 %v3223_v28, %v2274_v27 }
  0x35   :  { %896 = vmatpush.bf16.msrb.mxu1 %v2351_v37  ;;  %v2572_v62 = vld [vmem:[%s5204_s1 + $0x330] sm:$0xf0]  ;;  %v3196_v1 = vld [vmem:[%s5204_s1 + $0x4] sm:$0xf]  ;;  %v2447_v4 = vor.u32 %v3264_v57, %v2444_v58  ;;  %v2658_v34 = vld [vmem:[%s5204_s1 + $0x3c8] sm:$0xf]  ;;  %v2403_v37 = vor.u32 %v3255_v31, %v2402_v29 }
  0x36   :  { %910 = vmatpush.bf16.msrb.mxu2 %v2479_v38  ;;  %v2172_v2 = vld [vmem:[%s5204_s1 + $0x10] sm:$0xf0]  ;;  %v3228_v5 = vld [vmem:[%s5204_s1 + $0x104] sm:$0xf]  ;;  %v2575_v8 = vor.u32 %v3296_v61, %v2572_v62  ;;  %v3319_v35 = vld [vmem:[%s5204_s1 + $0x3d4] sm:$0xf0]  ;;  %v2531_v38 = vor.u32 %v3287_v33, %v2530_v32 }
  0x37   :  { %924 = vmatpush.bf16.msrb.mxu3 %v2607_v42  ;;  %v2300_v6 = vld [vmem:[%s5204_s1 + $0x110] sm:$0xf0]  ;;  %v3260_v7 = vld [vmem:[%s5204_s1 + $0x204] sm:$0xf]  ;;  %v2175_v15 = vor.u32 %v3196_v1, %v2172_v2  ;;  %v2258_v39 = vld [vmem:[%s5204_s1 + $0xa8] sm:$0xf]  ;;  %v2659_v42 = vor.u32 %v3319_v35, %v2658_v34 }
  0x38   :  { %883 = vmatpush.bf16.msrb.mxu0 %v2207_v48  ;;  %v2428_v9 = vld [vmem:[%s5204_s1 + $0x210] sm:$0xf0]  ;;  %v3292_v10 = vld [vmem:[%s5204_s1 + $0x304] sm:$0xf]  ;;  %v2303_v19 = vor.u32 %v3228_v5, %v2300_v6  ;;  %v3219_v40 = vld [vmem:[%s5204_s1 + $0xb4] sm:$0xf0] }
  0x39   :  { %897 = vmatpush.bf16.msrb.mxu1 %v2335_v49  ;;  %v2556_v11 = vld [vmem:[%s5204_s1 + $0x310] sm:$0xf0]  ;;  %v2431_v20 = vor.u32 %v3260_v7, %v2428_v9  ;;  %v2386_v41 = vld [vmem:[%s5204_s1 + $0x1a8] sm:$0xf]  ;;  %v3251_v43 = vld [vmem:[%s5204_s1 + $0x1b4] sm:$0xf0]  ;;  %v2259_v48 = vor.u32 %v3219_v40, %v2258_v39 }
  0x3a   :  { %911 = vmatpush.bf16.msrb.mxu2 %v2463_v50  ;;  %v2559_v23 = vor.u32 %v3292_v10, %v2556_v11  ;;  %v2514_v44 = vld [vmem:[%s5204_s1 + $0x2a8] sm:$0xf]  ;;  %v3283_v45 = vld [vmem:[%s5204_s1 + $0x2b4] sm:$0xf0]  ;;  %v2387_v49 = vor.u32 %v3251_v43, %v2386_v41 }
  0x3b   :  { %925 = vmatpush.bf16.msrb.mxu3 %v2591_v54  ;;  %v2642_v46 = vld [vmem:[%s5204_s1 + $0x3a8] sm:$0xf]  ;;  %v3315_v47 = vld [vmem:[%s5204_s1 + $0x3b4] sm:$0xf0]  ;;  %v2515_v50 = vor.u32 %v3283_v45, %v2514_v44 }
  0x3c   :  { %884 = vmatpush.bf16.msrb.mxu0 %v2191_v63  ;;  %v2242_v51 = vld [vmem:[%s5204_s1 + $0x88] sm:$0xf]  ;;  %v3215_v52 = vld [vmem:[%s5204_s1 + $0x94] sm:$0xf0]  ;;  %v2643_v54 = vor.u32 %v3315_v47, %v2642_v46 }
  0x3d   :  { %898 = vmatpush.bf16.msrb.mxu1 %v2319_v3  ;;  %v2370_v53 = vld [vmem:[%s5204_s1 + $0x188] sm:$0xf]  ;;  %v3247_v56 = vld [vmem:[%s5204_s1 + $0x194] sm:$0xf0]  ;;  %v2243_v63 = vor.u32 %v3215_v52, %v2242_v51  ;;  %v2420_v52 = vld [vmem:[%s5204_s1 + $0x1f8] sm:$0xf0] }
  0x3e   :  { %912 = vmatpush.bf16.msrb.mxu2 %v2447_v4  ;;  %v2498_v57 = vld [vmem:[%s5204_s1 + $0x288] sm:$0xf]  ;;  %v3279_v58 = vld [vmem:[%s5204_s1 + $0x294] sm:$0xf0]  ;;  %v2371_v1 = vor.u32 %v3247_v56, %v2370_v53  ;;  %v3289_v53 = vld [vmem:[%s5204_s1 + $0x2ec] sm:$0xf] }
  0x3f   :  { %926 = vmatpush.bf16.msrb.mxu3 %v2575_v8  ;;  %v2626_v61 = vld [vmem:[%s5204_s1 + $0x388] sm:$0xf]  ;;  %v3311_v62 = vld [vmem:[%s5204_s1 + $0x394] sm:$0xf0]  ;;  %v2499_v2 = vor.u32 %v3279_v58, %v2498_v57  ;;  %v3321_v58 = vld [vmem:[%s5204_s1 + $0x3ec] sm:$0xf] }
  0x40   :  { %885 = vmatpush.bf16.msrb.mxu0 %v2175_v15  ;;  %v2226_v3 = vld [vmem:[%s5204_s1 + $0x68] sm:$0xf]  ;;  %v3211_v4 = vld [vmem:[%s5204_s1 + $0x74] sm:$0xf0]  ;;  %v2627_v6 = vor.u32 %v3311_v62, %v2626_v61  ;;  %v2676_v61 = vld [vmem:[%s5204_s1 + $0x3f8] sm:$0xf0] }
  0x41   :  { %899 = vmatpush.bf16.msrb.mxu1 %v2303_v19  ;;  %v2354_v5 = vld [vmem:[%s5204_s1 + $0x168] sm:$0xf]  ;;  %v3243_v7 = vld [vmem:[%s5204_s1 + $0x174] sm:$0xf0]  ;;  %v2227_v12 = vor.u32 %v3211_v4, %v2226_v3  ;;  %v3221_v3 = vld [vmem:[%s5204_s1 + $0xcc] sm:$0xf] }
  0x42   :  { %913 = vmatpush.bf16.msrb.mxu2 %v2431_v20  ;;  %v2482_v8 = vld [vmem:[%s5204_s1 + $0x268] sm:$0xf]  ;;  %v3275_v9 = vld [vmem:[%s5204_s1 + $0x274] sm:$0xf0]  ;;  %v2355_v13 = vor.u32 %v3243_v7, %v2354_v5  ;;  %v2276_v4 = vld [vmem:[%s5204_s1 + $0xd8] sm:$0xf0] }
  0x43   :  { %927 = vmatpush.bf16.msrb.mxu3 %v2559_v23  ;;  %886 = vmatmul.bf16.vlgmr.msrb.gmra.mxu0 %v3758_v59  ;;  %v2610_v10 = vld [vmem:[%s5204_s1 + $0x368] sm:$0xf]  ;;  %v3307_v11 = vld [vmem:[%s5204_s1 + $0x374] sm:$0xf0]  ;;  %v2483_v14 = vor.u32 %v3275_v9, %v2482_v8  ;;  %v3253_v5 = vld [vmem:[%s5204_s1 + $0x1cc] sm:$0xf] }
  0x44   :  { %934 = vmatpush.bf16.msra.mxu0 %v2291_v24  ;;  %900 = vmatmul.bf16.vlgmr.msrb.gmra.mxu1 %v3768_v0  ;;  %v2210_v15 = vld [vmem:[%s5204_s1 + $0x48] sm:$0xf]  ;;  %v3207_v16 = vld [vmem:[%s5204_s1 + $0x54] sm:$0xf0]  ;;  %v2611_v18 = vor.u32 %v3307_v11, %v2610_v10  ;;  %v2404_v7 = vld [vmem:[%s5204_s1 + $0x1d8] sm:$0xf0] }
  0x45   :  { %948 = vmatpush.bf16.msra.mxu1 %v2419_v25  ;;  %914 = vmatmul.bf16.vlgmr.msrb.gmra.mxu2 %v3747_v55  ;;  %v2338_v17 = vld [vmem:[%s5204_s1 + $0x148] sm:$0xf]  ;;  %v3239_v19 = vld [vmem:[%s5204_s1 + $0x154] sm:$0xf0]  ;;  %v2211_v24 = vor.u32 %v3207_v16, %v2210_v15  ;;  %v3285_v8 = vld [vmem:[%s5204_s1 + $0x2cc] sm:$0xf] }
  0x46   :  { %962 = vmatpush.bf16.msra.mxu2 %v2547_v26  ;;  %928 = vmatmul.bf16.vlgmr.msrb.gmra.mxu3 %v3760_v60  ;;  %v2466_v20 = vld [vmem:[%s5204_s1 + $0x248] sm:$0xf]  ;;  %v3271_v21 = vld [vmem:[%s5204_s1 + $0x254] sm:$0xf0]  ;;  %v2339_v25 = vor.u32 %v3239_v19, %v2338_v17  ;;  %v2532_v9 = vld [vmem:[%s5204_s1 + $0x2d8] sm:$0xf0] }
  0x47   :  { %976 = vmatpush.bf16.msra.mxu3 %v2675_v30  ;;  %v2594_v22 = vld [vmem:[%s5204_s1 + $0x348] sm:$0xf]  ;;  %v3303_v23 = vld [vmem:[%s5204_s1 + $0x354] sm:$0xf0]  ;;  %v2467_v26 = vor.u32 %v3271_v21, %v2466_v20  ;;  %v3317_v10 = vld [vmem:[%s5204_s1 + $0x3cc] sm:$0xf] }
  0x48   :  { %935 = vmatpush.bf16.msra.mxu0 %v2275_v36  ;;  %v2194_v27 = vld [vmem:[%s5204_s1 + $0x28] sm:$0xf]  ;;  %v3203_v28 = vld [vmem:[%s5204_s1 + $0x34] sm:$0xf0]  ;;  %v2595_v30 = vor.u32 %v3303_v23, %v2594_v22  ;;  %v2660_v11 = vld [vmem:[%s5204_s1 + $0x3d8] sm:$0xf0] }
  0x49   :  { %949 = vmatpush.bf16.msra.mxu1 %v2403_v37  ;;  %v2322_v29 = vld [vmem:[%s5204_s1 + $0x128] sm:$0xf]  ;;  %v3235_v31 = vld [vmem:[%s5204_s1 + $0x134] sm:$0xf0]  ;;  %v2195_v36 = vor.u32 %v3203_v28, %v2194_v27  ;;  %v3217_v15 = vld [vmem:[%s5204_s1 + $0xac] sm:$0xf] }
  0x4a   :  { %963 = vmatpush.bf16.msra.mxu2 %v2531_v38  ;;  %v2450_v32 = vld [vmem:[%s5204_s1 + $0x228] sm:$0xf]  ;;  %v3267_v33 = vld [vmem:[%s5204_s1 + $0x234] sm:$0xf0]  ;;  %v2323_v39 = vor.u32 %v3235_v31, %v2322_v29  ;;  %v2260_v16 = vld [vmem:[%s5204_s1 + $0xb8] sm:$0xf0] }
  0x4b   :  { %977 = vmatpush.bf16.msra.mxu3 %v2659_v42  ;;  %v2578_v34 = vld [vmem:[%s5204_s1 + $0x328] sm:$0xf]  ;;  %v3299_v35 = vld [vmem:[%s5204_s1 + $0x334] sm:$0xf0]  ;;  %v2451_v40 = vor.u32 %v3267_v33, %v2450_v32  ;;  %v3249_v17 = vld [vmem:[%s5204_s1 + $0x1ac] sm:$0xf] }
  0x4c   :  { %936 = vmatpush.bf16.msra.mxu0 %v2259_v48  ;;  %v2178_v37 = vld [vmem:[%s5204_s1 + $0x8] sm:$0xf]  ;;  %v3199_v38 = vld [vmem:[%s5204_s1 + $0x14] sm:$0xf0]  ;;  %v2579_v44 = vor.u32 %v3299_v35, %v2578_v34  ;;  %v3225_v48 = vld [vmem:[%s5204_s1 + $0xec] sm:$0xf] }
  0x4d   :  { %950 = vmatpush.bf16.msra.mxu1 %v2387_v49  ;;  %v2306_v41 = vld [vmem:[%s5204_s1 + $0x108] sm:$0xf]  ;;  %v3231_v42 = vld [vmem:[%s5204_s1 + $0x114] sm:$0xf0]  ;;  %v2292_v49 = vld [vmem:[%s5204_s1 + $0xf8] sm:$0xf0]  ;;  %v2179_v51 = vor.u32 %v3199_v38, %v2178_v37 }
  0x4e   :  { %964 = vmatpush.bf16.msra.mxu2 %v2515_v50  ;;  %v2434_v43 = vld [vmem:[%s5204_s1 + $0x208] sm:$0xf]  ;;  %v3263_v45 = vld [vmem:[%s5204_s1 + $0x214] sm:$0xf0]  ;;  %v3257_v50 = vld [vmem:[%s5204_s1 + $0x1ec] sm:$0xf]  ;;  %v2307_v56 = vor.u32 %v3231_v42, %v2306_v41 }
  0x4f   :  { %978 = vmatpush.bf16.msra.mxu3 %v2643_v54  ;;  %v2562_v46 = vld [vmem:[%s5204_s1 + $0x308] sm:$0xf]  ;;  %v3295_v47 = vld [vmem:[%s5204_s1 + $0x314] sm:$0xf0]  ;;  %v2548_v54 = vld [vmem:[%s5204_s1 + $0x2f8] sm:$0xf0]  ;;  %v2435_v57 = vor.u32 %v3263_v45, %v2434_v43 }
  0x50   :  { %937 = vmatpush.bf16.msra.mxu0 %v2243_v63  ;;  %v2563_v62 = vor.u32 %v3295_v47, %v2562_v46  ;;  %v2295_v63 = vor.u32 %v3225_v48, %v2292_v49  ;;  %v2388_v19 = vld [vmem:[%s5204_s1 + $0x1b8] sm:$0xf0]  ;;  %v3281_v20 = vld [vmem:[%s5204_s1 + $0x2ac] sm:$0xf] }
  0x51   :  { %951 = vmatpush.bf16.msra.mxu1 %v2371_v1  ;;  %v2423_v1 = vor.u32 %v3257_v50, %v2420_v52  ;;  %v2516_v21 = vld [vmem:[%s5204_s1 + $0x2b8] sm:$0xf0]  ;;  %v3313_v22 = vld [vmem:[%s5204_s1 + $0x3ac] sm:$0xf] }
  0x52   :  { %965 = vmatpush.bf16.msra.mxu2 %v2499_v2  ;;  %v2551_v2 = vor.u32 %v3289_v53, %v2548_v54  ;;  %v2644_v23 = vld [vmem:[%s5204_s1 + $0x3b8] sm:$0xf0]  ;;  %v3213_v27 = vld [vmem:[%s5204_s1 + $0x8c] sm:$0xf] }
  0x53   :  { %979 = vmatpush.bf16.msra.mxu3 %v2627_v6  ;;  %v2679_v6 = vor.u32 %v3321_v58, %v2676_v61  ;;  %v2244_v28 = vld [vmem:[%s5204_s1 + $0x98] sm:$0xf0]  ;;  %v3245_v29 = vld [vmem:[%s5204_s1 + $0x18c] sm:$0xf] }
  0x54   :  { %938 = vmatpush.bf16.msra.mxu0 %v2227_v12  ;;  %v2279_v12 = vor.u32 %v3221_v3, %v2276_v4  ;;  %v2372_v31 = vld [vmem:[%s5204_s1 + $0x198] sm:$0xf0]  ;;  %v3277_v32 = vld [vmem:[%s5204_s1 + $0x28c] sm:$0xf] }
  0x55   :  { %952 = vmatpush.bf16.msra.mxu1 %v2355_v13  ;;  %v2407_v13 = vor.u32 %v3253_v5, %v2404_v7  ;;  %v2500_v33 = vld [vmem:[%s5204_s1 + $0x298] sm:$0xf0]  ;;  %v3309_v34 = vld [vmem:[%s5204_s1 + $0x38c] sm:$0xf]  ;;  %v2375_v37 = vor.u32 %v3245_v29, %v2372_v31  ;;  %v2778_v31 = vld [vmem:[%s5206_s3 + $0xc0] sm:$0xf] }
  0x56   :  { %966 = vmatpush.bf16.msra.mxu2 %v2483_v14  ;;  %v2535_v14 = vor.u32 %v3285_v8, %v2532_v9  ;;  %v2628_v35 = vld [vmem:[%s5204_s1 + $0x398] sm:$0xf0]  ;;  %v2503_v38 = vor.u32 %v3277_v32, %v2500_v33  ;;  %v3241_v41 = vld [vmem:[%s5204_s1 + $0x16c] sm:$0xf]  ;;  %v3350_v32 = vld [vmem:[%s5206_s3 + $0xcc] sm:$0xf0] }
  0x57   :  { %980 = vmatpush.bf16.msra.mxu3 %v2611_v18  ;;  %v2663_v18 = vor.u32 %v3317_v10, %v2660_v11  ;;  %v2631_v42 = vor.u32 %v3309_v34, %v2628_v35  ;;  %v2356_v43 = vld [vmem:[%s5204_s1 + $0x178] sm:$0xf0]  ;;  %v3305_v46 = vld [vmem:[%s5204_s1 + $0x36c] sm:$0xf]  ;;  %v2779_v33 = vor.u32 %v3350_v32, %v2778_v31  ;;  %v2762_v34 = vld [vmem:[%s5206_s3 + $0xa0] sm:$0xf] }
  0x58   :  { %939 = vmatpush.bf16.msra.mxu0 %v2211_v24  ;;  %v2263_v24 = vor.u32 %v3217_v15, %v2260_v16  ;;  %v2484_v45 = vld [vmem:[%s5204_s1 + $0x278] sm:$0xf0]  ;;  %v2359_v49 = vor.u32 %v3241_v41, %v2356_v43  ;;  %v3237_v53 = vld [vmem:[%s5204_s1 + $0x14c] sm:$0xf]  ;;  %v3346_v35 = vld [vmem:[%s5206_s3 + $0xac] sm:$0xf0] }
  0x59   :  { %953 = vmatpush.bf16.msra.mxu1 %v2339_v25  ;;  %v2391_v25 = vor.u32 %v3249_v17, %v2388_v19  ;;  %v2612_v47 = vld [vmem:[%s5204_s1 + $0x378] sm:$0xf0]  ;;  %v3301_v61 = vld [vmem:[%s5204_s1 + $0x34c] sm:$0xf]  ;;  %v3330_v43 = vld [vmem:[%s5206_s3 + $0x2c] sm:$0xf0] }
  0x5a   :  { %967 = vmatpush.bf16.msra.mxu2 %v2467_v26  ;;  %v2519_v26 = vor.u32 %v3281_v20, %v2516_v21  ;;  %v2212_v52 = vld [vmem:[%s5204_s1 + $0x58] sm:$0xf0]  ;;  %v2615_v54 = vor.u32 %v3305_v46, %v2612_v47  ;;  %v3201_v3 = vld [vmem:[%s5204_s1 + $0x2c] sm:$0xf]  ;;  %v3326_v46 = vld [vmem:[%s5206_s3 + $0xc] sm:$0xf0] }
  0x5b   :  { %981 = vmatpush.bf16.msra.mxu3 %v2595_v30  ;;  %v2647_v30 = vor.u32 %v3313_v22, %v2644_v23  ;;  %v2468_v58 = vld [vmem:[%s5204_s1 + $0x258] sm:$0xf0]  ;;  %v3233_v5 = vld [vmem:[%s5204_s1 + $0x12c] sm:$0xf]  ;;  %v2922_v47 = vld [vmem:[%s5206_s3 + $0x1e0] sm:$0xf] }
  0x5c   :  { %940 = vmatpush.bf16.msra.mxu0 %v2195_v36  ;;  %v2247_v36 = vor.u32 %v3213_v27, %v2244_v28  ;;  %v2196_v4 = vld [vmem:[%s5204_s1 + $0x38] sm:$0xf0]  ;;  %v3265_v8 = vld [vmem:[%s5204_s1 + $0x22c] sm:$0xf] }
  0x5d   :  { %954 = vmatpush.bf16.msra.mxu1 %v2323_v39  ;;  %v3209_v39 = vld [vmem:[%s5204_s1 + $0x6c] sm:$0xf]  ;;  %v2324_v7 = vld [vmem:[%s5204_s1 + $0x138] sm:$0xf0] }
  0x5e   :  { %968 = vmatpush.bf16.msra.mxu2 %v2451_v40  ;;  %v2228_v40 = vld [vmem:[%s5204_s1 + $0x78] sm:$0xf0]  ;;  %v3297_v10 = vld [vmem:[%s5204_s1 + $0x32c] sm:$0xf] }
  0x5f   :  { %982 = vmatpush.bf16.msra.mxu3 %v2579_v44  ;;  %v3273_v44 = vld [vmem:[%s5204_s1 + $0x26c] sm:$0xf]  ;;  %v2231_v48 = vor.u32 %v3209_v39, %v2228_v40  ;;  %v2452_v9 = vld [vmem:[%s5204_s1 + $0x238] sm:$0xf0]  ;;  %v2714_v39 = vld [vmem:[%s5206_s3 + $0x40] sm:$0xf] }
  0x60   :  { %941 = vmatpush.bf16.msra.mxu0 %v2179_v51  ;;  %v2487_v50 = vor.u32 %v3273_v44, %v2484_v45  ;;  %v3205_v51 = vld [vmem:[%s5204_s1 + $0x4c] sm:$0xf]  ;;  %v2580_v11 = vld [vmem:[%s5204_s1 + $0x338] sm:$0xf0]  ;;  %v2455_v15 = vor.u32 %v3265_v8, %v2452_v9  ;;  %v3334_v40 = vld [vmem:[%s5206_s3 + $0x4c] sm:$0xf0] }
  0x61   :  { %955 = vmatpush.bf16.msra.mxu1 %v2307_v56  ;;  %v2340_v56 = vld [vmem:[%s5204_s1 + $0x158] sm:$0xf0]  ;;  %v3229_v17 = vld [vmem:[%s5204_s1 + $0x10c] sm:$0xf]  ;;  %v2583_v19 = vor.u32 %v3297_v10, %v2580_v11  ;;  %v2715_v41 = vor.u32 %v3334_v40, %v2714_v39  ;;  %v2682_v45 = vld [vmem:[%s5206_s3] sm:$0xf] }
  0x62   :  { %969 = vmatpush.bf16.msra.mxu2 %v2435_v57  ;;  %v3269_v57 = vld [vmem:[%s5204_s1 + $0x24c] sm:$0xf]  ;;  %v2180_v16 = vld [vmem:[%s5204_s1 + $0x18] sm:$0xf0]  ;;  %v3374_v8 = vld [vmem:[%s5206_s3 + $0x18c] sm:$0xf0] }
  0x63   :  { %983 = vmatpush.bf16.msra.mxu3 %v2563_v62  ;;  %942 = vmatmul.bf16.vlgmr.msra.gmra.mxu0 %v3758_v59  ;;  %v2596_v62 = vld [vmem:[%s5204_s1 + $0x358] sm:$0xf0]  ;;  %v3261_v20 = vld [vmem:[%s5204_s1 + $0x20c] sm:$0xf]  ;;  %v3340_v10 = vld [vmem:[%s5206_s3 + $0x84] sm:$0xf] }
  0x64   :  { %990 = vmatpush.bf16.msrb.mxu0 %v2295_v63  ;;  %956 = vmatmul.bf16.vlgmr.msra.gmra.mxu1 %v3768_v0  ;;  %v2215_v63 = vor.u32 %v3205_v51, %v2212_v52  ;;  %v2436_v21 = vld [vmem:[%s5204_s1 + $0x218] sm:$0xf0]  ;;  %v3293_v22 = vld [vmem:[%s5204_s1 + $0x30c] sm:$0xf]  ;;  %v2796_v51 = vld [vmem:[%s5206_s3 + $0xf0] sm:$0xf0]  ;;  %v2683_v52 = vor.u32 %v3326_v46, %v2682_v45 }
  0x65   :  { %1004 = vmatpush.bf16.msrb.mxu1 %v2423_v1  ;;  %970 = vmatmul.bf16.vlgmr.msra.gmra.mxu2 %v3747_v55  ;;  %v2343_v1 = vor.u32 %v3237_v53, %v2340_v56  ;;  %v2564_v23 = vld [vmem:[%s5204_s1 + $0x318] sm:$0xf0]  ;;  %v2439_v28 = vor.u32 %v3261_v20, %v2436_v21  ;;  %v3382_v56 = vld [vmem:[%s5206_s3 + $0x1cc] sm:$0xf0]  ;;  %v2748_v11 = vld [vmem:[%s5206_s3 + $0x90] sm:$0xf0] }
  0x66   :  { %1018 = vmatpush.bf16.msrb.mxu2 %v2551_v2  ;;  %984 = vmatmul.bf16.vlgmr.msra.gmra.mxu3 %v3760_v60  ;;  %v2471_v2 = vor.u32 %v3269_v57, %v2468_v58  ;;  %v2567_v29 = vor.u32 %v3293_v22, %v2564_v23  ;;  %v3348_v58 = vld [vmem:[%s5206_s3 + $0xc4] sm:$0xf]  ;;  %v2684_v46 = vld [vmem:[%s5206_s3 + $0x10] sm:$0xf0] }
  0x67   :  { %1032 = vmatpush.bf16.msrb.mxu3 %v2679_v6  ;;  %v2599_v6 = vor.u32 %v3301_v61, %v2596_v62  ;;  %v2780_v61 = vld [vmem:[%s5206_s3 + $0xd0] sm:$0xf0] }
  0x68   :  { %991 = vmatpush.bf16.msrb.mxu0 %v2279_v12  ;;  %v2199_v12 = vor.u32 %v3201_v3, %v2196_v4  ;;  %v2783_v62 = vor.u32 %v3348_v58, %v2780_v61  ;;  %v3344_v3 = vld [vmem:[%s5206_s3 + $0xa4] sm:$0xf]  ;;  %v2764_v4 = vld [vmem:[%s5206_s3 + $0xb0] sm:$0xf0] }
  0x69   :  { %1005 = vmatpush.bf16.msrb.mxu1 %v2407_v13  ;;  %v3197_v13 = vld [vmem:[%s5204_s1 + $0xc] sm:$0xf] }
  0x6a   :  { %1019 = vmatpush.bf16.msrb.mxu2 %v2535_v14  ;;  %v2327_v14 = vor.u32 %v3233_v5, %v2324_v7  ;;  %v4401_v5 = vld [vmem:[%s5207_s2] sm:$0xf] }
  0x6b   :  { %1033 = vmatpush.bf16.msrb.mxu3 %v2663_v18  ;;  %v2308_v18 = vld [vmem:[%s5204_s1 + $0x118] sm:$0xf0]  ;;  %v2874_v7 = vld [vmem:[%s5206_s3 + $0x180] sm:$0xf] }
  0x6c   :  { %992 = vmatpush.bf16.msrb.mxu0 %v2263_v24  ;;  %v2794_v24 = vld [vmem:[%s5206_s3 + $0xe0] sm:$0xf]  ;;  %v2311_v27 = vor.u32 %v3229_v17, %v2308_v18  ;;  %v2875_v9 = vor.u32 %v3374_v8, %v2874_v7  ;;  %v3336_v18 = vld [vmem:[%s5206_s3 + $0x64] sm:$0xf] }
  0x6d   :  { %1006 = vmatpush.bf16.msrb.mxu1 %v2391_v25  ;;  %v3354_v25 = vld [vmem:[%s5206_s3 + $0xec] sm:$0xf0] }
  0x6e   :  { %1020 = vmatpush.bf16.msrb.mxu2 %v2519_v26  ;;  %v2183_v26 = vor.u32 %v3197_v13, %v2180_v16  ;;  %v2751_v13 = vor.u32 %v3340_v10, %v2748_v11  ;;  %v3018_v10 = vld [vmem:[%s5206_s3 + $0x2a0] sm:$0xf]  ;;  %v3410_v11 = vld [vmem:[%s5206_s3 + $0x2ac] sm:$0xf0] }
  0x6f   :  { %1034 = vmatpush.bf16.msrb.mxu3 %v2647_v30  ;;  %v2795_v30 = vor.u32 %v3354_v25, %v2794_v24  ;;  %v2842_v24 = vld [vmem:[%s5206_s3 + $0x140] sm:$0xf]  ;;  %v3366_v25 = vld [vmem:[%s5206_s3 + $0x14c] sm:$0xf0] }
  0x70   :  { %993 = vmatpush.bf16.msrb.mxu0 %v2247_v36  ;;  %v2763_v36 = vor.u32 %v3346_v35, %v2762_v34  ;;  %v3362_v34 = vld [vmem:[%s5206_s3 + $0x12c] sm:$0xf0] }
  0x71   :  { %1007 = vmatpush.bf16.msrb.mxu1 %v2375_v37  ;;  %v3342_v37 = vld [vmem:[%s5206_s3 + $0x8c] sm:$0xf0] }
  0x72   :  { %1021 = vmatpush.bf16.msrb.mxu2 %v2503_v38 }
  0x73   :  { %1035 = vmatpush.bf16.msrb.mxu3 %v2631_v42  ;;  %v2698_v42 = vld [vmem:[%s5206_s3 + $0x20] sm:$0xf] }
  0x74   :  { %994 = vmatpush.bf16.msrb.mxu0 %v2231_v48  ;;  %v2699_v44 = vor.u32 %v3330_v43, %v2698_v42  ;;  %v3386_v48 = vld [vmem:[%s5206_s3 + $0x1ec] sm:$0xf0]  ;;  %v3324_v43 = vld [vmem:[%s5206_s3 + $0x4] sm:$0xf] }
  0x75   :  { %1008 = vmatpush.bf16.msrb.mxu1 %v2359_v49  ;;  %v2923_v49 = vor.u32 %v3386_v48, %v2922_v47  ;;  %v3358_v42 = vld [vmem:[%s5206_s3 + $0x10c] sm:$0xf0]  ;;  %v3050_v47 = vld [vmem:[%s5206_s3 + $0x2e0] sm:$0xf]  ;;  %v2687_v58 = vor.u32 %v3324_v43, %v2684_v46 }
  0x76   :  { %1022 = vmatpush.bf16.msrb.mxu2 %v2487_v50  ;;  %v3352_v50 = vld [vmem:[%s5206_s3 + $0xe4] sm:$0xf]  ;;  %v3418_v48 = vld [vmem:[%s5206_s3 + $0x2ec] sm:$0xf0] }
  0x77   :  { %1036 = vmatpush.bf16.msrb.mxu3 %v2615_v54  ;;  %v2799_v53 = vor.u32 %v3352_v50, %v2796_v51  ;;  %v2906_v54 = vld [vmem:[%s5206_s3 + $0x1c0] sm:$0xf]  ;;  %v3051_v50 = vor.u32 %v3418_v48, %v3050_v47  ;;  %v3384_v51 = vld [vmem:[%s5206_s3 + $0x1e4] sm:$0xf] }
  0x78   :  { %995 = vmatpush.bf16.msrb.mxu0 %v2215_v63  ;;  %v2907_v57 = vor.u32 %v3382_v56, %v2906_v54  ;;  %v2890_v63 = vld [vmem:[%s5206_s3 + $0x1a0] sm:$0xf] }
  0x79   :  { %1009 = vmatpush.bf16.msrb.mxu1 %v2343_v1  ;;  %v3378_v1 = vld [vmem:[%s5206_s3 + $0x1ac] sm:$0xf0]  ;;  %v2954_v48 = vld [vmem:[%s5206_s3 + $0x220] sm:$0xf] }
  0x7a   :  { %1023 = vmatpush.bf16.msrb.mxu2 %v2471_v2  ;;  %v2891_v2 = vor.u32 %v3378_v1, %v2890_v63  ;;  %v3034_v63 = vld [vmem:[%s5206_s3 + $0x2c0] sm:$0xf]  ;;  %v3414_v1 = vld [vmem:[%s5206_s3 + $0x2cc] sm:$0xf0] }
  0x7b   :  { %1037 = vmatpush.bf16.msrb.mxu3 %v2599_v6  ;;  %v2767_v6 = vor.u32 %v3344_v3, %v2764_v4  ;;  %v3035_v3 = vor.u32 %v3414_v1, %v3034_v63  ;;  %v2908_v4 = vld [vmem:[%s5206_s3 + $0x1d0] sm:$0xf0] }
  0x7c   :  { %996 = vmatpush.bf16.msrb.mxu0 %v2199_v12  ;;  %v154_v12 = vperm.slane %v4401_v5, 0 }
  0x7d   :  { %1010 = vmatpush.bf16.msrb.mxu1 %v2327_v14  ;;  %v2858_v14 = vld [vmem:[%s5206_s3 + $0x160] sm:$0xf] }
  0x7e   :  { %1024 = vmatpush.bf16.msrb.mxu2 %v2455_v15  ;;  %v3370_v15 = vld [vmem:[%s5206_s3 + $0x16c] sm:$0xf0] }
  0x7f   :  { %1038 = vmatpush.bf16.msrb.mxu3 %v2583_v19  ;;  %v2859_v17 = vor.u32 %v3370_v15, %v2858_v14  ;;  %v2732_v19 = vld [vmem:[%s5206_s3 + $0x70] sm:$0xf0] }
  0x80   :  { %997 = vmatpush.bf16.msrb.mxu0 %v2183_v26  ;;  %v2735_v23 = vor.u32 %v3336_v18, %v2732_v19  ;;  %v2843_v26 = vor.u32 %v3366_v25, %v2842_v24  ;;  %v2892_v14 = vld [vmem:[%s5206_s3 + $0x1b0] sm:$0xf0]  ;;  %v3002_v18 = vld [vmem:[%s5206_s3 + $0x280] sm:$0xf]  ;;  %v3406_v19 = vld [vmem:[%s5206_s3 + $0x28c] sm:$0xf0] }
  0x81   :  { %1011 = vmatpush.bf16.msrb.mxu1 %v2311_v27  ;;  %v3332_v27 = vld [vmem:[%s5206_s3 + $0x44] sm:$0xf]  ;;  %v155_v25 = vperm.slane %v4401_v5, 1 }
  0x82   :  { %1025 = vmatpush.bf16.msrb.mxu2 %v2439_v28  ;;  %v2716_v28 = vld [vmem:[%s5206_s3 + $0x50] sm:$0xf0] }
  0x83   :  { %1039 = vmatpush.bf16.msrb.mxu3 %v2567_v29  ;;  %998 = vmatmul.bf16.vlgmr.msrb.gmra.mxu0 %v3758_v59  ;;  %v2746_v59 = vld [vmem:[%s5206_s3 + $0x80] sm:$0xf]  ;;  %v2719_v32 = vor.u32 %v3332_v27, %v2716_v28  ;;  %v3402_v28 = vld [vmem:[%s5206_s3 + $0x26c] sm:$0xf0] }
  0x84   :  { %1900 = vmatpush.bf16.msra.mxu0 %v2795_v30  ;;  %1012 = vmatmul.bf16.vlgmr.msrb.gmra.mxu1 %v3768_v0  ;;  %v2747_v38 = vor.u32 %v3342_v37, %v2746_v59  ;;  %v2730_v0 = vld [vmem:[%s5206_s3 + $0x60] sm:$0xf]  ;;  %v3328_v37 = vld [vmem:[%s5206_s3 + $0x24] sm:$0xf] }
  0x85   :  { %1026 = vmatmul.bf16.vlgmr.msrb.gmra.mxu2 %v3747_v55  ;;  %v3338_v55 = vld [vmem:[%s5206_s3 + $0x6c] sm:$0xf0]  ;;  %1914 = vmatpush.bf16.msra.mxu1 %v2923_v49  ;;  %v2986_v27 = vld [vmem:[%s5206_s3 + $0x260] sm:$0xf] }
  0x86   :  { %1040 = vmatmul.bf16.vlgmr.msrb.gmra.mxu3 %v3760_v60  ;;  %v2731_v60 = vor.u32 %v3338_v55, %v2730_v0  ;;  %1928 = vmatpush.bf16.msra.mxu2 %v3051_v50  ;;  %v3360_v50 = vld [vmem:[%s5206_s3 + $0x124] sm:$0xf] }
  0x88   :  { %1901 = vmatpush.bf16.msra.mxu0 %v2779_v33  ;;  %v2826_v33 = vld [vmem:[%s5206_s3 + $0x120] sm:$0xf] }
  0x89   :  { %1915 = vmatpush.bf16.msra.mxu1 %v2907_v57  ;;  %v2827_v59 = vor.u32 %v3362_v34, %v2826_v33 }
  0x8a   :  { %1929 = vmatpush.bf16.msra.mxu2 %v3035_v3 }
  0x8c   :  { %1902 = vmatpush.bf16.msra.mxu0 %v2763_v36 }
  0x8d   :  { %1916 = vmatpush.bf16.msra.mxu1 %v2891_v2  ;;  %v3380_v2 = vld [vmem:[%s5206_s3 + $0x1c4] sm:$0xf] }
  0x8e   :  { %v2911_v8 = vor.u32 %v3380_v2, %v2908_v4 }
  0x90   :  { %1903 = vmatpush.bf16.msra.mxu0 %v2747_v38  ;;  %v2700_v38 = vld [vmem:[%s5206_s3 + $0x30] sm:$0xf0] }
  0x91   :  { %1917 = vmatpush.bf16.msra.mxu1 %v2875_v9  ;;  %v2703_v40 = vor.u32 %v3328_v37, %v2700_v38  ;;  %v2970_v37 = vld [vmem:[%s5206_s3 + $0x240] sm:$0xf]  ;;  %v3398_v38 = vld [vmem:[%s5206_s3 + $0x24c] sm:$0xf0] }
  0x94   :  { %1904 = vmatpush.bf16.msra.mxu0 %v2731_v60 }
  0x95   :  { %1918 = vmatpush.bf16.msra.mxu1 %v2859_v17 }
  0x98   :  { %1905 = vmatpush.bf16.msra.mxu0 %v2715_v41  ;;  %v2810_v41 = vld [vmem:[%s5206_s3 + $0x100] sm:$0xf] }
  0x99   :  { %1919 = vmatpush.bf16.msra.mxu1 %v2843_v26  ;;  %v2811_v45 = vor.u32 %v3358_v42, %v2810_v41 }
  0x9c   :  { %1906 = vmatpush.bf16.msra.mxu0 %v2699_v44 }
  0x9d   :  { %1920 = vmatpush.bf16.msra.mxu1 %v2827_v59 }
  0xa0   :  { %1907 = vmatpush.bf16.msra.mxu0 %v2683_v52  ;;  %v2924_v52 = vld [vmem:[%s5206_s3 + $0x1f0] sm:$0xf0] }
  0xa1   :  { %v845_v21 = vpop.f32.mrf.mxu1  ;;  %1921 = vmatpush.bf16.msra.mxu1 %v2811_v45  ;;  %v2927_v57 = vor.u32 %v3384_v51, %v2924_v52  ;;  %v2802_v45 = vld [vmem:[%s5206_s3 + $0xe8] sm:$0xf]  ;;  %v3355_v52 = vld [vmem:[%s5206_s3 + $0xf4] sm:$0xf0] }
  0xa2   :  { %v2803_v4 = vor.u32 %v3355_v52, %v2802_v45 }
  0xa3   :  { %v831_v16 = vpop.f32.mrf.mxu0 }
  0xa4   :  { %1956 = vmatpush.bf16.msrb.mxu0 %v2799_v53  ;;  %v832_v20 = vadd.f32 %v831_v16, %v154_v12 }
  0xa5   :  { %1970 = vmatpush.bf16.msrb.mxu1 %v2927_v57 }
  0xa6   :  { %v846_v22 = vadd.f32 %v845_v21, %v832_v20  ;;  %v3372_v20 = vld [vmem:[%s5206_s3 + $0x184] sm:$0xf]  ;;  %v3003_v21 = vor.u32 %v3406_v19, %v3002_v18 }
  0xa8   :  { %1957 = vmatpush.bf16.msrb.mxu0 %v2783_v62  ;;  %v859_v29 = vpop.f32.mrf.mxu2 }
  0xa9   :  { %v860_v30 = vadd.f32 %v859_v29, %v846_v22  ;;  %v847_v55 = vpop.f32.mrf.mxu1  ;;  %1971 = vmatpush.bf16.msrb.mxu1 %v2911_v8  ;;  %v2876_v22 = vld [vmem:[%s5206_s3 + $0x190] sm:$0xf0]  ;;  %v3368_v29 = vld [vmem:[%s5206_s3 + $0x164] sm:$0xf] }
  0xaa   :  { %v2879_v24 = vor.u32 %v3372_v20, %v2876_v22  ;;  %v3052_v20 = vld [vmem:[%s5206_s3 + $0x2f0] sm:$0xf0] }
  0xab   :  { %v873_v31 = vpop.f32.mrf.mxu3  ;;  %v833_v36 = vpop.f32.mrf.mxu0 }
  0xac   :  { %1958 = vmatpush.bf16.msrb.mxu0 %v2767_v6  ;;  %v4446_v35 = vadd.f32 %v873_v31, %v860_v30  ;;  %v834_v0 = vadd.f32 %v833_v36, %v154_v12  ;;  %v3376_v12 = vld [vmem:[%s5206_s3 + $0x1a4] sm:$0xf]  ;;  %v2987_v30 = vor.u32 %v3402_v28, %v2986_v27  ;;  %v2860_v31 = vld [vmem:[%s5206_s3 + $0x170] sm:$0xf0]  ;;  %v3162_v28 = vld [vmem:[%s5206_s3 + $0x3c0] sm:$0xf] }
  0xad   :  { %v2895_v16 = vor.u32 %v3376_v12, %v2892_v14  ;;  %v2863_v33 = vor.u32 %v3368_v29, %v2860_v31  ;;  %v2812_v12 = vld [vmem:[%s5206_s3 + $0x110] sm:$0xf0]  ;;  %v3446_v29 = vld [vmem:[%s5206_s3 + $0x3cc] sm:$0xf0] }
  0xae   :  { %v1046_v60 = vmul.f32 %v4446_v35, %v4446_v35  ;;  %v848_v39 = vadd.f32 %v847_v55, %v834_v0  ;;  %v3364_v0 = vld [vmem:[%s5206_s3 + $0x144] sm:$0xf] }
  0xaf   :  { %1972 = vmatpush.bf16.msrb.mxu1 %v2895_v16  ;;  %v3450_v16 = vld [vmem:[%s5206_s3 + $0x3ec] sm:$0xf0] }
  0xb0   :  { %1959 = vmatpush.bf16.msrb.mxu0 %v2751_v13  ;;  %v1054_v44 = vmul.f32 %v1046_v60, %v4446_v35  ;;  %v861_v49 = vpop.f32.mrf.mxu2  ;;  %v3019_v13 = vor.u32 %v3410_v11, %v3018_v10  ;;  %v2971_v60 = vor.u32 %v3398_v38, %v2970_v37  ;;  %v3351_v10 = vld [vmem:[%s5206_s3 + $0xd4] sm:$0xf0] }
  0xb1   :  { %v862_v54 = vadd.f32 %v861_v49, %v848_v39  ;;  %v2844_v39 = vld [vmem:[%s5206_s3 + $0x150] sm:$0xf0]  ;;  %v3394_v49 = vld [vmem:[%s5206_s3 + $0x22c] sm:$0xf0] }
  0xb2   :  { %v1062_v53 = vmul.f32 0.044715, %v1054_v44  ;;  %1930 = vmatpush.bf16.msra.mxu2 %v3019_v13  ;;  %v2847_v41 = vor.u32 %v3364_v0, %v2844_v39  ;;  %v2754_v0 = vld [vmem:[%s5206_s3 + $0x88] sm:$0xf]  ;;  %v3442_v39 = vld [vmem:[%s5206_s3 + $0x3ac] sm:$0xf0] }
  0xb3   :  { %v875_v56 = vpop.f32.mrf.mxu3  ;;  %1973 = vmatpush.bf16.msrb.mxu1 %v2879_v24 }
  0xb4   :  { %1960 = vmatpush.bf16.msrb.mxu0 %v2735_v23  ;;  %v1070_v61 = vadd.f32 %v1062_v53, %v4446_v35  ;;  %v4482_v62 = vadd.f32 %v875_v56, %v862_v54  ;;  %v2955_v53 = vor.u32 %v3394_v49, %v2954_v48  ;;  %v2828_v54 = vld [vmem:[%s5206_s3 + $0x130] sm:$0xf0]  ;;  %v3339_v48 = vld [vmem:[%s5206_s3 + $0x74] sm:$0xf0]  ;;  %v3130_v49 = vld [vmem:[%s5206_s3 + $0x380] sm:$0xf] }
  0xb6   :  { %v1078_v6 = vmul.f32 0.7978846, %v1070_v61  ;;  %v1050_v7 = vmul.f32 %v4482_v62, %v4482_v62  ;;  %1931 = vmatpush.bf16.msra.mxu2 %v3003_v21 }
  0xb7   :  { %1974 = vmatpush.bf16.msrb.mxu1 %v2863_v33  ;;  %v3163_v33 = vor.u32 %v3446_v29, %v3162_v28  ;;  %v3353_v28 = vld [vmem:[%s5206_s3 + $0xec] sm:$0xf] }
  0xb8   :  { %1961 = vmatpush.bf16.msrb.mxu0 %v2719_v32  ;;  %v1058_v9 = vmul.f32 %v1050_v7, %v4482_v62  ;;  %3452 = vtanh.f32 %v1078_v6  ;;  %v2938_v6 = vld [vmem:[%s5206_s3 + $0x200] sm:$0xf]  ;;  %v3390_v7 = vld [vmem:[%s5206_s3 + $0x20c] sm:$0xf0] }
  0xb9   :  { %v2939_v11 = vor.u32 %v3390_v7, %v2938_v6  ;;  %v3434_v6 = vld [vmem:[%s5206_s3 + $0x36c] sm:$0xf0] }
  0xba   :  { %v1066_v15 = vmul.f32 0.044715, %v1058_v9  ;;  %1932 = vmatpush.bf16.msra.mxu2 %v2987_v30  ;;  %v2786_v9 = vld [vmem:[%s5206_s3 + $0xc8] sm:$0xf]  ;;  %v3412_v30 = vld [vmem:[%s5206_s3 + $0x2c4] sm:$0xf] }
  0xbb   :  { %1975 = vmatpush.bf16.msrb.mxu1 %v2847_v41  ;;  %v2787_v24 = vor.u32 %v3351_v10, %v2786_v9 }
  0xbc   :  { %1962 = vmatpush.bf16.msrb.mxu0 %v2703_v40  ;;  %v1074_v17 = vadd.f32 %v1066_v15, %v4482_v62  ;;  %v3178_v15 = vld [vmem:[%s5206_s3 + $0x3e0] sm:$0xf] }
  0xbd   :  { %v3179_v19 = vor.u32 %v3450_v16, %v3178_v15 }
  0xbe   :  { %v1082_v23 = vmul.f32 0.7978846, %v1074_v17  ;;  %v3453_v26 = vpop.eup %3452  ;;  %1933 = vmatpush.bf16.msra.mxu2 %v2971_v60  ;;  %v3416_v17 = vld [vmem:[%s5206_s3 + $0x2e4] sm:$0xf]  ;;  %v3146_v60 = vld [vmem:[%s5206_s3 + $0x3a0] sm:$0xf] }
  0xbf   :  { %v1094_v34 = vadd.f32 1.0, %v3453_v26  ;;  %v3347_v26 = vld [vmem:[%s5206_s3 + $0xb4] sm:$0xf0]  ;;  %v3055_v27 = vor.u32 %v3416_v17, %v3052_v20  ;;  %1942 = vmatpush.bf16.msra.mxu3 %v3179_v19  ;;  %v3098_v17 = vld [vmem:[%s5206_s3 + $0x340] sm:$0xf] }
  0xc0   :  { %1963 = vmatpush.bf16.msrb.mxu0 %v2687_v58  ;;  %3454 = vtanh.f32 %v1082_v23  ;;  %v887_v32 = vpop.f32.mrf.mxu0  ;;  %v2831_v58 = vor.u32 %v3360_v50, %v2828_v54  ;;  %v3438_v50 = vld [vmem:[%s5206_s3 + $0x38c] sm:$0xf0]  ;;  %v3004_v54 = vld [vmem:[%s5206_s3 + $0x290] sm:$0xf0]  ;;  %v3396_v19 = vld [vmem:[%s5206_s3 + $0x244] sm:$0xf] }
  0xc1   :  { %v888_v36 = vadd.f32 %v887_v32, %v155_v25  ;;  %v901_v59 = vpop.f32.mrf.mxu1  ;;  %v1102_v42 = vmul.f32 0.5, %v1094_v34  ;;  %v3036_v34 = vld [vmem:[%s5206_s3 + $0x2d0] sm:$0xf0] }
  0xc2   :  { %1934 = vmatpush.bf16.msra.mxu2 %v2955_v53  ;;  %1976 = vmatpush.bf16.msrb.mxu1 %v2831_v58  ;;  %v3131_v53 = vor.u32 %v3438_v50, %v3130_v49  ;;  %v3066_v50 = vld [vmem:[%s5206_s3 + $0x300] sm:$0xf] }
  0xc3   :  { %v902_v55 = vadd.f32 %v901_v59, %v888_v36  ;;  %v1110_v61 = vmul.f32 %v1102_v42, %v4446_v35  ;;  %v3356_v35 = vld [vmem:[%s5206_s3 + $0x104] sm:$0xf]  ;;  %v3039_v36 = vor.u32 %v3412_v30, %v3036_v34  ;;  %1943 = vmatpush.bf16.msra.mxu3 %v3163_v33  ;;  %v3147_v42 = vor.u32 %v3442_v39, %v3146_v60  ;;  %v3082_v33 = vld [vmem:[%s5206_s3 + $0x320] sm:$0xf]  ;;  %v3426_v34 = vld [vmem:[%s5206_s3 + $0x32c] sm:$0xf0] }
  0xc4   :  { %v2815_v14 = vor.u32 %v3356_v35, %v2812_v12  ;;  %v3400_v35 = vld [vmem:[%s5206_s3 + $0x264] sm:$0xf]  ;;  %v2930_v39 = vld [vmem:[%s5206_s3 + $0x1e8] sm:$0xf] }
  0xc6   :  { %v3455_v40 = vpop.eup %3454  ;;  %1935 = vmatpush.bf16.msra.mxu2 %v2939_v11  ;;  %1977 = vmatpush.bf16.msrb.mxu1 %v2815_v14  ;;  %v3331_v14 = vld [vmem:[%s5206_s3 + $0x34] sm:$0xf0] }
  0xc7   :  { %v1098_v43 = vadd.f32 1.0, %v3455_v40  ;;  %v3408_v40 = vld [vmem:[%s5206_s3 + $0x2a4] sm:$0xf]  ;;  %1944 = vmatpush.bf16.msra.mxu3 %v3147_v42 }
  0xc8   :  { %v915_v44 = vpop.f32.mrf.mxu2  ;;  %v889_v57 = vpop.f32.mrf.mxu0 }
  0xc9   :  { %v916_v46 = vadd.f32 %v915_v44, %v902_v55  ;;  %v929_v47 = vpop.f32.mrf.mxu3  ;;  %v1106_v51 = vmul.f32 0.5, %v1098_v43  ;;  %v890_v1 = vadd.f32 %v889_v57, %v155_v25  ;;  %v903_v2 = vpop.f32.mrf.mxu1  ;;  %v2770_v25 = vld [vmem:[%s5206_s3 + $0xa8] sm:$0xf]  ;;  %v3343_v55 = vld [vmem:[%s5206_s3 + $0x94] sm:$0xf0] }
  0xca   :  { %1984 = vmatpush.bf16.msrb.mxu2 %v3055_v27  ;;  %v2771_v38 = vor.u32 %v3347_v26, %v2770_v25  ;;  %v3020_v43 = vld [vmem:[%s5206_s3 + $0x2b0] sm:$0xf0]  ;;  %v2690_v26 = vld [vmem:[%s5206_s3 + $0x8] sm:$0xf]  ;;  %v3327_v27 = vld [vmem:[%s5206_s3 + $0x14] sm:$0xf0] }
  0xcb   :  { %v4567_v56 = vadd.f32 %v929_v47, %v916_v46  ;;  %v1114_v63 = vmul.f32 %v1106_v51, %v4482_v62  ;;  %v904_v62 = vadd.f32 %v903_v2, %v890_v1  ;;  %v3023_v44 = vor.u32 %v3408_v40, %v3020_v43  ;;  %v2738_v47 = vld [vmem:[%s5206_s3 + $0x68] sm:$0xf]  ;;  %v3404_v51 = vld [vmem:[%s5206_s3 + $0x284] sm:$0xf]  ;;  %1945 = vmatpush.bf16.msra.mxu3 %v3131_v53  ;;  %v3387_v40 = vld [vmem:[%s5206_s3 + $0x1f4] sm:$0xf0] }
  0xcc   :  { %v2755_v46 = vor.u32 %v3343_v55, %v2754_v0  ;;  %v3007_v57 = vor.u32 %v3404_v51, %v3004_v54  ;;  %v2722_v1 = vld [vmem:[%s5206_s3 + $0x48] sm:$0xf]  ;;  %v3392_v0 = vld [vmem:[%s5206_s3 + $0x224] sm:$0xf]  ;;  %v2956_v55 = vld [vmem:[%s5206_s3 + $0x230] sm:$0xf0] }
  0xcd   :  { %v1047_v3 = vmul.f32 %v4567_v56, %v4567_v56  ;;  %v4582_v8 = vpack.c.bf16 %v1114_v63, %v1110_v61  ;;  %v156_v61 = vperm.slane %v4401_v5, 2  ;;  %v2739_v63 = vor.u32 %v3339_v48, %v2738_v47  ;;  %v3422_v51 = vld [vmem:[%s5206_s3 + $0x30c] sm:$0xf0]  ;;  %v3349_v53 = vld [vmem:[%s5206_s3 + $0xcc] sm:$0xf] }
  0xce   :  { %1985 = vmatpush.bf16.msrb.mxu2 %v3039_v36  ;;  %v2788_v54 = vld [vmem:[%s5206_s3 + $0xd8] sm:$0xf0] }
  0xcf   :  { %v1055_v13 = vmul.f32 %v1047_v3, %v4567_v56  ;;  %1908 = vmatmul.bf16.vlgmr.msra.gmra.mxu0 %v4582_v8  ;;  %v3335_v3 = vld [vmem:[%s5206_s3 + $0x54] sm:$0xf0] }
  0xd0   :  { %v917_v18 = vpop.f32.mrf.mxu2  ;;  %2012 = vmatpush.bf16.msra.mxu0 %v2803_v4  ;;  %v3114_v4 = vld [vmem:[%s5206_s3 + $0x360] sm:$0xf]  ;;  %v2723_v12 = vor.u32 %v3335_v3, %v2722_v1  ;;  %v2914_v1 = vld [vmem:[%s5206_s3 + $0x1c8] sm:$0xf] }
  0xd1   :  { %v1063_v21 = vmul.f32 0.044715, %v1055_v13  ;;  %v918_v22 = vadd.f32 %v917_v18, %v904_v62  ;;  %v931_v23 = vpop.f32.mrf.mxu3  ;;  %v3115_v7 = vor.u32 %v3434_v6, %v3114_v4  ;;  %v2988_v62 = vld [vmem:[%s5206_s3 + $0x270] sm:$0xf0]  ;;  %v2706_v13 = vld [vmem:[%s5206_s3 + $0x28] sm:$0xf] }
  0xd2   :  { %1986 = vmatpush.bf16.msrb.mxu2 %v3023_v44  ;;  %v2991_v9 = vor.u32 %v3400_v35, %v2988_v62  ;;  %v3430_v18 = vld [vmem:[%s5206_s3 + $0x34c] sm:$0xf0]  ;;  %v2707_v25 = vor.u32 %v3331_v14, %v2706_v13  ;;  %v2691_v44 = vor.u32 %v3327_v27, %v2690_v26  ;;  %v3448_v4 = vld [vmem:[%s5206_s3 + $0x3e4] sm:$0xf]  ;;  %v2791_v62 = vor.u32 %v3349_v53, %v2788_v54 }
  0xd3   :  { %v1071_v31 = vadd.f32 %v1063_v21, %v4567_v56  ;;  %v4623_v32 = vadd.f32 %v931_v23, %v918_v22  ;;  %1946 = vmatpush.bf16.msra.mxu3 %v3115_v7  ;;  %v3099_v20 = vor.u32 %v3430_v18, %v3098_v17  ;;  %v2972_v21 = vld [vmem:[%s5206_s3 + $0x250] sm:$0xf0]  ;;  %v2898_v18 = vld [vmem:[%s5206_s3 + $0x1a8] sm:$0xf] }
  0xd4   :  { %2013 = vmatpush.bf16.msra.mxu0 %v2787_v24  ;;  %v2975_v23 = vor.u32 %v3396_v19, %v2972_v21  ;;  %v3180_v7 = vld [vmem:[%s5206_s3 + $0x3f0] sm:$0xf0]  ;;  %v3379_v19 = vld [vmem:[%s5206_s3 + $0x1b4] sm:$0xf0] }
  0xd5   :  { %v1079_v59 = vmul.f32 0.7978846, %v1071_v31  ;;  %v1051_v37 = vmul.f32 %v4623_v32, %v4623_v32  ;;  %v3164_v17 = vld [vmem:[%s5206_s3 + $0x3d0] sm:$0xf0] }
  0xd6   :  { %1987 = vmatpush.bf16.msrb.mxu2 %v3007_v57  ;;  %v3067_v57 = vor.u32 %v3422_v51, %v3066_v50  ;;  %v3432_v51 = vld [vmem:[%s5206_s3 + $0x364] sm:$0xf] }
  0xd7   :  { %v1059_v41 = vmul.f32 %v1051_v37, %v4623_v32  ;;  %3456 = vtanh.f32 %v1079_v59  ;;  %1947 = vmatpush.bf16.msra.mxu3 %v3099_v20  ;;  %v2804_v37 = vld [vmem:[%s5206_s3 + $0xf8] sm:$0xf0] }
  0xd8   :  { %2014 = vmatpush.bf16.msra.mxu0 %v2771_v38  ;;  %v3083_v38 = vor.u32 %v3426_v34, %v3082_v33  ;;  %v2807_v49 = vor.u32 %v3353_v28, %v2804_v37  ;;  %v2899_v28 = vor.u32 %v3379_v19, %v2898_v18  ;;  %v3375_v33 = vld [vmem:[%s5206_s3 + $0x194] sm:$0xf0]  ;;  %v3337_v37 = vld [vmem:[%s5206_s3 + $0x6c] sm:$0xf] }
  0xd9   :  { %v1067_v45 = vmul.f32 0.044715, %v1059_v41  ;;  %v2959_v41 = vor.u32 %v3392_v0, %v2956_v55 }
  0xda   :  { %1988 = vmatpush.bf16.msrb.mxu2 %v2991_v9  ;;  %v3345_v9 = vld [vmem:[%s5206_s3 + $0xac] sm:$0xf] }
  0xdb   :  { %v1075_v52 = vadd.f32 %v1067_v45, %v4623_v32  ;;  %1948 = vmatpush.bf16.msra.mxu3 %v3083_v38  ;;  %v2740_v38 = vld [vmem:[%s5206_s3 + $0x78] sm:$0xf0] }
  0xdc   :  { %2015 = vmatpush.bf16.msra.mxu0 %v2755_v46 }
  0xdd   :  { %v1083_v58 = vmul.f32 0.7978846, %v1075_v52  ;;  %v3457_v2 = vpop.eup %3456  ;;  %v3388_v52 = vld [vmem:[%s5206_s3 + $0x204] sm:$0xf] }
  0xde   :  { %v1095_v10 = vadd.f32 1.0, %v3457_v2  ;;  %1989 = vmatpush.bf16.msrb.mxu2 %v2975_v23  ;;  %v3383_v2 = vld [vmem:[%s5206_s3 + $0x1d4] sm:$0xf0] }
  0xdf   :  { %3458 = vtanh.f32 %v1083_v58  ;;  %1964 = vmatmul.bf16.vlgmr.msrb.gmra.mxu0 %v4582_v8  ;;  %v2940_v58 = vld [vmem:[%s5206_s3 + $0x210] sm:$0xf0]  ;;  %1949 = vmatpush.bf16.msra.mxu3 %v3067_v57 }
  0xe0   :  { %v943_v11 = vpop.f32.mrf.mxu0  ;;  %2016 = vmatpush.bf16.msra.mxu0 %v2739_v63  ;;  %v1103_v29 = vmul.f32 0.5, %v1095_v10  ;;  %v2943_v3 = vor.u32 %v3388_v52, %v2940_v58  ;;  %v2772_v10 = vld [vmem:[%s5206_s3 + $0xb8] sm:$0xf0]  ;;  %v2850_v52 = vld [vmem:[%s5206_s3 + $0x148] sm:$0xf] }
  0xe1   :  { %v944_v15 = vadd.f32 %v943_v11, %v156_v61  ;;  %v957_v16 = vpop.f32.mrf.mxu1  ;;  %v3183_v11 = vor.u32 %v3448_v4, %v3180_v7  ;;  %v2775_v23 = vor.u32 %v3345_v9, %v2772_v10  ;;  %v3100_v4 = vld [vmem:[%s5206_s3 + $0x350] sm:$0xf0] }
  0xe2   :  { %v1111_v45 = vmul.f32 %v1103_v29, %v4567_v56  ;;  %1990 = vmatpush.bf16.msrb.mxu2 %v2959_v41  ;;  %v3440_v29 = vld [vmem:[%s5206_s3 + $0x3a4] sm:$0xf]  ;;  %v3371_v41 = vld [vmem:[%s5206_s3 + $0x174] sm:$0xf0] }
  0xe3   :  { %v958_v22 = vadd.f32 %v957_v16, %v944_v15  ;;  %v2915_v15 = vor.u32 %v3383_v2, %v2914_v1  ;;  %v3444_v16 = vld [vmem:[%s5206_s3 + $0x3c4] sm:$0xf]  ;;  %1998 = vmatpush.bf16.msrb.mxu3 %v3183_v11  ;;  %v2708_v2 = vld [vmem:[%s5206_s3 + $0x38] sm:$0xf0] }
  0xe4   :  { %2017 = vmatpush.bf16.msra.mxu0 %v2723_v12 }
  0xe5   :  { %v3459_v24 = vpop.eup %3458 }
  0xe6   :  { %v1099_v30 = vadd.f32 1.0, %v3459_v24  ;;  %1991 = vmatpush.bf16.msrb.mxu2 %v2943_v3  ;;  %v3341_v24 = vld [vmem:[%s5206_s3 + $0x8c] sm:$0xf]  ;;  %v3428_v3 = vld [vmem:[%s5206_s3 + $0x344] sm:$0xf] }
  0xe7   :  { %v3103_v10 = vor.u32 %v3428_v3, %v3100_v4 }
  0xe8   :  { %v971_v31 = vpop.f32.mrf.mxu2  ;;  %v1107_v60 = vmul.f32 0.5, %v1099_v30  ;;  %v945_v43 = vpop.f32.mrf.mxu0  ;;  %2018 = vmatpush.bf16.msra.mxu0 %v2707_v25  ;;  %v2756_v25 = vld [vmem:[%s5206_s3 + $0x98] sm:$0xf0]  ;;  %v3148_v30 = vld [vmem:[%s5206_s3 + $0x3b0] sm:$0xf0] }
  0xe9   :  { %v972_v36 = vadd.f32 %v971_v31, %v958_v22  ;;  %v985_v59 = vpop.f32.mrf.mxu3  ;;  %v946_v47 = vadd.f32 %v945_v43, %v156_v61  ;;  %v959_v48 = vpop.f32.mrf.mxu1  ;;  %v3167_v22 = vor.u32 %v3444_v16, %v3164_v17  ;;  %v2882_v31 = vld [vmem:[%s5206_s3 + $0x188] sm:$0xf]  ;;  %v3424_v16 = vld [vmem:[%s5206_s3 + $0x324] sm:$0xf]  ;;  %v3084_v17 = vld [vmem:[%s5206_s3 + $0x330] sm:$0xf0] }
  0xea   :  { %v1115_v46 = vmul.f32 %v1107_v60, %v4623_v32  ;;  %v2931_v32 = vor.u32 %v3387_v40, %v2930_v39  ;;  %v2883_v55 = vor.u32 %v3375_v33, %v2882_v31  ;;  %v3436_v60 = vld [vmem:[%s5206_s3 + $0x384] sm:$0xf]  ;;  %v3132_v39 = vld [vmem:[%s5206_s3 + $0x390] sm:$0xf0]  ;;  %v2866_v40 = vld [vmem:[%s5206_s3 + $0x168] sm:$0xf] }
  0xeb   :  { %v4736_v42 = vadd.f32 %v985_v59, %v972_v36  ;;  %v960_v61 = vadd.f32 %v959_v48, %v946_v47  ;;  %1999 = vmatpush.bf16.msrb.mxu3 %v3167_v22  ;;  %v3151_v36 = vor.u32 %v3440_v29, %v3148_v30  ;;  %v2759_v59 = vor.u32 %v3341_v24, %v2756_v25  ;;  %v3333_v47 = vld [vmem:[%s5206_s3 + $0x4c] sm:$0xf]  ;;  %v2724_v48 = vld [vmem:[%s5206_s3 + $0x58] sm:$0xf0]  ;;  %v2818_v22 = vld [vmem:[%s5206_s3 + $0x108] sm:$0xf] }
  0xec   :  { %v4760_v63 = vpack.c.bf16 %v1115_v46, %v1111_v45  ;;  %2019 = vmatpush.bf16.msra.mxu0 %v2691_v44  ;;  %v3135_v44 = vor.u32 %v3436_v60, %v3132_v39  ;;  %v157_v45 = vperm.slane %v4401_v5, 3  ;;  %v2743_v46 = vor.u32 %v3337_v37, %v2740_v38  ;;  %v3116_v5 = vld [vmem:[%s5206_s3 + $0x370] sm:$0xf0]  ;;  %v3058_v33 = vld [vmem:[%s5206_s3 + $0x2e8] sm:$0xf] }
  0xed   :  { %v1048_v56 = vmul.f32 %v4736_v42, %v4736_v42  ;;  %v2867_v50 = vor.u32 %v3371_v41, %v2866_v40  ;;  %v3119_v54 = vor.u32 %v3432_v51, %v3116_v5  ;;  %v2727_v58 = vor.u32 %v3333_v47, %v2724_v48  ;;  %v3420_v38 = vld [vmem:[%s5206_s3 + $0x304] sm:$0xf] }
  0xee   :  { %1922 = vmatmul.bf16.vlgmr.msra.gmra.mxu1 %v4760_v63  ;;  %v3087_v29 = vor.u32 %v3424_v16, %v3084_v17  ;;  %v3403_v16 = vld [vmem:[%s5206_s3 + $0x274] sm:$0xf0] }
  0xef   :  { %v1056_v6 = vmul.f32 %v1048_v56, %v4736_v42  ;;  %2026 = vmatpush.bf16.msra.mxu1 %v2931_v32  ;;  %2020 = vmatmul.bf16.vlgmr.msra.gmra.mxu0 %v4582_v8  ;;  %v3367_v56 = vld [vmem:[%s5206_s3 + $0x154] sm:$0xf0] }
  0xf0   :  { %v973_v35 = vpop.f32.mrf.mxu2  ;;  %2068 = vmatpush.bf16.msrb.mxu0 %v2807_v49  ;;  %2000 = vmatpush.bf16.msrb.mxu3 %v3151_v36  ;;  %v2851_v1 = vor.u32 %v3367_v56, %v2850_v52 }
  0xf1   :  { %v1064_v12 = vmul.f32 0.044715, %v1056_v6  ;;  %v974_v13 = vadd.f32 %v973_v35, %v960_v61  ;;  %v987_v14 = vpop.f32.mrf.mxu3  ;;  %v3329_v61 = vld [vmem:[%s5206_s3 + $0x2c] sm:$0xf]  ;;  %v2834_v35 = vld [vmem:[%s5206_s3 + $0x128] sm:$0xf] }
  0xf2   :  { %v2711_v11 = vor.u32 %v3329_v61, %v2708_v2 }
  0xf3   :  { %v1072_v20 = vadd.f32 %v1064_v12, %v4736_v42  ;;  %v4796_v21 = vadd.f32 %v987_v14, %v974_v13  ;;  %2027 = vmatpush.bf16.msra.mxu1 %v2915_v15  ;;  %v3325_v12 = vld [vmem:[%s5206_s3 + $0xc] sm:$0xf]  ;;  %v2692_v15 = vld [vmem:[%s5206_s3 + $0x18] sm:$0xf0] }
  0xf4   :  { %2069 = vmatpush.bf16.msrb.mxu0 %v2791_v62  ;;  %2001 = vmatpush.bf16.msrb.mxu3 %v3135_v44  ;;  %v3363_v62 = vld [vmem:[%s5206_s3 + $0x134] sm:$0xf0]  ;;  %v2695_v31 = vor.u32 %v3325_v12, %v2692_v15  ;;  %v2916_v44 = vld [vmem:[%s5206_s3 + $0x1d8] sm:$0xf0]  ;;  %v2994_v15 = vld [vmem:[%s5206_s3 + $0x268] sm:$0xf] }
  0xf5   :  { %v1080_v26 = vmul.f32 0.7978846, %v1072_v20  ;;  %v1052_v27 = vmul.f32 %v4796_v21, %v4796_v21  ;;  %v2835_v14 = vor.u32 %v3363_v62, %v2834_v35  ;;  %v3010_v35 = vld [vmem:[%s5206_s3 + $0x288] sm:$0xf]  ;;  %v3407_v62 = vld [vmem:[%s5206_s3 + $0x294] sm:$0xf0] }
  0xf6   :  { %v3011_v12 = vor.u32 %v3407_v62, %v3010_v35 }
  0xf7   :  { %v1060_v34 = vmul.f32 %v1052_v27, %v4796_v21  ;;  %3460 = vtanh.f32 %v1080_v26  ;;  %2028 = vmatpush.bf16.msra.mxu1 %v2899_v28  ;;  %v3385_v27 = vld [vmem:[%s5206_s3 + $0x1ec] sm:$0xf]  ;;  %v2932_v28 = vld [vmem:[%s5206_s3 + $0x1f8] sm:$0xf0] }
  0xf8   :  { %2070 = vmatpush.bf16.msrb.mxu0 %v2775_v23  ;;  %2002 = vmatpush.bf16.msrb.mxu3 %v3119_v54  ;;  %v3359_v23 = vld [vmem:[%s5206_s3 + $0x114] sm:$0xf0]  ;;  %v2935_v39 = vor.u32 %v3385_v27, %v2932_v28 }
  0xf9   :  { %v1068_v0 = vmul.f32 0.044715, %v1060_v34  ;;  %v3419_v34 = vld [vmem:[%s5206_s3 + $0x2f4] sm:$0xf0]  ;;  %v2819_v37 = vor.u32 %v3359_v23, %v2818_v22  ;;  %v3365_v22 = vld [vmem:[%s5206_s3 + $0x14c] sm:$0xf] }
  0xfa   :  { %v3059_v41 = vor.u32 %v3419_v34, %v3058_v33  ;;  %v2852_v23 = vld [vmem:[%s5206_s3 + $0x158] sm:$0xf0]  ;;  %v2962_v33 = vld [vmem:[%s5206_s3 + $0x228] sm:$0xf]  ;;  %v3395_v34 = vld [vmem:[%s5206_s3 + $0x234] sm:$0xf0] }
  0xfb   :  { %v1076_v43 = vadd.f32 %v1068_v0, %v4796_v21  ;;  %2029 = vmatpush.bf16.msra.mxu1 %v2883_v55  ;;  %v3068_v0 = vld [vmem:[%s5206_s3 + $0x310] sm:$0xf0]  ;;  %v2855_v27 = vor.u32 %v3365_v22, %v2852_v23  ;;  %v3393_v22 = vld [vmem:[%s5206_s3 + $0x22c] sm:$0xf]  ;;  %v2964_v23 = vld [vmem:[%s5206_s3 + $0x238] sm:$0xf0] }
  0xfc   :  { %2071 = vmatpush.bf16.msrb.mxu0 %v2759_v59  ;;  %2003 = vmatpush.bf16.msrb.mxu3 %v3103_v10  ;;  %v3071_v47 = vor.u32 %v3420_v38, %v3068_v0  ;;  %v2963_v38 = vor.u32 %v3395_v34, %v2962_v33  ;;  %v3357_v0 = vld [vmem:[%s5206_s3 + $0x10c] sm:$0xf]  ;;  %v3188_v34 = vld [vmem:[%s5206_s3 + $0x3f8] sm:$0xf0] }
  0xfd   :  { %v1084_v49 = vmul.f32 0.7978846, %v1076_v43  ;;  %v3461_v32 = vpop.eup %3460  ;;  %v3381_v43 = vld [vmem:[%s5206_s3 + $0x1cc] sm:$0xf] }
  0xfe   :  { %1978 = vmatmul.bf16.vlgmr.msrb.gmra.mxu1 %v4760_v63  ;;  %v1096_v6 = vadd.f32 1.0, %v3461_v32  ;;  %v2919_v51 = vor.u32 %v3381_v43, %v2916_v44  ;;  %v3377_v32 = vld [vmem:[%s5206_s3 + $0x1ac] sm:$0xf]  ;;  %v3060_v44 = vld [vmem:[%s5206_s3 + $0x2f8] sm:$0xf0] }
  0xff   :  { %3462 = vtanh.f32 %v1084_v49  ;;  %2030 = vmatpush.bf16.msra.mxu1 %v2867_v50  ;;  %v3417_v43 = vld [vmem:[%s5206_s3 + $0x2ec] sm:$0xf] }
 0x100   :  { %v999_v53 = vpop.f32.mrf.mxu0  ;;  %2072 = vmatpush.bf16.msrb.mxu0 %v2743_v46  ;;  %v1104_v18 = vmul.f32 0.5, %v1096_v6  ;;  %2004 = vmatpush.bf16.msrb.mxu3 %v3087_v29  ;;  %v3373_v6 = vld [vmem:[%s5206_s3 + $0x18c] sm:$0xf] }
 0x101   :  { %v1000_v57 = vadd.f32 %v999_v53, %v157_v45  ;;  %v1013_v7 = vpop.f32.mrf.mxu1  ;;  %v2900_v53 = vld [vmem:[%s5206_s3 + $0x1b8] sm:$0xf0]  ;;  %v3361_v29 = vld [vmem:[%s5206_s3 + $0x12c] sm:$0xf] }
 0x102   :  { %v1112_v55 = vmul.f32 %v1104_v18, %v4736_v42  ;;  %v3042_v42 = vld [vmem:[%s5206_s3 + $0x2c8] sm:$0xf]  ;;  %v3449_v33 = vld [vmem:[%s5206_s3 + $0x3ec] sm:$0xf] }
 0x103   :  { %v1014_v9 = vadd.f32 %v1013_v7, %v1000_v57  ;;  %2031 = vmatpush.bf16.msra.mxu1 %v2851_v1  ;;  %v3026_v57 = vld [vmem:[%s5206_s3 + $0x2a8] sm:$0xf]  ;;  %v2903_v1 = vor.u32 %v3377_v32, %v2900_v53  ;;  %v2884_v7 = vld [vmem:[%s5206_s3 + $0x198] sm:$0xf0] }
 0x104   :  { %2073 = vmatpush.bf16.msrb.mxu0 %v2727_v58  ;;  %2005 = vmatpush.bf16.msrb.mxu3 %v3071_v47  ;;  %v2887_v10 = vor.u32 %v3373_v6, %v2884_v7  ;;  %v3451_v47 = vld [vmem:[%s5206_s3 + $0x3f4] sm:$0xf0]  ;;  %v3170_v53 = vld [vmem:[%s5206_s3 + $0x3c8] sm:$0xf] }
 0x105   :  { %v3463_v13 = vpop.eup %3462  ;;  %v3138_v6 = vld [vmem:[%s5206_s3 + $0x388] sm:$0xf]  ;;  %v3439_v7 = vld [vmem:[%s5206_s3 + $0x394] sm:$0xf0] }
 0x106   :  { %v1100_v19 = vadd.f32 1.0, %v3463_v13  ;;  %v3369_v13 = vld [vmem:[%s5206_s3 + $0x16c] sm:$0xf]  ;;  %v3139_v62 = vor.u32 %v3439_v7, %v3138_v6 }
 0x107   :  { %2032 = vmatpush.bf16.msra.mxu1 %v2835_v14  ;;  %v2868_v14 = vld [vmem:[%s5206_s3 + $0x178] sm:$0xf0] }
 0x108   :  { %v1027_v20 = vpop.f32.mrf.mxu2  ;;  %v1001_v26 = vpop.f32.mrf.mxu0  ;;  %v1108_v30 = vmul.f32 0.5, %v1100_v19  ;;  %2074 = vmatpush.bf16.msrb.mxu0 %v2711_v11  ;;  %v2871_v18 = vor.u32 %v3369_v13, %v2868_v14 }
 0x109   :  { %v1028_v24 = vadd.f32 %v1027_v20, %v1014_v9  ;;  %v1041_v25 = vpop.f32.mrf.mxu3  ;;  %v1002_v59 = vadd.f32 %v1001_v26, %v157_v45  ;;  %v1015_v45 = vpop.f32.mrf.mxu1  ;;  %v2995_v20 = vor.u32 %v3403_v16, %v2994_v15  ;;  %v3397_v15 = vld [vmem:[%s5206_s3 + $0x24c] sm:$0xf]  ;;  %v2980_v16 = vld [vmem:[%s5206_s3 + $0x258] sm:$0xf0] }
 0x10a   :  { %v1116_v60 = vmul.f32 %v1108_v30, %v4796_v21  ;;  %v3415_v21 = vld [vmem:[%s5206_s3 + $0x2d4] sm:$0xf0]  ;;  %v2836_v30 = vld [vmem:[%s5206_s3 + $0x138] sm:$0xf0] }
 0x10b   :  { %v4906_v36 = vadd.f32 %v1041_v25, %v1028_v24  ;;  %v1016_v49 = vadd.f32 %v1015_v45, %v1002_v59  ;;  %2033 = vmatpush.bf16.msra.mxu1 %v2819_v37  ;;  %v3043_v56 = vor.u32 %v3415_v21, %v3042_v42  ;;  %v2978_v24 = vld [vmem:[%s5206_s3 + $0x248] sm:$0xf]  ;;  %v3399_v25 = vld [vmem:[%s5206_s3 + $0x254] sm:$0xf0]  ;;  %v2839_v59 = vor.u32 %v3361_v29, %v2836_v30  ;;  %v2948_v29 = vld [vmem:[%s5206_s3 + $0x218] sm:$0xf0] }
 0x10c   :  { %2075 = vmatpush.bf16.msrb.mxu0 %v2695_v31  ;;  %v4924_v46 = vpack.c.bf16 %v1116_v60, %v1112_v55  ;;  %v2979_v28 = vor.u32 %v3399_v25, %v2978_v24  ;;  %v2820_v55 = vld [vmem:[%s5206_s3 + $0x118] sm:$0xf0]  ;;  %v3186_v21 = vld [vmem:[%s5206_s3 + $0x3e8] sm:$0xf]  ;;  %v3427_v25 = vld [vmem:[%s5206_s3 + $0x334] sm:$0xf0] }
 0x10d   :  { %v1049_v40 = vmul.f32 %v4906_v36, %v4906_v36  ;;  %v2823_v42 = vor.u32 %v3357_v0, %v2820_v55  ;;  %v3090_v24 = vld [vmem:[%s5206_s3 + $0x328] sm:$0xf]  ;;  %v3445_v0 = vld [vmem:[%s5206_s3 + $0x3cc] sm:$0xf]  ;;  %v3172_v55 = vld [vmem:[%s5206_s3 + $0x3d8] sm:$0xf0] }
 0x10e   :  { %1936 = vmatmul.bf16.vlgmr.msra.gmra.mxu2 %v4924_v46  ;;  %2034 = vmatmul.bf16.vlgmr.msra.gmra.mxu1 %v4760_v63  ;;  %v3074_v30 = vld [vmem:[%s5206_s3 + $0x308] sm:$0xf] }
 0x10f   :  { %v1057_v48 = vmul.f32 %v1049_v40, %v4906_v36  ;;  %2082 = vmatpush.bf16.msrb.mxu1 %v2935_v39  ;;  %2040 = vmatpush.bf16.msra.mxu2 %v3059_v41  ;;  %v2946_v40 = vld [vmem:[%s5206_s3 + $0x208] sm:$0xf]  ;;  %v3391_v41 = vld [vmem:[%s5206_s3 + $0x214] sm:$0xf0] }
 0x110   :  { %v1029_v50 = vpop.f32.mrf.mxu2  ;;  %2076 = vmatmul.bf16.vlgmr.msrb.gmra.mxu0 %v4582_v8  ;;  %v3411_v8 = vld [vmem:[%s5206_s3 + $0x2b4] sm:$0xf0] }
 0x111   :  { %v1065_v5 = vmul.f32 0.044715, %v1057_v48  ;;  %v1030_v52 = vadd.f32 %v1029_v50, %v1016_v49  ;;  %v1043_v54 = vpop.f32.mrf.mxu3  ;;  %v3027_v4 = vor.u32 %v3411_v8, %v3026_v57  ;;  %v2947_v48 = vor.u32 %v3391_v41, %v2946_v40  ;;  %v3409_v8 = vld [vmem:[%s5206_s3 + $0x2ac] sm:$0xf]  ;;  %v3156_v40 = vld [vmem:[%s5206_s3 + $0x3b8] sm:$0xf0] }
 0x113   :  { %v1073_v58 = vadd.f32 %v1065_v5, %v4906_v36  ;;  %v4949_v61 = vadd.f32 %v1043_v54, %v1030_v52  ;;  %2083 = vmatpush.bf16.msrb.mxu1 %v2919_v51  ;;  %2041 = vmatpush.bf16.msra.mxu2 %v3043_v56  ;;  %v3063_v51 = vor.u32 %v3417_v43, %v3060_v44  ;;  %v3413_v52 = vld [vmem:[%s5206_s3 + $0x2cc] sm:$0xf]  ;;  %v3044_v56 = vld [vmem:[%s5206_s3 + $0x2d8] sm:$0xf0] }
 0x114   :  { %v3187_v5 = vor.u32 %v3451_v47, %v3186_v21  ;;  %v3047_v54 = vor.u32 %v3413_v52, %v3044_v56  ;;  %v3437_v43 = vld [vmem:[%s5206_s3 + $0x38c] sm:$0xf]  ;;  %v3076_v56 = vld [vmem:[%s5206_s3 + $0x318] sm:$0xf0] }
 0x115   :  { %v1081_v2 = vmul.f32 0.7978846, %v1073_v58  ;;  %v1053_v3 = vmul.f32 %v4949_v61, %v4949_v61  ;;  %v3028_v58 = vld [vmem:[%s5206_s3 + $0x2b8] sm:$0xf0]  ;;  %v3429_v47 = vld [vmem:[%s5206_s3 + $0x34c] sm:$0xf] }
 0x116   :  { %v3421_v52 = vld [vmem:[%s5206_s3 + $0x30c] sm:$0xf] }
 0x117   :  { %v1061_v9 = vmul.f32 %v1053_v3, %v4949_v61  ;;  %2084 = vmatpush.bf16.msrb.mxu1 %v2903_v1  ;;  %3464 = vtanh.f32 %v1081_v2  ;;  %2042 = vmatpush.bf16.msra.mxu2 %v3027_v4  ;;  %v3443_v1 = vld [vmem:[%s5206_s3 + $0x3b4] sm:$0xf0]  ;;  %v3405_v3 = vld [vmem:[%s5206_s3 + $0x28c] sm:$0xf]  ;;  %v3012_v4 = vld [vmem:[%s5206_s3 + $0x298] sm:$0xf0] }
 0x118   :  { %v3015_v35 = vor.u32 %v3405_v3, %v3012_v4 }
 0x119   :  { %v1069_v11 = vmul.f32 0.044715, %v1061_v9  ;;  %v3401_v9 = vld [vmem:[%s5206_s3 + $0x26c] sm:$0xf] }
 0x11b   :  { %v1077_v17 = vadd.f32 %v1069_v11, %v4949_v61  ;;  %2085 = vmatpush.bf16.msrb.mxu1 %v2887_v10  ;;  %2043 = vmatpush.bf16.msra.mxu2 %v3011_v12  ;;  %v2996_v10 = vld [vmem:[%s5206_s3 + $0x278] sm:$0xf0]  ;;  %v3122_v11 = vld [vmem:[%s5206_s3 + $0x368] sm:$0xf]  ;;  %v3435_v12 = vld [vmem:[%s5206_s3 + $0x374] sm:$0xf0] }
 0x11c   :  { %v2999_v13 = vor.u32 %v3401_v9, %v2996_v10  ;;  %v3123_v14 = vor.u32 %v3435_v12, %v3122_v11  ;;  %v20_v10 = vld [vmem:[%s5205_s0] sm:$0xff] }
 0x11d   :  { %v1085_v19 = vmul.f32 0.7978846, %v1077_v17  ;;  %v3465_v26 = vpop.eup %3464  ;;  %v3106_v17 = vld [vmem:[%s5206_s3 + $0x348] sm:$0xf] }
 0x11e   :  { %1992 = vmatmul.bf16.vlgmr.msrb.gmra.mxu2 %v4924_v46  ;;  %v1097_v31 = vadd.f32 1.0, %v3465_v26  ;;  %v2967_v26 = vor.u32 %v3393_v22, %v2964_v23 }
 0x11f   :  { %3466 = vtanh.f32 %v1085_v19  ;;  %2086 = vmatpush.bf16.msrb.mxu1 %v2871_v18  ;;  %2044 = vmatpush.bf16.msra.mxu2 %v2995_v20  ;;  %v3431_v18 = vld [vmem:[%s5206_s3 + $0x354] sm:$0xf0]  ;;  %v2983_v19 = vor.u32 %v3397_v15, %v2980_v16  ;;  %v2124_v15 = vunpack.c.l.bf16 %v20_v10  ;;  %v2125_v16 = vunpack.c.h.bf16 %v20_v10 }
 0x120   :  { %v1105_v60 = vmul.f32 0.5, %v1097_v31  ;;  %v3107_v20 = vor.u32 %v3431_v18, %v3106_v17  ;;  %v3423_v31 = vld [vmem:[%s5206_s3 + $0x314] sm:$0xf0] }
 0x122   :  { %v1113_v49 = vmul.f32 %v1105_v60, %v4906_v36  ;;  %v3447_v36 = vld [vmem:[%s5206_s3 + $0x3d4] sm:$0xf0]  ;;  %v3175_v60 = vor.u32 %v3445_v0, %v3172_v55 }
 0x123   :  { %2087 = vmatpush.bf16.msrb.mxu1 %v2855_v27  ;;  %2045 = vmatpush.bf16.msra.mxu2 %v2979_v28  ;;  %v3171_v57 = vor.u32 %v3447_v36, %v3170_v53  ;;  %v3091_v27 = vor.u32 %v3427_v25, %v3090_v24  ;;  %v3389_v28 = vld [vmem:[%s5206_s3 + $0x20c] sm:$0xf]  ;;  %v3079_v53 = vor.u32 %v3421_v52, %v3076_v56 }
 0x125   :  { %v3467_v37 = vpop.eup %3466 }
 0x126   :  { %v1101_v39 = vadd.f32 1.0, %v3467_v37  ;;  %v3075_v37 = vor.u32 %v3423_v31, %v3074_v30 }
 0x127   :  { %2088 = vmatpush.bf16.msrb.mxu1 %v2839_v59  ;;  %2046 = vmatpush.bf16.msra.mxu2 %v2963_v38  ;;  %v2951_v59 = vor.u32 %v3389_v28, %v2948_v29  ;;  %v3191_v38 = vor.u32 %v3449_v33, %v3188_v34  ;;  %v22_v28 = vld [vmem:[%s5205_s0 + $0x10] sm:$0xff] }
 0x128   :  { %v1109_v45 = vmul.f32 0.5, %v1101_v39  ;;  %v3441_v39 = vld [vmem:[%s5206_s3 + $0x3ac] sm:$0xf] }
 0x129   :  { %v3159_v41 = vor.u32 %v3441_v39, %v3156_v40 }
 0x12a   :  { %v1117_v50 = vmul.f32 %v1109_v45, %v4949_v61  ;;  %v3154_v61 = vld [vmem:[%s5206_s3 + $0x3a8] sm:$0xf]  ;;  %v3433_v45 = vld [vmem:[%s5206_s3 + $0x36c] sm:$0xf] }
 0x12b   :  { %2089 = vmatpush.bf16.msrb.mxu1 %v2823_v42  ;;  %2047 = vmatpush.bf16.msra.mxu2 %v2947_v48  ;;  %v3155_v2 = vor.u32 %v3443_v1, %v3154_v61  ;;  %v3124_v42 = vld [vmem:[%s5206_s3 + $0x378] sm:$0xf0] }
 0x12c   :  { %v5036_v32 = vpack.c.bf16 %v1117_v50, %v1113_v49  ;;  %v3127_v21 = vor.u32 %v3433_v45, %v3124_v42  ;;  %v3108_v48 = vld [vmem:[%s5206_s3 + $0x358] sm:$0xf0]  ;;  %v3425_v50 = vld [vmem:[%s5206_s3 + $0x32c] sm:$0xf] }
 0x12d   :  { %v3111_v49 = vor.u32 %v3429_v47, %v3108_v48 }
 0x12e   :  { %1950 = vmatmul.bf16.vlgmr.msra.gmra.mxu3 %v5036_v32  ;;  %2090 = vmatmul.bf16.vlgmr.msrb.gmra.mxu1 %v4760_v63  ;;  %v3031_v63 = vor.u32 %v3409_v8, %v3028_v58 }
 0x12f   :  { %2096 = vmatpush.bf16.msrb.mxu2 %v3063_v51  ;;  %2054 = vmatpush.bf16.msra.mxu3 %v3187_v5  ;;  %v3092_v51 = vld [vmem:[%s5206_s3 + $0x338] sm:$0xf0] }
 0x130   :  { %2048 = vmatmul.bf16.vlgmr.msra.gmra.mxu2 %v4924_v46  ;;  %v3095_v5 = vor.u32 %v3425_v50, %v3092_v51 }
 0x133   :  { %2097 = vmatpush.bf16.msrb.mxu2 %v3047_v54  ;;  %2055 = vmatpush.bf16.msra.mxu3 %v3171_v57 }
 0x137   :  { %2098 = vmatpush.bf16.msrb.mxu2 %v3031_v63  ;;  %2056 = vmatpush.bf16.msra.mxu3 %v3155_v2  ;;  %v5174_v63 = vld [vmem:[%s5208_s4] sm:$0xf] }
 0x138   :  { %v1252_v2 = vperm.slane %v5174_v63, 0  ;;  %v1253_v4 = vperm.slane %v5174_v63, 1  ;;  %v1255_v48 = vperm.slane %v5174_v63, 3 }
 0x13b   :  { %2099 = vmatpush.bf16.msrb.mxu2 %v3015_v35  ;;  %2057 = vmatpush.bf16.msra.mxu3 %v3139_v62 }
 0x13e   :  { %2006 = vmatmul.bf16.vlgmr.msrb.gmra.mxu3 %v5036_v32 }
 0x13f   :  { %2100 = vmatpush.bf16.msrb.mxu2 %v2999_v13  ;;  %2058 = vmatpush.bf16.msra.mxu3 %v3123_v14 }
 0x143   :  { %2101 = vmatpush.bf16.msrb.mxu2 %v2983_v19  ;;  %2059 = vmatpush.bf16.msra.mxu3 %v3107_v20 }
 0x147   :  { %2102 = vmatpush.bf16.msrb.mxu2 %v2967_v26  ;;  %2060 = vmatpush.bf16.msra.mxu3 %v3091_v27 }
 0x14b   :  { %2103 = vmatpush.bf16.msrb.mxu2 %v2951_v59  ;;  %2061 = vmatpush.bf16.msra.mxu3 %v3075_v37  ;;  %v2128_v59 = vunpack.c.l.bf16 %v22_v28  ;;  %v2129_v37 = vunpack.c.h.bf16 %v22_v28 }
 0x14c   :  { %v1909_v36 = vpop.f32.mrf.mxu0 }
 0x14e   :  { %2104 = vmatmul.bf16.vlgmr.msrb.gmra.mxu2 %v4924_v46  ;;  %2062 = vmatmul.bf16.vlgmr.msra.gmra.mxu3 %v5036_v32  ;;  %v3140_v46 = vld [vmem:[%s5206_s3 + $0x398] sm:$0xf0] }
 0x14f   :  { %2110 = vmatpush.bf16.msrb.mxu3 %v3191_v38  ;;  %v3143_v44 = vor.u32 %v3437_v43, %v3140_v46 }
 0x153   :  { %2111 = vmatpush.bf16.msrb.mxu3 %v3175_v60 }
 0x154   :  { %v1911_v8 = vpop.f32.mrf.mxu0 }
 0x155   :  { %v1912_v19 = vadd.f32 %v1911_v8, %v1252_v2 }
 0x157   :  { %2112 = vmatpush.bf16.msrb.mxu3 %v3159_v41 }
 0x15b   :  { %2113 = vmatpush.bf16.msrb.mxu3 %v3143_v44 }
 0x15c   :  { %v1965_v3 = vpop.f32.mrf.mxu0 }
 0x15d   :  { %v1966_v62 = vadd.f32 %v1965_v3, %v1253_v4 }
 0x15f   :  { %2114 = vmatpush.bf16.msrb.mxu3 %v3127_v21  ;;  %v1254_v21 = vperm.slane %v5174_v63, 2 }
 0x163   :  { %2115 = vmatpush.bf16.msrb.mxu3 %v3111_v49 }
 0x164   :  { %v1967_v17 = vpop.f32.mrf.mxu0 }
 0x165   :  { %v1968_v23 = vadd.f32 %v1967_v17, %v1253_v4 }
 0x167   :  { %2116 = vmatpush.bf16.msrb.mxu3 %v3095_v5 }
 0x16b   :  { %2117 = vmatpush.bf16.msrb.mxu3 %v3079_v53  ;;  %v1923_v54 = vpop.f32.mrf.mxu1  ;;  %v21_v53 = vld [vmem:[%s5205_s0 + $0x8] sm:$0xff] }
 0x16c   :  { %v2021_v40 = vpop.f32.mrf.mxu0 }
 0x16d   :  { %v2022_v51 = vadd.f32 %v2021_v40, %v1254_v21 }
 0x16e   :  { %2118 = vmatmul.bf16.vlgmr.msrb.gmra.mxu3 %v5036_v32  ;;  %v1910_v32 = vadd.f32 %v1909_v36, %v1252_v2 }
 0x170   :  { %v1924_v9 = vadd.f32 %v1923_v54, %v1910_v32 }
 0x173   :  { %v1925_v58 = vpop.f32.mrf.mxu1 }
 0x174   :  { %v1926_v24 = vadd.f32 %v1925_v58, %v1912_v19  ;;  %v2023_v46 = vpop.f32.mrf.mxu0  ;;  %v2126_v58 = vunpack.c.l.bf16 %v21_v53 }
 0x175   :  { %v2024_v3 = vadd.f32 %v2023_v46, %v1254_v21 }
 0x17b   :  { %v1979_v6 = vpop.f32.mrf.mxu1 }
 0x17c   :  { %v1980_v11 = vadd.f32 %v1979_v6, %v1966_v62 }
 0x183   :  { %v1981_v22 = vpop.f32.mrf.mxu1 }
 0x184   :  { %v1982_v29 = vadd.f32 %v1981_v22, %v1968_v23 }
 0x18b   :  { %v2035_v41 = vpop.f32.mrf.mxu1 }
 0x18c   :  { %v2036_v56 = vadd.f32 %v2035_v41, %v2022_v51 }
 0x18d   :  { %v2077_v47 = vpop.f32.mrf.mxu0 }
 0x18e   :  { %v2078_v52 = vadd.f32 %v2077_v47, %v1255_v48 }
 0x191   :  { %v1937_v57 = vpop.f32.mrf.mxu2 }
 0x192   :  { %v1938_v12 = vadd.f32 %v1937_v57, %v1924_v9  ;;  %v23_v9 = vld [vmem:[%s5205_s0 + $0x18] sm:$0xff] }
 0x193   :  { %v2037_v45 = vpop.f32.mrf.mxu1 }
 0x199   :  { %v1939_v61 = vpop.f32.mrf.mxu2 }
 0x19a   :  { %v1940_v30 = vadd.f32 %v1939_v61, %v1926_v24  ;;  %v2127_v61 = vunpack.c.h.bf16 %v21_v53 }
 0x1a1   :  { %v1993_v35 = vpop.f32.mrf.mxu2 }
 0x1a2   :  { %v1994_v13 = vadd.f32 %v1993_v35, %v1980_v11 }
 0x1a9   :  { %v1995_v27 = vpop.f32.mrf.mxu2 }
 0x1aa   :  { %v1996_v33 = vadd.f32 %v1995_v27, %v1982_v29 }
 0x1ab   :  { %v2091_v49 = vpop.f32.mrf.mxu1 }
 0x1ac   :  { %v2092_v36 = vadd.f32 %v2091_v49, %v2078_v52 }
 0x1b1   :  { %v1951_v1 = vpop.f32.mrf.mxu3 }
 0x1b2   :  { %v1952_v14 = vadd.f32 %v1951_v1, %v1938_v12  ;;  %v2079_v1 = vpop.f32.mrf.mxu0 }
 0x1b3   :  { %v2049_v43 = vpop.f32.mrf.mxu2  ;;  %v2093_v4 = vpop.f32.mrf.mxu1  ;;  %v2080_v6 = vadd.f32 %v2079_v1, %v1255_v48 }
 0x1b4   :  { %v2132_v25 = vadd.f32 %v2124_v15, %v1952_v14  ;;  %v2050_v54 = vadd.f32 %v2049_v43, %v2036_v56  ;;  %v2130_v15 = vunpack.c.l.bf16 %v23_v9 }
 0x1b5   :  { %v2094_v10 = vadd.f32 %v2093_v4, %v2080_v6 }
 0x1b9   :  { %v1953_v7 = vpop.f32.mrf.mxu3 }
 0x1ba   :  { %v1954_v34 = vadd.f32 %v1953_v7, %v1940_v30  ;;  %v2038_v7 = vadd.f32 %v2037_v45, %v2024_v3 }
 0x1bb   :  { %v2051_v42 = vpop.f32.mrf.mxu2 }
 0x1bc   :  { %v2136_v55 = vadd.f32 %v2128_v59, %v1954_v34  ;;  %v2052_v11 = vadd.f32 %v2051_v42, %v2038_v7 }
 0x1c1   :  { %v2007_v18 = vpop.f32.mrf.mxu3 }
 0x1c2   :  { %v2008_v20 = vadd.f32 %v2007_v18, %v1994_v13 }
 0x1c4   :  { %v2133_v26 = vadd.f32 %v2125_v16, %v2008_v20  ;;  %v2131_v16 = vunpack.c.h.bf16 %v23_v9 }
 0x1c6   :  { %v2140_v31 = vpack.c.bf16 %v2133_v26, %v2132_v25 }
 0x1c8   :  { %2144 = vst [vmem:[%s5209_s5] sm:$0xff] %v2140_v31 }
 0x1c9   :  { %v2009_v38 = vpop.f32.mrf.mxu3 }
 0x1ca   :  { %v2010_v0 = vadd.f32 %v2009_v38, %v1996_v33 }
 0x1cc   :  { %v2137_v60 = vadd.f32 %v2129_v37, %v2010_v0 }
 0x1ce   :  { %v2142_v39 = vpack.c.bf16 %v2137_v60, %v2136_v55 }
 0x1d0   :  { %2146 = vst [vmem:[%s5209_s5 + $0x10] sm:$0xff] %v2142_v39 }
 0x1d1   :  { %v2063_v44 = vpop.f32.mrf.mxu3  ;;  %v2105_v5 = vpop.f32.mrf.mxu2 }
 0x1d2   :  { %v2106_v57 = vadd.f32 %v2105_v5, %v2092_v36  ;;  %v2064_v8 = vadd.f32 %v2063_v44, %v2050_v54 }
 0x1d4   :  { %v2134_v32 = vadd.f32 %v2126_v58, %v2064_v8 }
 0x1d9   :  { %v2065_v50 = vpop.f32.mrf.mxu3  ;;  %v2107_v62 = vpop.f32.mrf.mxu2 }
 0x1da   :  { %v2108_v13 = vadd.f32 %v2107_v62, %v2094_v10  ;;  %v2066_v14 = vadd.f32 %v2065_v50, %v2052_v11 }
 0x1dc   :  { %v2138_v19 = vadd.f32 %v2130_v15, %v2066_v14 }
 0x1f1   :  { %v2119_v2 = vpop.f32.mrf.mxu3 }
 0x1f2   :  { %v2120_v63 = vadd.f32 %v2119_v2, %v2106_v57 }
 0x1f4   :  { %v2135_v35 = vadd.f32 %v2127_v61, %v2120_v63 }
 0x1f6   :  { %v2141_v12 = vpack.c.bf16 %v2135_v35, %v2134_v32 }
 0x1f8   :  { %2145 = vst [vmem:[%s5209_s5 + $0x8] sm:$0xff] %v2141_v12 }
 0x1f9   :  { %v2121_v17 = vpop.f32.mrf.mxu3 }
 0x1fa   :  { %v2122_v18 = vadd.f32 %v2121_v17, %v2108_v13 }
 0x1fc   :  { %v2139_v20 = vadd.f32 %v2131_v16, %v2122_v18 }
 0x1fe   :  { %v2143_v22 = vpack.c.bf16 %v2139_v20, %v2138_v19 }
 0x200   :  { %2147 = vst [vmem:[%s5209_s5 + $0x18] sm:$0xff] %v2143_v22 }

</bundles_post_ra>
